<compile_context>
chip_gen: v6e
topology: v6e:2x2x1
jax: 0.10.0
libtpu: 0.0.40
codegen_flags: <defaults>
</compile_context>

<pallas_src>
import functools

import jax
import jax.numpy as jnp
from jax.experimental import pallas as pl
from jax.experimental.pallas import tpu as pltpu


_MASK = -1e30   # finite "minus infinity" for masked logits (avoids inf - inf NaNs)
_LANE = 128     # TPU lane width: pad N and pick tiles in multiples of this


def _round_up(x, m):
    return (x + m - 1) // m * m


def _pick_tiles(n_pad):
    """Row/col tile sizes for the attention kernel (n_pad is a multiple of 128).

    tile_m=128 keeps vreg pressure / live [tm, tk] temporaries low and maximizes the number
    of 'parallel' row blocks (feeds both TensorCores on v7x); tile_k up to 512 amortizes
    per-grid-step overhead and lengthens the MXU K dim.
    """
    tile_m = min(128, n_pad)
    if n_pad % 512 == 0:
        tile_k = 512
    elif n_pad % 256 == 0:
        tile_k = 256
    else:
        tile_k = 128
    return tile_m, min(tile_k, n_pad)


# ---------------------------------------------------------------------------
# Kernel 1: fused feature / attention-logit projection (cold path, <1% of runtime).
# ---------------------------------------------------------------------------
def _project_kernel(x_ref, w_ref, feat_ref, logit_ref, *, heads, out_ch):
    # One MXU pass: [tile_m, F_in] @ [F_in, H*C + 2H].
    res = jnp.dot(x_ref[...], w_ref[...], preferred_element_type=jnp.float32)
    hc = heads * out_ch
    ones = jnp.ones((res.shape[0], 1), jnp.bfloat16)
    for h in range(heads):
        c0 = h * (out_ch + 1)
        # bf16 feature columns + a folded "ones" column per head ([h_h | 1]).
        feat_ref[:, c0:c0 + out_ch] = res[:, h * out_ch:(h + 1) * out_ch].astype(jnp.bfloat16)
        feat_ref[:, c0 + out_ch:c0 + out_ch + 1] = ones
    logit_ref[...] = res[:, hc:]                              # [a_src | a_dst] in f32


def _project(x, w_aug, *, heads, out_ch, tile_m):
    n, f_in = x.shape
    d_aug = w_aug.shape[1]
    feat_w = heads * (out_ch + 1)
    kernel = functools.partial(_project_kernel, heads=heads, out_ch=out_ch)
    return pl.pallas_call(
        kernel,
        out_shape=(jax.ShapeDtypeStruct((n, feat_w), jnp.bfloat16),
                   jax.ShapeDtypeStruct((n, 2 * heads), jnp.float32)),
        grid_spec=pltpu.PrefetchScalarGridSpec(
            num_scalar_prefetch=0,
            grid=(n // tile_m,),
            in_specs=[
                pl.BlockSpec((tile_m, f_in), lambda i: (i, 0)),
                pl.BlockSpec((f_in, d_aug), lambda i: (0, 0)),
            ],
            out_specs=[
                pl.BlockSpec((tile_m, feat_w), lambda i: (i, 0)),
                pl.BlockSpec((tile_m, 2 * heads), lambda i: (i, 0)),
            ],
        ),
        compiler_params=pltpu.CompilerParams(
            dimension_semantics=("parallel",),
            vmem_limit_bytes=32 * 1024 * 1024,
        ),
    )(x, w_aug)


# ---------------------------------------------------------------------------
# Kernel 2: masked-softmax neighborhood aggregation (flash-attention style).
# ---------------------------------------------------------------------------
def _attn_kernel(blk_ref, feat_ref, asrc_ref, adst_ref, adj_ref, bias_ref,
                 out_ref, m_scr, acc_scr, *,
                 heads, out_ch, concat, activation, tile_k, resident,
                 exp_dtype, mxu_dtype):
    i = pl.program_id(0)
    j = pl.program_id(1)
    nj = pl.num_programs(1)
    cw = out_ch + 1  # per-head feature width including the folded ones column

    @pl.when(j == 0)
    def _init():
        m_scr[...] = jnp.full(m_scr.shape, _MASK, jnp.float32)
        acc_scr[...] = jnp.zeros(acc_scr.shape, jnp.float32)

    # Block-sparse gate: skip all exp/VPU/MXU work for (i, j) tiles with no edges.
    @pl.when(blk_ref[i * nj + j] > 0)
    def _compute():
        edge = adj_ref[...] != 0                          # [tm, tk] bool, shared by heads
        if resident:
            jj = pl.multiple_of(j * tile_k, tile_k)
            hk = feat_ref[pl.ds(jj, tile_k), :]           # [tk, H*(C+1)] bf16, VMEM-resident
        else:
            hk = feat_ref[...]                            # streamed fallback
        a_src = asrc_ref[...]                             # [H, tk] f32
        a_dst = adst_ref[...]                             # [tm, H] f32

        for h in range(heads):
            c0 = h * cw
            # e[i, j] = LeakyReLU(a_dst[i] + a_src[j], 0.2) on neighbors only.
            e = a_dst[:, h:h + 1] + a_src[h:h + 1, :]     # [tm, tk]
            e = jnp.maximum(e, 0.2 * e)                   # leaky relu (2 VPU passes)
            e = jnp.where(edge, e, _MASK)

            # Online (flash-style) softmax update.
            m_prev = m_scr[h]                             # [tm, 1]
            m_new = jnp.maximum(m_prev, jnp.max(e, axis=1, keepdims=True))
            corr = jnp.exp(m_prev - m_new)
            # bf16 exp (EUP bf16 path on v6e/v7x); p is cast to bf16 for the MXU anyway.
            p = jnp.exp((e - m_new).astype(exp_dtype)).astype(mxu_dtype)
            # alpha @ [h_h | 1] on the MXU (bf16 operands, f32 accumulation): the last
            # output column accumulates sum(p), i.e. the softmax denominator rides the MXU.
            acc_scr[h] = corr * acc_scr[h] + jnp.dot(
                p, hk[:, c0:c0 + cw], preferred_element_type=jnp.float32)
            m_scr[h] = m_new

    @pl.when(j == nj - 1)
    def _finalize():
        outs = []
        for h in range(heads):
            a = acc_scr[h]                                    # [tm, C+1]
            l = jnp.maximum(a[:, out_ch:out_ch + 1], 1e-30)   # folded denominator column
            outs.append(a[:, :out_ch] * pl.reciprocal(l, approx=True))
        if concat:
            out = jnp.concatenate(outs, axis=-1)              # [tm, H*C]
        else:
            out = outs[0]
            for o in outs[1:]:
                out = out + o
            out = out * (1.0 / heads)                         # [tm, C]
        out = out + bias_ref[...]
        if activation == "relu":
            out = jnp.maximum(out, 0.0)
        elif activation == "log_softmax":
            mx = jnp.max(out, axis=1, keepdims=True)
            lse = jnp.log(jnp.sum(jnp.exp(out - mx), axis=1, keepdims=True))
            out = out - (mx + lse)
        out_ref[...] = out.astype(out_ref.dtype)


def gat_conv(x, adj, blk, W, att_src, att_dst, bias, *, heads, out_ch, concat,
             activation, tile_m, tile_k):
    """One GATConv layer.

    x:   [N_pad, F_in] f32
    adj: [N_pad, N_pad] int8 {0,1} mask (adj[i, j]=1 iff edge j->i or i==j)
    blk: [gi*gj] int32 per-(row-block, col-block) "has edges" table (scalar-prefetched)
    """
    n_pad, f_in = x.shape
    hc = heads * out_ch
    feat_w = heads * (out_ch + 1)
    d_aug = hc + 2 * heads
    d_out = hc if concat else out_ch

    # Fold att_src / att_dst into the projection: W_aug = [W | W_h@att_src_h | W_h@att_dst_h].
    hi = jax.lax.Precision.HIGHEST
    w_heads = W.reshape(f_in, heads, out_ch)
    w_src = jnp.einsum("fhc,hc->fh", w_heads, att_src, precision=hi)
    w_dst = jnp.einsum("fhc,hc->fh", w_heads, att_dst, precision=hi)
    w_aug = jnp.concatenate([W, w_src, w_dst], axis=1)        # [F_in, d_aug]

    feat, logits = _project(x, w_aug, heads=heads, out_ch=out_ch, tile_m=tile_m)
    # Slim per-node attention logits (layout plumbing only; a_src transposed so the source
    # axis sits on TPU lanes inside the attention kernel -> no in-kernel transpose).
    a_src_t = jnp.transpose(logits[:, :heads])                # [H, N_pad]
    a_dst = logits[:, heads:2 * heads]                        # [N_pad, H]
    bias2d = bias.reshape(1, d_out).astype(jnp.float32)

    # Keep the bf16 source-feature table VMEM-resident (constant index_map => fetched once,
    # never re-streamed per row block) when it comfortably fits; stream per j block otherwise.
    resident = n_pad * feat_w * 2 <= 12 * 1024 * 1024
    if resident:
        feat_spec = pl.BlockSpec((n_pad, feat_w), lambda i, j, b: (0, 0))
    else:
        feat_spec = pl.BlockSpec((tile_k, feat_w), lambda i, j, b: (j, 0))

    kernel = functools.partial(
        _attn_kernel, heads=heads, out_ch=out_ch, concat=concat,
        activation=activation, tile_k=tile_k, resident=resident,
        exp_dtype=jnp.bfloat16, mxu_dtype=jnp.bfloat16)

    grid = (n_pad // tile_m, n_pad // tile_k)                 # (target rows, source cols)
    return pl.pallas_call(
        kernel,
        out_shape=jax.ShapeDtypeStruct((n_pad, d_out), jnp.float32),
        grid_spec=pltpu.PrefetchScalarGridSpec(
            num_scalar_prefetch=1,                            # block "has edges" table (SMEM)
            grid=grid,
            in_specs=[
                feat_spec,                                                 # bf16 [h_h | 1] feats
                pl.BlockSpec((heads, tile_k), lambda i, j, b: (0, j)),     # a_src^T
                pl.BlockSpec((tile_m, heads), lambda i, j, b: (i, 0)),     # a_dst
                pl.BlockSpec((tile_m, tile_k), lambda i, j, b: (i, j)),    # adj mask (int8)
                pl.BlockSpec((1, d_out), lambda i, j, b: (0, 0)),          # bias
            ],
            out_specs=pl.BlockSpec((tile_m, d_out), lambda i, j, b: (i, 0)),
            scratch_shapes=[
                pltpu.VMEM((heads, tile_m, 1), jnp.float32),           # running max (head-major)
                pltpu.VMEM((heads, tile_m, out_ch + 1), jnp.float32),  # acc | folded row-sum
            ],
        ),
        # Resident bf16 features + double-buffered int8 adj tiles + scratch stay far below
        # 32 MiB -> safe on v7x's 64 MiB physical VMEM as well as v5e/v6e's 128 MiB.
        compiler_params=pltpu.CompilerParams(
            dimension_semantics=("parallel", "arbitrary"),
            vmem_limit_bytes=32 * 1024 * 1024,
        ),
    )(blk, feat, a_src_t, a_dst, adj, bias2d)


def gat_forward(params, x, adj):
    """conv1 -> ReLU -> conv2 -> log_softmax, with the activations fused into the kernels."""
    n = x.shape[0]
    n_pad = _round_up(max(n, _LANE), _LANE)
    x_p = jnp.pad(x.astype(jnp.float32), ((0, n_pad - n), (0, 0)))
    adj_p = jnp.pad(adj.astype(jnp.int8), ((0, n_pad - n), (0, n_pad - n)))

    tile_m, tile_k = _pick_tiles(n_pad)
    gi, gj = n_pad // tile_m, n_pad // tile_k
    # Per-block edge-occupancy table (computed once, shared by both layers): lets the
    # attention kernel skip the dense work on tiles with no edges at all.
    blk = (adj_p.reshape(gi, tile_m, gj, tile_k) != 0).any(axis=(1, 3))
    blk = blk.reshape(-1).astype(jnp.int32)

    c1, c2 = params["conv1"], params["conv2"]
    h = gat_conv(x_p, adj_p, blk, c1["W"], c1["att_src"], c1["att_dst"], c1["bias"],
                 heads=2, out_ch=16, concat=True, activation="relu",
                 tile_m=tile_m, tile_k=tile_k)
    out = gat_conv(h, adj_p, blk, c2["W"], c2["att_src"], c2["att_dst"], c2["bias"],
                   heads=2, out_ch=7, concat=False, activation="log_softmax",
                   tile_m=tile_m, tile_k=tile_k)
    return out[:n]


# ---------------------------------------------------------------------------
# Parameters / graph construction
# ---------------------------------------------------------------------------
def init_gat_params(key):
    # conv1: GATConv(3, 16, heads=2, concat=True); conv2: GATConv(32, 7, heads=2, concat=False)
    k = jax.random.split(key, 6)

    def glorot(k_, shape):
        lim = jnp.sqrt(6.0 / (shape[0] + shape[1]))
        return jax.random.uniform(k_, shape, jnp.float32, -lim, lim)

    return {
        "conv1": {
            "W": glorot(k[0], (3, 2 * 16)),
            "att_src": 0.1 * jax.random.normal(k[1], (2, 16), jnp.float32),
            "att_dst": 0.1 * jax.random.normal(k[2], (2, 16), jnp.float32),
            "bias": jnp.zeros((2 * 16,), jnp.float32),
        },
        "conv2": {
            "W": glorot(k[3], (2 * 16, 2 * 7)),
            "att_src": 0.1 * jax.random.normal(k[4], (2, 7), jnp.float32),
            "att_dst": 0.1 * jax.random.normal(k[5], (2, 7), jnp.float32),
            "bias": jnp.zeros((7,), jnp.float32),
        },
    }


def edge_index_to_dense_adj(edge_index, num_nodes):
    # adj[i, j] = 1 if edge j -> i (edge_index[0]=src, edge_index[1]=dst), plus self loops
    # (GATConv default add_self_loops=True).  int8 mask -> 4x less O(N^2) HBM traffic.
    src, dst = edge_index[0], edge_index[1]
    adj = jnp.zeros((num_nodes, num_nodes), jnp.int8)
    adj = adj.at[dst, src].set(1)
    idx = jnp.arange(num_nodes)
    adj = adj.at[idx, idx].set(1)
    return adj


# ---------------------------------------------------------------------------
# Pure-JAX f32 reference (PyG semantics)
# ---------------------------------------------------------------------------
def _gat_conv_ref(x, adj, W, att_src, att_dst, bias, heads, out_ch, concat):
    hi = jax.lax.Precision.HIGHEST
    n = x.shape[0]
    h = jnp.dot(x, W, precision=hi).reshape(n, heads, out_ch)          # [N, H, C]
    a_src = jnp.einsum("nhc,hc->nh", h, att_src, precision=hi)
    a_dst = jnp.einsum("nhc,hc->nh", h, att_dst, precision=hi)
    e = a_dst[:, None, :] + a_src[None, :, :]                          # [i, j, H]
    e = jnp.where(e > 0, e, 0.2 * e)
    e = jnp.where(adj[:, :, None] > 0, e, _MASK)
    e = e - jnp.max(e, axis=1, keepdims=True)
    p = jnp.exp(e)
    alpha = p / jnp.sum(p, axis=1, keepdims=True)                      # [i, j, H]
    out = jnp.einsum("ijh,jhc->ihc", alpha, h, precision=hi)           # [i, H, C]
    if concat:
        out = out.reshape(n, heads * out_ch)
    else:
        out = jnp.mean(out, axis=1)
    return out + bias.reshape(1, -1)


def gat_forward_ref(params, x, adj):
    c1, c2 = params["conv1"], params["conv2"]
    h = _gat_conv_ref(x, adj, c1["W"], c1["att_src"], c1["att_dst"], c1["bias"], 2, 16, True)
    h = jnp.maximum(h, 0.0)
    o = _gat_conv_ref(h, adj, c2["W"], c2["att_src"], c2["att_dst"], c2["bias"], 2, 7, False)
    return jax.nn.log_softmax(o, axis=1)


if __name__ == "__main__":
    key = jax.random.PRNGKey(0)
    k_x, k_p = jax.random.split(key)

    N = 8  # nodes
    x = jax.random.normal(k_x, (N, 3), jnp.float32)

    # Small ring graph, both directions: edge_index shape [2, 2N].
    src = jnp.concatenate([jnp.arange(N), (jnp.arange(N) + 1) % N])
    dst = jnp.concatenate([(jnp.arange(N) + 1) % N, jnp.arange(N)])
    edge_index = jnp.stack([src, dst], axis=0).astype(jnp.int32)

    adj = edge_index_to_dense_adj(edge_index, N)
    params = init_gat_params(k_p)

    fwd = jax.jit(gat_forward)
    out = jax.block_until_ready(fwd(params, x, adj))
    assert out.shape == (N, 7)
    assert bool(jnp.all(jnp.isfinite(out)))

    # Structural check: rows of exp(log_softmax) must sum to 1.
    assert bool(jnp.allclose(jnp.sum(jnp.exp(out), axis=1), 1.0, atol=1e-3))

    # Numerical check vs the pure-f32 JAX reference.  Tolerance is sized for the
    # mixed-precision aggregation (bf16 exp / bf16 MXU operands, f32 accumulation).
    ref = gat_forward_ref(params, x, adj)
    assert bool(jnp.allclose(out, ref, atol=5e-2, rtol=5e-2)), "mismatch vs pure-JAX reference"

    print("KERNEL_OK")
</pallas_src>

<mosaic_0001>
module attributes {stable_mosaic.version = 11 : i64} {
  func.func @_project_kernel(%arg0: i32, %arg1: memref<128x32xf32, #tpu.memory_space<vmem>>, %arg2: memref<32x18xf32, #tpu.memory_space<vmem>>, %arg3: memref<128x16xbf16, #tpu.memory_space<vmem>>, %arg4: memref<128x4xf32, #tpu.memory_space<vmem>>) attributes {dimension_semantics = [#tpu.dimension_semantics<parallel>], iteration_bounds = array<i64: 1>, scalar_prefetch = 0 : i64, scratch_operands = 0 : i64, tpu.core_type = #tpu.core_type<tc>, window_params = [{transform_indices = @transform_0, window_bounds = array<i64: 128, 32>}, {pipeline_mode = #tpu.pipeline_mode<synchronous>, transform_indices = @transform_1, window_bounds = array<i64: 32, 18>}, {transform_indices = @transform_2, window_bounds = array<i64: 128, 16>}, {transform_indices = @transform_3, window_bounds = array<i64: 128, 4>}]} {
    %c0 = arith.constant 0 : index
    %c0_0 = arith.constant 0 : index
    %0 = vector.load %arg1[%c0, %c0_0] : memref<128x32xf32, #tpu.memory_space<vmem>>, vector<128x32xf32>
    %c0_1 = arith.constant 0 : index
    %c0_2 = arith.constant 0 : index
    %1 = vector.load %arg2[%c0_1, %c0_2] : memref<32x18xf32, #tpu.memory_space<vmem>>, vector<32x18xf32>
    %cst = arith.constant dense<0.000000e+00> : vector<128x18xf32>
    %2 = tpu.matmul %0, %1, %cst {dimension_numbers = #tpu.dot_dimension_numbers<[1], [0], [0], [1], [0, 0, 1, 1], [], []>} : vector<128x32xf32>, vector<32x18xf32>, vector<128x18xf32> -> vector<128x18xf32>
    %cst_3 = arith.constant 1.000000e+00 : bf16
    %3 = vector.broadcast %cst_3 : bf16 to vector<128x1xbf16>
    %4 = vector.extract_strided_slice %2 {offsets = [0, 0], sizes = [128, 7], strides = [1, 1]} : vector<128x18xf32> to vector<128x7xf32>
    %5 = arith.truncf %4 : vector<128x7xf32> to vector<128x7xbf16>
    %c0_4 = arith.constant 0 : index
    %c0_5 = arith.constant 0 : index
    %6 = vector.load %arg3[%c0_4, %c0_5] : memref<128x16xbf16, #tpu.memory_space<vmem>>, vector<128x7xbf16>
    tpu.vector_store %arg3[%c0_4, %c0_5], %5 {strides = array<i32>} : memref<128x16xbf16, #tpu.memory_space<vmem>>, vector<128x7xbf16>,
    %c0_6 = arith.constant 0 : index
    %c7 = arith.constant 7 : index
    %7 = vector.load %arg3[%c0_6, %c7] : memref<128x16xbf16, #tpu.memory_space<vmem>>, vector<128x1xbf16>
    tpu.vector_store %arg3[%c0_6, %c7], %3 {strides = array<i32>} : memref<128x16xbf16, #tpu.memory_space<vmem>>, vector<128x1xbf16>,
    %8 = vector.extract_strided_slice %2 {offsets = [0, 7], sizes = [128, 7], strides = [1, 1]} : vector<128x18xf32> to vector<128x7xf32>
    %9 = arith.truncf %8 : vector<128x7xf32> to vector<128x7xbf16>
    %c0_7 = arith.constant 0 : index
    %c8 = arith.constant 8 : index
    %10 = vector.load %arg3[%c0_7, %c8] : memref<128x16xbf16, #tpu.memory_space<vmem>>, vector<128x7xbf16>
    tpu.vector_store %arg3[%c0_7, %c8], %9 {strides = array<i32>} : memref<128x16xbf16, #tpu.memory_space<vmem>>, vector<128x7xbf16>,
    %c0_8 = arith.constant 0 : index
    %c15 = arith.constant 15 : index
    %11 = vector.load %arg3[%c0_8, %c15] : memref<128x16xbf16, #tpu.memory_space<vmem>>, vector<128x1xbf16>
    tpu.vector_store %arg3[%c0_8, %c15], %3 {strides = array<i32>} : memref<128x16xbf16, #tpu.memory_space<vmem>>, vector<128x1xbf16>,
    %12 = vector.extract_strided_slice %2 {offsets = [0, 14], sizes = [128, 4], strides = [1, 1]} : vector<128x18xf32> to vector<128x4xf32>
    %c0_9 = arith.constant 0 : index
    %c0_10 = arith.constant 0 : index
    %13 = vector.load %arg4[%c0_9, %c0_10] : memref<128x4xf32, #tpu.memory_space<vmem>>, vector<128x4xf32>
    tpu.vector_store %arg4[%c0_9, %c0_10], %12 {strides = array<i32>} : memref<128x4xf32, #tpu.memory_space<vmem>>, vector<128x4xf32>,
    return
  }
  func.func @transform_0(%arg0: i32) -> (i32, i32) {
    %c0_i32 = arith.constant 0 : i32
    %c0_i32_0 = arith.constant 0 : i32
    return %arg0, %c0_i32 : i32, i32
  }
  func.func @transform_1(%arg0: i32) -> (i32, i32) {
    %c0_i32 = arith.constant 0 : i32
    %c0_i32_0 = arith.constant 0 : i32
    %c0_i32_1 = arith.constant 0 : i32
    return %c0_i32, %c0_i32_0 : i32, i32
  }
  func.func @transform_2(%arg0: i32) -> (i32, i32) {
    %c0_i32 = arith.constant 0 : i32
    %c0_i32_0 = arith.constant 0 : i32
    return %arg0, %c0_i32 : i32, i32
  }
  func.func @transform_3(%arg0: i32) -> (i32, i32) {
    %c0_i32 = arith.constant 0 : i32
    %c0_i32_0 = arith.constant 0 : i32
    return %arg0, %c0_i32 : i32, i32
  }
}

module attributes {stable_mosaic.version = 11 : i64} {
  func.func @_attn_kernel(%arg0: i32, %arg1: i32, %arg2: memref<1xi32, #tpu.memory_space<smem>>, %arg3: memref<128x34xbf16, #tpu.memory_space<vmem>>, %arg4: memref<2x128xf32, #tpu.memory_space<vmem>>, %arg5: memref<128x2xf32, #tpu.memory_space<vmem>>, %arg6: memref<128x128xi8, #tpu.memory_space<vmem>>, %arg7: memref<1x32xf32, #tpu.memory_space<vmem>>, %arg8: memref<128x32xf32, #tpu.memory_space<vmem>>, %arg9: memref<2x128x1xf32, #tpu.memory_space<vmem>>, %arg10: memref<2x128x17xf32, #tpu.memory_space<vmem>>) attributes {dimension_semantics = [#tpu.dimension_semantics<parallel>, #tpu.dimension_semantics<arbitrary>], iteration_bounds = array<i64: 1, 1>, scalar_prefetch = 1 : i64, scratch_operands = 2 : i64, tpu.core_type = #tpu.core_type<tc>, window_params = [{pipeline_mode = #tpu.pipeline_mode<synchronous>, transform_indices = @transform_0, window_bounds = array<i64: 128, 34>}, {transform_indices = @transform_1, window_bounds = array<i64: 2, 128>}, {transform_indices = @transform_2, window_bounds = array<i64: 128, 2>}, {transform_indices = @transform_3, window_bounds = array<i64: 128, 128>}, {pipeline_mode = #tpu.pipeline_mode<synchronous>, transform_indices = @transform_4, window_bounds = array<i64: 1, 32>}, {transform_indices = @transform_5, window_bounds = array<i64: 128, 32>}]} {
    %c0_i32 = arith.constant 0 : i32
    %0 = arith.cmpi eq, %arg1, %c0_i32 : i32
    %1 = arith.extui %0 : i1 to i32
    %c0_i32_0 = arith.constant 0 : i32
    %2 = arith.cmpi ne, %1, %c0_i32_0 : i32
    scf.if %2 {
      %cst = arith.constant -1.000000e+30 : f32
      %13 = vector.broadcast %cst : f32 to vector<2x128x1xf32>
      %c0 = arith.constant 0 : index
      %c0_5 = arith.constant 0 : index
      %c0_6 = arith.constant 0 : index
      %14 = vector.load %arg9[%c0, %c0_5, %c0_6] : memref<2x128x1xf32, #tpu.memory_space<vmem>>, vector<2x128x1xf32>
      tpu.vector_store %arg9[%c0, %c0_5, %c0_6], %13 {strides = array<i32>} : memref<2x128x1xf32, #tpu.memory_space<vmem>>, vector<2x128x1xf32>,
      %cst_7 = arith.constant 0.000000e+00 : f32
      %15 = vector.broadcast %cst_7 : f32 to vector<2x128x17xf32>
      %c0_8 = arith.constant 0 : index
      %c0_9 = arith.constant 0 : index
      %c0_10 = arith.constant 0 : index
      %16 = vector.load %arg10[%c0_8, %c0_9, %c0_10] : memref<2x128x17xf32, #tpu.memory_space<vmem>>, vector<2x128x17xf32>
      tpu.vector_store %arg10[%c0_8, %c0_9, %c0_10], %15 {strides = array<i32>} : memref<2x128x17xf32, #tpu.memory_space<vmem>>, vector<2x128x17xf32>,
    } else {
    }
    %c1_i32 = arith.constant 1 : i32
    %3 = arith.muli %arg0, %c1_i32 : i32
    %4 = arith.addi %3, %arg1 : i32
    %5 = arith.index_cast %4 : i32 to index
    %6 = memref.load %arg2[%5] : memref<1xi32, #tpu.memory_space<smem>>
    %c0_i32_1 = arith.constant 0 : i32
    %7 = arith.cmpi sgt, %6, %c0_i32_1 : i32
    %8 = arith.extui %7 : i1 to i32
    %c0_i32_2 = arith.constant 0 : i32
    %9 = arith.cmpi ne, %8, %c0_i32_2 : i32
    scf.if %9 {
      %c0 = arith.constant 0 : index
      %c0_5 = arith.constant 0 : index
      %13 = vector.load %arg6[%c0, %c0_5] : memref<128x128xi8, #tpu.memory_space<vmem>>, vector<128x128xi8>
      %c0_i8 = arith.constant 0 : i8
      %14 = vector.broadcast %c0_i8 : i8 to vector<128x128xi8>
      %15 = arith.cmpi ne, %13, %14 : vector<128x128xi8>
      %c128_i32 = arith.constant 128 : i32
      %16 = arith.muli %arg1, %c128_i32 : i32
      %17 = tpu.assume_multiple %16, 128 : i32
      %18 = arith.index_cast %17 : i32 to index
      %c0_6 = arith.constant 0 : index
      %19 = vector.load %arg3[%18, %c0_6] : memref<128x34xbf16, #tpu.memory_space<vmem>>, vector<128x34xbf16>
      %c0_7 = arith.constant 0 : index
      %c0_8 = arith.constant 0 : index
      %20 = vector.load %arg4[%c0_7, %c0_8] : memref<2x128xf32, #tpu.memory_space<vmem>>, vector<2x128xf32>
      %c0_9 = arith.constant 0 : index
      %c0_10 = arith.constant 0 : index
      %21 = vector.load %arg5[%c0_9, %c0_10] : memref<128x2xf32, #tpu.memory_space<vmem>>, vector<128x2xf32>
      %22 = vector.extract_strided_slice %21 {offsets = [0, 0], sizes = [128, 1], strides = [1, 1]} : vector<128x2xf32> to vector<128x1xf32>
      %23 = vector.extract_strided_slice %20 {offsets = [0, 0], sizes = [1, 128], strides = [1, 1]} : vector<2x128xf32> to vector<1x128xf32>
      %24 = vector.broadcast %22 : vector<128x1xf32> to vector<128x128xf32>
      %25 = vector.broadcast %23 : vector<1x128xf32> to vector<128x128xf32>
      %26 = arith.addf %24, %25 : vector<128x128xf32>
      %cst = arith.constant 2.000000e-01 : f32
      %27 = vector.broadcast %cst : f32 to vector<128x128xf32>
      %28 = arith.mulf %27, %26 : vector<128x128xf32>
      %29 = arith.maximumf %26, %28 : vector<128x128xf32>
      %cst_11 = arith.constant -1.000000e+30 : f32
      %30 = vector.broadcast %cst_11 : f32 to vector<128x128xf32>
      %31 = arith.select %15, %29, %30 : vector<128x128xi1>, vector<128x128xf32>
      %c0_12 = arith.constant 0 : index
      %c0_13 = arith.constant 0 : index
      %c0_14 = arith.constant 0 : index
      %32 = vector.load %arg9[%c0_12, %c0_13, %c0_14] : memref<2x128x1xf32, #tpu.memory_space<vmem>>, vector<1x128x1xf32>
      %33 = vector.shape_cast %32 : vector<1x128x1xf32> to vector<128x1xf32>
      %cst_15 = arith.constant dense<0xFF800000> : vector<128xf32>
      %34 = vector.multi_reduction <maximumf>, %31, %cst_15 [1] : vector<128x128xf32> to vector<128xf32>
      %35 = vector.shape_cast %34 : vector<128xf32> to vector<128x1xf32>
      %36 = arith.maximumf %33, %35 : vector<128x1xf32>
      %37 = arith.subf %33, %36 : vector<128x1xf32>
      %38 = math.exp %37 : vector<128x1xf32>
      %39 = vector.broadcast %36 : vector<128x1xf32> to vector<128x128xf32>
      %40 = arith.subf %31, %39 : vector<128x128xf32>
      %41 = arith.truncf %40 : vector<128x128xf32> to vector<128x128xbf16>
      %42 = math.exp %41 : vector<128x128xbf16>
      %c0_16 = arith.constant 0 : index
      %c0_17 = arith.constant 0 : index
      %c0_18 = arith.constant 0 : index
      %43 = vector.load %arg10[%c0_16, %c0_17, %c0_18] : memref<2x128x17xf32, #tpu.memory_space<vmem>>, vector<1x128x17xf32>
      %44 = vector.shape_cast %43 : vector<1x128x17xf32> to vector<128x17xf32>
      %45 = vector.broadcast %38 : vector<128x1xf32> to vector<128x17xf32>
      %46 = arith.mulf %45, %44 : vector<128x17xf32>
      %47 = vector.extract_strided_slice %19 {offsets = [0, 0], sizes = [128, 17], strides = [1, 1]} : vector<128x34xbf16> to vector<128x17xbf16>
      %cst_19 = arith.constant dense<0.000000e+00> : vector<128x17xf32>
      %48 = tpu.matmul %42, %47, %cst_19 {dimension_numbers = #tpu.dot_dimension_numbers<[1], [0], [0], [1], [0, 0, 1, 1], [], []>} : vector<128x128xbf16>, vector<128x17xbf16>, vector<128x17xf32> -> vector<128x17xf32>
      %49 = arith.addf %46, %48 : vector<128x17xf32>
      %c0_20 = arith.constant 0 : index
      %c0_21 = arith.constant 0 : index
      %c0_22 = arith.constant 0 : index
      %50 = vector.load %arg10[%c0_20, %c0_21, %c0_22] : memref<2x128x17xf32, #tpu.memory_space<vmem>>, vector<1x128x17xf32>
      %51 = vector.shape_cast %50 : vector<1x128x17xf32> to vector<128x17xf32>
      %52 = vector.shape_cast %49 : vector<128x17xf32> to vector<1x128x17xf32>
      tpu.vector_store %arg10[%c0_20, %c0_21, %c0_22], %52 {strides = array<i32>} : memref<2x128x17xf32, #tpu.memory_space<vmem>>, vector<1x128x17xf32>,
      %c0_23 = arith.constant 0 : index
      %c0_24 = arith.constant 0 : index
      %c0_25 = arith.constant 0 : index
      %53 = vector.load %arg9[%c0_23, %c0_24, %c0_25] : memref<2x128x1xf32, #tpu.memory_space<vmem>>, vector<1x128x1xf32>
      %54 = vector.shape_cast %53 : vector<1x128x1xf32> to vector<128x1xf32>
      %55 = vector.shape_cast %36 : vector<128x1xf32> to vector<1x128x1xf32>
      tpu.vector_store %arg9[%c0_23, %c0_24, %c0_25], %55 {strides = array<i32>} : memref<2x128x1xf32, #tpu.memory_space<vmem>>, vector<1x128x1xf32>,
      %56 = vector.extract_strided_slice %21 {offsets = [0, 1], sizes = [128, 1], strides = [1, 1]} : vector<128x2xf32> to vector<128x1xf32>
      %57 = vector.extract_strided_slice %20 {offsets = [1, 0], sizes = [1, 128], strides = [1, 1]} : vector<2x128xf32> to vector<1x128xf32>
      %58 = vector.broadcast %56 : vector<128x1xf32> to vector<128x128xf32>
      %59 = vector.broadcast %57 : vector<1x128xf32> to vector<128x128xf32>
      %60 = arith.addf %58, %59 : vector<128x128xf32>
      %cst_26 = arith.constant 2.000000e-01 : f32
      %61 = vector.broadcast %cst_26 : f32 to vector<128x128xf32>
      %62 = arith.mulf %61, %60 : vector<128x128xf32>
      %63 = arith.maximumf %60, %62 : vector<128x128xf32>
      %cst_27 = arith.constant -1.000000e+30 : f32
      %64 = vector.broadcast %cst_27 : f32 to vector<128x128xf32>
      %65 = arith.select %15, %63, %64 : vector<128x128xi1>, vector<128x128xf32>
      %c1 = arith.constant 1 : index
      %c0_28 = arith.constant 0 : index
      %c0_29 = arith.constant 0 : index
      %66 = vector.load %arg9[%c1, %c0_28, %c0_29] : memref<2x128x1xf32, #tpu.memory_space<vmem>>, vector<1x128x1xf32>
      %67 = vector.shape_cast %66 : vector<1x128x1xf32> to vector<128x1xf32>
      %cst_30 = arith.constant dense<0xFF800000> : vector<128xf32>
      %68 = vector.multi_reduction <maximumf>, %65, %cst_30 [1] : vector<128x128xf32> to vector<128xf32>
      %69 = vector.shape_cast %68 : vector<128xf32> to vector<128x1xf32>
      %70 = arith.maximumf %67, %69 : vector<128x1xf32>
      %71 = arith.subf %67, %70 : vector<128x1xf32>
      %72 = math.exp %71 : vector<128x1xf32>
      %73 = vector.broadcast %70 : vector<128x1xf32> to vector<128x128xf32>
      %74 = arith.subf %65, %73 : vector<128x128xf32>
      %75 = arith.truncf %74 : vector<128x128xf32> to vector<128x128xbf16>
      %76 = math.exp %75 : vector<128x128xbf16>
      %c1_31 = arith.constant 1 : index
      %c0_32 = arith.constant 0 : index
      %c0_33 = arith.constant 0 : index
      %77 = vector.load %arg10[%c1_31, %c0_32, %c0_33] : memref<2x128x17xf32, #tpu.memory_space<vmem>>, vector<1x128x17xf32>
      %78 = vector.shape_cast %77 : vector<1x128x17xf32> to vector<128x17xf32>
      %79 = vector.broadcast %72 : vector<128x1xf32> to vector<128x17xf32>
      %80 = arith.mulf %79, %78 : vector<128x17xf32>
      %81 = vector.extract_strided_slice %19 {offsets = [0, 17], sizes = [128, 17], strides = [1, 1]} : vector<128x34xbf16> to vector<128x17xbf16>
      %cst_34 = arith.constant dense<0.000000e+00> : vector<128x17xf32>
      %82 = tpu.matmul %76, %81, %cst_34 {dimension_numbers = #tpu.dot_dimension_numbers<[1], [0], [0], [1], [0, 0, 1, 1], [], []>} : vector<128x128xbf16>, vector<128x17xbf16>, vector<128x17xf32> -> vector<128x17xf32>
      %83 = arith.addf %80, %82 : vector<128x17xf32>
      %c1_35 = arith.constant 1 : index
      %c0_36 = arith.constant 0 : index
      %c0_37 = arith.constant 0 : index
      %84 = vector.load %arg10[%c1_35, %c0_36, %c0_37] : memref<2x128x17xf32, #tpu.memory_space<vmem>>, vector<1x128x17xf32>
      %85 = vector.shape_cast %84 : vector<1x128x17xf32> to vector<128x17xf32>
      %86 = vector.shape_cast %83 : vector<128x17xf32> to vector<1x128x17xf32>
      tpu.vector_store %arg10[%c1_35, %c0_36, %c0_37], %86 {strides = array<i32>} : memref<2x128x17xf32, #tpu.memory_space<vmem>>, vector<1x128x17xf32>,
      %c1_38 = arith.constant 1 : index
      %c0_39 = arith.constant 0 : index
      %c0_40 = arith.constant 0 : index
      %87 = vector.load %arg9[%c1_38, %c0_39, %c0_40] : memref<2x128x1xf32, #tpu.memory_space<vmem>>, vector<1x128x1xf32>
      %88 = vector.shape_cast %87 : vector<1x128x1xf32> to vector<128x1xf32>
      %89 = vector.shape_cast %70 : vector<128x1xf32> to vector<1x128x1xf32>
      tpu.vector_store %arg9[%c1_38, %c0_39, %c0_40], %89 {strides = array<i32>} : memref<2x128x1xf32, #tpu.memory_space<vmem>>, vector<1x128x1xf32>,
    } else {
    }
    %c0_i32_3 = arith.constant 0 : i32
    %10 = arith.cmpi eq, %arg1, %c0_i32_3 : i32
    %11 = arith.extui %10 : i1 to i32
    %c0_i32_4 = arith.constant 0 : i32
    %12 = arith.cmpi ne, %11, %c0_i32_4 : i32
    scf.if %12 {
      %c0 = arith.constant 0 : index
      %c0_5 = arith.constant 0 : index
      %c0_6 = arith.constant 0 : index
      %13 = vector.load %arg10[%c0, %c0_5, %c0_6] : memref<2x128x17xf32, #tpu.memory_space<vmem>>, vector<1x128x17xf32>
      %14 = vector.shape_cast %13 : vector<1x128x17xf32> to vector<128x17xf32>
      %15 = vector.extract_strided_slice %14 {offsets = [0, 16], sizes = [128, 1], strides = [1, 1]} : vector<128x17xf32> to vector<128x1xf32>
      %cst = arith.constant 1.000000e-30 : f32
      %16 = vector.broadcast %cst : f32 to vector<128x1xf32>
      %17 = arith.maximumf %15, %16 : vector<128x1xf32>
      %18 = vector.extract_strided_slice %14 {offsets = [0, 0], sizes = [128, 16], strides = [1, 1]} : vector<128x17xf32> to vector<128x16xf32>
      %19 = tpu.reciprocal %17 {approx = true} : vector<128x1xf32> -> vector<128x1xf32>
      %20 = vector.broadcast %19 : vector<128x1xf32> to vector<128x16xf32>
      %21 = arith.mulf %18, %20 : vector<128x16xf32>
      %c1 = arith.constant 1 : index
      %c0_7 = arith.constant 0 : index
      %c0_8 = arith.constant 0 : index
      %22 = vector.load %arg10[%c1, %c0_7, %c0_8] : memref<2x128x17xf32, #tpu.memory_space<vmem>>, vector<1x128x17xf32>
      %23 = vector.shape_cast %22 : vector<1x128x17xf32> to vector<128x17xf32>
      %24 = vector.extract_strided_slice %23 {offsets = [0, 16], sizes = [128, 1], strides = [1, 1]} : vector<128x17xf32> to vector<128x1xf32>
      %cst_9 = arith.constant 1.000000e-30 : f32
      %25 = vector.broadcast %cst_9 : f32 to vector<128x1xf32>
      %26 = arith.maximumf %24, %25 : vector<128x1xf32>
      %27 = vector.extract_strided_slice %23 {offsets = [0, 0], sizes = [128, 16], strides = [1, 1]} : vector<128x17xf32> to vector<128x16xf32>
      %28 = tpu.reciprocal %26 {approx = true} : vector<128x1xf32> -> vector<128x1xf32>
      %29 = vector.broadcast %28 : vector<128x1xf32> to vector<128x16xf32>
      %30 = arith.mulf %27, %29 : vector<128x16xf32>
      %31 = tpu.concatenate %21, %30 in 1 : vector<128x16xf32>, vector<128x16xf32> -> vector<128x32xf32>
      %c0_10 = arith.constant 0 : index
      %c0_11 = arith.constant 0 : index
      %32 = vector.load %arg7[%c0_10, %c0_11] : memref<1x32xf32, #tpu.memory_space<vmem>>, vector<1x32xf32>
      %33 = vector.broadcast %32 : vector<1x32xf32> to vector<128x32xf32>
      %34 = arith.addf %31, %33 : vector<128x32xf32>
      %cst_12 = arith.constant 0.000000e+00 : f32
      %35 = vector.broadcast %cst_12 : f32 to vector<128x32xf32>
      %36 = arith.maximumf %34, %35 : vector<128x32xf32>
      %c0_13 = arith.constant 0 : index
      %c0_14 = arith.constant 0 : index
      %37 = vector.load %arg8[%c0_13, %c0_14] : memref<128x32xf32, #tpu.memory_space<vmem>>, vector<128x32xf32>
      tpu.vector_store %arg8[%c0_13, %c0_14], %36 {strides = array<i32>} : memref<128x32xf32, #tpu.memory_space<vmem>>, vector<128x32xf32>,
    } else {
    }
    return
  }
  func.func @transform_0(%arg0: i32, %arg1: i32, %arg2: memref<1xi32, #tpu.memory_space<smem>>) -> (i32, i32) {
    %c0_i32 = arith.constant 0 : i32
    %c0_i32_0 = arith.constant 0 : i32
    %c0_i32_1 = arith.constant 0 : i32
    return %c0_i32, %c0_i32_0 : i32, i32
  }
  func.func @transform_1(%arg0: i32, %arg1: i32, %arg2: memref<1xi32, #tpu.memory_space<smem>>) -> (i32, i32) {
    %c0_i32 = arith.constant 0 : i32
    %c0_i32_0 = arith.constant 0 : i32
    return %c0_i32, %arg1 : i32, i32
  }
  func.func @transform_2(%arg0: i32, %arg1: i32, %arg2: memref<1xi32, #tpu.memory_space<smem>>) -> (i32, i32) {
    %c0_i32 = arith.constant 0 : i32
    %c0_i32_0 = arith.constant 0 : i32
    return %arg0, %c0_i32 : i32, i32
  }
  func.func @transform_3(%arg0: i32, %arg1: i32, %arg2: memref<1xi32, #tpu.memory_space<smem>>) -> (i32, i32) {
    %c0_i32 = arith.constant 0 : i32
    return %arg0, %arg1 : i32, i32
  }
  func.func @transform_4(%arg0: i32, %arg1: i32, %arg2: memref<1xi32, #tpu.memory_space<smem>>) -> (i32, i32) {
    %c0_i32 = arith.constant 0 : i32
    %c0_i32_0 = arith.constant 0 : i32
    %c0_i32_1 = arith.constant 0 : i32
    return %c0_i32, %c0_i32_0 : i32, i32
  }
  func.func @transform_5(%arg0: i32, %arg1: i32, %arg2: memref<1xi32, #tpu.memory_space<smem>>) -> (i32, i32) {
    %c0_i32 = arith.constant 0 : i32
    %c0_i32_0 = arith.constant 0 : i32
    return %arg0, %c0_i32 : i32, i32
  }
}

module attributes {stable_mosaic.version = 11 : i64} {
  func.func @_attn_kernel(%arg0: i32, %arg1: i32, %arg2: memref<1xi32, #tpu.memory_space<smem>>, %arg3: memref<128x16xbf16, #tpu.memory_space<vmem>>, %arg4: memref<2x128xf32, #tpu.memory_space<vmem>>, %arg5: memref<128x2xf32, #tpu.memory_space<vmem>>, %arg6: memref<128x128xi8, #tpu.memory_space<vmem>>, %arg7: memref<1x7xf32, #tpu.memory_space<vmem>>, %arg8: memref<128x7xf32, #tpu.memory_space<vmem>>, %arg9: memref<2x128x1xf32, #tpu.memory_space<vmem>>, %arg10: memref<2x128x8xf32, #tpu.memory_space<vmem>>) attributes {dimension_semantics = [#tpu.dimension_semantics<parallel>, #tpu.dimension_semantics<arbitrary>], iteration_bounds = array<i64: 1, 1>, scalar_prefetch = 1 : i64, scratch_operands = 2 : i64, tpu.core_type = #tpu.core_type<tc>, window_params = [{pipeline_mode = #tpu.pipeline_mode<synchronous>, transform_indices = @transform_0, window_bounds = array<i64: 128, 16>}, {transform_indices = @transform_1, window_bounds = array<i64: 2, 128>}, {transform_indices = @transform_2, window_bounds = array<i64: 128, 2>}, {transform_indices = @transform_3, window_bounds = array<i64: 128, 128>}, {pipeline_mode = #tpu.pipeline_mode<synchronous>, transform_indices = @transform_4, window_bounds = array<i64: 1, 7>}, {transform_indices = @transform_5, window_bounds = array<i64: 128, 7>}]} {
    %c0_i32 = arith.constant 0 : i32
    %0 = arith.cmpi eq, %arg1, %c0_i32 : i32
    %1 = arith.extui %0 : i1 to i32
    %c0_i32_0 = arith.constant 0 : i32
    %2 = arith.cmpi ne, %1, %c0_i32_0 : i32
    scf.if %2 {
      %cst = arith.constant -1.000000e+30 : f32
      %13 = vector.broadcast %cst : f32 to vector<2x128x1xf32>
      %c0 = arith.constant 0 : index
      %c0_5 = arith.constant 0 : index
      %c0_6 = arith.constant 0 : index
      %14 = vector.load %arg9[%c0, %c0_5, %c0_6] : memref<2x128x1xf32, #tpu.memory_space<vmem>>, vector<2x128x1xf32>
      tpu.vector_store %arg9[%c0, %c0_5, %c0_6], %13 {strides = array<i32>} : memref<2x128x1xf32, #tpu.memory_space<vmem>>, vector<2x128x1xf32>,
      %cst_7 = arith.constant 0.000000e+00 : f32
      %15 = vector.broadcast %cst_7 : f32 to vector<2x128x8xf32>
      %c0_8 = arith.constant 0 : index
      %c0_9 = arith.constant 0 : index
      %c0_10 = arith.constant 0 : index
      %16 = vector.load %arg10[%c0_8, %c0_9, %c0_10] : memref<2x128x8xf32, #tpu.memory_space<vmem>>, vector<2x128x8xf32>
      tpu.vector_store %arg10[%c0_8, %c0_9, %c0_10], %15 {strides = array<i32>} : memref<2x128x8xf32, #tpu.memory_space<vmem>>, vector<2x128x8xf32>,
    } else {
    }
    %c1_i32 = arith.constant 1 : i32
    %3 = arith.muli %arg0, %c1_i32 : i32
    %4 = arith.addi %3, %arg1 : i32
    %5 = arith.index_cast %4 : i32 to index
    %6 = memref.load %arg2[%5] : memref<1xi32, #tpu.memory_space<smem>>
    %c0_i32_1 = arith.constant 0 : i32
    %7 = arith.cmpi sgt, %6, %c0_i32_1 : i32
    %8 = arith.extui %7 : i1 to i32
    %c0_i32_2 = arith.constant 0 : i32
    %9 = arith.cmpi ne, %8, %c0_i32_2 : i32
    scf.if %9 {
      %c0 = arith.constant 0 : index
      %c0_5 = arith.constant 0 : index
      %13 = vector.load %arg6[%c0, %c0_5] : memref<128x128xi8, #tpu.memory_space<vmem>>, vector<128x128xi8>
      %c0_i8 = arith.constant 0 : i8
      %14 = vector.broadcast %c0_i8 : i8 to vector<128x128xi8>
      %15 = arith.cmpi ne, %13, %14 : vector<128x128xi8>
      %c128_i32 = arith.constant 128 : i32
      %16 = arith.muli %arg1, %c128_i32 : i32
      %17 = tpu.assume_multiple %16, 128 : i32
      %18 = arith.index_cast %17 : i32 to index
      %c0_6 = arith.constant 0 : index
      %19 = vector.load %arg3[%18, %c0_6] : memref<128x16xbf16, #tpu.memory_space<vmem>>, vector<128x16xbf16>
      %c0_7 = arith.constant 0 : index
      %c0_8 = arith.constant 0 : index
      %20 = vector.load %arg4[%c0_7, %c0_8] : memref<2x128xf32, #tpu.memory_space<vmem>>, vector<2x128xf32>
      %c0_9 = arith.constant 0 : index
      %c0_10 = arith.constant 0 : index
      %21 = vector.load %arg5[%c0_9, %c0_10] : memref<128x2xf32, #tpu.memory_space<vmem>>, vector<128x2xf32>
      %22 = vector.extract_strided_slice %21 {offsets = [0, 0], sizes = [128, 1], strides = [1, 1]} : vector<128x2xf32> to vector<128x1xf32>
      %23 = vector.extract_strided_slice %20 {offsets = [0, 0], sizes = [1, 128], strides = [1, 1]} : vector<2x128xf32> to vector<1x128xf32>
      %24 = vector.broadcast %22 : vector<128x1xf32> to vector<128x128xf32>
      %25 = vector.broadcast %23 : vector<1x128xf32> to vector<128x128xf32>
      %26 = arith.addf %24, %25 : vector<128x128xf32>
      %cst = arith.constant 2.000000e-01 : f32
      %27 = vector.broadcast %cst : f32 to vector<128x128xf32>
      %28 = arith.mulf %27, %26 : vector<128x128xf32>
      %29 = arith.maximumf %26, %28 : vector<128x128xf32>
      %cst_11 = arith.constant -1.000000e+30 : f32
      %30 = vector.broadcast %cst_11 : f32 to vector<128x128xf32>
      %31 = arith.select %15, %29, %30 : vector<128x128xi1>, vector<128x128xf32>
      %c0_12 = arith.constant 0 : index
      %c0_13 = arith.constant 0 : index
      %c0_14 = arith.constant 0 : index
      %32 = vector.load %arg9[%c0_12, %c0_13, %c0_14] : memref<2x128x1xf32, #tpu.memory_space<vmem>>, vector<1x128x1xf32>
      %33 = vector.shape_cast %32 : vector<1x128x1xf32> to vector<128x1xf32>
      %cst_15 = arith.constant dense<0xFF800000> : vector<128xf32>
      %34 = vector.multi_reduction <maximumf>, %31, %cst_15 [1] : vector<128x128xf32> to vector<128xf32>
      %35 = vector.shape_cast %34 : vector<128xf32> to vector<128x1xf32>
      %36 = arith.maximumf %33, %35 : vector<128x1xf32>
      %37 = arith.subf %33, %36 : vector<128x1xf32>
      %38 = math.exp %37 : vector<128x1xf32>
      %39 = vector.broadcast %36 : vector<128x1xf32> to vector<128x128xf32>
      %40 = arith.subf %31, %39 : vector<128x128xf32>
      %41 = arith.truncf %40 : vector<128x128xf32> to vector<128x128xbf16>
      %42 = math.exp %41 : vector<128x128xbf16>
      %c0_16 = arith.constant 0 : index
      %c0_17 = arith.constant 0 : index
      %c0_18 = arith.constant 0 : index
      %43 = vector.load %arg10[%c0_16, %c0_17, %c0_18] : memref<2x128x8xf32, #tpu.memory_space<vmem>>, vector<1x128x8xf32>
      %44 = vector.shape_cast %43 : vector<1x128x8xf32> to vector<128x8xf32>
      %45 = vector.broadcast %38 : vector<128x1xf32> to vector<128x8xf32>
      %46 = arith.mulf %45, %44 : vector<128x8xf32>
      %47 = vector.extract_strided_slice %19 {offsets = [0, 0], sizes = [128, 8], strides = [1, 1]} : vector<128x16xbf16> to vector<128x8xbf16>
      %cst_19 = arith.constant dense<0.000000e+00> : vector<128x8xf32>
      %48 = tpu.matmul %42, %47, %cst_19 {dimension_numbers = #tpu.dot_dimension_numbers<[1], [0], [0], [1], [0, 0, 1, 1], [], []>} : vector<128x128xbf16>, vector<128x8xbf16>, vector<128x8xf32> -> vector<128x8xf32>
      %49 = arith.addf %46, %48 : vector<128x8xf32>
      %c0_20 = arith.constant 0 : index
      %c0_21 = arith.constant 0 : index
      %c0_22 = arith.constant 0 : index
      %50 = vector.load %arg10[%c0_20, %c0_21, %c0_22] : memref<2x128x8xf32, #tpu.memory_space<vmem>>, vector<1x128x8xf32>
      %51 = vector.shape_cast %50 : vector<1x128x8xf32> to vector<128x8xf32>
      %52 = vector.shape_cast %49 : vector<128x8xf32> to vector<1x128x8xf32>
      tpu.vector_store %arg10[%c0_20, %c0_21, %c0_22], %52 {strides = array<i32>} : memref<2x128x8xf32, #tpu.memory_space<vmem>>, vector<1x128x8xf32>,
      %c0_23 = arith.constant 0 : index
      %c0_24 = arith.constant 0 : index
      %c0_25 = arith.constant 0 : index
      %53 = vector.load %arg9[%c0_23, %c0_24, %c0_25] : memref<2x128x1xf32, #tpu.memory_space<vmem>>, vector<1x128x1xf32>
      %54 = vector.shape_cast %53 : vector<1x128x1xf32> to vector<128x1xf32>
      %55 = vector.shape_cast %36 : vector<128x1xf32> to vector<1x128x1xf32>
      tpu.vector_store %arg9[%c0_23, %c0_24, %c0_25], %55 {strides = array<i32>} : memref<2x128x1xf32, #tpu.memory_space<vmem>>, vector<1x128x1xf32>,
      %56 = vector.extract_strided_slice %21 {offsets = [0, 1], sizes = [128, 1], strides = [1, 1]} : vector<128x2xf32> to vector<128x1xf32>
      %57 = vector.extract_strided_slice %20 {offsets = [1, 0], sizes = [1, 128], strides = [1, 1]} : vector<2x128xf32> to vector<1x128xf32>
      %58 = vector.broadcast %56 : vector<128x1xf32> to vector<128x128xf32>
      %59 = vector.broadcast %57 : vector<1x128xf32> to vector<128x128xf32>
      %60 = arith.addf %58, %59 : vector<128x128xf32>
      %cst_26 = arith.constant 2.000000e-01 : f32
      %61 = vector.broadcast %cst_26 : f32 to vector<128x128xf32>
      %62 = arith.mulf %61, %60 : vector<128x128xf32>
      %63 = arith.maximumf %60, %62 : vector<128x128xf32>
      %cst_27 = arith.constant -1.000000e+30 : f32
      %64 = vector.broadcast %cst_27 : f32 to vector<128x128xf32>
      %65 = arith.select %15, %63, %64 : vector<128x128xi1>, vector<128x128xf32>
      %c1 = arith.constant 1 : index
      %c0_28 = arith.constant 0 : index
      %c0_29 = arith.constant 0 : index
      %66 = vector.load %arg9[%c1, %c0_28, %c0_29] : memref<2x128x1xf32, #tpu.memory_space<vmem>>, vector<1x128x1xf32>
      %67 = vector.shape_cast %66 : vector<1x128x1xf32> to vector<128x1xf32>
      %cst_30 = arith.constant dense<0xFF800000> : vector<128xf32>
      %68 = vector.multi_reduction <maximumf>, %65, %cst_30 [1] : vector<128x128xf32> to vector<128xf32>
      %69 = vector.shape_cast %68 : vector<128xf32> to vector<128x1xf32>
      %70 = arith.maximumf %67, %69 : vector<128x1xf32>
      %71 = arith.subf %67, %70 : vector<128x1xf32>
      %72 = math.exp %71 : vector<128x1xf32>
      %73 = vector.broadcast %70 : vector<128x1xf32> to vector<128x128xf32>
      %74 = arith.subf %65, %73 : vector<128x128xf32>
      %75 = arith.truncf %74 : vector<128x128xf32> to vector<128x128xbf16>
      %76 = math.exp %75 : vector<128x128xbf16>
      %c1_31 = arith.constant 1 : index
      %c0_32 = arith.constant 0 : index
      %c0_33 = arith.constant 0 : index
      %77 = vector.load %arg10[%c1_31, %c0_32, %c0_33] : memref<2x128x8xf32, #tpu.memory_space<vmem>>, vector<1x128x8xf32>
      %78 = vector.shape_cast %77 : vector<1x128x8xf32> to vector<128x8xf32>
      %79 = vector.broadcast %72 : vector<128x1xf32> to vector<128x8xf32>
      %80 = arith.mulf %79, %78 : vector<128x8xf32>
      %81 = vector.extract_strided_slice %19 {offsets = [0, 8], sizes = [128, 8], strides = [1, 1]} : vector<128x16xbf16> to vector<128x8xbf16>
      %cst_34 = arith.constant dense<0.000000e+00> : vector<128x8xf32>
      %82 = tpu.matmul %76, %81, %cst_34 {dimension_numbers = #tpu.dot_dimension_numbers<[1], [0], [0], [1], [0, 0, 1, 1], [], []>} : vector<128x128xbf16>, vector<128x8xbf16>, vector<128x8xf32> -> vector<128x8xf32>
      %83 = arith.addf %80, %82 : vector<128x8xf32>
      %c1_35 = arith.constant 1 : index
      %c0_36 = arith.constant 0 : index
      %c0_37 = arith.constant 0 : index
      %84 = vector.load %arg10[%c1_35, %c0_36, %c0_37] : memref<2x128x8xf32, #tpu.memory_space<vmem>>, vector<1x128x8xf32>
      %85 = vector.shape_cast %84 : vector<1x128x8xf32> to vector<128x8xf32>
      %86 = vector.shape_cast %83 : vector<128x8xf32> to vector<1x128x8xf32>
      tpu.vector_store %arg10[%c1_35, %c0_36, %c0_37], %86 {strides = array<i32>} : memref<2x128x8xf32, #tpu.memory_space<vmem>>, vector<1x128x8xf32>,
      %c1_38 = arith.constant 1 : index
      %c0_39 = arith.constant 0 : index
      %c0_40 = arith.constant 0 : index
      %87 = vector.load %arg9[%c1_38, %c0_39, %c0_40] : memref<2x128x1xf32, #tpu.memory_space<vmem>>, vector<1x128x1xf32>
      %88 = vector.shape_cast %87 : vector<1x128x1xf32> to vector<128x1xf32>
      %89 = vector.shape_cast %70 : vector<128x1xf32> to vector<1x128x1xf32>
      tpu.vector_store %arg9[%c1_38, %c0_39, %c0_40], %89 {strides = array<i32>} : memref<2x128x1xf32, #tpu.memory_space<vmem>>, vector<1x128x1xf32>,
    } else {
    }
    %c0_i32_3 = arith.constant 0 : i32
    %10 = arith.cmpi eq, %arg1, %c0_i32_3 : i32
    %11 = arith.extui %10 : i1 to i32
    %c0_i32_4 = arith.constant 0 : i32
    %12 = arith.cmpi ne, %11, %c0_i32_4 : i32
    scf.if %12 {
      %c0 = arith.constant 0 : index
      %c0_5 = arith.constant 0 : index
      %c0_6 = arith.constant 0 : index
      %13 = vector.load %arg10[%c0, %c0_5, %c0_6] : memref<2x128x8xf32, #tpu.memory_space<vmem>>, vector<1x128x8xf32>
      %14 = vector.shape_cast %13 : vector<1x128x8xf32> to vector<128x8xf32>
      %15 = vector.extract_strided_slice %14 {offsets = [0, 7], sizes = [128, 1], strides = [1, 1]} : vector<128x8xf32> to vector<128x1xf32>
      %cst = arith.constant 1.000000e-30 : f32
      %16 = vector.broadcast %cst : f32 to vector<128x1xf32>
      %17 = arith.maximumf %15, %16 : vector<128x1xf32>
      %18 = vector.extract_strided_slice %14 {offsets = [0, 0], sizes = [128, 7], strides = [1, 1]} : vector<128x8xf32> to vector<128x7xf32>
      %19 = tpu.reciprocal %17 {approx = true} : vector<128x1xf32> -> vector<128x1xf32>
      %20 = vector.broadcast %19 : vector<128x1xf32> to vector<128x7xf32>
      %21 = arith.mulf %18, %20 : vector<128x7xf32>
      %c1 = arith.constant 1 : index
      %c0_7 = arith.constant 0 : index
      %c0_8 = arith.constant 0 : index
      %22 = vector.load %arg10[%c1, %c0_7, %c0_8] : memref<2x128x8xf32, #tpu.memory_space<vmem>>, vector<1x128x8xf32>
      %23 = vector.shape_cast %22 : vector<1x128x8xf32> to vector<128x8xf32>
      %24 = vector.extract_strided_slice %23 {offsets = [0, 7], sizes = [128, 1], strides = [1, 1]} : vector<128x8xf32> to vector<128x1xf32>
      %cst_9 = arith.constant 1.000000e-30 : f32
      %25 = vector.broadcast %cst_9 : f32 to vector<128x1xf32>
      %26 = arith.maximumf %24, %25 : vector<128x1xf32>
      %27 = vector.extract_strided_slice %23 {offsets = [0, 0], sizes = [128, 7], strides = [1, 1]} : vector<128x8xf32> to vector<128x7xf32>
      %28 = tpu.reciprocal %26 {approx = true} : vector<128x1xf32> -> vector<128x1xf32>
      %29 = vector.broadcast %28 : vector<128x1xf32> to vector<128x7xf32>
      %30 = arith.mulf %27, %29 : vector<128x7xf32>
      %31 = arith.addf %21, %30 : vector<128x7xf32>
      %cst_10 = arith.constant 5.000000e-01 : f32
      %32 = vector.broadcast %cst_10 : f32 to vector<128x7xf32>
      %33 = arith.mulf %31, %32 : vector<128x7xf32>
      %c0_11 = arith.constant 0 : index
      %c0_12 = arith.constant 0 : index
      %34 = vector.load %arg7[%c0_11, %c0_12] : memref<1x7xf32, #tpu.memory_space<vmem>>, vector<1x7xf32>
      %35 = vector.broadcast %34 : vector<1x7xf32> to vector<128x7xf32>
      %36 = arith.addf %33, %35 : vector<128x7xf32>
      %cst_13 = arith.constant dense<0xFF800000> : vector<128xf32>
      %37 = vector.multi_reduction <maximumf>, %36, %cst_13 [1] : vector<128x7xf32> to vector<128xf32>
      %38 = vector.shape_cast %37 : vector<128xf32> to vector<128x1xf32>
      %39 = vector.broadcast %38 : vector<128x1xf32> to vector<128x7xf32>
      %40 = arith.subf %36, %39 : vector<128x7xf32>
      %41 = math.exp %40 : vector<128x7xf32>
      %cst_14 = arith.constant dense<0.000000e+00> : vector<128xf32>
      %42 = vector.multi_reduction <add>, %41, %cst_14 [1] : vector<128x7xf32> to vector<128xf32>
      %43 = vector.shape_cast %42 : vector<128xf32> to vector<128x1xf32>
      %44 = math.log %43 : vector<128x1xf32>
      %45 = arith.addf %38, %44 : vector<128x1xf32>
      %46 = vector.broadcast %45 : vector<128x1xf32> to vector<128x7xf32>
      %47 = arith.subf %36, %46 : vector<128x7xf32>
      %c0_15 = arith.constant 0 : index
      %c0_16 = arith.constant 0 : index
      %48 = vector.load %arg8[%c0_15, %c0_16] : memref<128x7xf32, #tpu.memory_space<vmem>>, vector<128x7xf32>
      tpu.vector_store %arg8[%c0_15, %c0_16], %47 {strides = array<i32>} : memref<128x7xf32, #tpu.memory_space<vmem>>, vector<128x7xf32>,
    } else {
    }
    return
  }
  func.func @transform_0(%arg0: i32, %arg1: i32, %arg2: memref<1xi32, #tpu.memory_space<smem>>) -> (i32, i32) {
    %c0_i32 = arith.constant 0 : i32
    %c0_i32_0 = arith.constant 0 : i32
    %c0_i32_1 = arith.constant 0 : i32
    return %c0_i32, %c0_i32_0 : i32, i32
  }
  func.func @transform_1(%arg0: i32, %arg1: i32, %arg2: memref<1xi32, #tpu.memory_space<smem>>) -> (i32, i32) {
    %c0_i32 = arith.constant 0 : i32
    %c0_i32_0 = arith.constant 0 : i32
    return %c0_i32, %arg1 : i32, i32
  }
  func.func @transform_2(%arg0: i32, %arg1: i32, %arg2: memref<1xi32, #tpu.memory_space<smem>>) -> (i32, i32) {
    %c0_i32 = arith.constant 0 : i32
    %c0_i32_0 = arith.constant 0 : i32
    return %arg0, %c0_i32 : i32, i32
  }
  func.func @transform_3(%arg0: i32, %arg1: i32, %arg2: memref<1xi32, #tpu.memory_space<smem>>) -> (i32, i32) {
    %c0_i32 = arith.constant 0 : i32
    return %arg0, %arg1 : i32, i32
  }
  func.func @transform_4(%arg0: i32, %arg1: i32, %arg2: memref<1xi32, #tpu.memory_space<smem>>) -> (i32, i32) {
    %c0_i32 = arith.constant 0 : i32
    %c0_i32_0 = arith.constant 0 : i32
    %c0_i32_1 = arith.constant 0 : i32
    return %c0_i32, %c0_i32_0 : i32, i32
  }
  func.func @transform_5(%arg0: i32, %arg1: i32, %arg2: memref<1xi32, #tpu.memory_space<smem>>) -> (i32, i32) {
    %c0_i32 = arith.constant 0 : i32
    %c0_i32_0 = arith.constant 0 : i32
    return %arg0, %c0_i32 : i32, i32
  }
}

module attributes {stable_mosaic.version = 11 : i64} {
  func.func @_project_kernel(%arg0: i32, %arg1: memref<128x3xf32, #tpu.memory_space<vmem>>, %arg2: memref<3x36xf32, #tpu.memory_space<vmem>>, %arg3: memref<128x34xbf16, #tpu.memory_space<vmem>>, %arg4: memref<128x4xf32, #tpu.memory_space<vmem>>) attributes {dimension_semantics = [#tpu.dimension_semantics<parallel>], iteration_bounds = array<i64: 1>, scalar_prefetch = 0 : i64, scratch_operands = 0 : i64, tpu.core_type = #tpu.core_type<tc>, window_params = [{transform_indices = @transform_0, window_bounds = array<i64: 128, 3>}, {pipeline_mode = #tpu.pipeline_mode<synchronous>, transform_indices = @transform_1, window_bounds = array<i64: 3, 36>}, {transform_indices = @transform_2, window_bounds = array<i64: 128, 34>}, {transform_indices = @transform_3, window_bounds = array<i64: 128, 4>}]} {
    %c0 = arith.constant 0 : index
    %c0_0 = arith.constant 0 : index
    %0 = vector.load %arg1[%c0, %c0_0] : memref<128x3xf32, #tpu.memory_space<vmem>>, vector<128x3xf32>
    %c0_1 = arith.constant 0 : index
    %c0_2 = arith.constant 0 : index
    %1 = vector.load %arg2[%c0_1, %c0_2] : memref<3x36xf32, #tpu.memory_space<vmem>>, vector<3x36xf32>
    %cst = arith.constant dense<0.000000e+00> : vector<128x36xf32>
    %2 = tpu.matmul %0, %1, %cst {dimension_numbers = #tpu.dot_dimension_numbers<[1], [0], [0], [1], [0, 0, 1, 1], [], []>} : vector<128x3xf32>, vector<3x36xf32>, vector<128x36xf32> -> vector<128x36xf32>
    %cst_3 = arith.constant 1.000000e+00 : bf16
    %3 = vector.broadcast %cst_3 : bf16 to vector<128x1xbf16>
    %4 = vector.extract_strided_slice %2 {offsets = [0, 0], sizes = [128, 16], strides = [1, 1]} : vector<128x36xf32> to vector<128x16xf32>
    %5 = arith.truncf %4 : vector<128x16xf32> to vector<128x16xbf16>
    %c0_4 = arith.constant 0 : index
    %c0_5 = arith.constant 0 : index
    %6 = vector.load %arg3[%c0_4, %c0_5] : memref<128x34xbf16, #tpu.memory_space<vmem>>, vector<128x16xbf16>
    tpu.vector_store %arg3[%c0_4, %c0_5], %5 {strides = array<i32>} : memref<128x34xbf16, #tpu.memory_space<vmem>>, vector<128x16xbf16>,
    %c0_6 = arith.constant 0 : index
    %c16 = arith.constant 16 : index
    %7 = vector.load %arg3[%c0_6, %c16] : memref<128x34xbf16, #tpu.memory_space<vmem>>, vector<128x1xbf16>
    tpu.vector_store %arg3[%c0_6, %c16], %3 {strides = array<i32>} : memref<128x34xbf16, #tpu.memory_space<vmem>>, vector<128x1xbf16>,
    %8 = vector.extract_strided_slice %2 {offsets = [0, 16], sizes = [128, 16], strides = [1, 1]} : vector<128x36xf32> to vector<128x16xf32>
    %9 = arith.truncf %8 : vector<128x16xf32> to vector<128x16xbf16>
    %c0_7 = arith.constant 0 : index
    %c17 = arith.constant 17 : index
    %10 = vector.load %arg3[%c0_7, %c17] : memref<128x34xbf16, #tpu.memory_space<vmem>>, vector<128x16xbf16>
    tpu.vector_store %arg3[%c0_7, %c17], %9 {strides = array<i32>} : memref<128x34xbf16, #tpu.memory_space<vmem>>, vector<128x16xbf16>,
    %c0_8 = arith.constant 0 : index
    %c33 = arith.constant 33 : index
    %11 = vector.load %arg3[%c0_8, %c33] : memref<128x34xbf16, #tpu.memory_space<vmem>>, vector<128x1xbf16>
    tpu.vector_store %arg3[%c0_8, %c33], %3 {strides = array<i32>} : memref<128x34xbf16, #tpu.memory_space<vmem>>, vector<128x1xbf16>,
    %12 = vector.extract_strided_slice %2 {offsets = [0, 32], sizes = [128, 4], strides = [1, 1]} : vector<128x36xf32> to vector<128x4xf32>
    %c0_9 = arith.constant 0 : index
    %c0_10 = arith.constant 0 : index
    %13 = vector.load %arg4[%c0_9, %c0_10] : memref<128x4xf32, #tpu.memory_space<vmem>>, vector<128x4xf32>
    tpu.vector_store %arg4[%c0_9, %c0_10], %12 {strides = array<i32>} : memref<128x4xf32, #tpu.memory_space<vmem>>, vector<128x4xf32>,
    return
  }
  func.func @transform_0(%arg0: i32) -> (i32, i32) {
    %c0_i32 = arith.constant 0 : i32
    %c0_i32_0 = arith.constant 0 : i32
    return %arg0, %c0_i32 : i32, i32
  }
  func.func @transform_1(%arg0: i32) -> (i32, i32) {
    %c0_i32 = arith.constant 0 : i32
    %c0_i32_0 = arith.constant 0 : i32
    %c0_i32_1 = arith.constant 0 : i32
    return %c0_i32, %c0_i32_0 : i32, i32
  }
  func.func @transform_2(%arg0: i32) -> (i32, i32) {
    %c0_i32 = arith.constant 0 : i32
    %c0_i32_0 = arith.constant 0 : i32
    return %arg0, %c0_i32 : i32, i32
  }
  func.func @transform_3(%arg0: i32) -> (i32, i32) {
    %c0_i32 = arith.constant 0 : i32
    %c0_i32_0 = arith.constant 0 : i32
    return %arg0, %c0_i32 : i32, i32
  }
}

</mosaic_0001>

<bundles_post_ra>
// kernel: gat_forward.4
= control target key start
LH: loop header
LB: loop body
LE: loop exit
PB: predicated region body
PF: predicated region fallthrough
CT: control target
= control target key end

     0   :  { %vm80_vm0 = vcmask 1042432   ;;  %vm31_vm1 = vcmask 23552   ;;  %vm293_vm2 = vcmask 125952   ;;  %s595_s18 = smov 96   ;;  %vm310_vm3 = vcmask 134272   ;;  %s596_s19 = smov 1   ;;  %s1069_s1 = inlined_call_operand.vmem [shape: f32[3,36], index: 1, kind: input, shape index: {}]   ;;  %s1070_s0 = inlined_call_operand.vmem [shape: f32[128,3], index: 0, kind: input, shape index: {}]   ;;  %s1071_s2 = inlined_call_operand.vmem [shape: bf16[128,34], index: 2, kind: output, shape index: {0}]   ;;  %s1072_s3 = inlined_call_operand.vmem [shape: f32[128,4], index: 3, kind: output, shape index: {1}]  }
   0x1   :  { %v30_v0 = vld [vmem:[%s1069_s1] sm:$0x7]  ;;  %v15_v2 = vld [vmem:[%s1070_s0 + $0x8] sm:$0xff]  ;;  %v16_v4 = vld [vmem:[%s1070_s0 + $0x10] sm:$0xff]  ;;  %v597_v25 = vmov 1065369472  }
   0x2   :  { %v14_v1 = vld [vmem:[%s1070_s0] sm:$0xff]  ;;  %564 = vmatprep.subr.msk.mxu0 %vm80_vm0, %v30_v0  ;;  %590 = vmatprep.subr.msk.mxu1 %vm80_vm0, %v30_v0  ;;  %v23_v5 = vld [vmem:[%s1070_s0 + $0x48] sm:$0xff]  ;;  %v24_v6 = vld [vmem:[%s1070_s0 + $0x50] sm:$0xff]  ;;  %vm473_vm4 = vcmask 31744   ;;  %vm375_vm5 = vcmask 265352   ;;  %vm392_vm6 = vcmask 273672  }
   0x3   :  { %566 = vmatprep.mubr.msk.f32.mxu0 %vm31_vm1, %v14_v1  ;;  %v22_v3 = vld [vmem:[%s1070_s0 + $0x40] sm:$0xff]  ;;  %565 = vmatpush3.msk.msra.mxu0 %vm80_vm0, %v30_v0  ;;  %v17_v7 = vld [vmem:[%s1070_s0 + $0x18] sm:$0xff]  ;;  %v19_v11 = vld [vmem:[%s1070_s0 + $0x28] sm:$0xff] }
   0x4   :  { %567 = vmatmul.mubr.msk.f32.vlgmr.msra.gmra.mxu0 %vm31_vm1, %v15_v2  ;;  %591 = vmatpush3.msk.msra.mxu1 %vm80_vm0, %v30_v0  ;;  %v18_v8 = vld [vmem:[%s1070_s0 + $0x20] sm:$0xff]  ;;  %v25_v9 = vld [vmem:[%s1070_s0 + $0x58] sm:$0xff]  ;;  %v20_v12 = vld [vmem:[%s1070_s0 + $0x30] sm:$0xff] }
   0x5   :  { %578 = vmatprep.mubr.msk.f32.mxu1 %vm31_vm1, %v22_v3  ;;  %569 = vmatprep.mubr.msk.f32.mxu0 %vm31_vm1, %v16_v4  ;;  %v26_v10 = vld [vmem:[%s1070_s0 + $0x60] sm:$0xff]  ;;  %v27_v13 = vld [vmem:[%s1070_s0 + $0x68] sm:$0xff]  ;;  %v28_v14 = vld [vmem:[%s1070_s0 + $0x70] sm:$0xff] }
   0x6   :  { %579 = vmatmul.mubr.msk.f32.vlgmr.msra.gmra.mxu1 %vm31_vm1, %v23_v5  ;;  %v21_v15 = vld [vmem:[%s1070_s0 + $0x38] sm:$0xff] }
   0x7   :  { %581 = vmatprep.mubr.msk.f32.mxu1 %vm31_vm1, %v24_v6  ;;  %v29_v16 = vld [vmem:[%s1070_s0 + $0x78] sm:$0xff] }
   0x8   :  { %570 = vmatmul.mubr.msk.f32.gmra.mxu0 %vm31_vm1, %v17_v7 }
   0x9   :  { %572 = vmatprep.mubr.msk.f32.mxu0 %vm31_vm1, %v18_v8 }
   0xa   :  { %582 = vmatmul.mubr.msk.f32.gmra.mxu1 %vm31_vm1, %v25_v9 }
   0xb   :  { %584 = vmatprep.mubr.msk.f32.mxu1 %vm31_vm1, %v26_v10 }
   0xc   :  { %573 = vmatmul.mubr.msk.f32.gmra.mxu0 %vm31_vm1, %v19_v11 }
   0xd   :  { %575 = vmatprep.mubr.msk.f32.mxu0 %vm31_vm1, %v20_v12 }
   0xe   :  { %585 = vmatmul.mubr.msk.f32.gmra.mxu1 %vm31_vm1, %v27_v13 }
   0xf   :  { %587 = vmatprep.mubr.msk.f32.mxu1 %vm31_vm1, %v28_v14 }
  0x10   :  { %576 = vmatmul.mubr.msk.f32.gmra.mxu0 %vm31_vm1, %v21_v15 }
  0x12   :  { %588 = vmatmul.mubr.msk.f32.gmra.mxu1 %vm31_vm1, %v29_v16 }
  0xc4   :  { %v568_v17 = vpop.f32.mrf.mxu0 }
  0xc5   :  { %427 = vrot.lane.b32.xlu1 %v568_v17, %s595_s18  ;;  %v532_v18 = vpack.c.bf16 %v568_v17, %v568_v17 }
  0xc6   :  { %v150_v19 = vpop.f32.mrf.mxu0  ;;  %v580_v20 = vpop.f32.mrf.mxu1 }
  0xc7   :  { %v531_v21 = vpack.c.bf16 %v150_v19, %v150_v19  ;;  %329 = vrot.lane.b32.xlu0 %v532_v18, %s596_s19  ;;  %295 = vst.msk [vmem:[%s1071_s2 + $0x4] sm:$0xf] %vm293_vm2, %v532_v18  ;;  %v540_v22 = vpack.c.bf16 %v580_v20, %v580_v20 }
  0xc8   :  { %v190_v23 = vpop.f32.mrf.mxu1  ;;  %v571_v24 = vpop.f32.mrf.mxu0  ;;  %312 = vst.msk [vmem:[%s1071_s2 + $0x4] sm:$0xf] %vm310_vm3, %v597_v25 }
  0xc9   :  { %294 = vst.msk [vmem:[%s1071_s2] sm:$0xf] %vm293_vm2, %v531_v21  ;;  %303 = vst.msk [vmem:[%s1071_s2 + $0x24] sm:$0xf] %vm293_vm2, %v540_v22  ;;  %443 = vrot.lane.b32.xlu1 %v580_v20, %s595_s18  ;;  %v539_v26 = vpack.c.bf16 %v190_v23, %v190_v23  ;;  %v534_v27 = vpack.c.bf16 %v571_v24, %v571_v24 }
  0xca   :  { %v160_v28 = vpop.f32.mrf.mxu0  ;;  %v583_v29 = vpop.f32.mrf.mxu1  ;;  %311 = vst.msk [vmem:[%s1071_s2] sm:$0xf] %vm310_vm3, %v597_v25  ;;  %320 = vst.msk [vmem:[%s1071_s2 + $0x24] sm:$0xf] %vm310_vm3, %v597_v25 }
  0xcb   :  { %302 = vst.msk [vmem:[%s1071_s2 + $0x20] sm:$0xf] %vm293_vm2, %v539_v26  ;;  %425 = vrot.lane.b32.xlu0 %v150_v19, %s595_s18  ;;  %297 = vst.msk [vmem:[%s1071_s2 + $0xc] sm:$0xf] %vm293_vm2, %v534_v27  ;;  %v533_v30 = vpack.c.bf16 %v160_v28, %v160_v28  ;;  %v542_v31 = vpack.c.bf16 %v583_v29, %v583_v29 }
  0xcc   :  { %v200_v32 = vpop.f32.mrf.mxu1  ;;  %v574_v33 = vpop.f32.mrf.mxu0  ;;  %314 = vst.msk [vmem:[%s1071_s2 + $0xc] sm:$0xf] %vm310_vm3, %v597_v25  ;;  %319 = vst.msk [vmem:[%s1071_s2 + $0x20] sm:$0xf] %vm310_vm3, %v597_v25 }
  0xcd   :  { %345 = vrot.lane.b32.xlu1 %v540_v22, %s596_s19  ;;  %296 = vst.msk [vmem:[%s1071_s2 + $0x8] sm:$0xf] %vm293_vm2, %v533_v30  ;;  %305 = vst.msk [vmem:[%s1071_s2 + $0x2c] sm:$0xf] %vm293_vm2, %v542_v31  ;;  %v541_v34 = vpack.c.bf16 %v200_v32, %v200_v32  ;;  %v536_v35 = vpack.c.bf16 %v574_v33, %v574_v33 }
  0xce   :  { %v170_v36 = vpop.f32.mrf.mxu0  ;;  %v586_v37 = vpop.f32.mrf.mxu1  ;;  %313 = vst.msk [vmem:[%s1071_s2 + $0x8] sm:$0xf] %vm310_vm3, %v597_v25  ;;  %322 = vst.msk [vmem:[%s1071_s2 + $0x2c] sm:$0xf] %vm310_vm3, %v597_v25 }
  0xcf   :  { %441 = vrot.lane.b32.xlu0 %v190_v23, %s595_s18  ;;  %304 = vst.msk [vmem:[%s1071_s2 + $0x28] sm:$0xf] %vm293_vm2, %v541_v34  ;;  %299 = vst.msk [vmem:[%s1071_s2 + $0x14] sm:$0xf] %vm293_vm2, %v536_v35  ;;  %v535_v38 = vpack.c.bf16 %v170_v36, %v170_v36  ;;  %v544_v39 = vpack.c.bf16 %v586_v37, %v586_v37 }
  0xd0   :  { %v210_v40 = vpop.f32.mrf.mxu1  ;;  %v577_v41 = vpop.f32.mrf.mxu0  ;;  %316 = vst.msk [vmem:[%s1071_s2 + $0x14] sm:$0xf] %vm310_vm3, %v597_v25  ;;  %321 = vst.msk [vmem:[%s1071_s2 + $0x28] sm:$0xf] %vm310_vm3, %v597_v25 }
  0xd1   :  { %431 = vrot.lane.b32.xlu1 %v571_v24, %s595_s18  ;;  %298 = vst.msk [vmem:[%s1071_s2 + $0x10] sm:$0xf] %vm293_vm2, %v535_v38  ;;  %307 = vst.msk [vmem:[%s1071_s2 + $0x34] sm:$0xf] %vm293_vm2, %v544_v39  ;;  %v543_v42 = vpack.c.bf16 %v210_v40, %v210_v40  ;;  %v538_v43 = vpack.c.bf16 %v577_v41, %v577_v41 }
  0xd2   :  { %v180_v44 = vpop.f32.mrf.mxu0  ;;  %v589_v45 = vpop.f32.mrf.mxu1  ;;  %315 = vst.msk [vmem:[%s1071_s2 + $0x10] sm:$0xf] %vm310_vm3, %v597_v25  ;;  %324 = vst.msk [vmem:[%s1071_s2 + $0x34] sm:$0xf] %vm310_vm3, %v597_v25 }
  0xd3   :  { %327 = vrot.lane.b32.xlu0 %v531_v21, %s596_s19  ;;  %306 = vst.msk [vmem:[%s1071_s2 + $0x30] sm:$0xf] %vm293_vm2, %v543_v42  ;;  %301 = vst.msk [vmem:[%s1071_s2 + $0x1c] sm:$0xf] %vm293_vm2, %v538_v43  ;;  %v537_v46 = vpack.c.bf16 %v180_v44, %v180_v44  ;;  %v546_v47 = vpack.c.bf16 %v589_v45, %v589_v45 }
  0xd4   :  { %v220_v48 = vpop.f32.mrf.mxu1  ;;  %318 = vst.msk [vmem:[%s1071_s2 + $0x1c] sm:$0xf] %vm310_vm3, %v597_v25  ;;  %323 = vst.msk [vmem:[%s1071_s2 + $0x30] sm:$0xf] %vm310_vm3, %v597_v25 }
  0xd5   :  { %447 = vrot.lane.b32.xlu1 %v583_v29, %s595_s18  ;;  %300 = vst.msk [vmem:[%s1071_s2 + $0x18] sm:$0xf] %vm293_vm2, %v537_v46  ;;  %309 = vst.msk [vmem:[%s1071_s2 + $0x3c] sm:$0xf] %vm293_vm2, %v546_v47  ;;  %v545_v49 = vpack.c.bf16 %v220_v48, %v220_v48 }
  0xd6   :  { %317 = vst.msk [vmem:[%s1071_s2 + $0x18] sm:$0xf] %vm310_vm3, %v597_v25  ;;  %326 = vst.msk [vmem:[%s1071_s2 + $0x3c] sm:$0xf] %vm310_vm3, %v597_v25 }
  0xd7   :  { %343 = vrot.lane.b32.xlu0 %v539_v26, %s596_s19  ;;  %308 = vst.msk [vmem:[%s1071_s2 + $0x38] sm:$0xf] %vm293_vm2, %v545_v49 }
  0xd8   :  { %325 = vst.msk [vmem:[%s1071_s2 + $0x38] sm:$0xf] %vm310_vm3, %v597_v25 }
  0xd9   :  { %333 = vrot.lane.b32.xlu1 %v534_v27, %s596_s19 }
  0xdb   :  { %429 = vrot.lane.b32.xlu0 %v160_v28, %s595_s18 }
  0xdd   :  { %349 = vrot.lane.b32.xlu1 %v542_v31, %s596_s19 }
  0xdf   :  { %445 = vrot.lane.b32.xlu0 %v200_v32, %s595_s18 }
  0xe1   :  { %331 = vrot.lane.b32.xlu1 %v533_v30, %s596_s19 }
  0xe3   :  { %347 = vrot.lane.b32.xlu0 %v541_v34, %s596_s19 }
  0xe5   :  { %435 = vrot.lane.b32.xlu1 %v574_v33, %s595_s18 }
  0xe7   :  { %433 = vrot.lane.b32.xlu0 %v170_v36, %s595_s18 }
  0xe9   :  { %451 = vrot.lane.b32.xlu1 %v586_v37, %s595_s18 }
  0xeb   :  { %449 = vrot.lane.b32.xlu0 %v210_v40, %s595_s18 }
  0xed   :  { %337 = vrot.lane.b32.xlu1 %v536_v35, %s596_s19 }
  0xef   :  { %335 = vrot.lane.b32.xlu0 %v535_v38, %s596_s19 }
  0xf1   :  { %353 = vrot.lane.b32.xlu1 %v544_v39, %s596_s19 }
  0xf3   :  { %351 = vrot.lane.b32.xlu0 %v543_v42, %s596_s19 }
  0xf5   :  { %439 = vrot.lane.b32.xlu1 %v577_v41, %s595_s18 }
  0xf7   :  { %437 = vrot.lane.b32.xlu0 %v180_v44, %s595_s18 }
  0xf9   :  { %341 = vrot.lane.b32.xlu1 %v538_v43, %s596_s19 }
  0xfb   :  { %339 = vrot.lane.b32.xlu0 %v537_v46, %s596_s19 }
  0xfd   :  { %357 = vrot.lane.b32.xlu1 %v546_v47, %s596_s19 }
  0xff   :  { %355 = vrot.lane.b32.xlu0 %v545_v49, %s596_s19 }
 0x101   :  { %455 = vrot.lane.b32.xlu1 %v589_v45, %s595_s18 }
 0x103   :  { %453 = vrot.lane.b32.xlu0 %v220_v48, %s595_s18 }
 0x137   :  { %v428_v50 = vpop.permute.xlu1 %427 }
 0x138   :  { %475 = vst.msk [vmem:[%s1072_s3 + $0x8] sm:$0xff] %vm473_vm4, %v428_v50 }
 0x139   :  { %v330_v51 = vpop.permute.xlu0 %329 }
 0x13a   :  { %377 = vst.msk [vmem:[%s1071_s2 + $0x4] sm:$0xf] %vm375_vm5, %v330_v51 }
 0x13b   :  { %394 = vst.msk [vmem:[%s1071_s2 + $0x4] sm:$0xf] %vm392_vm6, %v597_v25  ;;  %v444_v52 = vpop.permute.xlu1 %443 }
 0x13c   :  { %483 = vst.msk [vmem:[%s1072_s3 + $0x48] sm:$0xff] %vm473_vm4, %v444_v52 }
 0x13d   :  { %v426_v53 = vpop.permute.xlu0 %425 }
 0x13e   :  { %474 = vst.msk [vmem:[%s1072_s3] sm:$0xff] %vm473_vm4, %v426_v53 }
 0x13f   :  { %v346_v54 = vpop.permute.xlu1 %345 }
 0x140   :  { %385 = vst.msk [vmem:[%s1071_s2 + $0x24] sm:$0xf] %vm375_vm5, %v346_v54 }
 0x141   :  { %402 = vst.msk [vmem:[%s1071_s2 + $0x24] sm:$0xf] %vm392_vm6, %v597_v25  ;;  %v442_v55 = vpop.permute.xlu0 %441 }
 0x142   :  { %482 = vst.msk [vmem:[%s1072_s3 + $0x40] sm:$0xff] %vm473_vm4, %v442_v55 }
 0x143   :  { %v432_v56 = vpop.permute.xlu1 %431 }
 0x144   :  { %477 = vst.msk [vmem:[%s1072_s3 + $0x18] sm:$0xff] %vm473_vm4, %v432_v56 }
 0x145   :  { %v328_v57 = vpop.permute.xlu0 %327 }
 0x146   :  { %376 = vst.msk [vmem:[%s1071_s2] sm:$0xf] %vm375_vm5, %v328_v57 }
 0x147   :  { %393 = vst.msk [vmem:[%s1071_s2] sm:$0xf] %vm392_vm6, %v597_v25  ;;  %v448_v58 = vpop.permute.xlu1 %447 }
 0x148   :  { %485 = vst.msk [vmem:[%s1072_s3 + $0x58] sm:$0xff] %vm473_vm4, %v448_v58 }
 0x149   :  { %v344_v59 = vpop.permute.xlu0 %343 }
 0x14a   :  { %384 = vst.msk [vmem:[%s1071_s2 + $0x20] sm:$0xf] %vm375_vm5, %v344_v59 }
 0x14b   :  { %401 = vst.msk [vmem:[%s1071_s2 + $0x20] sm:$0xf] %vm392_vm6, %v597_v25  ;;  %v334_v60 = vpop.permute.xlu1 %333 }
 0x14c   :  { %379 = vst.msk [vmem:[%s1071_s2 + $0xc] sm:$0xf] %vm375_vm5, %v334_v60 }
 0x14d   :  { %396 = vst.msk [vmem:[%s1071_s2 + $0xc] sm:$0xf] %vm392_vm6, %v597_v25  ;;  %v430_v61 = vpop.permute.xlu0 %429 }
 0x14e   :  { %476 = vst.msk [vmem:[%s1072_s3 + $0x10] sm:$0xff] %vm473_vm4, %v430_v61 }
 0x14f   :  { %v350_v62 = vpop.permute.xlu1 %349 }
 0x150   :  { %387 = vst.msk [vmem:[%s1071_s2 + $0x2c] sm:$0xf] %vm375_vm5, %v350_v62 }
 0x151   :  { %404 = vst.msk [vmem:[%s1071_s2 + $0x2c] sm:$0xf] %vm392_vm6, %v597_v25  ;;  %v446_v63 = vpop.permute.xlu0 %445 }
 0x152   :  { %484 = vst.msk [vmem:[%s1072_s3 + $0x50] sm:$0xff] %vm473_vm4, %v446_v63 }
 0x153   :  { %v332_v0 = vpop.permute.xlu1 %331 }
 0x154   :  { %378 = vst.msk [vmem:[%s1071_s2 + $0x8] sm:$0xf] %vm375_vm5, %v332_v0 }
 0x155   :  { %395 = vst.msk [vmem:[%s1071_s2 + $0x8] sm:$0xf] %vm392_vm6, %v597_v25  ;;  %v348_v1 = vpop.permute.xlu0 %347 }
 0x156   :  { %386 = vst.msk [vmem:[%s1071_s2 + $0x28] sm:$0xf] %vm375_vm5, %v348_v1 }
 0x157   :  { %403 = vst.msk [vmem:[%s1071_s2 + $0x28] sm:$0xf] %vm392_vm6, %v597_v25  ;;  %v436_v2 = vpop.permute.xlu1 %435 }
 0x158   :  { %479 = vst.msk [vmem:[%s1072_s3 + $0x28] sm:$0xff] %vm473_vm4, %v436_v2 }
 0x159   :  { %v434_v3 = vpop.permute.xlu0 %433 }
 0x15a   :  { %478 = vst.msk [vmem:[%s1072_s3 + $0x20] sm:$0xff] %vm473_vm4, %v434_v3 }
 0x15b   :  { %v452_v4 = vpop.permute.xlu1 %451 }
 0x15c   :  { %487 = vst.msk [vmem:[%s1072_s3 + $0x68] sm:$0xff] %vm473_vm4, %v452_v4 }
 0x15d   :  { %v450_v5 = vpop.permute.xlu0 %449 }
 0x15e   :  { %486 = vst.msk [vmem:[%s1072_s3 + $0x60] sm:$0xff] %vm473_vm4, %v450_v5 }
 0x15f   :  { %v338_v6 = vpop.permute.xlu1 %337 }
 0x160   :  { %381 = vst.msk [vmem:[%s1071_s2 + $0x14] sm:$0xf] %vm375_vm5, %v338_v6 }
 0x161   :  { %398 = vst.msk [vmem:[%s1071_s2 + $0x14] sm:$0xf] %vm392_vm6, %v597_v25  ;;  %v336_v7 = vpop.permute.xlu0 %335 }
 0x162   :  { %380 = vst.msk [vmem:[%s1071_s2 + $0x10] sm:$0xf] %vm375_vm5, %v336_v7 }
 0x163   :  { %397 = vst.msk [vmem:[%s1071_s2 + $0x10] sm:$0xf] %vm392_vm6, %v597_v25  ;;  %v354_v8 = vpop.permute.xlu1 %353 }
 0x164   :  { %389 = vst.msk [vmem:[%s1071_s2 + $0x34] sm:$0xf] %vm375_vm5, %v354_v8 }
 0x165   :  { %406 = vst.msk [vmem:[%s1071_s2 + $0x34] sm:$0xf] %vm392_vm6, %v597_v25  ;;  %v352_v9 = vpop.permute.xlu0 %351 }
 0x166   :  { %388 = vst.msk [vmem:[%s1071_s2 + $0x30] sm:$0xf] %vm375_vm5, %v352_v9 }
 0x167   :  { %405 = vst.msk [vmem:[%s1071_s2 + $0x30] sm:$0xf] %vm392_vm6, %v597_v25  ;;  %v440_v10 = vpop.permute.xlu1 %439 }
 0x168   :  { %481 = vst.msk [vmem:[%s1072_s3 + $0x38] sm:$0xff] %vm473_vm4, %v440_v10 }
 0x169   :  { %v438_v11 = vpop.permute.xlu0 %437 }
 0x16a   :  { %480 = vst.msk [vmem:[%s1072_s3 + $0x30] sm:$0xff] %vm473_vm4, %v438_v11 }
 0x16b   :  { %v342_v12 = vpop.permute.xlu1 %341 }
 0x16c   :  { %383 = vst.msk [vmem:[%s1071_s2 + $0x1c] sm:$0xf] %vm375_vm5, %v342_v12 }
 0x16d   :  { %400 = vst.msk [vmem:[%s1071_s2 + $0x1c] sm:$0xf] %vm392_vm6, %v597_v25  ;;  %v340_v13 = vpop.permute.xlu0 %339 }
 0x16e   :  { %382 = vst.msk [vmem:[%s1071_s2 + $0x18] sm:$0xf] %vm375_vm5, %v340_v13 }
 0x16f   :  { %399 = vst.msk [vmem:[%s1071_s2 + $0x18] sm:$0xf] %vm392_vm6, %v597_v25  ;;  %v358_v14 = vpop.permute.xlu1 %357 }
 0x170   :  { %391 = vst.msk [vmem:[%s1071_s2 + $0x3c] sm:$0xf] %vm375_vm5, %v358_v14 }
 0x171   :  { %408 = vst.msk [vmem:[%s1071_s2 + $0x3c] sm:$0xf] %vm392_vm6, %v597_v25  ;;  %v356_v15 = vpop.permute.xlu0 %355 }
 0x172   :  { %390 = vst.msk [vmem:[%s1071_s2 + $0x38] sm:$0xf] %vm375_vm5, %v356_v15 }
 0x173   :  { %407 = vst.msk [vmem:[%s1071_s2 + $0x38] sm:$0xf] %vm392_vm6, %v597_v25  ;;  %v456_v16 = vpop.permute.xlu1 %455 }
 0x174   :  { %489 = vst.msk [vmem:[%s1072_s3 + $0x78] sm:$0xff] %vm473_vm4, %v456_v16 }
 0x175   :  { %v454_v17 = vpop.permute.xlu0 %453 }
 0x176   :  { %488 = vst.msk [vmem:[%s1072_s3 + $0x70] sm:$0xff] %vm473_vm4, %v454_v17 }

// kernel: gat_forward.6
= control target key start
LH: loop header
LB: loop body
LE: loop exit
PB: predicated region body
PF: predicated region fallthrough
CT: control target
= control target key end

     0   :  { %vm34_vm0 = vcmask 261120   ;;  %vm292_vm1 = vcmask 52224   ;;  %s608_s24 = smov 114   ;;  %vm309_vm2 = vcmask 60472   ;;  %s609_s25 = smov 1   ;;  %vm472_vm3 = vcmask 31744   ;;  %s1091_s1 = inlined_call_operand.vmem [shape: f32[32,18], index: 1, kind: input, shape index: {}]   ;;  %s1092_s0 = inlined_call_operand.vmem [shape: f32[128,32], index: 0, kind: input, shape index: {}]   ;;  %s1093_s2 = inlined_call_operand.vmem [shape: bf16[128,16], index: 2, kind: output, shape index: {0}]   ;;  %s1094_s3 = inlined_call_operand.vmem [shape: f32[128,4], index: 3, kind: output, shape index: {1}]  }
   0x1   :  { %v33_v0 = vld [vmem:[%s1091_s1 + $0x18] sm:$0xff]  ;;  %v32_v1 = vld [vmem:[%s1091_s1 + $0x10] sm:$0xff]  ;;  %v31_v2 = vld [vmem:[%s1091_s1 + $0x8] sm:$0xff]  ;;  %v610_v28 = vmov 1065369472   ;;  %vm374_vm4 = vcmask 117824  }
   0x2   :  { %565 = vmatprep.subr.mxu0 %v33_v0  ;;  %597 = vmatprep.subr.mxu1 %v33_v0  ;;  %v14_v3 = vld [vmem:[%s1092_s0] sm:$0xff]  ;;  %v15_v5 = vld [vmem:[%s1092_s0 + $0x8] sm:$0xff]  ;;  %v16_v7 = vld [vmem:[%s1092_s0 + $0x10] sm:$0xff]  ;;  %vm391_vm5 = vcmask 126072  }
   0x3   :  { %566 = vmatpush3.msra.mxu0 %v33_v0  ;;  %601 = vmatpush3.msra.mxu1 %v33_v0  ;;  %v30_v4 = vld [vmem:[%s1091_s1] sm:$0xff]  ;;  %v23_v8 = vld [vmem:[%s1092_s0 + $0x48] sm:$0xff]  ;;  %v24_v9 = vld [vmem:[%s1092_s0 + $0x50] sm:$0xff] }
   0x4   :  { %567 = vmatprep.subr.mxu0 %v32_v1  ;;  %598 = vmatprep.subr.mxu1 %v32_v1  ;;  %v22_v6 = vld [vmem:[%s1092_s0 + $0x40] sm:$0xff]  ;;  %v17_v10 = vld [vmem:[%s1092_s0 + $0x18] sm:$0xff]  ;;  %v19_v14 = vld [vmem:[%s1092_s0 + $0x28] sm:$0xff] }
   0x5   :  { %568 = vmatpush3.msra.mxu0 %v32_v1  ;;  %602 = vmatpush3.msra.mxu1 %v32_v1  ;;  %v18_v11 = vld [vmem:[%s1092_s0 + $0x20] sm:$0xff]  ;;  %v25_v12 = vld [vmem:[%s1092_s0 + $0x58] sm:$0xff]  ;;  %v20_v15 = vld [vmem:[%s1092_s0 + $0x30] sm:$0xff] }
   0x6   :  { %569 = vmatprep.subr.mxu0 %v31_v2  ;;  %573 = vmatprep.mubr.msk.f32.mxu0 %vm34_vm0, %v14_v3  ;;  %v26_v13 = vld [vmem:[%s1092_s0 + $0x60] sm:$0xff]  ;;  %v27_v16 = vld [vmem:[%s1092_s0 + $0x68] sm:$0xff]  ;;  %v28_v17 = vld [vmem:[%s1092_s0 + $0x70] sm:$0xff] }
   0x7   :  { %570 = vmatpush3.msra.mxu0 %v31_v2  ;;  %599 = vmatprep.subr.mxu1 %v31_v2  ;;  %v21_v18 = vld [vmem:[%s1092_s0 + $0x38] sm:$0xff] }
   0x8   :  { %571 = vmatprep.subr.mxu0 %v30_v4  ;;  %603 = vmatpush3.msra.mxu1 %v31_v2  ;;  %v29_v19 = vld [vmem:[%s1092_s0 + $0x78] sm:$0xff] }
   0x9   :  { %572 = vmatpush3.msra.mxu0 %v30_v4  ;;  %600 = vmatprep.subr.mxu1 %v30_v4 }
   0xa   :  { %574 = vmatmul.mubr.msk.f32.vlgmr.msra.gmra.mxu0 %vm34_vm0, %v15_v5  ;;  %604 = vmatpush3.msra.mxu1 %v30_v4 }
   0xb   :  { %585 = vmatprep.mubr.msk.f32.mxu1 %vm34_vm0, %v22_v6  ;;  %576 = vmatprep.mubr.msk.f32.mxu0 %vm34_vm0, %v16_v7 }
   0xc   :  { %586 = vmatmul.mubr.msk.f32.vlgmr.msra.gmra.mxu1 %vm34_vm0, %v23_v8 }
   0xd   :  { %588 = vmatprep.mubr.msk.f32.mxu1 %vm34_vm0, %v24_v9 }
   0xe   :  { %577 = vmatmul.mubr.msk.f32.gmra.mxu0 %vm34_vm0, %v17_v10 }
   0xf   :  { %579 = vmatprep.mubr.msk.f32.mxu0 %vm34_vm0, %v18_v11 }
  0x10   :  { %589 = vmatmul.mubr.msk.f32.gmra.mxu1 %vm34_vm0, %v25_v12 }
  0x11   :  { %591 = vmatprep.mubr.msk.f32.mxu1 %vm34_vm0, %v26_v13 }
  0x12   :  { %580 = vmatmul.mubr.msk.f32.gmra.mxu0 %vm34_vm0, %v19_v14 }
  0x13   :  { %582 = vmatprep.mubr.msk.f32.mxu0 %vm34_vm0, %v20_v15 }
  0x14   :  { %592 = vmatmul.mubr.msk.f32.gmra.mxu1 %vm34_vm0, %v27_v16 }
  0x15   :  { %594 = vmatprep.mubr.msk.f32.mxu1 %vm34_vm0, %v28_v17 }
  0x16   :  { %583 = vmatmul.mubr.msk.f32.gmra.mxu0 %vm34_vm0, %v21_v18 }
  0x18   :  { %595 = vmatmul.mubr.msk.f32.gmra.mxu1 %vm34_vm0, %v29_v19 }
  0xca   :  { %v575_v20 = vpop.f32.mrf.mxu0 }
  0xcb   :  { %426 = vrot.lane.b32.xlu1 %v575_v20, %s608_s24  ;;  %v530_v21 = vpack.c.bf16 %v575_v20, %v575_v20 }
  0xcc   :  { %v149_v22 = vpop.f32.mrf.mxu0  ;;  %v587_v23 = vpop.f32.mrf.mxu1 }
  0xcd   :  { %v529_v24 = vpack.c.bf16 %v149_v22, %v149_v22  ;;  %328 = vrot.lane.b32.xlu0 %v530_v21, %s609_s25  ;;  %294 = vst.msk [vmem:[%s1093_s2 + $0x4] sm:$0xf] %vm292_vm1, %v530_v21  ;;  %v538_v25 = vpack.c.bf16 %v587_v23, %v587_v23 }
  0xce   :  { %v189_v26 = vpop.f32.mrf.mxu1  ;;  %v578_v27 = vpop.f32.mrf.mxu0  ;;  %311 = vst.msk [vmem:[%s1093_s2 + $0x4] sm:$0xf] %vm309_vm2, %v610_v28 }
  0xcf   :  { %293 = vst.msk [vmem:[%s1093_s2] sm:$0xf] %vm292_vm1, %v529_v24  ;;  %302 = vst.msk [vmem:[%s1093_s2 + $0x24] sm:$0xf] %vm292_vm1, %v538_v25  ;;  %442 = vrot.lane.b32.xlu1 %v587_v23, %s608_s24  ;;  %v537_v29 = vpack.c.bf16 %v189_v26, %v189_v26  ;;  %v532_v30 = vpack.c.bf16 %v578_v27, %v578_v27 }
  0xd0   :  { %v159_v31 = vpop.f32.mrf.mxu0  ;;  %v590_v32 = vpop.f32.mrf.mxu1  ;;  %310 = vst.msk [vmem:[%s1093_s2] sm:$0xf] %vm309_vm2, %v610_v28  ;;  %319 = vst.msk [vmem:[%s1093_s2 + $0x24] sm:$0xf] %vm309_vm2, %v610_v28 }
  0xd1   :  { %301 = vst.msk [vmem:[%s1093_s2 + $0x20] sm:$0xf] %vm292_vm1, %v537_v29  ;;  %424 = vrot.lane.b32.xlu0 %v149_v22, %s608_s24  ;;  %296 = vst.msk [vmem:[%s1093_s2 + $0xc] sm:$0xf] %vm292_vm1, %v532_v30  ;;  %v531_v33 = vpack.c.bf16 %v159_v31, %v159_v31  ;;  %v540_v34 = vpack.c.bf16 %v590_v32, %v590_v32 }
  0xd2   :  { %v199_v35 = vpop.f32.mrf.mxu1  ;;  %v581_v36 = vpop.f32.mrf.mxu0  ;;  %313 = vst.msk [vmem:[%s1093_s2 + $0xc] sm:$0xf] %vm309_vm2, %v610_v28  ;;  %318 = vst.msk [vmem:[%s1093_s2 + $0x20] sm:$0xf] %vm309_vm2, %v610_v28 }
  0xd3   :  { %344 = vrot.lane.b32.xlu1 %v538_v25, %s609_s25  ;;  %295 = vst.msk [vmem:[%s1093_s2 + $0x8] sm:$0xf] %vm292_vm1, %v531_v33  ;;  %304 = vst.msk [vmem:[%s1093_s2 + $0x2c] sm:$0xf] %vm292_vm1, %v540_v34  ;;  %v539_v37 = vpack.c.bf16 %v199_v35, %v199_v35  ;;  %v534_v38 = vpack.c.bf16 %v581_v36, %v581_v36 }
  0xd4   :  { %v169_v39 = vpop.f32.mrf.mxu0  ;;  %v593_v40 = vpop.f32.mrf.mxu1  ;;  %312 = vst.msk [vmem:[%s1093_s2 + $0x8] sm:$0xf] %vm309_vm2, %v610_v28  ;;  %321 = vst.msk [vmem:[%s1093_s2 + $0x2c] sm:$0xf] %vm309_vm2, %v610_v28 }
  0xd5   :  { %440 = vrot.lane.b32.xlu0 %v189_v26, %s608_s24  ;;  %303 = vst.msk [vmem:[%s1093_s2 + $0x28] sm:$0xf] %vm292_vm1, %v539_v37  ;;  %298 = vst.msk [vmem:[%s1093_s2 + $0x14] sm:$0xf] %vm292_vm1, %v534_v38  ;;  %v533_v41 = vpack.c.bf16 %v169_v39, %v169_v39  ;;  %v542_v42 = vpack.c.bf16 %v593_v40, %v593_v40 }
  0xd6   :  { %v209_v43 = vpop.f32.mrf.mxu1  ;;  %v584_v44 = vpop.f32.mrf.mxu0  ;;  %315 = vst.msk [vmem:[%s1093_s2 + $0x14] sm:$0xf] %vm309_vm2, %v610_v28  ;;  %320 = vst.msk [vmem:[%s1093_s2 + $0x28] sm:$0xf] %vm309_vm2, %v610_v28 }
  0xd7   :  { %430 = vrot.lane.b32.xlu1 %v578_v27, %s608_s24  ;;  %297 = vst.msk [vmem:[%s1093_s2 + $0x10] sm:$0xf] %vm292_vm1, %v533_v41  ;;  %306 = vst.msk [vmem:[%s1093_s2 + $0x34] sm:$0xf] %vm292_vm1, %v542_v42  ;;  %v541_v45 = vpack.c.bf16 %v209_v43, %v209_v43  ;;  %v536_v46 = vpack.c.bf16 %v584_v44, %v584_v44 }
  0xd8   :  { %v179_v47 = vpop.f32.mrf.mxu0  ;;  %v596_v48 = vpop.f32.mrf.mxu1  ;;  %314 = vst.msk [vmem:[%s1093_s2 + $0x10] sm:$0xf] %vm309_vm2, %v610_v28  ;;  %323 = vst.msk [vmem:[%s1093_s2 + $0x34] sm:$0xf] %vm309_vm2, %v610_v28 }
  0xd9   :  { %326 = vrot.lane.b32.xlu0 %v529_v24, %s609_s25  ;;  %305 = vst.msk [vmem:[%s1093_s2 + $0x30] sm:$0xf] %vm292_vm1, %v541_v45  ;;  %300 = vst.msk [vmem:[%s1093_s2 + $0x1c] sm:$0xf] %vm292_vm1, %v536_v46  ;;  %v535_v49 = vpack.c.bf16 %v179_v47, %v179_v47  ;;  %v544_v50 = vpack.c.bf16 %v596_v48, %v596_v48 }
  0xda   :  { %v219_v51 = vpop.f32.mrf.mxu1  ;;  %317 = vst.msk [vmem:[%s1093_s2 + $0x1c] sm:$0xf] %vm309_vm2, %v610_v28  ;;  %322 = vst.msk [vmem:[%s1093_s2 + $0x30] sm:$0xf] %vm309_vm2, %v610_v28 }
  0xdb   :  { %446 = vrot.lane.b32.xlu1 %v590_v32, %s608_s24  ;;  %299 = vst.msk [vmem:[%s1093_s2 + $0x18] sm:$0xf] %vm292_vm1, %v535_v49  ;;  %308 = vst.msk [vmem:[%s1093_s2 + $0x3c] sm:$0xf] %vm292_vm1, %v544_v50  ;;  %v543_v52 = vpack.c.bf16 %v219_v51, %v219_v51 }
  0xdc   :  { %316 = vst.msk [vmem:[%s1093_s2 + $0x18] sm:$0xf] %vm309_vm2, %v610_v28  ;;  %325 = vst.msk [vmem:[%s1093_s2 + $0x3c] sm:$0xf] %vm309_vm2, %v610_v28 }
  0xdd   :  { %342 = vrot.lane.b32.xlu0 %v537_v29, %s609_s25  ;;  %307 = vst.msk [vmem:[%s1093_s2 + $0x38] sm:$0xf] %vm292_vm1, %v543_v52 }
  0xde   :  { %324 = vst.msk [vmem:[%s1093_s2 + $0x38] sm:$0xf] %vm309_vm2, %v610_v28 }
  0xdf   :  { %332 = vrot.lane.b32.xlu1 %v532_v30, %s609_s25 }
  0xe1   :  { %428 = vrot.lane.b32.xlu0 %v159_v31, %s608_s24 }
  0xe3   :  { %348 = vrot.lane.b32.xlu1 %v540_v34, %s609_s25 }
  0xe5   :  { %444 = vrot.lane.b32.xlu0 %v199_v35, %s608_s24 }
  0xe7   :  { %330 = vrot.lane.b32.xlu1 %v531_v33, %s609_s25 }
  0xe9   :  { %346 = vrot.lane.b32.xlu0 %v539_v37, %s609_s25 }
  0xeb   :  { %434 = vrot.lane.b32.xlu1 %v581_v36, %s608_s24 }
  0xed   :  { %432 = vrot.lane.b32.xlu0 %v169_v39, %s608_s24 }
  0xef   :  { %450 = vrot.lane.b32.xlu1 %v593_v40, %s608_s24 }
  0xf1   :  { %448 = vrot.lane.b32.xlu0 %v209_v43, %s608_s24 }
  0xf3   :  { %336 = vrot.lane.b32.xlu1 %v534_v38, %s609_s25 }
  0xf5   :  { %334 = vrot.lane.b32.xlu0 %v533_v41, %s609_s25 }
  0xf7   :  { %352 = vrot.lane.b32.xlu1 %v542_v42, %s609_s25 }
  0xf9   :  { %350 = vrot.lane.b32.xlu0 %v541_v45, %s609_s25 }
  0xfb   :  { %438 = vrot.lane.b32.xlu1 %v584_v44, %s608_s24 }
  0xfd   :  { %436 = vrot.lane.b32.xlu0 %v179_v47, %s608_s24 }
  0xff   :  { %340 = vrot.lane.b32.xlu1 %v536_v46, %s609_s25 }
 0x101   :  { %338 = vrot.lane.b32.xlu0 %v535_v49, %s609_s25 }
 0x103   :  { %356 = vrot.lane.b32.xlu1 %v544_v50, %s609_s25 }
 0x105   :  { %354 = vrot.lane.b32.xlu0 %v543_v52, %s609_s25 }
 0x107   :  { %454 = vrot.lane.b32.xlu1 %v596_v48, %s608_s24 }
 0x109   :  { %452 = vrot.lane.b32.xlu0 %v219_v51, %s608_s24 }
 0x13d   :  { %v427_v53 = vpop.permute.xlu1 %426 }
 0x13e   :  { %474 = vst.msk [vmem:[%s1094_s3 + $0x8] sm:$0xff] %vm472_vm3, %v427_v53 }
 0x13f   :  { %v329_v54 = vpop.permute.xlu0 %328 }
 0x140   :  { %376 = vst.msk [vmem:[%s1093_s2 + $0x4] sm:$0xf] %vm374_vm4, %v329_v54 }
 0x141   :  { %393 = vst.msk [vmem:[%s1093_s2 + $0x4] sm:$0xf] %vm391_vm5, %v610_v28  ;;  %v443_v55 = vpop.permute.xlu1 %442 }
 0x142   :  { %482 = vst.msk [vmem:[%s1094_s3 + $0x48] sm:$0xff] %vm472_vm3, %v443_v55 }
 0x143   :  { %v425_v56 = vpop.permute.xlu0 %424 }
 0x144   :  { %473 = vst.msk [vmem:[%s1094_s3] sm:$0xff] %vm472_vm3, %v425_v56 }
 0x145   :  { %v345_v57 = vpop.permute.xlu1 %344 }
 0x146   :  { %384 = vst.msk [vmem:[%s1093_s2 + $0x24] sm:$0xf] %vm374_vm4, %v345_v57 }
 0x147   :  { %401 = vst.msk [vmem:[%s1093_s2 + $0x24] sm:$0xf] %vm391_vm5, %v610_v28  ;;  %v441_v58 = vpop.permute.xlu0 %440 }
 0x148   :  { %481 = vst.msk [vmem:[%s1094_s3 + $0x40] sm:$0xff] %vm472_vm3, %v441_v58 }
 0x149   :  { %v431_v59 = vpop.permute.xlu1 %430 }
 0x14a   :  { %476 = vst.msk [vmem:[%s1094_s3 + $0x18] sm:$0xff] %vm472_vm3, %v431_v59 }
 0x14b   :  { %v327_v60 = vpop.permute.xlu0 %326 }
 0x14c   :  { %375 = vst.msk [vmem:[%s1093_s2] sm:$0xf] %vm374_vm4, %v327_v60 }
 0x14d   :  { %392 = vst.msk [vmem:[%s1093_s2] sm:$0xf] %vm391_vm5, %v610_v28  ;;  %v447_v61 = vpop.permute.xlu1 %446 }
 0x14e   :  { %484 = vst.msk [vmem:[%s1094_s3 + $0x58] sm:$0xff] %vm472_vm3, %v447_v61 }
 0x14f   :  { %v343_v62 = vpop.permute.xlu0 %342 }
 0x150   :  { %383 = vst.msk [vmem:[%s1093_s2 + $0x20] sm:$0xf] %vm374_vm4, %v343_v62 }
 0x151   :  { %400 = vst.msk [vmem:[%s1093_s2 + $0x20] sm:$0xf] %vm391_vm5, %v610_v28  ;;  %v333_v63 = vpop.permute.xlu1 %332 }
 0x152   :  { %378 = vst.msk [vmem:[%s1093_s2 + $0xc] sm:$0xf] %vm374_vm4, %v333_v63 }
 0x153   :  { %395 = vst.msk [vmem:[%s1093_s2 + $0xc] sm:$0xf] %vm391_vm5, %v610_v28  ;;  %v429_v0 = vpop.permute.xlu0 %428 }
 0x154   :  { %475 = vst.msk [vmem:[%s1094_s3 + $0x10] sm:$0xff] %vm472_vm3, %v429_v0 }
 0x155   :  { %v349_v1 = vpop.permute.xlu1 %348 }
 0x156   :  { %386 = vst.msk [vmem:[%s1093_s2 + $0x2c] sm:$0xf] %vm374_vm4, %v349_v1 }
 0x157   :  { %403 = vst.msk [vmem:[%s1093_s2 + $0x2c] sm:$0xf] %vm391_vm5, %v610_v28  ;;  %v445_v2 = vpop.permute.xlu0 %444 }
 0x158   :  { %483 = vst.msk [vmem:[%s1094_s3 + $0x50] sm:$0xff] %vm472_vm3, %v445_v2 }
 0x159   :  { %v331_v3 = vpop.permute.xlu1 %330 }
 0x15a   :  { %377 = vst.msk [vmem:[%s1093_s2 + $0x8] sm:$0xf] %vm374_vm4, %v331_v3 }
 0x15b   :  { %394 = vst.msk [vmem:[%s1093_s2 + $0x8] sm:$0xf] %vm391_vm5, %v610_v28  ;;  %v347_v4 = vpop.permute.xlu0 %346 }
 0x15c   :  { %385 = vst.msk [vmem:[%s1093_s2 + $0x28] sm:$0xf] %vm374_vm4, %v347_v4 }
 0x15d   :  { %402 = vst.msk [vmem:[%s1093_s2 + $0x28] sm:$0xf] %vm391_vm5, %v610_v28  ;;  %v435_v5 = vpop.permute.xlu1 %434 }
 0x15e   :  { %478 = vst.msk [vmem:[%s1094_s3 + $0x28] sm:$0xff] %vm472_vm3, %v435_v5 }
 0x15f   :  { %v433_v6 = vpop.permute.xlu0 %432 }
 0x160   :  { %477 = vst.msk [vmem:[%s1094_s3 + $0x20] sm:$0xff] %vm472_vm3, %v433_v6 }
 0x161   :  { %v451_v7 = vpop.permute.xlu1 %450 }
 0x162   :  { %486 = vst.msk [vmem:[%s1094_s3 + $0x68] sm:$0xff] %vm472_vm3, %v451_v7 }
 0x163   :  { %v449_v8 = vpop.permute.xlu0 %448 }
 0x164   :  { %485 = vst.msk [vmem:[%s1094_s3 + $0x60] sm:$0xff] %vm472_vm3, %v449_v8 }
 0x165   :  { %v337_v9 = vpop.permute.xlu1 %336 }
 0x166   :  { %380 = vst.msk [vmem:[%s1093_s2 + $0x14] sm:$0xf] %vm374_vm4, %v337_v9 }
 0x167   :  { %397 = vst.msk [vmem:[%s1093_s2 + $0x14] sm:$0xf] %vm391_vm5, %v610_v28  ;;  %v335_v10 = vpop.permute.xlu0 %334 }
 0x168   :  { %379 = vst.msk [vmem:[%s1093_s2 + $0x10] sm:$0xf] %vm374_vm4, %v335_v10 }
 0x169   :  { %396 = vst.msk [vmem:[%s1093_s2 + $0x10] sm:$0xf] %vm391_vm5, %v610_v28  ;;  %v353_v11 = vpop.permute.xlu1 %352 }
 0x16a   :  { %388 = vst.msk [vmem:[%s1093_s2 + $0x34] sm:$0xf] %vm374_vm4, %v353_v11 }
 0x16b   :  { %405 = vst.msk [vmem:[%s1093_s2 + $0x34] sm:$0xf] %vm391_vm5, %v610_v28  ;;  %v351_v12 = vpop.permute.xlu0 %350 }
 0x16c   :  { %387 = vst.msk [vmem:[%s1093_s2 + $0x30] sm:$0xf] %vm374_vm4, %v351_v12 }
 0x16d   :  { %404 = vst.msk [vmem:[%s1093_s2 + $0x30] sm:$0xf] %vm391_vm5, %v610_v28  ;;  %v439_v13 = vpop.permute.xlu1 %438 }
 0x16e   :  { %480 = vst.msk [vmem:[%s1094_s3 + $0x38] sm:$0xff] %vm472_vm3, %v439_v13 }
 0x16f   :  { %v437_v14 = vpop.permute.xlu0 %436 }
 0x170   :  { %479 = vst.msk [vmem:[%s1094_s3 + $0x30] sm:$0xff] %vm472_vm3, %v437_v14 }
 0x171   :  { %v341_v15 = vpop.permute.xlu1 %340 }
 0x172   :  { %382 = vst.msk [vmem:[%s1093_s2 + $0x1c] sm:$0xf] %vm374_vm4, %v341_v15 }
 0x173   :  { %399 = vst.msk [vmem:[%s1093_s2 + $0x1c] sm:$0xf] %vm391_vm5, %v610_v28  ;;  %v339_v16 = vpop.permute.xlu0 %338 }
 0x174   :  { %381 = vst.msk [vmem:[%s1093_s2 + $0x18] sm:$0xf] %vm374_vm4, %v339_v16 }
 0x175   :  { %398 = vst.msk [vmem:[%s1093_s2 + $0x18] sm:$0xf] %vm391_vm5, %v610_v28  ;;  %v357_v17 = vpop.permute.xlu1 %356 }
 0x176   :  { %390 = vst.msk [vmem:[%s1093_s2 + $0x3c] sm:$0xf] %vm374_vm4, %v357_v17 }
 0x177   :  { %407 = vst.msk [vmem:[%s1093_s2 + $0x3c] sm:$0xf] %vm391_vm5, %v610_v28  ;;  %v355_v18 = vpop.permute.xlu0 %354 }
 0x178   :  { %389 = vst.msk [vmem:[%s1093_s2 + $0x38] sm:$0xf] %vm374_vm4, %v355_v18 }
 0x179   :  { %406 = vst.msk [vmem:[%s1093_s2 + $0x38] sm:$0xf] %vm391_vm5, %v610_v28  ;;  %v455_v19 = vpop.permute.xlu1 %454 }
 0x17a   :  { %488 = vst.msk [vmem:[%s1094_s3 + $0x78] sm:$0xff] %vm472_vm3, %v455_v19 }
 0x17b   :  { %v453_v20 = vpop.permute.xlu0 %452 }
 0x17c   :  { %487 = vst.msk [vmem:[%s1094_s3 + $0x70] sm:$0xff] %vm472_vm3, %v453_v20 }

// kernel: gat_forward.7
= control target key start
LH: loop header
LB: loop body
LE: loop exit
PB: predicated region body
PF: predicated region fallthrough
CT: control target
= control target key end

     0   :  { %vm29_vm0 = vcmask 7168   ;;  %vm62_vm1 = vcmask 64512   ;;  %v2542_v0 = vmov -1e+30   ;;  %v2543_v1 = vmov 0.0   ;;  %s3979_s0 = inlined_call_operand.<no memory space> [shape: s32[1], index: 0, kind: input, shape index: {}]   ;;  %s3980_s1 = inlined_call_operand.vmem [shape: bf16[128,16], index: 1, kind: input, shape index: {}]   ;;  %s3981_s2 = inlined_call_operand.vmem [shape: f32[2,128], index: 2, kind: input, shape index: {}]   ;;  %s3982_s3 = inlined_call_operand.vmem [shape: f32[128,2], index: 3, kind: input, shape index: {}]   ;;  %s3983_s4 = inlined_call_operand.vmem [shape: s8[128,128], index: 4, kind: input, shape index: {}]   ;;  %s3984_s5 = inlined_call_operand.vmem [shape: f32[1,7], index: 5, kind: input, shape index: {}]   ;;  %s3985_s6 = inlined_call_operand.vmem [shape: f32[128,7], index: 6, kind: output, shape index: {}]  }
   0x1   :  { %30 = vst.msk [vmem:[#allocation2] sm:$0xff] %vm29_vm0, %v2542_v0  ;;  %31 = vst.msk [vmem:[#allocation2 + $0x8] sm:$0xff] %vm29_vm0, %v2542_v0  ;;  %p2191_p0 = scmp.le.s32.totalorder %s3979_s0, 0 }
   0x2   :  { %32 = vst.msk [vmem:[#allocation2 + $0x10] sm:$0xff] %vm29_vm0, %v2542_v0  ;;  %33 = vst.msk [vmem:[#allocation2 + $0x18] sm:$0xff] %vm29_vm0, %v2542_v0 }
   0x3   :  { %34 = vst.msk [vmem:[#allocation2 + $0x20] sm:$0xff] %vm29_vm0, %v2542_v0  ;;  %35 = vst.msk [vmem:[#allocation2 + $0x28] sm:$0xff] %vm29_vm0, %v2542_v0 }
   0x4   :  { %36 = vst.msk [vmem:[#allocation2 + $0x30] sm:$0xff] %vm29_vm0, %v2542_v0  ;;  %37 = vst.msk [vmem:[#allocation2 + $0x38] sm:$0xff] %vm29_vm0, %v2542_v0 }
   0x5   :  { %38 = vst.msk [vmem:[#allocation2 + $0x40] sm:$0xff] %vm29_vm0, %v2542_v0  ;;  %39 = vst.msk [vmem:[#allocation2 + $0x48] sm:$0xff] %vm29_vm0, %v2542_v0 }
   0x6   :  { %40 = vst.msk [vmem:[#allocation2 + $0x50] sm:$0xff] %vm29_vm0, %v2542_v0  ;;  %41 = vst.msk [vmem:[#allocation2 + $0x58] sm:$0xff] %vm29_vm0, %v2542_v0 }
   0x7   :  { %42 = vst.msk [vmem:[#allocation2 + $0x60] sm:$0xff] %vm29_vm0, %v2542_v0  ;;  %43 = vst.msk [vmem:[#allocation2 + $0x68] sm:$0xff] %vm29_vm0, %v2542_v0 }
   0x8   :  { %44 = vst.msk [vmem:[#allocation2 + $0x70] sm:$0xff] %vm29_vm0, %v2542_v0  ;;  %45 = vst.msk [vmem:[#allocation2 + $0x78] sm:$0xff] %vm29_vm0, %v2542_v0 }
   0x9   :  { %46 = vst.msk [vmem:[#allocation2 + $0x80] sm:$0xff] %vm29_vm0, %v2542_v0  ;;  %47 = vst.msk [vmem:[#allocation2 + $0x88] sm:$0xff] %vm29_vm0, %v2542_v0 }
   0xa   :  { %48 = vst.msk [vmem:[#allocation2 + $0x90] sm:$0xff] %vm29_vm0, %v2542_v0  ;;  %49 = vst.msk [vmem:[#allocation2 + $0x98] sm:$0xff] %vm29_vm0, %v2542_v0 }
   0xb   :  { %50 = vst.msk [vmem:[#allocation2 + $0xa0] sm:$0xff] %vm29_vm0, %v2542_v0  ;;  %51 = vst.msk [vmem:[#allocation2 + $0xa8] sm:$0xff] %vm29_vm0, %v2542_v0 }
   0xc   :  { %52 = vst.msk [vmem:[#allocation2 + $0xb0] sm:$0xff] %vm29_vm0, %v2542_v0  ;;  %53 = vst.msk [vmem:[#allocation2 + $0xb8] sm:$0xff] %vm29_vm0, %v2542_v0 }
   0xd   :  { %54 = vst.msk [vmem:[#allocation2 + $0xc0] sm:$0xff] %vm29_vm0, %v2542_v0  ;;  %55 = vst.msk [vmem:[#allocation2 + $0xc8] sm:$0xff] %vm29_vm0, %v2542_v0 }
   0xe   :  { %56 = vst.msk [vmem:[#allocation2 + $0xd0] sm:$0xff] %vm29_vm0, %v2542_v0  ;;  %57 = vst.msk [vmem:[#allocation2 + $0xd8] sm:$0xff] %vm29_vm0, %v2542_v0 }
   0xf   :  { %58 = vst.msk [vmem:[#allocation2 + $0xe0] sm:$0xff] %vm29_vm0, %v2542_v0  ;;  %59 = vst.msk [vmem:[#allocation2 + $0xe8] sm:$0xff] %vm29_vm0, %v2542_v0 }
  0x10   :  { %60 = vst.msk [vmem:[#allocation2 + $0xf0] sm:$0xff] %vm29_vm0, %v2542_v0  ;;  %61 = vst.msk [vmem:[#allocation2 + $0xf8] sm:$0xff] %vm29_vm0, %v2542_v0 }
  0x11   :  { %63 = vst.msk [vmem:[#allocation3] sm:$0xff] %vm62_vm1, %v2543_v1  ;;  %64 = vst.msk [vmem:[#allocation3 + $0x8] sm:$0xff] %vm62_vm1, %v2543_v1 }
  0x12   :  { %65 = vst.msk [vmem:[#allocation3 + $0x10] sm:$0xff] %vm62_vm1, %v2543_v1  ;;  %66 = vst.msk [vmem:[#allocation3 + $0x18] sm:$0xff] %vm62_vm1, %v2543_v1 }
  0x13   :  { %67 = vst.msk [vmem:[#allocation3 + $0x20] sm:$0xff] %vm62_vm1, %v2543_v1  ;;  %68 = vst.msk [vmem:[#allocation3 + $0x28] sm:$0xff] %vm62_vm1, %v2543_v1 }
  0x14   :  { %69 = vst.msk [vmem:[#allocation3 + $0x30] sm:$0xff] %vm62_vm1, %v2543_v1  ;;  %70 = vst.msk [vmem:[#allocation3 + $0x38] sm:$0xff] %vm62_vm1, %v2543_v1 }
  0x15   :  { %71 = vst.msk [vmem:[#allocation3 + $0x40] sm:$0xff] %vm62_vm1, %v2543_v1  ;;  %72 = vst.msk [vmem:[#allocation3 + $0x48] sm:$0xff] %vm62_vm1, %v2543_v1 }
  0x16   :  { %73 = vst.msk [vmem:[#allocation3 + $0x50] sm:$0xff] %vm62_vm1, %v2543_v1  ;;  %74 = vst.msk [vmem:[#allocation3 + $0x58] sm:$0xff] %vm62_vm1, %v2543_v1 }
  0x17   :  { %75 = vst.msk [vmem:[#allocation3 + $0x60] sm:$0xff] %vm62_vm1, %v2543_v1  ;;  %76 = vst.msk [vmem:[#allocation3 + $0x68] sm:$0xff] %vm62_vm1, %v2543_v1 }
  0x18   :  { %77 = vst.msk [vmem:[#allocation3 + $0x70] sm:$0xff] %vm62_vm1, %v2543_v1  ;;  %78 = vst.msk [vmem:[#allocation3 + $0x78] sm:$0xff] %vm62_vm1, %v2543_v1 }
  0x19   :  { %79 = vst.msk [vmem:[#allocation3 + $0x80] sm:$0xff] %vm62_vm1, %v2543_v1  ;;  %80 = vst.msk [vmem:[#allocation3 + $0x88] sm:$0xff] %vm62_vm1, %v2543_v1 }
  0x1a   :  { %81 = vst.msk [vmem:[#allocation3 + $0x90] sm:$0xff] %vm62_vm1, %v2543_v1  ;;  %82 = vst.msk [vmem:[#allocation3 + $0x98] sm:$0xff] %vm62_vm1, %v2543_v1 }
  0x1b   :  { %83 = vst.msk [vmem:[#allocation3 + $0xa0] sm:$0xff] %vm62_vm1, %v2543_v1  ;;  %84 = vst.msk [vmem:[#allocation3 + $0xa8] sm:$0xff] %vm62_vm1, %v2543_v1 }
  0x1c   :  { %85 = vst.msk [vmem:[#allocation3 + $0xb0] sm:$0xff] %vm62_vm1, %v2543_v1  ;;  %86 = vst.msk [vmem:[#allocation3 + $0xb8] sm:$0xff] %vm62_vm1, %v2543_v1  ;;  %100 = sbr.rel (%p2191_p0) target bundleno = 750 (0x2ee), region = 29 }
  0x1d   :  { %87 = vst.msk [vmem:[#allocation3 + $0xc0] sm:$0xff] %vm62_vm1, %v2543_v1  ;;  %88 = vst.msk [vmem:[#allocation3 + $0xc8] sm:$0xff] %vm62_vm1, %v2543_v1 }
  0x1e   :  { %89 = vst.msk [vmem:[#allocation3 + $0xd0] sm:$0xff] %vm62_vm1, %v2543_v1  ;;  %90 = vst.msk [vmem:[#allocation3 + $0xd8] sm:$0xff] %vm62_vm1, %v2543_v1 }
  0x1f   :  { %91 = vst.msk [vmem:[#allocation3 + $0xe0] sm:$0xff] %vm62_vm1, %v2543_v1  ;;  %92 = vst.msk [vmem:[#allocation3 + $0xe8] sm:$0xff] %vm62_vm1, %v2543_v1 }
  0x20   :  { %93 = vst.msk [vmem:[#allocation3 + $0xf0] sm:$0xff] %vm62_vm1, %v2543_v1  ;;  %94 = vst.msk [vmem:[#allocation3 + $0xf8] sm:$0xff] %vm62_vm1, %v2543_v1 }
  0x21   :  { %v139_v2 = vld [vmem:[%s3982_s3 + $0x40] sm:$0xff]  ;;  %v133_v3 = vld [vmem:[%s3982_s3 + $0x10] sm:$0xff]  ;;  %v2544_v4 = vmov 1   ;;  %v2545_v5 = vmov 0   ;;  %v134_v6 = vld [vmem:[%s3982_s3 + $0x18] sm:$0xff]  ;;  %v227_v25 = vlaneseq }
  0x22   :  { %2305 = vset.pattern.permute.xlu0 %v2544_v4  ;;  %2303 = vset.pattern.permute.xlu1 %v2545_v5  ;;  %v131_v7 = vld [vmem:[%s3982_s3] sm:$0xff]  ;;  %v136_v8 = vld [vmem:[%s3982_s3 + $0x28] sm:$0xff]  ;;  %v138_v10 = vld [vmem:[%s3982_s3 + $0x38] sm:$0xff] }
  0x23   :  { %991 = vperm.xlu0 %2305, %v139_v2   ;;  %159 = vperm.xlu1 %2303, %v133_v3   ;;  %v132_v9 = vld [vmem:[%s3982_s3 + $0x8] sm:$0xff]  ;;  %v135_v11 = vld [vmem:[%s3982_s3 + $0x20] sm:$0xff]  ;;  %v137_v13 = vld [vmem:[%s3982_s3 + $0x30] sm:$0xff]  ;;  %v2709_v28 = vshrl.u32 %v227_v25, 7 }
  0x24   :  { %v140_v12 = vld [vmem:[%s3982_s3 + $0x48] sm:$0xff]  ;;  %v142_v14 = vld [vmem:[%s3982_s3 + $0x58] sm:$0xff]  ;;  %v141_v16 = vld [vmem:[%s3982_s3 + $0x50] sm:$0xff] }
  0x25   :  { %v144_v15 = vld [vmem:[%s3982_s3 + $0x68] sm:$0xff]  ;;  %v146_v17 = vld [vmem:[%s3982_s3 + $0x78] sm:$0xff]  ;;  %v143_v18 = vld [vmem:[%s3982_s3 + $0x60] sm:$0xff]  ;;  %v229_v31 = vsub.s32 0, %v2709_v28 }
  0x26   :  { %v145_v19 = vld [vmem:[%s3982_s3 + $0x70] sm:$0xff]  ;;  %v101_v20 = vld [vmem:[%s3983_s4] sm:$0xff]  ;;  %v2714_v29 = vld [vmem:[%s3980_s1 + $0x38] sm:$0xff]  }
  0x27   :  { %2306 = vset.pattern.permute.xlu0 %v2545_v5  ;;  %164 = vperm.xlu1 %2303, %v134_v6   ;;  %vm105_vm2 = vnez %v101_v20  ;;  %v2724_v34 = vld [vmem:[%s3980_s1 + $0x30] sm:$0xff]   ;;  %v130_v35 = vld [vmem:[%s3981_s2] sm:$0x3]  ;;  %v2740_v39 = vld [vmem:[%s3980_s1 + $0x28] sm:$0xff]  }
  0x28   :  { %149 = vperm.xlu0 %2306, %v131_v7   ;;  %v2705_v21 = vsel %vm105_vm2, 16843009, %v2545_v5  ;;  %2233 = vmatprep.subr.bf16.mxu0 %v2714_v29  ;;  %v2733_v37 = vrot.slane %v130_v35, %v229_v31  ;;  %v2751_v46 = vld [vmem:[%s3980_s1 + $0x20] sm:$0xff]   ;;  %v2769_v55 = vld [vmem:[%s3980_s1 + $0x18] sm:$0xff]   ;;  %v2787_v60 = vld [vmem:[%s3980_s1 + $0x10] sm:$0xff]  }
  0x29   :  { %v283_v22 = vunpack.c.0.s8 %v2705_v21  ;;  %v284_v24 = vunpack.c.1.s8 %v2705_v21  ;;  %2234 = vmatpush3.bf16.msra.mxu0 %v2714_v29  ;;  %v285_v62 = vunpack.c.2.s8 %v2705_v21  ;;  %v102_v63 = vld [vmem:[%s3983_s4 + $0x8] sm:$0xff]  ;;  %v286_v0 = vunpack.c.3.s8 %v2705_v21  ;;  %v103_v20 = vld [vmem:[%s3983_s4 + $0x10] sm:$0xff] }
  0x2a   :  { %2235 = vmatprep.subr.bf16.mxu0 %v2724_v34  ;;  %vm106_vm7 = vnez %v102_v63  ;;  %v2803_v1 = vld [vmem:[%s3980_s1 + $0x8] sm:$0xff]   ;;  %vm107_vm10 = vnez %v103_v20 }
  0x2b   :  { %174 = vperm.xlu1 %2303, %v136_v8   ;;  %v299_v23 = vpack.c.b16 %v283_v22, %v283_v22  ;;  %v301_v27 = vpack.c.b16 %v284_v24, %v284_v24 }
  0x2c   :  { %154 = vperm.xlu0 %2306, %v132_v9  }
  0x2d   :  { %v300_v26 = vpack.c.b8 %v299_v23, %v299_v23  ;;  %v302_v30 = vpack.c.b8 %v301_v27, %v301_v27  ;;  %2236 = vmatpush3.bf16.msra.mxu0 %v2724_v34 }
  0x2e   :  { %2237 = vmatprep.subr.bf16.mxu0 %v2740_v39 }
  0x2f   :  { %184 = vperm.xlu1 %2303, %v138_v10   ;;  %vm331_vm3 = vnez %v300_v26  ;;  %vm332_vm4 = vnez %v302_v30 }
  0x30   :  { %169 = vperm.xlu0 %2306, %v135_v11   ;;  %v347_v36 = vsel %vm331_vm3, 16843009, %v2545_v5  ;;  %v348_v43 = vsel %vm332_vm4, 16843009, %v2545_v5 }
  0x31   :  { %v363_v41 = vunpack.c.0.s8 %v347_v36  ;;  %v364_v49 = vunpack.c.0.s8 %v348_v43  ;;  %2238 = vmatpush3.bf16.msra.mxu0 %v2740_v39 }
  0x32   :  { %2239 = vmatprep.subr.bf16.mxu0 %v2751_v46 }
  0x33   :  { %194 = vperm.xlu1 %2303, %v140_v12   ;;  %vm2753_vm5 = vcmp.ne.s32.totalorder %v363_v41, 0  ;;  %vm2772_vm6 = vcmp.ne.s32.totalorder %v364_v49, 0 }
  0x34   :  { %179 = vperm.xlu0 %2306, %v137_v13  }
  0x35   :  { %2240 = vmatpush3.bf16.msra.mxu0 %v2751_v46 }
  0x36   :  { %2241 = vmatprep.subr.bf16.mxu0 %v2769_v55 }
  0x37   :  { %204 = vperm.xlu1 %2303, %v142_v14  }
  0x38   :  { %189 = vperm.xlu0 %2306, %v139_v2  }
  0x39   :  { %2242 = vmatpush3.bf16.msra.mxu0 %v2769_v55 }
  0x3a   :  { %2243 = vmatprep.subr.bf16.mxu0 %v2787_v60 }
  0x3b   :  { %214 = vperm.xlu1 %2303, %v144_v15  }
  0x3c   :  { %199 = vperm.xlu0 %2306, %v141_v16  }
  0x3d   :  { %2244 = vmatpush3.bf16.msra.mxu0 %v2787_v60 }
  0x3e   :  { %2245 = vmatprep.subr.bf16.mxu0 %v2803_v1 }
  0x3f   :  { %224 = vperm.xlu1 %2303, %v146_v17  }
  0x40   :  { %209 = vperm.xlu0 %2306, %v143_v18  }
  0x41   :  { %2246 = vmatpush3.bf16.msra.mxu0 %v2803_v1 }
  0x43   :  { %2304 = vset.pattern.permute.xlu1 %v2544_v4  ;;  %v2810_v4 = vld [vmem:[%s3980_s1] sm:$0xff]  }
  0x44   :  { %219 = vperm.xlu0 %2306, %v145_v19   ;;  %959 = vperm.xlu1 %2304, %v131_v7   ;;  %v280_v7 = vsel %vm106_vm7, 16843009, %v2545_v5 }
  0x45   :  { %2247 = vmatprep.subr.bf16.mxu0 %v2810_v4  ;;  %v289_v24 = vunpack.c.2.s8 %v280_v7 }
  0x46   :  { %2248 = vmatpush3.bf16.msra.mxu0 %v2810_v4 }
  0x48   :  { %963 = vperm.xlu1 %2304, %v132_v9   ;;  %v1024_v9 = vsub.s32 1, %v2709_v28 }
  0x4c   :  { %967 = vperm.xlu1 %2304, %v133_v3   ;;  %v303_v3 = vpack.c.b16 %v285_v62, %v285_v62 }
  0x50   :  { %971 = vperm.xlu1 %2304, %v134_v6   ;;  %v305_v6 = vpack.c.b16 %v286_v0, %v286_v0 }
  0x54   :  { %975 = vperm.xlu1 %2304, %v135_v11   ;;  %v304_v11 = vpack.c.b8 %v303_v3, %v303_v3 }
  0x56   :  { %vm333_vm8 = vnez %v304_v11 }
  0x57   :  { %v349_v22 = vsel %vm333_vm8, 16843009, %v2545_v5 }
  0x58   :  { %979 = vperm.xlu1 %2304, %v136_v8   ;;  %v287_v8 = vunpack.c.0.s8 %v280_v7 }
  0x5c   :  { %983 = vperm.xlu1 %2304, %v137_v13   ;;  %v306_v13 = vpack.c.b8 %v305_v6, %v305_v6 }
  0x5e   :  { %vm334_vm9 = vnez %v306_v13 }
  0x5f   :  { %v350_v36 = vsel %vm334_vm9, 16843009, %v2545_v5 }
  0x60   :  { %987 = vperm.xlu1 %2304, %v138_v10  }
  0x64   :  { %995 = vperm.xlu1 %2304, %v140_v12   ;;  %v288_v12 = vunpack.c.1.s8 %v280_v7 }
  0x68   :  { %999 = vperm.xlu1 %2304, %v141_v16  }
  0x6c   :  { %1003 = vperm.xlu1 %2304, %v142_v14   ;;  %v307_v14 = vpack.c.b16 %v287_v8, %v287_v8 }
  0x6e   :  { %v308_v23 = vpack.c.b8 %v307_v14, %v307_v14 }
  0x70   :  { %1007 = vperm.xlu1 %2304, %v143_v18   ;;  %v290_v18 = vunpack.c.3.s8 %v280_v7  ;;  %vm335_vm11 = vnez %v308_v23 }
  0x71   :  { %v351_v48 = vsel %vm335_vm11, 16843009, %v2545_v5 }
  0x72   :  { %v313_v28 = vpack.c.b16 %v290_v18, %v290_v18  ;;  %v367_v14 = vunpack.c.0.s8 %v351_v48 }
  0x74   :  { %1011 = vperm.xlu1 %2304, %v144_v15   ;;  %v2820_v15 = vrot.slane %v130_v35, %v1024_v9  ;;  %v365_v35 = vunpack.c.0.s8 %v349_v22  ;;  %vm2885_vm3 = vcmp.ne.s32.totalorder %v367_v14, 0 }
  0x76   :  { %vm2850_vm13 = vcmp.ne.s32.totalorder %v365_v35, 0 }
  0x78   :  { %1015 = vperm.xlu1 %2304, %v145_v19  }
  0x7c   :  { %1019 = vperm.xlu1 %2304, %v146_v17   ;;  %v309_v17 = vpack.c.b16 %v288_v12, %v288_v12 }
  0x7e   :  { %v310_v27 = vpack.c.b8 %v309_v17, %v309_v17 }
  0x80   :  { %2307 = vset.pattern.permute.xlu1 %v2545_v5  ;;  %vm2839_vm12 = vnez %v310_v27 }
  0x9e   :  { %v2717_v32 = vpop.permute.xlu1 %159  ;;  %v2719_v33 = vpop.permute.xlu0 %991 }
  0x9f   :  { %v233_v21 = vadd.f32 %v2733_v37, %v2717_v32 }
  0xa2   :  { %v2735_v38 = vpop.permute.xlu1 %164 }
  0xa3   :  { %v150_v40 = vpop.permute.xlu0 %149  ;;  %v234_v41 = vadd.f32 %v2733_v37, %v2735_v38  ;;  %v2845_v38 = vsel %vm107_vm10, 16843009, %v2545_v5 }
  0xa4   :  { %v231_v42 = vadd.f32 %v2733_v37, %v150_v40  ;;  %v249_v40 = vmul.f32 0.2, %v233_v21  ;;  %v291_v63 = vunpack.c.0.s8 %v2845_v38  ;;  %v292_v17 = vunpack.c.1.s8 %v2845_v38 }
  0xa5   :  { %v250_v0 = vmul.f32 0.2, %v234_v41 }
  0xa6   :  { %v247_v44 = vmul.f32 0.2, %v231_v42  ;;  %v2746_v45 = vpop.permute.xlu1 %174  ;;  %v265_v3 = vmax.f32 %v233_v21, %v249_v40  ;;  %v315_v20 = vpack.c.b16 %v291_v63, %v291_v63  ;;  %v317_v35 = vpack.c.b16 %v292_v17, %v292_v17 }
  0xa7   :  { %v155_v47 = vpop.permute.xlu0 %154  ;;  %v236_v21 = vadd.f32 %v2733_v37, %v2746_v45 }
  0xa8   :  { %v232_v50 = vadd.f32 %v2733_v37, %v155_v47  ;;  %v263_v51 = vmax.f32 %v231_v42, %v247_v44  ;;  %v311_v42 = vpack.c.b16 %v289_v24, %v289_v24  ;;  %v2876_v23 = vsel %vm2850_vm13, %v265_v3, -1e+30 }
  0xa9   :  { %4026 = vst [vmem:[#allocation6_spill] sm:$0xff] %v2876_v23  ;;  %v266_v24 = vmax.f32 %v234_v41, %v250_v0  ;;  %v318_v0 = vpack.c.b8 %v317_v35, %v317_v35 }
  0xaa   :  { %v248_v52 = vmul.f32 0.2, %v232_v50  ;;  %v2760_v53 = vpop.permute.xlu1 %184  ;;  %v2764_v54 = vsel %vm2753_vm5, %v263_v51, -1e+30  ;;  %v312_v7 = vpack.c.b8 %v311_v42, %v311_v42  ;;  %v104_v42 = vld [vmem:[%s3983_s4 + $0x18] sm:$0xff]  ;;  %s2546_s4 = smov 120  }
  0xab   :  { %427 = vmax.xlane.f32.xlu0 %v2764_v54  ;;  %v170_v32 = vpop.permute.xlu0 %169  ;;  %vm340_vm8 = vnez %v318_v0 }
  0xac   :  { %v264_v57 = vmax.f32 %v232_v50, %v248_v52  ;;  %v235_v43 = vadd.f32 %v2733_v37, %v170_v32  ;;  %v366_v50 = vunpack.c.0.s8 %v350_v36  ;;  %v314_v52 = vpack.c.b8 %v313_v28, %v313_v28 }
  0xad   :  { %vm337_vm2 = vnez %v312_v7  ;;  %v293_v36 = vunpack.c.2.s8 %v2845_v38  ;;  %v294_v32 = vunpack.c.3.s8 %v2845_v38 }
  0xae   :  { %v2778_v58 = vpop.permute.xlu1 %194  ;;  %v2782_v59 = vsel %vm2772_vm6, %v264_v57, -1e+30  ;;  %v251_v8 = vmul.f32 0.2, %v235_v43  ;;  %vm2859_vm14 = vcmp.ne.s32.totalorder %v366_v50, 0  ;;  %vm2868_vm15 = vnez %v314_v52 }
  0xaf   :  { %429 = vmax.xlane.f32.xlu1 %v2782_v59  ;;  %v180_v22 = vpop.permute.xlu0 %179  ;;  %v353_v41 = vsel %vm337_vm2, 16843009, %v2545_v5  ;;  %v316_v50 = vpack.c.b8 %v315_v20, %v315_v20  ;;  %v319_v3 = vpack.c.b16 %v293_v36, %v293_v36  ;;  %v240_v0 = vadd.f32 %v2733_v37, %v2778_v58 }
  0xb0   :  { %v267_v28 = vmax.f32 %v235_v43, %v251_v8  ;;  %v252_v43 = vmul.f32 0.2, %v236_v21  ;;  %v369_v63 = vunpack.c.0.s8 %v353_v41 }
  0xb2   :  { %v2792_v61 = vpop.permute.xlu1 %204  ;;  %vm2929_vm7 = vcmp.ne.s32.totalorder %v369_v63, 0 }
  0xb3   :  { %v190_v6 = vpop.permute.xlu0 %189 }
  0xb4   :  { %v2917_v14 = vadd.f32 %v2733_v37, %v190_v6 }
  0xb6   :  { %v2805_v2 = vpop.permute.xlu1 %214  ;;  %v255_v35 = vmul.f32 0.2, %v2917_v14 }
  0xba   :  { %v2817_v10 = vpop.permute.xlu1 %224 }
  0xbf   :  { %v960_v16 = vpop.permute.xlu1 %959 }
  0xc0   :  { %v1026_v19 = vadd.f32 %v2820_v15, %v960_v16  ;;  %v352_v16 = vsel %vm2839_vm12, 16843009, %v2545_v5 }
  0xc2   :  { %v1042_v25 = vmul.f32 0.2, %v1026_v19 }
  0xc3   :  { %v964_v26 = vpop.permute.xlu1 %963 }
  0xc4   :  { %v1027_v30 = vadd.f32 %v2820_v15, %v964_v26  ;;  %v1058_v31 = vmax.f32 %v1026_v19, %v1042_v25  ;;  %v237_v25 = vadd.f32 %v2733_v37, %v180_v22  ;;  %v321_v22 = vpack.c.b16 %v294_v32, %v294_v32 }
  0xc6   :  { %v1043_v44 = vmul.f32 0.2, %v1027_v30  ;;  %v2836_v47 = vsel %vm2753_vm5, %v1058_v31, -1e+30  ;;  %v368_v31 = vunpack.c.0.s8 %v352_v16  ;;  %v253_v51 = vmul.f32 0.2, %v237_v25 }
  0xc7   :  { %v968_v49 = vpop.permute.xlu1 %967  ;;  %1107 = vmax.xlane.f32.xlu0 %v2836_v47  ;;  %vm108_vm5 = vnez %v104_v42  ;;  %v268_v16 = vmax.f32 %v236_v21, %v252_v43  ;;  %v320_v21 = vpack.c.b8 %v319_v3, %v319_v3  ;;  %v356_v42 = vsel %vm340_vm8, 16843009, %v2545_v5 }
  0xc8   :  { %v1028_v57 = vadd.f32 %v2820_v15, %v968_v49  ;;  %v1059_v62 = vmax.f32 %v1027_v30, %v1043_v44  ;;  %v2898_v44 = vsel %vm2859_vm14, %v266_v24, -1e+30  ;;  %v354_v49 = vsel %vm2868_vm15, 16843009, %v2545_v5 }
  0xc9   :  { %4030 = vst [vmem:[#allocation8_spill] sm:$0xff] %v2898_v44  ;;  %vm2909_vm4 = vcmp.ne.s32.totalorder %v368_v31, 0  ;;  %v269_v56 = vmax.f32 %v237_v25, %v253_v51  ;;  %v2934_v13 = vsel %vm108_vm5, 16843009, %v2545_v5  ;;  %vm2957_vm10 = vnez %v320_v21 }
  0xca   :  { %v1044_v9 = vmul.f32 0.2, %v1028_v57  ;;  %v2856_v11 = vsel %vm2772_vm6, %v1059_v62, -1e+30  ;;  %vm339_vm6 = vnez %v316_v50  ;;  %v295_v25 = vunpack.c.0.s8 %v2934_v13  ;;  %v200_v50 = vpop.permute.xlu0 %199 }
  0xcb   :  { %v972_v12 = vpop.permute.xlu1 %971  ;;  %1109 = vmax.xlane.f32.xlu1 %v2856_v11  ;;  %v2943_v45 = vsel %vm2909_vm4, %v268_v16, -1e+30  ;;  %v241_v3 = vadd.f32 %v2733_v37, %v200_v50  ;;  %v271_v16 = vmax.f32 %v2917_v14, %v255_v35  ;;  %v372_v58 = vunpack.c.0.s8 %v356_v42 }
  0xcc   :  { %v1029_v18 = vadd.f32 %v2820_v15, %v972_v12  ;;  %v1060_v19 = vmax.f32 %v1028_v57, %v1044_v9  ;;  %v2905_v57 = vsel %vm2885_vm3, %v267_v28, -1e+30  ;;  %v370_v9 = vunpack.c.0.s8 %v354_v49  ;;  %4038 = vst [vmem:[#allocation12_spill] sm:$0xff] %v2943_v45 }
  0xcd   :  { %4031 = vst [vmem:[#allocation9_spill] sm:$0xff] %v2905_v57  ;;  %v238_v12 = vadd.f32 %v2733_v37, %v2760_v53  ;;  %v1034_v28 = vadd.f32 %v2820_v15, %v2719_v33  ;;  %v322_v49 = vpack.c.b8 %v321_v22, %v321_v22  ;;  %v297_v53 = vunpack.c.2.s8 %v2934_v13 }
  0xce   :  { %v1045_v26 = vmul.f32 0.2, %v1029_v18  ;;  %v2881_v27 = vsel %vm2850_vm13, %v1060_v19, -1e+30  ;;  %vm2945_vm9 = vcmp.ne.s32.totalorder %v370_v9, 0  ;;  %vm3000_vm13 = vcmp.ne.s32.totalorder %v372_v58, 0 }
  0xcf   :  { %4027 = vst [vmem:[#allocation7_spill] sm:$0xff] %v2881_v27  ;;  %v976_v30 = vpop.permute.xlu1 %975  ;;  %431 = vmax.xlane.f32.xlu1 %v2876_v23  ;;  %1111 = vmax.xlane.f32.xlu0 %v2881_v27  ;;  %v1050_v63 = vmul.f32 0.2, %v1034_v28  ;;  %vm2980_vm11 = vnez %v322_v49  ;;  %v256_v21 = vmul.f32 0.2, %v240_v0  ;;  %v327_v50 = vpack.c.b16 %v297_v53, %v297_v53  ;;  %v3352_v27 = vld [vmem:[#allocation2 + $0x68] sm:$0xff] }
  0xd0   :  { %v1030_v40 = vadd.f32 %v2820_v15, %v976_v30  ;;  %v1061_v38 = vmax.f32 %v1029_v18, %v1045_v26  ;;  %v355_v26 = vsel %vm339_vm6, 16843009, %v2545_v5  ;;  %v254_v30 = vmul.f32 0.2, %v238_v12 }
  0xd1   :  { %v371_v33 = vunpack.c.0.s8 %v355_v26  ;;  %v257_v26 = vmul.f32 0.2, %v241_v3  ;;  %v298_v31 = vunpack.c.3.s8 %v2934_v13 }
  0xd2   :  { %v1046_v52 = vmul.f32 0.2, %v1030_v40  ;;  %v2921_v18 = vsel %vm2859_vm14, %v1061_v38, -1e+30  ;;  %v323_v38 = vpack.c.b16 %v295_v25, %v295_v25  ;;  %v270_v6 = vmax.f32 %v238_v12, %v254_v30  ;;  %v210_v25 = vpop.permute.xlu0 %209 }
  0xd3   :  { %v980_v62 = vpop.permute.xlu1 %979  ;;  %433 = vmax.xlane.f32.xlu1 %v2898_v44  ;;  %435 = vmax.xlane.f32.xlu0 %v2905_v57  ;;  %4034 = vst [vmem:[#allocation10_spill] sm:$0xff] %v2921_v18  ;;  %v357_v12 = vsel %vm2957_vm10, 16843009, %v2545_v5  ;;  %vm2989_vm12 = vcmp.ne.s32.totalorder %v371_v33, 0  ;;  %v3354_v44 = vld [vmem:[#allocation2 + $0x70] sm:$0xff] }
  0xd4   :  { %v1031_v7 = vadd.f32 %v2820_v15, %v980_v62  ;;  %v1062_v8 = vmax.f32 %v1030_v40, %v1046_v52  ;;  %v2952_v40 = vsel %vm2929_vm7, %v269_v56, -1e+30  ;;  %v296_v62 = vunpack.c.1.s8 %v2934_v13 }
  0xd5   :  { %4041 = vst [vmem:[#allocation13_spill] sm:$0xff] %v2952_v40  ;;  %v324_v56 = vpack.c.b8 %v323_v38, %v323_v38  ;;  %v2987_v14 = vsel %vm2945_vm9, %v270_v6, -1e+30  ;;  %v2996_v35 = vsel %vm2989_vm12, %v271_v16, -1e+30  ;;  %v373_v33 = vunpack.c.0.s8 %v357_v12 }
  0xd6   :  { %v1047_v17 = vmul.f32 0.2, %v1031_v7  ;;  %v2925_v19 = vsel %vm2885_vm3, %v1062_v8, -1e+30  ;;  %4048 = vst [vmem:[#allocation16_spill] sm:$0xff] %v2987_v14  ;;  %4051 = vst [vmem:[#allocation17_spill] sm:$0xff] %v2996_v35  ;;  %v273_v16 = vmax.f32 %v241_v3, %v257_v26  ;;  %v328_v12 = vpack.c.b8 %v327_v50, %v327_v50  ;;  %v220_v53 = vpop.permute.xlu0 %219 }
  0xd7   :  { %4035 = vst [vmem:[#allocation11_spill] sm:$0xff] %v2925_v19  ;;  %v984_v20 = vpop.permute.xlu1 %983  ;;  %1113 = vmax.xlane.f32.xlu1 %v2921_v18  ;;  %1115 = vmax.xlane.f32.xlu0 %v2925_v19  ;;  %vm3008_vm14 = vnez %v324_v56  ;;  %vm3025_vm15 = vcmp.ne.s32.totalorder %v373_v33, 0  ;;  %v329_v33 = vpack.c.b16 %v298_v31, %v298_v31 }
  0xd8   :  { %v1032_v24 = vadd.f32 %v2820_v15, %v984_v20  ;;  %v1063_v41 = vmax.f32 %v1031_v7, %v1047_v17  ;;  %v325_v20 = vpack.c.b16 %v296_v62, %v296_v62  ;;  %v272_v62 = vmax.f32 %v240_v0, %v256_v21 }
  0xd9   :  { %v359_v0 = vsel %vm3008_vm14, 16843009, %v2545_v5  ;;  %v3040_v21 = vsel %vm3025_vm15, %v273_v16, -1e+30  ;;  %v330_v16 = vpack.c.b8 %v329_v33, %v329_v33 }
  0xda   :  { %v1048_v36 = vmul.f32 0.2, %v1032_v24  ;;  %v2968_v8 = vsel %vm2909_vm4, %v1063_v41, -1e+30  ;;  %v326_v49 = vpack.c.b8 %v325_v20, %v325_v20  ;;  %v3036_v56 = vsel %vm3000_vm13, %v272_v62, -1e+30 }
  0xdb   :  { %v988_v32 = vpop.permute.xlu1 %987  ;;  %437 = vmax.xlane.f32.xlu1 %v2943_v45  ;;  %439 = vmax.xlane.f32.xlu0 %v2952_v40  ;;  %4044 = vst [vmem:[#allocation14_spill] sm:$0xff] %v2968_v8  ;;  %4060 = vst [vmem:[#allocation20_spill] sm:$0xff] %v3036_v56  ;;  %vm345_vm4 = vnez %v328_v12  ;;  %vm346_vm6 = vnez %v330_v16  ;;  %v3333_v40 = vld [vmem:[#allocation2 + $0xe0] sm:$0xff] }
  0xdc   :  { %v1033_v51 = vadd.f32 %v2820_v15, %v988_v32  ;;  %v1064_v52 = vmax.f32 %v1032_v24, %v1048_v36  ;;  %v1066_v24 = vmax.f32 %v1034_v28, %v1050_v63  ;;  %v358_v28 = vsel %vm2980_vm11, 16843009, %v2545_v5  ;;  %4061 = vst [vmem:[#allocation21_spill] sm:$0xff] %v3040_v21 }
  0xdd   :  { %v374_v58 = vunpack.c.0.s8 %v358_v28  ;;  %vm344_vm2 = vnez %v326_v49  ;;  %v245_v28 = vadd.f32 %v2733_v37, %v220_v53 }
  0xde   :  { %v1049_v7 = vmul.f32 0.2, %v1033_v51  ;;  %v2972_v9 = vsel %vm2929_vm7, %v1064_v52, -1e+30  ;;  %v243_v52 = vadd.f32 %v2733_v37, %v210_v25  ;;  %v3017_v38 = vsel %vm2989_vm12, %v1066_v24, -1e+30 }
  0xdf   :  { %4045 = vst [vmem:[#allocation15_spill] sm:$0xff] %v2972_v9  ;;  %v996_v17 = vpop.permute.xlu1 %995  ;;  %1117 = vmax.xlane.f32.xlu1 %v2968_v8  ;;  %1119 = vmax.xlane.f32.xlu0 %v2972_v9  ;;  %4056 = vst [vmem:[#allocation18_spill] sm:$0xff] %v3017_v38  ;;  %vm3044_vm3 = vcmp.ne.s32.totalorder %v374_v58, 0  ;;  %v375_v25 = vunpack.c.0.s8 %v359_v0 }
  0xe0   :  { %v1035_v30 = vadd.f32 %v2820_v15, %v996_v17  ;;  %v1065_v36 = vmax.f32 %v1033_v51, %v1049_v7  ;;  %v242_v51 = vadd.f32 %v2733_v37, %v2792_v61  ;;  %v259_v20 = vmul.f32 0.2, %v243_v52 }
  0xe1   :  { %vm3063_vm5 = vcmp.ne.s32.totalorder %v375_v25, 0 }
  0xe2   :  { %v1051_v63 = vmul.f32 0.2, %v1035_v30  ;;  %v3021_v7 = vsel %vm2945_vm9, %v1065_v36, -1e+30  ;;  %v258_v48 = vmul.f32 0.2, %v242_v51 }
  0xe3   :  { %v1000_v41 = vpop.permute.xlu1 %999  ;;  %441 = vmax.xlane.f32.xlu1 %v2987_v14  ;;  %443 = vmax.xlane.f32.xlu0 %v2996_v35  ;;  %4057 = vst [vmem:[#allocation19_spill] sm:$0xff] %v3021_v7  ;;  %v3317_v35 = vld [vmem:[#allocation2 + $0x60] sm:$0xff]  ;;  %v3331_v14 = vld [vmem:[#allocation2 + $0xd8] sm:$0xff] }
  0xe4   :  { %v1036_v42 = vadd.f32 %v2820_v15, %v1000_v41  ;;  %v1067_v22 = vmax.f32 %v1035_v30, %v1051_v63  ;;  %v360_v41 = vsel %vm344_vm2, 16843009, %v2545_v5  ;;  %v244_v30 = vadd.f32 %v2733_v37, %v2805_v2 }
  0xe5   :  { %v274_v43 = vmax.f32 %v242_v51, %v258_v48  ;;  %v275_v63 = vmax.f32 %v243_v52, %v259_v20  ;;  %v361_v51 = vsel %vm345_vm4, 16843009, %v2545_v5  ;;  %v376_v58 = vunpack.c.0.s8 %v360_v41 }
  0xe6   :  { %v1052_v6 = vmul.f32 0.2, %v1036_v42  ;;  %v3055_v50 = vsel %vm3000_vm13, %v1067_v22, -1e+30  ;;  %v260_v32 = vmul.f32 0.2, %v244_v30  ;;  %v377_v20 = vunpack.c.0.s8 %v361_v51 }
  0xe7   :  { %v1004_v17 = vpop.permute.xlu1 %1003  ;;  %1121 = vmax.xlane.f32.xlu1 %v3021_v7  ;;  %1123 = vmax.xlane.f32.xlu0 %v3017_v38  ;;  %4064 = vst [vmem:[#allocation22_spill] sm:$0xff] %v3055_v50  ;;  %v261_v52 = vmul.f32 0.2, %v245_v28  ;;  %v3075_v12 = vsel %vm3063_vm5, %v275_v63, -1e+30  ;;  %vm3086_vm7 = vcmp.ne.s32.totalorder %v376_v58, 0 }
  0xe8   :  { %v1037_v3 = vadd.f32 %v2820_v15, %v1004_v17  ;;  %v1068_v24 = vmax.f32 %v1036_v42, %v1052_v6  ;;  %v3070_v17 = vsel %vm3044_vm3, %v274_v43, -1e+30  ;;  %4069 = vst [vmem:[#allocation25_spill] sm:$0xff] %v3075_v12  ;;  %vm393_vm8 = vcmp.ne.s32.totalorder %v377_v20, 0 }
  0xe9   :  { %4068 = vst [vmem:[#allocation24_spill] sm:$0xff] %v3070_v17  ;;  %v277_v33 = vmax.f32 %v245_v28, %v261_v52 }
  0xea   :  { %v1053_v42 = vmul.f32 0.2, %v1037_v3  ;;  %v3059_v62 = vsel %vm3025_vm15, %v1068_v24, -1e+30  ;;  %v276_v24 = vmax.f32 %v244_v30, %v260_v32 }
  0xeb   :  { %v1008_v26 = vpop.permute.xlu1 %1007  ;;  %445 = vmax.xlane.f32.xlu1 %v3036_v56  ;;  %447 = vmax.xlane.f32.xlu0 %v3040_v21  ;;  %4065 = vst [vmem:[#allocation23_spill] sm:$0xff] %v3059_v62  ;;  %v3102_v43 = vsel %vm393_vm8, %v277_v33, -1e+30  ;;  %v3301_v21 = vld [vmem:[#allocation2 + $0xd0] sm:$0xff]  ;;  %v3315_v56 = vld [vmem:[#allocation2 + $0x58] sm:$0xff] }
  0xec   :  { %v1038_v36 = vadd.f32 %v2820_v15, %v1008_v26  ;;  %v1069_v61 = vmax.f32 %v1037_v3, %v1053_v42  ;;  %v246_v3 = vadd.f32 %v2733_v37, %v2817_v10  ;;  %v362_v37 = vsel %vm346_vm6, 16843009, %v2545_v5  ;;  %4075 = vst [vmem:[#allocation29_spill] sm:$0xff] %v3102_v43 }
  0xed   :  { %v3099_v13 = vsel %vm3086_vm7, %v276_v24, -1e+30  ;;  %v378_v28 = vunpack.c.0.s8 %v362_v37  ;;  %v3180_v37 = vld [vmem:[#allocation2 + $0x20] sm:$0xff]  ;;  %v3233_v24 = vld [vmem:[#allocation2 + $0xb0] sm:$0xff] }
  0xee   :  { %v1054_v49 = vmul.f32 0.2, %v1038_v36  ;;  %v3084_v22 = vsel %vm3044_vm3, %v1069_v61, -1e+30  ;;  %v262_v10 = vmul.f32 0.2, %v246_v3 }
  0xef   :  { %v1012_v6 = vpop.permute.xlu1 %1011  ;;  %1125 = vmax.xlane.f32.xlu1 %v3055_v50  ;;  %1127 = vmax.xlane.f32.xlu0 %v3059_v62  ;;  %4070 = vst [vmem:[#allocation26_spill] sm:$0xff] %v3084_v22  ;;  %4074 = vst [vmem:[#allocation28_spill] sm:$0xff] %v3099_v13  ;;  %vm394_vm9 = vcmp.ne.s32.totalorder %v378_v28, 0  ;;  %v3128_v61 = vld [vmem:[#allocation2] sm:$0xff] }
  0xf0   :  { %v1039_v0 = vadd.f32 %v2820_v15, %v1012_v6  ;;  %v1070_v31 = vmax.f32 %v1038_v36, %v1054_v49  ;;  %v278_v51 = vmax.f32 %v246_v3, %v262_v10  ;;  %v3165_v3 = vld [vmem:[#allocation2 + $0x90] sm:$0xff]  ;;  %v3231_v10 = vld [vmem:[#allocation2 + $0xa8] sm:$0xff] }
  0xf2   :  { %v1055_v25 = vmul.f32 0.2, %v1039_v0  ;;  %v3092_v41 = vsel %vm3063_vm5, %v1070_v31, -1e+30 }
  0xf3   :  { %v1016_v48 = vpop.permute.xlu1 %1015  ;;  %449 = vmax.xlane.f32.xlu1 %v3070_v17  ;;  %451 = vmax.xlane.f32.xlu0 %v3075_v12  ;;  %4073 = vst [vmem:[#allocation27_spill] sm:$0xff] %v3092_v41  ;;  %v3285_v12 = vld [vmem:[#allocation2 + $0x50] sm:$0xff]  ;;  %v3299_v17 = vld [vmem:[#allocation2 + $0xc8] sm:$0xff] }
  0xf4   :  { %v1040_v53 = vadd.f32 %v2820_v15, %v1016_v48  ;;  %v1071_v49 = vmax.f32 %v1039_v0, %v1055_v25  ;;  %v3153_v0 = vld [vmem:[#allocation2 + $0x88] sm:$0xff] }
  0xf6   :  { %v1056_v36 = vmul.f32 0.2, %v1040_v53  ;;  %v3108_v5 = vsel %vm3086_vm7, %v1071_v49, -1e+30 }
  0xf7   :  { %v1020_v42 = vpop.permute.xlu1 %1019  ;;  %1129 = vmax.xlane.f32.xlu1 %v3084_v22  ;;  %1131 = vmax.xlane.f32.xlu0 %v3092_v41  ;;  %4076 = vst [vmem:[#allocation30_spill] sm:$0xff] %v3108_v5 }
  0xf8   :  { %v1041_v30 = vadd.f32 %v2820_v15, %v1020_v42  ;;  %v1072_v63 = vmax.f32 %v1040_v53, %v1056_v36  ;;  %v3114_v15 = vsel %vm394_vm9, %v278_v51, -1e+30  ;;  %v3163_v53 = vld [vmem:[#allocation2 + $0x10] sm:$0xff]  ;;  %v3178_v42 = vld [vmem:[#allocation2 + $0x18] sm:$0xff]  ;;  %v3197_v51 = vld [vmem:[#allocation2 + $0xa0] sm:$0xff] }
  0xf9   :  { %4078 = vst [vmem:[#allocation32_spill] sm:$0xff] %v3114_v15 }
  0xfa   :  { %v1057_v6 = vmul.f32 0.2, %v1041_v30  ;;  %v3110_v2 = vsel %vm393_vm8, %v1072_v63, -1e+30 }
  0xfb   :  { %453 = vmax.xlane.f32.xlu1 %v3099_v13  ;;  %455 = vmax.xlane.f32.xlu0 %v3102_v43  ;;  %4077 = vst [vmem:[#allocation31_spill] sm:$0xff] %v3110_v2  ;;  %v3267_v43 = vld [vmem:[#allocation2 + $0xb8] sm:$0xff]  ;;  %v3283_v13 = vld [vmem:[#allocation2 + $0x48] sm:$0xff] }
  0xfc   :  { %v1073_v16 = vmax.f32 %v1041_v30, %v1057_v6  ;;  %v3195_v6 = vld [vmem:[#allocation2 + $0x98] sm:$0xff] }
  0xfe   :  { %v3117_v32 = vsel %vm394_vm9, %v1073_v16, -1e+30 }
  0xff   :  { %1133 = vmax.xlane.f32.xlu1 %v3108_v5  ;;  %1135 = vmax.xlane.f32.xlu0 %v3110_v2  ;;  %4079 = vst [vmem:[#allocation33_spill] sm:$0xff] %v3117_v32  ;;  %v3269_v5 = vld [vmem:[#allocation2 + $0xc0] sm:$0xff] }
 0x103   :  { %457 = vmax.xlane.f32.xlu1 %v3114_v15 }
 0x107   :  { %1137 = vmax.xlane.f32.xlu1 %v3117_v32 }
 0x115   :  { %1458 = vrot.lane.b32.xlu0 %v2714_v29, %s2546_s4  ;;  %v3133_v29 = vld [vmem:[#allocation2 + $0x8] sm:$0xff] }
 0x118   :  { %1456 = vrot.lane.b32.xlu1 %v2724_v34, %s2546_s4  ;;  %v3249_v34 = vld [vmem:[#allocation2 + $0x40] sm:$0xff] }
 0x119   :  { %1454 = vrot.lane.b32.xlu0 %v2740_v39, %s2546_s4 }
 0x11c   :  { %1452 = vrot.lane.b32.xlu1 %v2751_v46, %s2546_s4 }
 0x11d   :  { %1450 = vrot.lane.b32.xlu0 %v2769_v55, %s2546_s4  ;;  %v3247_v55 = vld [vmem:[#allocation2 + $0x38] sm:$0xff] }
 0x120   :  { %1448 = vrot.lane.b32.xlu1 %v2787_v60, %s2546_s4  ;;  %v3148_v60 = vld [vmem:[#allocation2 + $0x80] sm:$0xff] }
 0x121   :  { %1446 = vrot.lane.b32.xlu0 %v2803_v1, %s2546_s4 }
 0x124   :  { %1444 = vrot.lane.b32.xlu1 %v2810_v4, %s2546_s4 }
 0x134   :  { %v428_v58 = vpop.xlane.xlu0 %427 }
 0x135   :  { %v3131_v52 = vmax.f32 %v3128_v61, %v428_v58 }
 0x137   :  { %942 = vst.msk [vmem:[#allocation2] sm:$0xff] %vm29_vm0, %v3131_v52  ;;  %525 = vperm.xlu1 %2307, %v3131_v52   ;;  %v4080_v19 = vsub.f32 %v3128_v61, %v3131_v52 }
 0x138   :  { %v430_v39 = vpop.xlane.xlu1 %429 }
 0x139   :  { %v3141_v46 = vmax.f32 %v3133_v29, %v430_v39  ;;  %v491_v45 = vmul.f32 1.442695, %v4080_v19 }
 0x13b   :  { %943 = vst.msk [vmem:[#allocation2 + $0x8] sm:$0xff] %vm29_vm0, %v3141_v46  ;;  %530 = vperm.xlu0 %2306, %v3141_v46   ;;  %v4081_v23 = vsub.f32 %v3133_v29, %v3141_v46  ;;  %2316 = vpow2.f32 %v491_v45 }
 0x150   :  { %v1108_v1 = vpop.xlane.xlu0 %1107 }
 0x151   :  { %v3151_v4 = vmax.f32 %v3148_v60, %v1108_v1 }
 0x153   :  { %1597 = vst.msk [vmem:[#allocation2 + $0x80] sm:$0xff] %vm29_vm0, %v3151_v4  ;;  %1205 = vperm.xlu1 %2307, %v3151_v4  }
 0x154   :  { %v1110_v48 = vpop.xlane.xlu1 %1109 }
 0x155   :  { %v3161_v20 = vmax.f32 %v3153_v0, %v1110_v48  ;;  %v3211_v48 = vld [vmem:[#allocation2 + $0x28] sm:$0xff] }
 0x157   :  { %1598 = vst.msk [vmem:[#allocation2 + $0x88] sm:$0xff] %vm29_vm0, %v3161_v20  ;;  %1210 = vperm.xlu1 %2307, %v3161_v20  }
 0x158   :  { %v432_v26 = vpop.xlane.xlu1 %431  ;;  %v1112_v25 = vpop.xlane.xlu0 %1111 }
 0x159   :  { %v3173_v36 = vmax.f32 %v3163_v53, %v432_v26  ;;  %v3176_v33 = vmax.f32 %v3165_v3, %v1112_v25  ;;  %v3213_v26 = vld [vmem:[#allocation2 + $0x30] sm:$0xff] }
 0x15b   :  { %944 = vst.msk [vmem:[#allocation2 + $0x10] sm:$0xff] %vm29_vm0, %v3173_v36  ;;  %1599 = vst.msk [vmem:[#allocation2 + $0x90] sm:$0xff] %vm29_vm0, %v3176_v33  ;;  %535 = vperm.xlu0 %2306, %v3173_v36  }
 0x15c   :  { %v434_v30 = vpop.xlane.xlu1 %433  ;;  %v436_v49 = vpop.xlane.xlu0 %435 }
 0x15d   :  { %v3190_v63 = vmax.f32 %v3178_v42, %v434_v30  ;;  %v3193_v28 = vmax.f32 %v3180_v37, %v436_v49 }
 0x15f   :  { %945 = vst.msk [vmem:[#allocation2 + $0x18] sm:$0xff] %vm29_vm0, %v3190_v63  ;;  %946 = vst.msk [vmem:[#allocation2 + $0x20] sm:$0xff] %vm29_vm0, %v3193_v28  ;;  %540 = vperm.xlu1 %2307, %v3190_v63   ;;  %1215 = vperm.xlu0 %2306, %v3176_v33  }
 0x160   :  { %v1114_v16 = vpop.xlane.xlu1 %1113  ;;  %v1116_v58 = vpop.xlane.xlu0 %1115 }
 0x161   :  { %v3206_v39 = vmax.f32 %v3195_v6, %v1114_v16  ;;  %v3209_v1 = vmax.f32 %v3197_v51, %v1116_v58 }
 0x163   :  { %1600 = vst.msk [vmem:[#allocation2 + $0x98] sm:$0xff] %vm29_vm0, %v3206_v39  ;;  %1601 = vst.msk [vmem:[#allocation2 + $0xa0] sm:$0xff] %vm29_vm0, %v3209_v1  ;;  %1220 = vperm.xlu1 %2307, %v3206_v39   ;;  %545 = vperm.xlu0 %2306, %v3193_v28  }
 0x164   :  { %v438_v49 = vpop.xlane.xlu1 %437  ;;  %v440_v16 = vpop.xlane.xlu0 %439 }
 0x165   :  { %v3226_v58 = vmax.f32 %v3211_v48, %v438_v49  ;;  %v3229_v25 = vmax.f32 %v3213_v26, %v440_v16 }
 0x167   :  { %947 = vst.msk [vmem:[#allocation2 + $0x28] sm:$0xff] %vm29_vm0, %v3226_v58  ;;  %948 = vst.msk [vmem:[#allocation2 + $0x30] sm:$0xff] %vm29_vm0, %v3229_v25  ;;  %550 = vperm.xlu1 %2307, %v3226_v58   ;;  %1225 = vperm.xlu0 %2306, %v3209_v1  }
 0x168   :  { %v1118_v30 = vpop.xlane.xlu1 %1117  ;;  %v1120_v49 = vpop.xlane.xlu0 %1119 }
 0x169   :  { %v3242_v31 = vmax.f32 %v3231_v10, %v1118_v30  ;;  %v3245_v16 = vmax.f32 %v3233_v24, %v1120_v49 }
 0x16b   :  { %1602 = vst.msk [vmem:[#allocation2 + $0xa8] sm:$0xff] %vm29_vm0, %v3242_v31  ;;  %1603 = vst.msk [vmem:[#allocation2 + $0xb0] sm:$0xff] %vm29_vm0, %v3245_v16  ;;  %1230 = vperm.xlu1 %2307, %v3242_v31   ;;  %555 = vperm.xlu0 %2306, %v3229_v25  }
 0x16c   :  { %v442_v30 = vpop.xlane.xlu1 %441  ;;  %v444_v49 = vpop.xlane.xlu0 %443 }
 0x16d   :  { %v3262_v15 = vmax.f32 %v3247_v55, %v442_v30  ;;  %v3265_v32 = vmax.f32 %v3249_v34, %v444_v49 }
 0x16f   :  { %949 = vst.msk [vmem:[#allocation2 + $0x38] sm:$0xff] %vm29_vm0, %v3262_v15  ;;  %950 = vst.msk [vmem:[#allocation2 + $0x40] sm:$0xff] %vm29_vm0, %v3265_v32  ;;  %560 = vperm.xlu1 %2307, %v3262_v15   ;;  %1235 = vperm.xlu0 %2306, %v3245_v16  }
 0x170   :  { %v1122_v2 = vpop.xlane.xlu1 %1121  ;;  %v1124_v30 = vpop.xlane.xlu0 %1123 }
 0x171   :  { %v3278_v41 = vmax.f32 %v3267_v43, %v1122_v2  ;;  %v3281_v49 = vmax.f32 %v3269_v5, %v1124_v30 }
 0x173   :  { %1604 = vst.msk [vmem:[#allocation2 + $0xb8] sm:$0xff] %vm29_vm0, %v3278_v41  ;;  %1605 = vst.msk [vmem:[#allocation2 + $0xc0] sm:$0xff] %vm29_vm0, %v3281_v49  ;;  %1240 = vperm.xlu1 %2307, %v3278_v41   ;;  %565 = vperm.xlu0 %2306, %v3265_v32  }
 0x174   :  { %v446_v22 = vpop.xlane.xlu1 %445  ;;  %v448_v2 = vpop.xlane.xlu0 %447 }
 0x175   :  { %v3294_v62 = vmax.f32 %v3283_v13, %v446_v22  ;;  %v3297_v30 = vmax.f32 %v3285_v12, %v448_v2 }
 0x177   :  { %951 = vst.msk [vmem:[#allocation2 + $0x48] sm:$0xff] %vm29_vm0, %v3294_v62  ;;  %952 = vst.msk [vmem:[#allocation2 + $0x50] sm:$0xff] %vm29_vm0, %v3297_v30  ;;  %570 = vperm.xlu1 %2307, %v3294_v62   ;;  %1245 = vperm.xlu0 %2306, %v3281_v49  }
 0x178   :  { %v1126_v50 = vpop.xlane.xlu1 %1125  ;;  %v1128_v22 = vpop.xlane.xlu0 %1127 }
 0x179   :  { %v3310_v38 = vmax.f32 %v3299_v17, %v1126_v50  ;;  %v3313_v2 = vmax.f32 %v3301_v21, %v1128_v22 }
 0x17b   :  { %1606 = vst.msk [vmem:[#allocation2 + $0xc8] sm:$0xff] %vm29_vm0, %v3310_v38  ;;  %1607 = vst.msk [vmem:[#allocation2 + $0xd0] sm:$0xff] %vm29_vm0, %v3313_v2  ;;  %1250 = vperm.xlu1 %2307, %v3310_v38   ;;  %575 = vperm.xlu0 %2306, %v3297_v30  }
 0x17c   :  { %v450_v7 = vpop.xlane.xlu1 %449  ;;  %v452_v50 = vpop.xlane.xlu0 %451 }
 0x17d   :  { %v3326_v9 = vmax.f32 %v3315_v56, %v450_v7  ;;  %v3329_v22 = vmax.f32 %v3317_v35, %v452_v50  ;;  %v477_v7 = vsub.f32 %v3163_v53, %v3173_v36  ;;  %v493_v53 = vmul.f32 1.442695, %v4081_v23  ;;  %v3375_v36 = vld [vmem:[#allocation2 + $0xe8] sm:$0xff] }
 0x17e   :  { %v479_v23 = vsub.f32 %v3180_v37, %v3193_v28 }
 0x17f   :  { %953 = vst.msk [vmem:[#allocation2 + $0x58] sm:$0xff] %vm29_vm0, %v3326_v9  ;;  %954 = vst.msk [vmem:[#allocation2 + $0x60] sm:$0xff] %vm29_vm0, %v3329_v22  ;;  %580 = vperm.xlu1 %2307, %v3326_v9   ;;  %1255 = vperm.xlu0 %2306, %v3313_v2   ;;  %v495_v19 = vmul.f32 1.442695, %v477_v7  ;;  %2318 = vpow2.f32 %v493_v53  ;;  %v481_v7 = vsub.f32 %v3213_v26, %v3229_v25 }
 0x180   :  { %v1130_v8 = vpop.xlane.xlu1 %1129  ;;  %v1132_v50 = vpop.xlane.xlu0 %1131  ;;  %v499_v28 = vmul.f32 1.442695, %v479_v23  ;;  %v482_v26 = vsub.f32 %v3247_v55, %v3262_v15  ;;  %v484_v55 = vsub.f32 %v3283_v13, %v3294_v62  ;;  %v486_v62 = vsub.f32 %v3315_v56, %v3326_v9 }
 0x181   :  { %v3347_v57 = vmax.f32 %v3331_v14, %v1130_v8  ;;  %v3350_v18 = vmax.f32 %v3333_v40, %v1132_v50  ;;  %v478_v8 = vsub.f32 %v3178_v42, %v3190_v63  ;;  %v3377_v50 = vld [vmem:[#allocation2 + $0xf0] sm:$0xff]  ;;  %2320 = vpow2.f32 %v495_v19 }
 0x182   :  { %v480_v42 = vsub.f32 %v3211_v48, %v3226_v58  ;;  %v503_v19 = vmul.f32 1.442695, %v481_v7  ;;  %v505_v15 = vmul.f32 1.442695, %v482_v26  ;;  %v509_v7 = vmul.f32 1.442695, %v484_v55 }
 0x183   :  { %1608 = vst.msk [vmem:[#allocation2 + $0xd8] sm:$0xff] %vm29_vm0, %v3347_v57  ;;  %1609 = vst.msk [vmem:[#allocation2 + $0xe0] sm:$0xff] %vm29_vm0, %v3350_v18  ;;  %1260 = vperm.xlu1 %2307, %v3347_v57   ;;  %585 = vperm.xlu0 %2306, %v3329_v22   ;;  %v497_v45 = vmul.f32 1.442695, %v478_v8  ;;  %v483_v8 = vsub.f32 %v3249_v34, %v3265_v32 }
 0x184   :  { %v454_v61 = vpop.xlane.xlu1 %453  ;;  %v456_v52 = vpop.xlane.xlu0 %455  ;;  %v501_v48 = vmul.f32 1.442695, %v480_v42 }
 0x185   :  { %v3370_v29 = vmax.f32 %v3352_v27, %v454_v61  ;;  %v3373_v46 = vmax.f32 %v3354_v44, %v456_v52  ;;  %v3395_v52 = vld [vmem:[#allocation2 + $0x78] sm:$0xff]  ;;  %2322 = vpow2.f32 %v497_v45  ;;  %v507_v34 = vmul.f32 1.442695, %v483_v8 }
 0x186   :  { %2324 = vpow2.f32 %v499_v28  ;;  %v485_v45 = vsub.f32 %v3285_v12, %v3297_v30  ;;  %v487_v30 = vsub.f32 %v3317_v35, %v3329_v22 }
 0x187   :  { %955 = vst.msk [vmem:[#allocation2 + $0x68] sm:$0xff] %vm29_vm0, %v3370_v29  ;;  %956 = vst.msk [vmem:[#allocation2 + $0x70] sm:$0xff] %vm29_vm0, %v3373_v46  ;;  %590 = vperm.xlu1 %2307, %v3370_v29   ;;  %1265 = vperm.xlu0 %2306, %v3350_v18   ;;  %2326 = vpow2.f32 %v501_v48  ;;  %v489_v56 = vsub.f32 %v3354_v44, %v3373_v46  ;;  %v4082_v44 = vsub.f32 %v3148_v60, %v3151_v4 }
 0x188   :  { %v1134_v37 = vpop.xlane.xlu1 %1133  ;;  %v1136_v63 = vpop.xlane.xlu0 %1135  ;;  %2328 = vpow2.f32 %v503_v19  ;;  %v511_v12 = vmul.f32 1.442695, %v485_v45  ;;  %v515_v9 = vmul.f32 1.442695, %v487_v30  ;;  %v4084_v60 = vsub.f32 %v3165_v3, %v3176_v33 }
 0x189   :  { %v3390_v53 = vmax.f32 %v3375_v36, %v1134_v37  ;;  %v3393_v61 = vmax.f32 %v3377_v50, %v1136_v63  ;;  %v3410_v37 = vld [vmem:[#allocation2 + $0xf8] sm:$0xff]  ;;  %v2317_v63 = vpop.eup %2316  ;;  %2330 = vpow2.f32 %v505_v15  ;;  %v519_v55 = vmul.f32 1.442695, %v489_v56 }
 0x18a   :  { %2332 = vpow2.f32 %v507_v34  ;;  %v1175_v4 = vmul.f32 1.442695, %v4084_v60 }
 0x18b   :  { %1610 = vst.msk [vmem:[#allocation2 + $0xe8] sm:$0xff] %vm29_vm0, %v3390_v53  ;;  %1611 = vst.msk [vmem:[#allocation2 + $0xf0] sm:$0xff] %vm29_vm0, %v3393_v61  ;;  %1270 = vperm.xlu1 %2307, %v3390_v53   ;;  %595 = vperm.xlu0 %2306, %v3373_v46   ;;  %2334 = vpow2.f32 %v509_v7  ;;  %v1171_v46 = vmul.f32 1.442695, %v4082_v44 }
 0x18c   :  { %v458_v25 = vpop.xlane.xlu1 %457  ;;  %v1459_v58 = vpop.permute.xlu0 %1458  ;;  %2336 = vpow2.f32 %v511_v12 }
 0x18d   :  { %v3408_v23 = vmax.f32 %v3395_v52, %v458_v25  ;;  %2265 = vmatprep.subr.bf16.mxu1 %v1459_v58  ;;  %v2319_v28 = vpop.eup %2318  ;;  %v513_v25 = vmul.f32 1.442695, %v486_v62 }
 0x18e   :  { %2266 = vmatpush3.bf16.msra.mxu1 %v1459_v58  ;;  %v2321_v48 = vpop.eup %2320  ;;  %v488_v58 = vsub.f32 %v3352_v27, %v3370_v29 }
 0x18f   :  { %957 = vst.msk [vmem:[#allocation2 + $0x78] sm:$0xff] %vm29_vm0, %v3408_v23  ;;  %600 = vperm.xlu1 %2307, %v3408_v23   ;;  %1275 = vperm.xlu0 %2306, %v3393_v61   ;;  %2338 = vpow2.f32 %v513_v25  ;;  %v490_v27 = vsub.f32 %v3395_v52, %v3408_v23  ;;  %v4083_v52 = vsub.f32 %v3153_v0, %v3161_v20 }
 0x190   :  { %v1138_v32 = vpop.xlane.xlu1 %1137  ;;  %v1455_v26 = vpop.permute.xlu0 %1454  ;;  %v517_v22 = vmul.f32 1.442695, %v488_v58  ;;  %2340 = vpow2.f32 %v515_v9  ;;  %v4086_v20 = vsub.f32 %v3197_v51, %v3209_v1  ;;  %v4088_v51 = vsub.f32 %v3233_v24, %v3245_v16 }
 0x191   :  { %v3421_v42 = vmax.f32 %v3410_v37, %v1138_v32  ;;  %v521_v45 = vmul.f32 1.442695, %v490_v27  ;;  %v1173_v23 = vmul.f32 1.442695, %v4083_v52  ;;  %v1163_v58 = vsub.f32 %v3269_v5, %v3281_v49 }
 0x192   :  { %v2323_v19 = vpop.eup %2322  ;;  %2342 = vpow2.f32 %v517_v22  ;;  %v1179_v30 = vmul.f32 1.442695, %v4086_v20  ;;  %v1183_v1 = vmul.f32 1.442695, %v4088_v51  ;;  %v1165_v9 = vsub.f32 %v3301_v21, %v3313_v2 }
 0x193   :  { %1612 = vst.msk [vmem:[#allocation2 + $0xf8] sm:$0xff] %vm29_vm0, %v3421_v42  ;;  %1280 = vperm.xlu1 %2307, %v3421_v42   ;;  %669 = vperm.xlu0 %2306, %v2317_v63   ;;  %v2325_v8 = vpop.eup %2324  ;;  %2344 = vpow2.f32 %v519_v55  ;;  %v1166_v16 = vsub.f32 %v3331_v14, %v3347_v57  ;;  %v1167_v49 = vsub.f32 %v3333_v40, %v3350_v18 }
 0x194   :  { %v1457_v13 = vpop.permute.xlu1 %1456  ;;  %v2327_v15 = vpop.eup %2326  ;;  %2346 = vpow2.f32 %v1171_v46  ;;  %v1168_v14 = vsub.f32 %v3375_v36, %v3390_v53  ;;  %v1169_v18 = vsub.f32 %v3377_v50, %v3393_v61 }
 0x195   :  { %2267 = vmatprep.subr.bf16.mxu1 %v1457_v13  ;;  %v2329_v29 = vpop.eup %2328  ;;  %v1451_v32 = vpop.permute.xlu0 %1450  ;;  %2348 = vpow2.f32 %v521_v45  ;;  %v1193_v22 = vmul.f32 1.442695, %v1166_v16  ;;  %v1195_v57 = vmul.f32 1.442695, %v1167_v49 }
 0x196   :  { %2268 = vmatpush3.bf16.msra.mxu1 %v1457_v13  ;;  %v2331_v34 = vpop.eup %2330  ;;  %2350 = vpow2.f32 %v1173_v23 }
 0x197   :  { %674 = vperm.xlu1 %2307, %v2319_v28   ;;  %679 = vperm.xlu0 %2306, %v2321_v48   ;;  %v2333_v63 = vpop.eup %2332  ;;  %v4085_v48 = vsub.f32 %v3195_v6, %v3206_v39  ;;  %2352 = vpow2.f32 %v1175_v4  ;;  %v1162_v6 = vsub.f32 %v3267_v43, %v3278_v41  ;;  %v1187_v43 = vmul.f32 1.442695, %v1163_v58 }
 0x198   :  { %2269 = vmatprep.subr.bf16.mxu1 %v1455_v26  ;;  %v1453_v35 = vpop.permute.xlu1 %1452  ;;  %v2335_v7 = vpop.eup %2334 }
 0x199   :  { %v2337_v62 = vpop.eup %2336  ;;  %v1447_v13 = vpop.permute.xlu0 %1446  ;;  %v1177_v12 = vmul.f32 1.442695, %v4085_v48 }
 0x19a   :  { %2270 = vmatpush3.bf16.msra.mxu1 %v1455_v26  ;;  %v4087_v26 = vsub.f32 %v3231_v10, %v3242_v31  ;;  %v1185_v31 = vmul.f32 1.442695, %v1162_v6  ;;  %v1164_v10 = vsub.f32 %v3299_v17, %v3310_v38  ;;  %v1191_v38 = vmul.f32 1.442695, %v1165_v9 }
 0x19b   :  { %684 = vperm.xlu1 %2307, %v2323_v19   ;;  %689 = vperm.xlu0 %2306, %v2325_v8   ;;  %2354 = vpow2.f32 %v1177_v12 }
 0x19c   :  { %2271 = vmatprep.subr.bf16.mxu1 %v1453_v35  ;;  %v1449_v28 = vpop.permute.xlu1 %1448  ;;  %v2339_v0 = vpop.eup %2338  ;;  %v1181_v25 = vmul.f32 1.442695, %v4087_v26  ;;  %2356 = vpow2.f32 %v1179_v30  ;;  %v1189_v5 = vmul.f32 1.442695, %v1164_v10  ;;  %v4090_v30 = vld [vmem:[#allocation8_spill] sm:$0xff]  ;;  %v4093_v10 = vld [vmem:[#allocation9_spill] sm:$0xff] }
 0x19d   :  { %v2341_v3 = vpop.eup %2340 }
 0x19e   :  { %2272 = vmatpush3.bf16.msra.mxu1 %v1453_v35  ;;  %2358 = vpow2.f32 %v1181_v25 }
 0x19f   :  { %694 = vperm.xlu1 %2307, %v2327_v15   ;;  %699 = vperm.xlu0 %2306, %v2329_v29   ;;  %v2343_v39 = vpop.eup %2342  ;;  %2360 = vpow2.f32 %v1183_v1  ;;  %v1199_v29 = vmul.f32 1.442695, %v1169_v18  ;;  %v4098_v18 = vld [vmem:[#allocation16_spill] sm:$0xff] }
 0x1a0   :  { %2273 = vmatprep.subr.bf16.mxu1 %v1451_v32  ;;  %v1445_v33 = vpop.permute.xlu1 %1444  ;;  %v2345_v19 = vpop.eup %2344  ;;  %2362 = vpow2.f32 %v1185_v31 }
 0x1a1   :  { %v2347_v41 = vpop.eup %2346  ;;  %2364 = vpow2.f32 %v1187_v43  ;;  %v4094_v43 = vld [vmem:[#allocation12_spill] sm:$0xff] }
 0x1a2   :  { %2274 = vmatpush3.bf16.msra.mxu1 %v1451_v32  ;;  %v2349_v24 = vpop.eup %2348  ;;  %2366 = vpow2.f32 %v1189_v5  ;;  %v1170_v32 = vsub.f32 %v3410_v37, %v3421_v42 }
 0x1a3   :  { %704 = vperm.xlu1 %2307, %v2331_v34   ;;  %709 = vperm.xlu0 %2306, %v2333_v63   ;;  %v2351_v8 = vpop.eup %2350  ;;  %2368 = vpow2.f32 %v1191_v38 }
 0x1a4   :  { %2275 = vmatprep.subr.bf16.mxu1 %v1449_v28  ;;  %v2353_v17 = vpop.eup %2352  ;;  %2370 = vpow2.f32 %v1193_v22  ;;  %v1201_v50 = vmul.f32 1.442695, %v1170_v32  ;;  %v4099_v32 = vld [vmem:[#allocation15_spill] sm:$0xff] }
 0x1a5   :  { %2372 = vpow2.f32 %v1195_v57 }
 0x1a6   :  { %2276 = vmatpush3.bf16.msra.mxu1 %v1449_v28 }
 0x1a7   :  { %714 = vperm.xlu1 %2307, %v2335_v7   ;;  %719 = vperm.xlu0 %2306, %v2337_v62  }
 0x1a8   :  { %2277 = vmatprep.subr.bf16.mxu1 %v1447_v13  ;;  %v2355_v15 = vpop.eup %2354 }
 0x1a9   :  { %v2357_v55 = vpop.eup %2356 }
 0x1aa   :  { %2278 = vmatpush3.bf16.msra.mxu1 %v1447_v13 }
 0x1ab   :  { %724 = vperm.xlu1 %2307, %v2339_v0   ;;  %729 = vperm.xlu0 %2306, %v2341_v3   ;;  %v4089_v0 = vld [vmem:[#allocation6_spill] sm:$0xff] }
 0x1ac   :  { %2279 = vmatprep.subr.bf16.mxu1 %v1445_v33 }
 0x1ae   :  { %2280 = vmatpush3.bf16.msra.mxu1 %v1445_v33 }
 0x1af   :  { %734 = vperm.xlu1 %2307, %v2343_v39   ;;  %739 = vperm.xlu0 %2306, %v2345_v19   ;;  %v4091_v39 = vld [vmem:[#allocation7_spill] sm:$0xff] }
 0x1b2   :  { %v526_v56 = vpop.permute.xlu1 %525 }
 0x1b3   :  { %744 = vperm.xlu1 %2307, %v2349_v24   ;;  %1350 = vperm.xlu0 %2306, %v2347_v41   ;;  %v603_v21 = vsub.f32 %v2764_v54, %v526_v56  ;;  %v1197_v54 = vmul.f32 1.442695, %v1168_v14  ;;  %v4097_v14 = vld [vmem:[#allocation13_spill] sm:$0xff] }
 0x1b6   :  { %v531_v35 = vpop.permute.xlu0 %530 }
 0x1b7   :  { %v604_v2 = vsub.f32 %v2782_v59, %v531_v35  ;;  %1355 = vperm.xlu1 %2307, %v2351_v8   ;;  %1360 = vperm.xlu0 %2306, %v2353_v17   ;;  %v2359_v59 = vpop.eup %2358  ;;  %v4095_v8 = vld [vmem:[#allocation11_spill] sm:$0xff]  ;;  %v4096_v17 = vld [vmem:[#allocation14_spill] sm:$0xff] }
 0x1b8   :  { %v2361_v36 = vpop.eup %2360 }
 0x1b9   :  { %v619_v40 = vpack.c.bf16 %v604_v2, %v603_v21  ;;  %v2363_v53 = vpop.eup %2362 }
 0x1ba   :  { %v2365_v61 = vpop.eup %2364 }
 0x1bb   :  { %v628_v27 = vmul.bf16 1069105081, %v619_v40  ;;  %1365 = vperm.xlu1 %2307, %v2355_v15   ;;  %1370 = vperm.xlu0 %2306, %v2357_v55   ;;  %v2367_v44 = vpop.eup %2366 }
 0x1bc   :  { %v2369_v46 = vpop.eup %2368 }
 0x1bd   :  { %2374 = vpow.bf16 %v628_v27  ;;  %v2371_v34 = vpop.eup %2370 }
 0x1be   :  { %2376 = vpow2.f32 %v1197_v54  ;;  %v2373_v45 = vpop.eup %2372 }
 0x1bf   :  { %1375 = vperm.xlu1 %2307, %v2359_v59   ;;  %1380 = vperm.xlu0 %2306, %v2361_v36   ;;  %2378 = vpow2.f32 %v1199_v29 }
 0x1c0   :  { %2380 = vpow2.f32 %v1201_v50 }
 0x1c3   :  { %1385 = vperm.xlu1 %2307, %v2363_v53   ;;  %1390 = vperm.xlu0 %2306, %v2365_v61   ;;  %v4100_v53 = vld [vmem:[#allocation19_spill] sm:$0xff] }
 0x1c7   :  { %1395 = vperm.xlu1 %2307, %v2367_v44   ;;  %1400 = vperm.xlu0 %2306, %v2369_v46  }
 0x1cb   :  { %v2375_v63 = vpop.eup %2374  ;;  %1405 = vperm.xlu1 %2307, %v2371_v34   ;;  %1410 = vperm.xlu0 %2306, %v2373_v45  }
 0x1cc   :  { %2249 = vmatprep.mubr.bf16.mxu0 %v2375_v63  ;;  %v2377_v37 = vpop.eup %2376  ;;  %v4101_v63 = vld [vmem:[#allocation17_spill] sm:$0xff] }
 0x1cd   :  { %v2379_v42 = vpop.eup %2378 }
 0x1ce   :  { %v1206_v28 = vpop.permute.xlu1 %1205  ;;  %v2381_v52 = vpop.eup %2380 }
 0x1cf   :  { %1415 = vperm.xlu1 %2307, %v2377_v37   ;;  %1420 = vperm.xlu0 %2306, %v2379_v42   ;;  %v1283_v7 = vsub.f32 %v2836_v47, %v1206_v28  ;;  %v4092_v47 = vld [vmem:[#allocation10_spill] sm:$0xff]  ;;  %v4102_v42 = vld [vmem:[#allocation20_spill] sm:$0xff] }
 0x1d2   :  { %v1211_v23 = vpop.permute.xlu1 %1210 }
 0x1d3   :  { %v1284_v60 = vsub.f32 %v2856_v11, %v1211_v23  ;;  %1425 = vperm.xlu1 %2307, %v2381_v52  }
 0x1d5   :  { %v1299_v4 = vpack.c.bf16 %v1284_v60, %v1283_v7 }
 0x1d6   :  { %v536_v62 = vpop.permute.xlu0 %535 }
 0x1d7   :  { %v1308_v13 = vmul.bf16 1069105081, %v1299_v4  ;;  %v605_v20 = vsub.f32 %v4089_v0, %v536_v62  ;;  %v4103_v62 = vld [vmem:[#allocation18_spill] sm:$0xff] }
 0x1d9   :  { %2382 = vpow.bf16 %v1308_v13 }
 0x1da   :  { %v541_v48 = vpop.permute.xlu1 %540  ;;  %v1216_v12 = vpop.permute.xlu0 %1215 }
 0x1db   :  { %v606_v3 = vsub.f32 %v4090_v30, %v541_v48  ;;  %v1285_v51 = vsub.f32 %v4091_v39, %v1216_v12  ;;  %v4104_v48 = vld [vmem:[#allocation22_spill] sm:$0xff] }
 0x1dd   :  { %v620_v33 = vpack.c.bf16 %v606_v3, %v605_v20 }
 0x1de   :  { %v1221_v26 = vpop.permute.xlu1 %1220  ;;  %v546_v25 = vpop.permute.xlu0 %545 }
 0x1df   :  { %v631_v6 = vmul.bf16 1069105081, %v620_v33  ;;  %v1286_v1 = vsub.f32 %v4092_v47, %v1221_v26  ;;  %v607_v41 = vsub.f32 %v4093_v10, %v546_v25  ;;  %v4105_v26 = vld [vmem:[#allocation21_spill] sm:$0xff]  ;;  %v4108_v10 = vld [vmem:[#allocation26_spill] sm:$0xff] }
 0x1e1   :  { %2384 = vpow.bf16 %v631_v6  ;;  %v1300_v11 = vpack.c.bf16 %v1286_v1, %v1285_v51  ;;  %v4106_v6 = vld [vmem:[#allocation24_spill] sm:$0xff] }
 0x1e2   :  { %v551_v58 = vpop.permute.xlu1 %550  ;;  %v1226_v19 = vpop.permute.xlu0 %1225 }
 0x1e3   :  { %v1311_v31 = vmul.bf16 1069105081, %v1300_v11  ;;  %v608_v9 = vsub.f32 %v4094_v43, %v551_v58  ;;  %v1287_v38 = vsub.f32 %v4095_v8, %v1226_v19  ;;  %v4107_v19 = vld [vmem:[#allocation23_spill] sm:$0xff]  ;;  %v4110_v8 = vld [vmem:[#allocation28_spill] sm:$0xff] }
 0x1e5   :  { %2386 = vpow.bf16 %v1311_v31  ;;  %v621_v24 = vpack.c.bf16 %v608_v9, %v607_v41 }
 0x1e6   :  { %v1231_v16 = vpop.permute.xlu1 %1230  ;;  %v556_v5 = vpop.permute.xlu0 %555 }
 0x1e7   :  { %v2383_v49 = vpop.eup %2382  ;;  %v634_v56 = vmul.bf16 1069105081, %v621_v24  ;;  %v1288_v35 = vsub.f32 %v4096_v17, %v1231_v16  ;;  %v609_v15 = vsub.f32 %v4097_v14, %v556_v5 }
 0x1e8   :  { %2281 = vmatprep.mubr.bf16.mxu1 %v2383_v49  ;;  %v4109_v49 = vld [vmem:[#allocation25_spill] sm:$0xff] }
 0x1e9   :  { %2388 = vpow.bf16 %v634_v56  ;;  %v1301_v22 = vpack.c.bf16 %v1288_v35, %v1287_v38 }
 0x1ea   :  { %v561_v21 = vpop.permute.xlu1 %560  ;;  %v1236_v2 = vpop.permute.xlu0 %1235 }
 0x1eb   :  { %v1314_v57 = vmul.bf16 1069105081, %v1301_v22  ;;  %v610_v40 = vsub.f32 %v4098_v18, %v561_v21  ;;  %v1289_v36 = vsub.f32 %v4099_v32, %v1236_v2  ;;  %v4114_v32 = vld [vmem:[#allocation32_spill] sm:$0xff] }
 0x1ed   :  { %2390 = vpow.bf16 %v1314_v57  ;;  %v622_v55 = vpack.c.bf16 %v610_v40, %v609_v15  ;;  %v4111_v57 = vld [vmem:[#allocation27_spill] sm:$0xff]  ;;  %v4112_v15 = vld [vmem:[#allocation30_spill] sm:$0xff] }
 0x1ee   :  { %v1241_v27 = vpop.permute.xlu1 %1240  ;;  %v566_v54 = vpop.permute.xlu0 %565 }
 0x1ef   :  { %v2385_v59 = vpop.eup %2384  ;;  %v637_v29 = vmul.bf16 1069105081, %v622_v55  ;;  %v1290_v50 = vsub.f32 %v4100_v53, %v1241_v27  ;;  %v611_v37 = vsub.f32 %v4101_v63, %v566_v54  ;;  %v4116_v63 = vld [vmem:[#allocation33_spill] sm:$0xff] }
 0x1f0   :  { %2250 = vmatmul.mubr.bf16.vlgmr.msra.gmra.mxu0 %v2385_v59  ;;  %v4113_v59 = vld [vmem:[#allocation29_spill] sm:$0xff] }
 0x1f1   :  { %2392 = vpow.bf16 %v637_v29  ;;  %v1302_v61 = vpack.c.bf16 %v1290_v50, %v1289_v36 }
 0x1f2   :  { %v571_v44 = vpop.permute.xlu1 %570  ;;  %v1246_v46 = vpop.permute.xlu0 %1245 }
 0x1f3   :  { %v2387_v34 = vpop.eup %2386  ;;  %v1317_v45 = vmul.bf16 1069105081, %v1302_v61  ;;  %v612_v28 = vsub.f32 %v4102_v42, %v571_v44  ;;  %v1291_v13 = vsub.f32 %v4103_v62, %v1246_v46 }
 0x1f4   :  { %2282 = vmatmul.mubr.bf16.vlgmr.msra.gmra.mxu1 %v2387_v34  ;;  %v4115_v34 = vld [vmem:[#allocation31_spill] sm:$0xff] }
 0x1f5   :  { %2394 = vpow.bf16 %v1317_v45  ;;  %v623_v52 = vpack.c.bf16 %v612_v28, %v611_v37 }
 0x1f6   :  { %v1251_v23 = vpop.permute.xlu1 %1250  ;;  %v576_v7 = vpop.permute.xlu0 %575 }
 0x1f7   :  { %v2389_v60 = vpop.eup %2388  ;;  %v640_v4 = vmul.bf16 1069105081, %v623_v52  ;;  %v1292_v12 = vsub.f32 %v4104_v48, %v1251_v23  ;;  %v613_v25 = vsub.f32 %v4105_v26, %v576_v7 }
 0x1f8   :  { %2253 = vmatprep.mubr.bf16.mxu0 %v2389_v60 }
 0x1f9   :  { %2396 = vpow.bf16 %v640_v4  ;;  %v1303_v0 = vpack.c.bf16 %v1292_v12, %v1291_v13 }
 0x1fa   :  { %v581_v20 = vpop.permute.xlu1 %580  ;;  %v1256_v30 = vpop.permute.xlu0 %1255 }
 0x1fb   :  { %v2391_v3 = vpop.eup %2390  ;;  %v1320_v33 = vmul.bf16 1069105081, %v1303_v0  ;;  %v614_v39 = vsub.f32 %v4106_v6, %v581_v20  ;;  %v1293_v31 = vsub.f32 %v4107_v19, %v1256_v30 }
 0x1fc   :  { %2285 = vmatprep.mubr.bf16.mxu1 %v2391_v3 }
 0x1fd   :  { %2398 = vpow.bf16 %v1320_v33  ;;  %v624_v51 = vpack.c.bf16 %v614_v39, %v613_v25 }
 0x1fe   :  { %v1261_v47 = vpop.permute.xlu1 %1260  ;;  %v586_v1 = vpop.permute.xlu0 %585 }
 0x1ff   :  { %v2393_v11 = vpop.eup %2392  ;;  %v643_v58 = vmul.bf16 1069105081, %v624_v51  ;;  %v1294_v41 = vsub.f32 %v4108_v10, %v1261_v47  ;;  %v615_v56 = vsub.f32 %v4109_v49, %v586_v1  ;;  %v652_v49 = vld [vmem:[#allocation3 + $0x8] sm:$0xff] }
 0x200   :  { %2254 = vmatmul.mubr.bf16.gmra.mxu0 %v2393_v11 }
 0x201   :  { %2400 = vpow.bf16 %v643_v58  ;;  %v1304_v43 = vpack.c.bf16 %v1294_v41, %v1293_v31  ;;  %v653_v58 = vld [vmem:[#allocation3 + $0x10] sm:$0xff]  ;;  %v651_v31 = vld [vmem:[#allocation3] sm:$0xff]  ;;  %v654_v41 = vld [vmem:[#allocation3 + $0x18] sm:$0xff] }
 0x202   :  { %v591_v9 = vpop.permute.xlu1 %590  ;;  %v1266_v24 = vpop.permute.xlu0 %1265 }
 0x203   :  { %v2395_v16 = vpop.eup %2394  ;;  %v1323_v5 = vmul.bf16 1069105081, %v1304_v43  ;;  %v616_v38 = vsub.f32 %v4110_v8, %v591_v9  ;;  %v1295_v14 = vsub.f32 %v4111_v57, %v1266_v24  ;;  %v1334_v43 = vld [vmem:[#allocation3 + $0x90] sm:$0xff] }
 0x204   :  { %2286 = vmatmul.mubr.bf16.gmra.mxu1 %v2395_v16 }
 0x205   :  { %2402 = vpow.bf16 %v1323_v5  ;;  %v625_v17 = vpack.c.bf16 %v616_v38, %v615_v56  ;;  %v1332_v56 = vld [vmem:[#allocation3 + $0x80] sm:$0xff] }
 0x206   :  { %v1271_v35 = vpop.permute.xlu1 %1270  ;;  %v596_v22 = vpop.permute.xlu0 %595 }
 0x207   :  { %v2397_v21 = vpop.eup %2396  ;;  %v646_v2 = vmul.bf16 1069105081, %v625_v17  ;;  %v1296_v18 = vsub.f32 %v4112_v15, %v1271_v35  ;;  %v617_v29 = vsub.f32 %v4113_v59, %v596_v22 }
 0x208   :  { %2257 = vmatprep.mubr.bf16.mxu0 %v2397_v21  ;;  %v1335_v21 = vld [vmem:[#allocation3 + $0x98] sm:$0xff] }
 0x209   :  { %2404 = vpow.bf16 %v646_v2  ;;  %v1305_v40 = vpack.c.bf16 %v1296_v18, %v1295_v14 }
 0x20a   :  { %v601_v55 = vpop.permute.xlu1 %600  ;;  %v1276_v53 = vpop.permute.xlu0 %1275 }
 0x20b   :  { %v2399_v27 = vpop.eup %2398  ;;  %v1326_v54 = vmul.bf16 1069105081, %v1305_v40  ;;  %v618_v36 = vsub.f32 %v4114_v32, %v601_v55  ;;  %v1297_v45 = vsub.f32 %v4115_v34, %v1276_v53  ;;  %v1333_v55 = vld [vmem:[#allocation3 + $0x88] sm:$0xff]  ;;  %v657_v34 = vld [vmem:[#allocation3 + $0x30] sm:$0xff] }
 0x20c   :  { %2289 = vmatprep.mubr.bf16.mxu1 %v2399_v27 }
 0x20d   :  { %2406 = vpow.bf16 %v1326_v54  ;;  %v626_v50 = vpack.c.bf16 %v618_v36, %v617_v29 }
 0x20e   :  { %v1281_v61 = vpop.permute.xlu1 %1280  ;;  %v670_v62 = vpop.permute.xlu0 %669 }
 0x20f   :  { %v2401_v44 = vpop.eup %2400  ;;  %v649_v46 = vmul.bf16 1069105081, %v626_v50  ;;  %v1298_v37 = vsub.f32 %v4116_v63, %v1281_v61  ;;  %v747_v16 = vmul.f32 %v670_v62, %v651_v31  ;;  %v655_v63 = vld [vmem:[#allocation3 + $0x20] sm:$0xff] }
 0x210   :  { %2258 = vmatmul.mubr.bf16.gmra.mxu0 %v2401_v44  ;;  %v1336_v62 = vld [vmem:[#allocation3 + $0xa0] sm:$0xff] }
 0x211   :  { %2408 = vpow.bf16 %v649_v46  ;;  %v1306_v42 = vpack.c.bf16 %v1298_v37, %v1297_v45 }
 0x212   :  { %v675_v13 = vpop.permute.xlu1 %674  ;;  %v680_v48 = vpop.permute.xlu0 %679 }
 0x213   :  { %v2403_v28 = vpop.eup %2402  ;;  %v1329_v52 = vmul.bf16 1069105081, %v1306_v42  ;;  %v749_v10 = vmul.f32 %v680_v48, %v653_v58  ;;  %v748_v14 = vmul.f32 %v675_v13, %v652_v49  ;;  %v658_v42 = vld [vmem:[#allocation3 + $0x38] sm:$0xff] }
 0x214   :  { %2290 = vmatmul.mubr.bf16.gmra.mxu1 %v2403_v28  ;;  %v1338_v28 = vld [vmem:[#allocation3 + $0xb0] sm:$0xff] }
 0x215   :  { %2410 = vpow.bf16 %v1329_v52 }
 0x216   :  { %v685_v12 = vpop.permute.xlu1 %684  ;;  %v3507_v0 = vpop.permute.xlu0 %689 }
 0x217   :  { %v2405_v23 = vpop.eup %2404  ;;  %v750_v38 = vmul.f32 %v685_v12, %v654_v41 }
 0x218   :  { %2261 = vmatprep.mubr.bf16.mxu0 %v2405_v23 }
 0x21a   :  { %v3509_v20 = vpop.permute.xlu1 %694  ;;  %v700_v30 = vpop.permute.xlu0 %699 }
 0x21b   :  { %v2407_v7 = vpop.eup %2406  ;;  %v753_v37 = vmul.f32 %v700_v30, %v657_v34 }
 0x21c   :  { %2293 = vmatprep.mubr.bf16.mxu1 %v2407_v7  ;;  %v751_v7 = vmul.f32 %v3507_v0, %v655_v63  ;;  %v1341_v63 = vld [vmem:[#allocation3 + $0xc8] sm:$0xff] }
 0x21e   :  { %v3511_v3 = vpop.permute.xlu1 %704  ;;  %v3513_v33 = vpop.permute.xlu0 %709 }
 0x21f   :  { %v2409_v60 = vpop.eup %2408  ;;  %v754_v48 = vmul.f32 %v3511_v3, %v658_v42 }
 0x220   :  { %2262 = vmatmul.mubr.bf16.gmra.mxu0 %v2409_v60 }
 0x222   :  { %v3515_v26 = vpop.permute.xlu1 %714  ;;  %v3517_v25 = vpop.permute.xlu0 %719 }
 0x223   :  { %v2411_v4 = vpop.eup %2410 }
 0x224   :  { %2294 = vmatmul.mubr.bf16.gmra.mxu1 %v2411_v4  ;;  %v656_v4 = vld [vmem:[#allocation3 + $0x28] sm:$0xff] }
 0x226   :  { %v3519_v6 = vpop.permute.xlu1 %724  ;;  %v3521_v39 = vpop.permute.xlu0 %729 }
 0x22a   :  { %v3523_v51 = vpop.permute.xlu1 %734  ;;  %v3525_v47 = vpop.permute.xlu0 %739 }
 0x22e   :  { %v3527_v1 = vpop.permute.xlu1 %744  ;;  %v1351_v11 = vpop.permute.xlu0 %1350 }
 0x22f   :  { %v1428_v15 = vmul.f32 %v1351_v11, %v1332_v56 }
 0x232   :  { %v1356_v19 = vpop.permute.xlu1 %1355  ;;  %v1361_v9 = vpop.permute.xlu0 %1360 }
 0x233   :  { %v1430_v17 = vmul.f32 %v1361_v9, %v1334_v43  ;;  %v1429_v53 = vmul.f32 %v1356_v19, %v1333_v55  ;;  %v1339_v19 = vld [vmem:[#allocation3 + $0xb8] sm:$0xff]  ;;  %v1337_v9 = vld [vmem:[#allocation3 + $0xa8] sm:$0xff] }
 0x236   :  { %v1366_v35 = vpop.permute.xlu1 %1365  ;;  %v1371_v61 = vpop.permute.xlu0 %1370 }
 0x237   :  { %v1431_v59 = vmul.f32 %v1366_v35, %v1335_v21  ;;  %v1432_v41 = vmul.f32 %v1371_v61, %v1336_v62  ;;  %v1343_v61 = vld [vmem:[#allocation3 + $0xd8] sm:$0xff] }
 0x23a   :  { %v1376_v45 = vpop.permute.xlu1 %1375  ;;  %v1381_v52 = vpop.permute.xlu0 %1380 }
 0x23b   :  { %v1434_v12 = vmul.f32 %v1381_v52, %v1338_v28 }
 0x23e   :  { %v1386_v11 = vpop.permute.xlu1 %1385 }
 0x242   :  { %v1396_v21 = vpop.permute.xlu1 %1395 }
 0x2b0   :  { %v2251_v24 = vpop.f32.mrf.mxu0 }
 0x2b1   :  { %v910_v5 = vadd.f32 %v2251_v24, %v749_v10  ;;  %v752_v10 = vmul.f32 %v3509_v20, %v656_v4 }
 0x2b2   :  { %v845_v8 = vpop.f32.mrf.mxu0 }
 0x2b3   :  { %927 = vst.msk [vmem:[#allocation3 + $0x10] sm:$0xff] %vm62_vm1, %v910_v5  ;;  %v908_v22 = vadd.f32 %v845_v8, %v747_v16  ;;  %v1435_v5 = vmul.f32 %v1386_v11, %v1339_v19  ;;  %v1433_v8 = vmul.f32 %v1376_v45, %v1337_v9  ;;  %v1346_v19 = vld [vmem:[#allocation3 + $0xf0] sm:$0xff] }
 0x2b4   :  { %v2252_v2 = vpop.f32.mrf.mxu0  ;;  %v2283_v57 = vpop.f32.mrf.mxu1 }
 0x2b5   :  { %925 = vst.msk [vmem:[#allocation3] sm:$0xff] %vm62_vm1, %v908_v22  ;;  %v911_v18 = vadd.f32 %v2252_v2, %v750_v38  ;;  %v1567_v40 = vadd.f32 %v2283_v57, %v1430_v17  ;;  %v1391_v38 = vpop.permute.xlu0 %1390  ;;  %v661_v22 = vld [vmem:[#allocation3 + $0x50] sm:$0xff]  ;;  %v659_v2 = vld [vmem:[#allocation3 + $0x40] sm:$0xff] }
 0x2b6   :  { %v848_v27 = vpop.f32.mrf.mxu0  ;;  %v1502_v54 = vpop.f32.mrf.mxu1  ;;  %v757_v57 = vmul.f32 %v3517_v25, %v661_v22  ;;  %v755_v55 = vmul.f32 %v3513_v33, %v659_v2 }
 0x2b7   :  { %928 = vst.msk [vmem:[#allocation3 + $0x18] sm:$0xff] %vm62_vm1, %v911_v18  ;;  %1583 = vst.msk [vmem:[#allocation3 + $0x90] sm:$0xff] %vm62_vm1, %v1567_v40  ;;  %v909_v29 = vadd.f32 %v848_v27, %v748_v14  ;;  %v1565_v32 = vadd.f32 %v1502_v54, %v1428_v15  ;;  %v662_v14 = vld [vmem:[#allocation3 + $0x58] sm:$0xff]  ;;  %v1342_v15 = vld [vmem:[#allocation3 + $0xd0] sm:$0xff] }
 0x2b8   :  { %v2284_v36 = vpop.f32.mrf.mxu1  ;;  %v660_v54 = vld [vmem:[#allocation3 + $0x48] sm:$0xff] }
 0x2b9   :  { %926 = vst.msk [vmem:[#allocation3 + $0x8] sm:$0xff] %vm62_vm1, %v909_v29  ;;  %1581 = vst.msk [vmem:[#allocation3 + $0x80] sm:$0xff] %vm62_vm1, %v1565_v32  ;;  %v1568_v50 = vadd.f32 %v2284_v36, %v1431_v59  ;;  %v1401_v18 = vpop.permute.xlu0 %1400  ;;  %v1340_v59 = vld [vmem:[#allocation3 + $0xc0] sm:$0xff]  ;;  %v758_v32 = vmul.f32 %v3519_v6, %v662_v14 }
 0x2ba   :  { %v1505_v44 = vpop.f32.mrf.mxu1  ;;  %v1438_v36 = vmul.f32 %v1401_v18, %v1342_v15  ;;  %v1436_v34 = vmul.f32 %v1391_v38, %v1340_v59 }
 0x2bb   :  { %1584 = vst.msk [vmem:[#allocation3 + $0x98] sm:$0xff] %vm62_vm1, %v1568_v50  ;;  %v1566_v46 = vadd.f32 %v1505_v44, %v1429_v53  ;;  %v1406_v53 = vpop.permute.xlu1 %1405 }
 0x2bc   :  { %v1439_v28 = vmul.f32 %v1406_v53, %v1343_v61 }
 0x2bd   :  { %1582 = vst.msk [vmem:[#allocation3 + $0x88] sm:$0xff] %vm62_vm1, %v1566_v46  ;;  %v756_v46 = vmul.f32 %v3515_v26, %v660_v54 }
 0x2c0   :  { %v2255_v23 = vpop.f32.mrf.mxu0 }
 0x2c1   :  { %v914_v60 = vadd.f32 %v2255_v23, %v753_v37 }
 0x2c2   :  { %v861_v13 = vpop.f32.mrf.mxu0 }
 0x2c3   :  { %931 = vst.msk [vmem:[#allocation3 + $0x30] sm:$0xff] %vm62_vm1, %v914_v60  ;;  %v912_v58 = vadd.f32 %v861_v13, %v751_v7  ;;  %v1437_v7 = vmul.f32 %v1396_v21, %v1341_v63  ;;  %v1411_v60 = vpop.permute.xlu0 %1410  ;;  %v665_v13 = vld [vmem:[#allocation3 + $0x70] sm:$0xff] }
 0x2c4   :  { %v2256_v31 = vpop.f32.mrf.mxu0  ;;  %v2287_v30 = vpop.f32.mrf.mxu1  ;;  %v761_v11 = vmul.f32 %v3525_v47, %v665_v13 }
 0x2c5   :  { %929 = vst.msk [vmem:[#allocation3 + $0x20] sm:$0xff] %vm62_vm1, %v912_v58  ;;  %v915_v0 = vadd.f32 %v2256_v31, %v754_v48  ;;  %v1571_v43 = vadd.f32 %v2287_v30, %v1434_v12  ;;  %v1416_v48 = vpop.permute.xlu1 %1415  ;;  %v663_v12 = vld [vmem:[#allocation3 + $0x60] sm:$0xff]  ;;  %v666_v58 = vld [vmem:[#allocation3 + $0x78] sm:$0xff] }
 0x2c6   :  { %v864_v24 = vpop.f32.mrf.mxu0  ;;  %v1518_v16 = vpop.f32.mrf.mxu1 }
 0x2c7   :  { %932 = vst.msk [vmem:[#allocation3 + $0x38] sm:$0xff] %vm62_vm1, %v915_v0  ;;  %1587 = vst.msk [vmem:[#allocation3 + $0xb0] sm:$0xff] %vm62_vm1, %v1571_v43  ;;  %v913_v3 = vadd.f32 %v864_v24, %v752_v10  ;;  %v1569_v49 = vadd.f32 %v1518_v16, %v1432_v41  ;;  %v1421_v31 = vpop.permute.xlu0 %1420  ;;  %v759_v10 = vmul.f32 %v3521_v39, %v663_v12  ;;  %v664_v0 = vld [vmem:[#allocation3 + $0x68] sm:$0xff]  ;;  %v1344_v43 = vld [vmem:[#allocation3 + $0xe0] sm:$0xff] }
 0x2c8   :  { %v2288_v56 = vpop.f32.mrf.mxu1  ;;  %v762_v24 = vmul.f32 %v3527_v1, %v666_v58  ;;  %v1442_v16 = vmul.f32 %v1421_v31, %v1346_v19 }
 0x2c9   :  { %930 = vst.msk [vmem:[#allocation3 + $0x28] sm:$0xff] %vm62_vm1, %v913_v3  ;;  %1585 = vst.msk [vmem:[#allocation3 + $0xa0] sm:$0xff] %vm62_vm1, %v1569_v49  ;;  %v1572_v20 = vadd.f32 %v2288_v56, %v1435_v5  ;;  %v1426_v5 = vpop.permute.xlu1 %1425  ;;  %v1347_v49 = vld [vmem:[#allocation3 + $0xf8] sm:$0xff] }
 0x2ca   :  { %v1521_v17 = vpop.f32.mrf.mxu1  ;;  %v1443_v21 = vmul.f32 %v1426_v5, %v1347_v49 }
 0x2cb   :  { %1588 = vst.msk [vmem:[#allocation3 + $0xb8] sm:$0xff] %vm62_vm1, %v1572_v20  ;;  %v1570_v35 = vadd.f32 %v1521_v17, %v1433_v8  ;;  %v760_v8 = vmul.f32 %v3523_v51, %v664_v0  ;;  %v1440_v20 = vmul.f32 %v1411_v60, %v1344_v43  ;;  %v1345_v17 = vld [vmem:[#allocation3 + $0xe8] sm:$0xff] }
 0x2cc   :  { %v1441_v14 = vmul.f32 %v1416_v48, %v1345_v17 }
 0x2cd   :  { %1586 = vst.msk [vmem:[#allocation3 + $0xa8] sm:$0xff] %vm62_vm1, %v1570_v35 }
 0x2d0   :  { %v2259_v40 = vpop.f32.mrf.mxu0 }
 0x2d1   :  { %v918_v27 = vadd.f32 %v2259_v40, %v757_v57 }
 0x2d2   :  { %v877_v29 = vpop.f32.mrf.mxu0 }
 0x2d3   :  { %935 = vst.msk [vmem:[#allocation3 + $0x50] sm:$0xff] %vm62_vm1, %v918_v27  ;;  %v916_v50 = vadd.f32 %v877_v29, %v755_v55 }
 0x2d4   :  { %v2260_v44 = vpop.f32.mrf.mxu0  ;;  %v2291_v25 = vpop.f32.mrf.mxu1 }
 0x2d5   :  { %933 = vst.msk [vmem:[#allocation3 + $0x40] sm:$0xff] %vm62_vm1, %v916_v50  ;;  %v919_v33 = vadd.f32 %v2260_v44, %v758_v32  ;;  %v1575_v45 = vadd.f32 %v2291_v25, %v1438_v36 }
 0x2d6   :  { %v880_v37 = vpop.f32.mrf.mxu0  ;;  %v1534_v42 = vpop.f32.mrf.mxu1 }
 0x2d7   :  { %936 = vst.msk [vmem:[#allocation3 + $0x58] sm:$0xff] %vm62_vm1, %v919_v33  ;;  %1591 = vst.msk [vmem:[#allocation3 + $0xd0] sm:$0xff] %vm62_vm1, %v1575_v45  ;;  %v917_v6 = vadd.f32 %v880_v37, %v756_v46  ;;  %v1573_v52 = vadd.f32 %v1534_v42, %v1436_v34 }
 0x2d8   :  { %v2292_v23 = vpop.f32.mrf.mxu1 }
 0x2d9   :  { %934 = vst.msk [vmem:[#allocation3 + $0x48] sm:$0xff] %vm62_vm1, %v917_v6  ;;  %1589 = vst.msk [vmem:[#allocation3 + $0xc0] sm:$0xff] %vm62_vm1, %v1573_v52  ;;  %v1576_v26 = vadd.f32 %v2292_v23, %v1439_v28 }
 0x2da   :  { %v1537_v4 = vpop.f32.mrf.mxu1 }
 0x2db   :  { %1592 = vst.msk [vmem:[#allocation3 + $0xd8] sm:$0xff] %vm62_vm1, %v1576_v26  ;;  %v1574_v62 = vadd.f32 %v1537_v4, %v1437_v7 }
 0x2dd   :  { %1590 = vst.msk [vmem:[#allocation3 + $0xc8] sm:$0xff] %vm62_vm1, %v1574_v62 }
 0x2e0   :  { %v2263_v30 = vpop.f32.mrf.mxu0 }
 0x2e1   :  { %v922_v41 = vadd.f32 %v2263_v30, %v761_v11 }
 0x2e2   :  { %v893_v9 = vpop.f32.mrf.mxu0 }
 0x2e3   :  { %939 = vst.msk [vmem:[#allocation3 + $0x70] sm:$0xff] %vm62_vm1, %v922_v41  ;;  %v920_v3 = vadd.f32 %v893_v9, %v759_v10 }
 0x2e4   :  { %v2264_v56 = vpop.f32.mrf.mxu0  ;;  %v2295_v47 = vpop.f32.mrf.mxu1 }
 0x2e5   :  { %937 = vst.msk [vmem:[#allocation3 + $0x60] sm:$0xff] %vm62_vm1, %v920_v3  ;;  %v923_v39 = vadd.f32 %v2264_v56, %v762_v24  ;;  %v1579_v38 = vadd.f32 %v2295_v47, %v1442_v16 }
 0x2e6   :  { %v896_v35 = vpop.f32.mrf.mxu0  ;;  %v1550_v22 = vpop.f32.mrf.mxu1 }
 0x2e7   :  { %940 = vst.msk [vmem:[#allocation3 + $0x78] sm:$0xff] %vm62_vm1, %v923_v39  ;;  %1595 = vst.msk [vmem:[#allocation3 + $0xf0] sm:$0xff] %vm62_vm1, %v1579_v38  ;;  %v921_v1 = vadd.f32 %v896_v35, %v760_v8  ;;  %v1577_v2 = vadd.f32 %v1550_v22, %v1440_v20 }
 0x2e8   :  { %v2296_v57 = vpop.f32.mrf.mxu1 }
 0x2e9   :  { %938 = vst.msk [vmem:[#allocation3 + $0x68] sm:$0xff] %vm62_vm1, %v921_v1  ;;  %1593 = vst.msk [vmem:[#allocation3 + $0xe0] sm:$0xff] %vm62_vm1, %v1577_v2  ;;  %v1580_v51 = vadd.f32 %v2296_v57, %v1443_v21 }
 0x2ea   :  { %v1553_v15 = vpop.f32.mrf.mxu1 }
 0x2eb   :  { %1596 = vst.msk [vmem:[#allocation3 + $0xf8] sm:$0xff] %vm62_vm1, %v1580_v51  ;;  %v1578_v18 = vadd.f32 %v1553_v15, %v1441_v14 }
 0x2ed   :  { %1594 = vst.msk [vmem:[#allocation3 + $0xe8] sm:$0xff] %vm62_vm1, %v1578_v18 }
 0x2ee PF:  { %v3572_v40 = vld [vmem:[#allocation3 + $0x10] sm:$0xff]  ;;  %v3574_v55 = vld [vmem:[#allocation3] sm:$0xff]  ;;  %v3576_v27 = vld [vmem:[#allocation3 + $0x18] sm:$0xff]  ;;  %v2547_v54 = vmov 7   ;;  %vm1960_vm0 = vcmask 56320  }
 0x2ef   :  { %2413 = vset.pattern.permute.xlu1 %v2547_v54  ;;  %2412 = vset.pattern.permute.xlu0 %v2547_v54  ;;  %v1634_v59 = vmax.f32 %v3572_v40, 1e-30  ;;  %v1632_v29 = vmax.f32 %v3574_v55, 1e-30  ;;  %v1635_v32 = vmax.f32 %v3576_v27, 1e-30 }
 0x2f0   :  { %v3581_v36 = vld [vmem:[#allocation3 + $0x8] sm:$0xff]  ;;  %v3586_v61 = vld [vmem:[#allocation3 + $0x20] sm:$0xff]  ;;  %v3590_v46 = vld [vmem:[#allocation3 + $0x38] sm:$0xff] }
 0x2f1   :  { %v3583_v53 = vld [vmem:[#allocation3 + $0x28] sm:$0xff]  ;;  %2414 = vrcp.f32 %v1634_v59  ;;  %v1633_v50 = vmax.f32 %v3581_v36, 1e-30  ;;  %v1636_v25 = vmax.f32 %v3586_v61, 1e-30  ;;  %v3592_v34 = vld [vmem:[#allocation3 + $0x30] sm:$0xff] }
 0x2f2   :  { %2416 = vrcp.f32 %v1632_v29  ;;  %v1637_v44 = vmax.f32 %v3583_v53, 1e-30  ;;  %v1639_v33 = vmax.f32 %v3590_v46, 1e-30  ;;  %v1638_v45 = vmax.f32 %v3592_v34, 1e-30 }
 0x2f3   :  { %2418 = vrcp.f32 %v1635_v32  ;;  %v3596_v63 = vld [vmem:[#allocation3 + $0x48] sm:$0xff]  ;;  %v3598_v37 = vld [vmem:[#allocation3 + $0x40] sm:$0xff]  ;;  %v3602_v6 = vld [vmem:[#allocation3 + $0x58] sm:$0xff] }
 0x2f4   :  { %2420 = vrcp.f32 %v1633_v50  ;;  %v1641_v42 = vmax.f32 %v3596_v63, 1e-30  ;;  %v1640_v28 = vmax.f32 %v3598_v37, 1e-30  ;;  %v3604_v52 = vld [vmem:[#allocation3 + $0x50] sm:$0xff]  ;;  %v3608_v62 = vld [vmem:[#allocation3 + $0x68] sm:$0xff] }
 0x2f5   :  { %2422 = vrcp.f32 %v1637_v44  ;;  %v1643_v26 = vmax.f32 %v3602_v6, 1e-30  ;;  %v1642_v4 = vmax.f32 %v3604_v52, 1e-30  ;;  %v3610_v48 = vld [vmem:[#allocation3 + $0x60] sm:$0xff]  ;;  %v3614_v19 = vld [vmem:[#allocation3 + $0x78] sm:$0xff] }
 0x2f6   :  { %2424 = vrcp.f32 %v1636_v25  ;;  %v1645_v12 = vmax.f32 %v3608_v62, 1e-30  ;;  %v1644_v58 = vmax.f32 %v3610_v48, 1e-30  ;;  %v3616_v30 = vld [vmem:[#allocation3 + $0x70] sm:$0xff]  ;;  %v3620_v43 = vld [vmem:[#allocation3 + $0x88] sm:$0xff] }
 0x2f7   :  { %2426 = vrcp.f32 %v1639_v33  ;;  %v1647_v10 = vmax.f32 %v3614_v19, 1e-30  ;;  %v1646_v0 = vmax.f32 %v3616_v30, 1e-30  ;;  %v3622_v24 = vld [vmem:[#allocation3 + $0x80] sm:$0xff]  ;;  %v3626_v49 = vld [vmem:[#allocation3 + $0x98] sm:$0xff] }
 0x2f8   :  { %2428 = vrcp.f32 %v1638_v45  ;;  %v1778_v16 = vmax.f32 %v3620_v43, 1e-30  ;;  %v1777_v3 = vmax.f32 %v3622_v24, 1e-30  ;;  %v3628_v47 = vld [vmem:[#allocation3 + $0x90] sm:$0xff]  ;;  %v3632_v38 = vld [vmem:[#allocation3 + $0xa8] sm:$0xff] }
 0x2f9   :  { %2430 = vrcp.f32 %v1641_v42  ;;  %v1780_v8 = vmax.f32 %v3626_v49, 1e-30  ;;  %v1779_v39 = vmax.f32 %v3628_v47, 1e-30  ;;  %v3634_v35 = vld [vmem:[#allocation3 + $0xa0] sm:$0xff]  ;;  %v3638_v2 = vld [vmem:[#allocation3 + $0xb8] sm:$0xff] }
 0x2fa   :  { %2432 = vrcp.f32 %v1640_v28  ;;  %v1782_v22 = vmax.f32 %v3632_v38, 1e-30  ;;  %v1781_v1 = vmax.f32 %v3634_v35, 1e-30  ;;  %v3640_v14 = vld [vmem:[#allocation3 + $0xb0] sm:$0xff]  ;;  %v3644_v54 = vld [vmem:[#allocation3 + $0xc8] sm:$0xff] }
 0x2fb   :  { %2434 = vrcp.f32 %v1643_v26  ;;  %v1784_v51 = vmax.f32 %v3638_v2, 1e-30  ;;  %v1783_v18 = vmax.f32 %v3640_v14, 1e-30  ;;  %v3646_v29 = vld [vmem:[#allocation3 + $0xc0] sm:$0xff]  ;;  %v3650_v25 = vld [vmem:[#allocation3 + $0xd8] sm:$0xff] }
 0x2fc   :  { %2436 = vrcp.f32 %v1642_v4  ;;  %v1786_v32 = vmax.f32 %v3644_v54, 1e-30  ;;  %v1785_v44 = vmax.f32 %v3646_v29, 1e-30  ;;  %v3652_v45 = vld [vmem:[#allocation3 + $0xd0] sm:$0xff] }
 0x2fd   :  { %2438 = vrcp.f32 %v1645_v12  ;;  %v1788_v42 = vmax.f32 %v3650_v25, 1e-30 }
 0x2fe   :  { %v2415_v23 = vpop.eup %2414  ;;  %2440 = vrcp.f32 %v1644_v58 }
 0x2ff   :  { %v2417_v7 = vpop.eup %2416  ;;  %1676 = vperm.xlu1 %2413, %v2415_v23   ;;  %2442 = vrcp.f32 %v1647_v10  ;;  %v1787_v23 = vmax.f32 %v3652_v45, 1e-30 }
 0x300   :  { %v2419_v60 = vpop.eup %2418  ;;  %1666 = vperm.xlu0 %2412, %v2417_v7   ;;  %2444 = vrcp.f32 %v1646_v0  ;;  %v3656_v7 = vld [vmem:[#allocation3 + $0xe8] sm:$0xff] }
 0x301   :  { %v2421_v13 = vpop.eup %2420  ;;  %2446 = vrcp.f32 %v1778_v16  ;;  %v1790_v4 = vmax.f32 %v3656_v7, 1e-30 }
 0x302   :  { %v2423_v11 = vpop.eup %2422  ;;  %2448 = vrcp.f32 %v1777_v3 }
 0x303   :  { %1681 = vperm.xlu1 %2413, %v2419_v60   ;;  %v2425_v31 = vpop.eup %2424  ;;  %2450 = vrcp.f32 %v1780_v8  ;;  %v3658_v60 = vld [vmem:[#allocation3 + $0xe0] sm:$0xff] }
 0x304   :  { %1671 = vperm.xlu0 %2412, %v2421_v13   ;;  %v2427_v41 = vpop.eup %2426  ;;  %2452 = vrcp.f32 %v1779_v39  ;;  %v1789_v12 = vmax.f32 %v3658_v60, 1e-30 }
 0x305   :  { %v2429_v9 = vpop.eup %2428  ;;  %2454 = vrcp.f32 %v1782_v22 }
 0x306   :  { %v2431_v5 = vpop.eup %2430  ;;  %2456 = vrcp.f32 %v1781_v1 }
 0x307   :  { %1691 = vperm.xlu1 %2413, %v2423_v11   ;;  %v2433_v56 = vpop.eup %2432  ;;  %2458 = vrcp.f32 %v1784_v51  ;;  %v3662_v11 = vld [vmem:[#allocation3 + $0xf8] sm:$0xff] }
 0x308   :  { %1686 = vperm.xlu0 %2412, %v2425_v31   ;;  %v2435_v20 = vpop.eup %2434  ;;  %2460 = vrcp.f32 %v1783_v18  ;;  %v3664_v31 = vld [vmem:[#allocation3 + $0xf0] sm:$0xff]  ;;  %v1792_v10 = vmax.f32 %v3662_v11, 1e-30 }
 0x309   :  { %v2437_v17 = vpop.eup %2436  ;;  %2462 = vrcp.f32 %v1786_v32  ;;  %v1791_v0 = vmax.f32 %v3664_v31, 1e-30 }
 0x30a   :  { %v2439_v21 = vpop.eup %2438  ;;  %2464 = vrcp.f32 %v1785_v44 }
 0x30b   :  { %1701 = vperm.xlu1 %2413, %v2427_v41   ;;  %v2441_v57 = vpop.eup %2440  ;;  %2466 = vrcp.f32 %v1788_v42 }
 0x30c   :  { %1696 = vperm.xlu0 %2412, %v2429_v9   ;;  %v2443_v15 = vpop.eup %2442  ;;  %2468 = vrcp.f32 %v1787_v23 }
 0x30d   :  { %v2445_v59 = vpop.eup %2444  ;;  %2470 = vrcp.f32 %v1790_v4 }
 0x30e   :  { %v2447_v50 = vpop.eup %2446  ;;  %2472 = vrcp.f32 %v1789_v12 }
 0x30f   :  { %1711 = vperm.xlu1 %2413, %v2431_v5   ;;  %v2449_v33 = vpop.eup %2448  ;;  %2474 = vrcp.f32 %v1792_v10 }
 0x310   :  { %1706 = vperm.xlu0 %2412, %v2433_v56   ;;  %v2451_v28 = vpop.eup %2450  ;;  %2476 = vrcp.f32 %v1791_v0 }
 0x311   :  { %v2453_v26 = vpop.eup %2452 }
 0x312   :  { %v2455_v13 = vpop.eup %2454 }
 0x313   :  { %1721 = vperm.xlu1 %2413, %v2435_v20   ;;  %v2457_v58 = vpop.eup %2456 }
 0x314   :  { %1716 = vperm.xlu0 %2412, %v2437_v17   ;;  %v2459_v41 = vpop.eup %2458 }
 0x315   :  { %v2461_v9 = vpop.eup %2460 }
 0x316   :  { %v2463_v16 = vpop.eup %2462 }
 0x317   :  { %1731 = vperm.xlu1 %2413, %v2439_v21   ;;  %v2465_v5 = vpop.eup %2464 }
 0x318   :  { %1726 = vperm.xlu0 %2412, %v2441_v57   ;;  %v2467_v3 = vpop.eup %2466 }
 0x319   :  { %v2469_v56 = vpop.eup %2468 }
 0x31a   :  { %v2471_v8 = vpop.eup %2470 }
 0x31b   :  { %1741 = vperm.xlu1 %2413, %v2443_v15   ;;  %v2473_v20 = vpop.eup %2472 }
 0x31c   :  { %1736 = vperm.xlu0 %2412, %v2445_v59   ;;  %v2475_v39 = vpop.eup %2474 }
 0x31d   :  { %v2477_v17 = vpop.eup %2476 }
 0x31f   :  { %1816 = vperm.xlu1 %2413, %v2447_v50  }
 0x320   :  { %1811 = vperm.xlu0 %2412, %v2449_v33  }
 0x323   :  { %1826 = vperm.xlu1 %2413, %v2451_v28  }
 0x324   :  { %1821 = vperm.xlu0 %2412, %v2453_v26  }
 0x327   :  { %1836 = vperm.xlu1 %2413, %v2455_v13  }
 0x328   :  { %1831 = vperm.xlu0 %2412, %v2457_v58  }
 0x32b   :  { %1846 = vperm.xlu1 %2413, %v2459_v41  }
 0x32c   :  { %1841 = vperm.xlu0 %2412, %v2461_v9  }
 0x32f   :  { %1856 = vperm.xlu1 %2413, %v2463_v16  }
 0x330   :  { %1851 = vperm.xlu0 %2412, %v2465_v5   ;;  %v3687_v5 = vld [vmem:[%s3984_s5] ss:$0 sm:$0xff] }
 0x333   :  { %1866 = vperm.xlu1 %2413, %v2467_v3  }
 0x334   :  { %1861 = vperm.xlu0 %2412, %v2469_v56  }
 0x337   :  { %1876 = vperm.xlu1 %2413, %v2471_v8  }
 0x338   :  { %1871 = vperm.xlu0 %2412, %v2473_v20  }
 0x33b   :  { %1886 = vperm.xlu1 %2413, %v2475_v39  }
 0x33c   :  { %1881 = vperm.xlu0 %2412, %v2477_v17  }
 0x37a   :  { %v1677_v22 = vpop.permute.xlu1 %1676 }
 0x37b   :  { %v1667_v21 = vpop.permute.xlu0 %1666 }
 0x37c   :  { %v1744_v10 = vmul.f32 %v1667_v21, %v3574_v55 }
 0x37e   :  { %v1682_v1 = vpop.permute.xlu1 %1681 }
 0x37f   :  { %v1672_v57 = vpop.permute.xlu0 %1671  ;;  %v1747_v3 = vmul.f32 %v1682_v1, %v3576_v27 }
 0x380   :  { %v1745_v13 = vmul.f32 %v1672_v57, %v3581_v36 }
 0x382   :  { %v1692_v51 = vpop.permute.xlu1 %1691 }
 0x383   :  { %v1687_v15 = vpop.permute.xlu0 %1686  ;;  %v1749_v27 = vmul.f32 %v1692_v51, %v3583_v53 }
 0x386   :  { %v1702_v18 = vpop.permute.xlu1 %1701 }
 0x387   :  { %v1697_v59 = vpop.permute.xlu0 %1696 }
 0x38a   :  { %v1712_v32 = vpop.permute.xlu1 %1711 }
 0x38b   :  { %v1707_v50 = vpop.permute.xlu0 %1706 }
 0x38e   :  { %v3668_v44 = vpop.permute.xlu1 %1721 }
 0x38f   :  { %v3670_v33 = vpop.permute.xlu0 %1716 }
 0x392   :  { %v3672_v42 = vpop.permute.xlu1 %1731 }
 0x393   :  { %v3674_v28 = vpop.permute.xlu0 %1726 }
 0x396   :  { %v3676_v23 = vpop.permute.xlu1 %1741 }
 0x397   :  { %v3678_v26 = vpop.permute.xlu0 %1736 }
 0x39a   :  { %v1817_v4 = vpop.permute.xlu1 %1816 }
 0x39b   :  { %v1890_v12 = vmul.f32 %v1817_v4, %v3620_v43  ;;  %v1812_v58 = vpop.permute.xlu0 %1811  ;;  %v1746_v43 = vmul.f32 %v1677_v22, %v3572_v40 }
 0x39c   :  { %v1889_v41 = vmul.f32 %v1812_v58, %v3622_v24 }
 0x39d   :  { %v1906_v0 = vadd.f32 %v1890_v12, %v1745_v13 }
 0x39e   :  { %v1905_v9 = vadd.f32 %v1889_v41, %v1744_v10  ;;  %v1827_v16 = vpop.permute.xlu1 %1826 }
 0x39f   :  { %v1922_v56 = vmul.f32 0.5, %v1906_v0  ;;  %v1892_v36 = vmul.f32 %v1827_v16, %v3626_v49  ;;  %v1822_v8 = vpop.permute.xlu0 %1821 }
 0x3a0   :  { %v1921_v20 = vmul.f32 0.5, %v1905_v9  ;;  %v1891_v55 = vmul.f32 %v1822_v8, %v3628_v47  ;;  %v1748_v47 = vmul.f32 %v1687_v15, %v3586_v61  ;;  %v1752_v8 = vmul.f32 %v1707_v50, %v3598_v37 }
 0x3a1   :  { %v1908_v24 = vadd.f32 %v1892_v36, %v1747_v3  ;;  %v3694_v39 = vadd.f32 %v3687_v5, %v1922_v56  ;;  %v1753_v36 = vmul.f32 %v1712_v32, %v3596_v63  ;;  %v1755_v37 = vmul.f32 %v3668_v44, %v3602_v6 }
 0x3a2   :  { %v1907_v17 = vadd.f32 %v1891_v55, %v1746_v43  ;;  %v1837_v21 = vpop.permute.xlu1 %1836  ;;  %v3697_v57 = vadd.f32 %v3687_v5, %v1921_v20 }
 0x3a3   :  { %v1924_v1 = vmul.f32 0.5, %v1908_v24  ;;  %v1894_v49 = vmul.f32 %v1837_v21, %v3632_v38  ;;  %v1832_v4 = vpop.permute.xlu0 %1831  ;;  %v1964_v40 = vsel %vm1960_vm0, %v3694_v39, -inf  ;;  %v1751_v38 = vmul.f32 %v1702_v18, %v3590_v46 }
 0x3a4   :  { %v1923_v22 = vmul.f32 0.5, %v1907_v17  ;;  %v1893_v13 = vmul.f32 %v1832_v4, %v3634_v35  ;;  %1965 = vmax.xlane.f32.xlu1 %v1964_v40  ;;  %v1961_v12 = vsel %vm1960_vm0, %v3697_v57, -inf  ;;  %v1750_v35 = vmul.f32 %v1697_v59, %v3592_v34 }
 0x3a5   :  { %v1910_v58 = vadd.f32 %v1894_v49, %v1749_v27  ;;  %1962 = vmax.xlane.f32.xlu0 %v1961_v12  ;;  %v3713_v15 = vadd.f32 %v3687_v5, %v1924_v1  ;;  %v1754_v21 = vmul.f32 %v3670_v33, %v3604_v52  ;;  %v1757_v52 = vmul.f32 %v3672_v42, %v3608_v62 }
 0x3a6   :  { %v1909_v10 = vadd.f32 %v1893_v13, %v1748_v47  ;;  %v1847_v53 = vpop.permute.xlu1 %1846  ;;  %v3708_v51 = vadd.f32 %v3687_v5, %v1923_v22 }
 0x3a7   :  { %v1926_v41 = vmul.f32 0.5, %v1910_v58  ;;  %v1896_v0 = vmul.f32 %v1847_v53, %v3638_v2  ;;  %v1842_v61 = vpop.permute.xlu0 %1841 }
 0x3a8   :  { %v1925_v9 = vmul.f32 0.5, %v1909_v10  ;;  %v1895_v16 = vmul.f32 %v1842_v61, %v3640_v14  ;;  %v1967_v3 = vsel %vm1960_vm0, %v3708_v51, -inf  ;;  %v1970_v14 = vsel %vm1960_vm0, %v3713_v15, -inf }
 0x3a9   :  { %v1912_v56 = vadd.f32 %v1896_v0, %v1751_v38  ;;  %1968 = vmax.xlane.f32.xlu0 %v1967_v3  ;;  %v3728_v59 = vadd.f32 %v3687_v5, %v1926_v41 }
 0x3aa   :  { %v1911_v46 = vadd.f32 %v1895_v16, %v1750_v35  ;;  %v1857_v18 = vpop.permute.xlu1 %1856  ;;  %v3721_v2 = vadd.f32 %v3687_v5, %v1925_v9 }
 0x3ab   :  { %v1898_v43 = vmul.f32 %v1857_v18, %v3644_v54  ;;  %v1852_v34 = vpop.permute.xlu0 %1851  ;;  %v1928_v20 = vmul.f32 0.5, %v1912_v56  ;;  %v1976_v49 = vsel %vm1960_vm0, %v3728_v59, -inf }
 0x3ac   :  { %v1927_v55 = vmul.f32 0.5, %v1911_v46  ;;  %v1897_v63 = vmul.f32 %v1852_v34, %v3646_v29  ;;  %v1973_v32 = vsel %vm1960_vm0, %v3721_v2, -inf }
 0x3ad   :  { %v1914_v24 = vadd.f32 %v1898_v43, %v1753_v36  ;;  %1971 = vmax.xlane.f32.xlu0 %v1970_v14  ;;  %1974 = vmax.xlane.f32.xlu1 %v1973_v32  ;;  %v3747_v44 = vadd.f32 %v3687_v5, %v1928_v20 }
 0x3ae   :  { %v1913_v54 = vadd.f32 %v1897_v63, %v1752_v8  ;;  %v1867_v50 = vpop.permute.xlu1 %1866  ;;  %v3736_v17 = vadd.f32 %v3687_v5, %v1927_v55 }
 0x3af   :  { %v1930_v27 = vmul.f32 0.5, %v1914_v24  ;;  %v1900_v29 = vmul.f32 %v1867_v50, %v3650_v25  ;;  %v1862_v1 = vpop.permute.xlu0 %1861  ;;  %v1982_v62 = vsel %vm1960_vm0, %v3747_v44, -inf }
 0x3b0   :  { %v1929_v4 = vmul.f32 0.5, %v1913_v54  ;;  %v1899_v40 = vmul.f32 %v1862_v1, %v3652_v45  ;;  %v1979_v6 = vsel %vm1960_vm0, %v3736_v17, -inf  ;;  %v1756_v45 = vmul.f32 %v3674_v28, %v3610_v48 }
 0x3b1   :  { %v1916_v47 = vadd.f32 %v1900_v29, %v1755_v37  ;;  %1977 = vmax.xlane.f32.xlu0 %v1976_v49  ;;  %1980 = vmax.xlane.f32.xlu1 %v1979_v6  ;;  %v3758_v10 = vadd.f32 %v3687_v5, %v1930_v27  ;;  %v1759_v48 = vmul.f32 %v3676_v23, %v3614_v19 }
 0x3b2   :  { %v1915_v25 = vadd.f32 %v1899_v40, %v1754_v21  ;;  %v1877_v33 = vpop.permute.xlu1 %1876  ;;  %v3752_v22 = vadd.f32 %v3687_v5, %v1929_v4 }
 0x3b3   :  { %v1932_v13 = vmul.f32 0.5, %v1916_v47  ;;  %v1902_v12 = vmul.f32 %v1877_v33, %v3656_v7  ;;  %v1872_v58 = vpop.permute.xlu0 %1871  ;;  %v1988_v9 = vsel %vm1960_vm0, %v3758_v10, -inf }
 0x3b4   :  { %v1931_v53 = vmul.f32 0.5, %v1915_v25  ;;  %v1901_v38 = vmul.f32 %v1872_v58, %v3658_v60  ;;  %v1985_v42 = vsel %vm1960_vm0, %v3752_v22, -inf  ;;  %v1758_v60 = vmul.f32 %v3678_v26, %v3616_v30 }
 0x3b5   :  { %v1918_v41 = vadd.f32 %v1902_v12, %v1757_v52  ;;  %1983 = vmax.xlane.f32.xlu0 %v1982_v62  ;;  %1986 = vmax.xlane.f32.xlu1 %v1985_v42  ;;  %v3776_v16 = vadd.f32 %v3687_v5, %v1932_v13 }
 0x3b6   :  { %v1917_v7 = vadd.f32 %v1901_v38, %v1756_v45  ;;  %v1887_v28 = vpop.permute.xlu1 %1886  ;;  %v3768_v0 = vadd.f32 %v3687_v5, %v1931_v53 }
 0x3b7   :  { %v1904_v61 = vmul.f32 %v1887_v28, %v3662_v11  ;;  %v1882_v35 = vpop.permute.xlu0 %1881  ;;  %v1934_v3 = vmul.f32 0.5, %v1918_v41  ;;  %v1994_v26 = vsel %vm1960_vm0, %v3776_v16, -inf }
 0x3b8   :  { %v1933_v56 = vmul.f32 0.5, %v1917_v7  ;;  %v1903_v19 = vmul.f32 %v1882_v35, %v3664_v31  ;;  %v1991_v23 = vsel %vm1960_vm0, %v3768_v0, -inf }
 0x3b9   :  { %v1920_v36 = vadd.f32 %v1904_v61, %v1759_v48  ;;  %1989 = vmax.xlane.f32.xlu0 %v1988_v9  ;;  %1992 = vmax.xlane.f32.xlu1 %v1991_v23  ;;  %v3789_v31 = vadd.f32 %v3687_v5, %v1934_v3 }
 0x3ba   :  { %v1919_v30 = vadd.f32 %v1903_v19, %v1758_v60  ;;  %v3782_v11 = vadd.f32 %v3687_v5, %v1933_v56 }
 0x3bb   :  { %v1936_v46 = vmul.f32 0.5, %v1920_v36  ;;  %v2000_v34 = vsel %vm1960_vm0, %v3789_v31, -inf }
 0x3bc   :  { %v1935_v18 = vmul.f32 0.5, %v1919_v30  ;;  %v1997_v8 = vsel %vm1960_vm0, %v3782_v11, -inf }
 0x3bd   :  { %1995 = vmax.xlane.f32.xlu0 %v1994_v26  ;;  %1998 = vmax.xlane.f32.xlu1 %v1997_v8  ;;  %v3799_v20 = vadd.f32 %v3687_v5, %v1936_v46 }
 0x3be   :  { %v3792_v43 = vadd.f32 %v3687_v5, %v1935_v18 }
 0x3bf   :  { %v2006_v55 = vsel %vm1960_vm0, %v3799_v20, -inf }
 0x3c0   :  { %v2003_v14 = vsel %vm1960_vm0, %v3792_v43, -inf }
 0x3c1   :  { %2001 = vmax.xlane.f32.xlu0 %v2000_v34  ;;  %2004 = vmax.xlane.f32.xlu1 %v2003_v14 }
 0x3c5   :  { %2007 = vmax.xlane.f32.xlu0 %v2006_v55 }
 0x42d   :  { %v3803_v63 = vpop.xlane.xlu1 %1965 }
 0x42e   :  { %v2010_v32 = vsub.f32 %v3694_v39, %v3803_v63  ;;  %v3807_v24 = vpop.xlane.xlu0 %1962 }
 0x42f   :  { %v2009_v37 = vsub.f32 %v3697_v57, %v3807_v24 }
 0x430   :  { %v2027_v54 = vmul.f32 1.442695, %v2010_v32 }
 0x431   :  { %v2025_v50 = vmul.f32 1.442695, %v2009_v37 }
 0x432   :  { %2478 = vpow2.f32 %v2027_v54  ;;  %v3811_v5 = vpop.xlane.xlu0 %1968 }
 0x433   :  { %2480 = vpow2.f32 %v2025_v50  ;;  %v2011_v21 = vsub.f32 %v3708_v51, %v3811_v5 }
 0x435   :  { %v2029_v27 = vmul.f32 1.442695, %v2011_v21 }
 0x436   :  { %v3815_v29 = vpop.xlane.xlu1 %1974  ;;  %v3817_v1 = vpop.xlane.xlu0 %1971 }
 0x437   :  { %2482 = vpow2.f32 %v2029_v27  ;;  %v2013_v49 = vsub.f32 %v3721_v2, %v3815_v29  ;;  %v2012_v4 = vsub.f32 %v3713_v15, %v3817_v1 }
 0x439   :  { %v2033_v40 = vmul.f32 1.442695, %v2013_v49  ;;  %v2031_v6 = vmul.f32 1.442695, %v2012_v4 }
 0x43a   :  { %v3823_v47 = vpop.xlane.xlu1 %1980  ;;  %v3825_v52 = vpop.xlane.xlu0 %1977 }
 0x43b   :  { %2484 = vpow2.f32 %v2033_v40  ;;  %v2015_v25 = vsub.f32 %v3736_v17, %v3823_v47  ;;  %v2014_v33 = vsub.f32 %v3728_v59, %v3825_v52 }
 0x43c   :  { %2486 = vpow2.f32 %v2031_v6 }
 0x43d   :  { %v2037_v45 = vmul.f32 1.442695, %v2015_v25  ;;  %v2035_v13 = vmul.f32 1.442695, %v2014_v33 }
 0x43e   :  { %v3831_v12 = vpop.xlane.xlu1 %1986  ;;  %v3833_v58 = vpop.xlane.xlu0 %1983 }
 0x43f   :  { %v2479_v53 = vpop.eup %2478  ;;  %2488 = vpow2.f32 %v2037_v45  ;;  %v2017_v38 = vsub.f32 %v3752_v22, %v3831_v12  ;;  %v2016_v62 = vsub.f32 %v3747_v44, %v3833_v58 }
 0x440   :  { %v2481_v42 = vpop.eup %2480  ;;  %2490 = vpow2.f32 %v2035_v13  ;;  %v2060_v41 = vsel %vm1960_vm0, %v2479_v53, 0.0 }
 0x441   :  { %v2041_v48 = vmul.f32 1.442695, %v2017_v38  ;;  %v2039_v7 = vmul.f32 1.442695, %v2016_v62  ;;  %2061 = vadd.xlane.f32.xlu0 %v2060_v41  ;;  %v2057_v28 = vsel %vm1960_vm0, %v2481_v42, 0.0 }
 0x442   :  { %v3841_v60 = vpop.xlane.xlu1 %1992  ;;  %2058 = vadd.xlane.f32.xlu1 %v2057_v28  ;;  %v3843_v61 = vpop.xlane.xlu0 %1989 }
 0x443   :  { %2492 = vpow2.f32 %v2041_v48  ;;  %v2019_v35 = vsub.f32 %v3768_v0, %v3841_v60  ;;  %v2018_v9 = vsub.f32 %v3758_v10, %v3843_v61 }
 0x444   :  { %v2483_v3 = vpop.eup %2482  ;;  %2494 = vpow2.f32 %v2039_v7 }
 0x445   :  { %v2045_v56 = vmul.f32 1.442695, %v2019_v35  ;;  %v2043_v19 = vmul.f32 1.442695, %v2018_v9  ;;  %v2063_v23 = vsel %vm1960_vm0, %v2483_v3, 0.0 }
 0x446   :  { %v3850_v36 = vpop.xlane.xlu1 %1998  ;;  %2064 = vadd.xlane.f32.xlu1 %v2063_v23  ;;  %v3852_v30 = vpop.xlane.xlu0 %1995 }
 0x447   :  { %2496 = vpow2.f32 %v2045_v56  ;;  %v2021_v26 = vsub.f32 %v3782_v11, %v3850_v36  ;;  %v2020_v46 = vsub.f32 %v3776_v16, %v3852_v30 }
 0x448   :  { %v2485_v18 = vpop.eup %2484  ;;  %2498 = vpow2.f32 %v2043_v19 }
 0x449   :  { %v2487_v8 = vpop.eup %2486  ;;  %v2049_v34 = vmul.f32 1.442695, %v2021_v26  ;;  %v2047_v14 = vmul.f32 1.442695, %v2020_v46  ;;  %v2069_v55 = vsel %vm1960_vm0, %v2485_v18, 0.0 }
 0x44a   :  { %v3859_v32 = vpop.xlane.xlu1 %2004  ;;  %2070 = vadd.xlane.f32.xlu1 %v2069_v55  ;;  %v2066_v37 = vsel %vm1960_vm0, %v2487_v8, 0.0  ;;  %v3862_v54 = vpop.xlane.xlu0 %2001 }
 0x44b   :  { %2500 = vpow2.f32 %v2049_v34  ;;  %v2023_v50 = vsub.f32 %v3792_v43, %v3859_v32  ;;  %2067 = vadd.xlane.f32.xlu0 %v2066_v37  ;;  %v2022_v21 = vsub.f32 %v3789_v31, %v3862_v54 }
 0x44c   :  { %v2489_v27 = vpop.eup %2488  ;;  %2502 = vpow2.f32 %v2047_v14 }
 0x44d   :  { %v2491_v49 = vpop.eup %2490  ;;  %v2053_v4 = vmul.f32 1.442695, %v2023_v50  ;;  %v2051_v40 = vmul.f32 1.442695, %v2022_v21  ;;  %v2075_v6 = vsel %vm1960_vm0, %v2489_v27, 0.0 }
 0x44e   :  { %2076 = vadd.xlane.f32.xlu1 %v2075_v6  ;;  %v2072_v25 = vsel %vm1960_vm0, %v2491_v49, 0.0  ;;  %v3870_v33 = vpop.xlane.xlu0 %2007 }
 0x44f   :  { %2504 = vpow2.f32 %v2053_v4  ;;  %2073 = vadd.xlane.f32.xlu0 %v2072_v25  ;;  %v2024_v45 = vsub.f32 %v3799_v20, %v3870_v33 }
 0x450   :  { %v2493_v13 = vpop.eup %2492  ;;  %2506 = vpow2.f32 %v2051_v40 }
 0x451   :  { %v2495_v53 = vpop.eup %2494  ;;  %v2055_v38 = vmul.f32 1.442695, %v2024_v45  ;;  %v2081_v62 = vsel %vm1960_vm0, %v2493_v13, 0.0 }
 0x452   :  { %2082 = vadd.xlane.f32.xlu1 %v2081_v62  ;;  %v2078_v42 = vsel %vm1960_vm0, %v2495_v53, 0.0 }
 0x453   :  { %2508 = vpow2.f32 %v2055_v38  ;;  %2079 = vadd.xlane.f32.xlu0 %v2078_v42 }
 0x454   :  { %v2497_v41 = vpop.eup %2496 }
 0x455   :  { %v2499_v48 = vpop.eup %2498  ;;  %v2087_v7 = vsel %vm1960_vm0, %v2497_v41, 0.0 }
 0x456   :  { %2088 = vadd.xlane.f32.xlu1 %v2087_v7  ;;  %v2084_v28 = vsel %vm1960_vm0, %v2499_v48, 0.0 }
 0x457   :  { %2085 = vadd.xlane.f32.xlu0 %v2084_v28 }
 0x458   :  { %v2501_v35 = vpop.eup %2500 }
 0x459   :  { %v2503_v9 = vpop.eup %2502  ;;  %v2093_v3 = vsel %vm1960_vm0, %v2501_v35, 0.0 }
 0x45a   :  { %2094 = vadd.xlane.f32.xlu1 %v2093_v3  ;;  %v2090_v56 = vsel %vm1960_vm0, %v2503_v9, 0.0 }
 0x45b   :  { %2091 = vadd.xlane.f32.xlu0 %v2090_v56 }
 0x45c   :  { %v2505_v19 = vpop.eup %2504 }
 0x45d   :  { %v2507_v23 = vpop.eup %2506  ;;  %v2099_v26 = vsel %vm1960_vm0, %v2505_v19, 0.0 }
 0x45e   :  { %2100 = vadd.xlane.f32.xlu1 %v2099_v26  ;;  %v2096_v46 = vsel %vm1960_vm0, %v2507_v23, 0.0 }
 0x45f   :  { %2097 = vadd.xlane.f32.xlu0 %v2096_v46 }
 0x460   :  { %v2509_v18 = vpop.eup %2508 }
 0x461   :  { %v2102_v8 = vsel %vm1960_vm0, %v2509_v18, 0.0 }
 0x463   :  { %2103 = vadd.xlane.f32.xlu0 %v2102_v8 }
 0x4ca   :  { %v2062_v34 = vpop.xlane.xlu0 %2061 }
 0x4cb   :  { %v2059_v14 = vpop.xlane.xlu1 %2058  ;;  %2510 = vlog2.f32 %v2062_v34 }
 0x4cc   :  { %2512 = vlog2.f32 %v2059_v14 }
 0x4cf   :  { %v2065_v55 = vpop.xlane.xlu1 %2064 }
 0x4d0   :  { %2514 = vlog2.f32 %v2065_v55 }
 0x4d3   :  { %v2071_v37 = vpop.xlane.xlu1 %2070 }
 0x4d4   :  { %2516 = vlog2.f32 %v2071_v37  ;;  %v2068_v50 = vpop.xlane.xlu0 %2067 }
 0x4d5   :  { %2518 = vlog2.f32 %v2068_v50 }
 0x4d7   :  { %v2077_v21 = vpop.xlane.xlu1 %2076 }
 0x4d8   :  { %v2511_v27 = vpop.eup %2510  ;;  %2520 = vlog2.f32 %v2077_v21  ;;  %v2074_v49 = vpop.xlane.xlu0 %2073 }
 0x4d9   :  { %v2513_v4 = vpop.eup %2512  ;;  %v2108_v40 = vmul.f32 0.6931472, %v2511_v27  ;;  %2522 = vlog2.f32 %v2074_v49 }
 0x4da   :  { %v2106_v6 = vmul.f32 0.6931472, %v2513_v4 }
 0x4db   :  { %v2138_v25 = vadd.f32 %v2108_v40, %v3803_v63  ;;  %v2083_v45 = vpop.xlane.xlu1 %2082 }
 0x4dc   :  { %v2137_v13 = vadd.f32 %v2106_v6, %v3807_v24  ;;  %2524 = vlog2.f32 %v2083_v45  ;;  %v2080_v53 = vpop.xlane.xlu0 %2079 }
 0x4dd   :  { %v2515_v38 = vpop.eup %2514  ;;  %v2154_v62 = vsub.f32 %v3694_v39, %v2138_v25  ;;  %2526 = vlog2.f32 %v2080_v53 }
 0x4de   :  { %v2153_v42 = vsub.f32 %v3697_v57, %v2137_v13  ;;  %v2110_v41 = vmul.f32 0.6931472, %v2515_v38 }
 0x4df   :  { %2170 = vst.msk [vmem:[%s3985_s6 + $0x8] sm:$0xff] %vm1960_vm0, %v2154_v62  ;;  %v2089_v48 = vpop.xlane.xlu1 %2088 }
 0x4e0   :  { %2169 = vst.msk [vmem:[%s3985_s6] sm:$0xff] %vm1960_vm0, %v2153_v42  ;;  %v2139_v63 = vadd.f32 %v2110_v41, %v3811_v5  ;;  %2528 = vlog2.f32 %v2089_v48  ;;  %v2086_v24 = vpop.xlane.xlu0 %2085 }
 0x4e1   :  { %v2517_v39 = vpop.eup %2516  ;;  %2530 = vlog2.f32 %v2086_v24 }
 0x4e2   :  { %v2519_v7 = vpop.eup %2518  ;;  %v2155_v57 = vsub.f32 %v3708_v51, %v2139_v63  ;;  %v2114_v28 = vmul.f32 0.6931472, %v2517_v39 }
 0x4e3   :  { %v2112_v35 = vmul.f32 0.6931472, %v2519_v7  ;;  %v2095_v9 = vpop.xlane.xlu1 %2094 }
 0x4e4   :  { %2171 = vst.msk [vmem:[%s3985_s6 + $0x10] sm:$0xff] %vm1960_vm0, %v2155_v57  ;;  %v2141_v3 = vadd.f32 %v2114_v28, %v3815_v29  ;;  %2532 = vlog2.f32 %v2095_v9  ;;  %v2092_v56 = vpop.xlane.xlu0 %2091 }
 0x4e5   :  { %v2521_v5 = vpop.eup %2520  ;;  %v2140_v19 = vadd.f32 %v2112_v35, %v3817_v1  ;;  %2534 = vlog2.f32 %v2092_v56 }
 0x4e6   :  { %v2523_v23 = vpop.eup %2522  ;;  %v2157_v26 = vsub.f32 %v3721_v2, %v2141_v3  ;;  %v2118_v51 = vmul.f32 0.6931472, %v2521_v5 }
 0x4e7   :  { %v2156_v46 = vsub.f32 %v3713_v15, %v2140_v19  ;;  %v2116_v18 = vmul.f32 0.6931472, %v2523_v23  ;;  %v2101_v8 = vpop.xlane.xlu1 %2100 }
 0x4e8   :  { %2173 = vst.msk [vmem:[%s3985_s6 + $0x20] sm:$0xff] %vm1960_vm0, %v2157_v26  ;;  %v2143_v29 = vadd.f32 %v2118_v51, %v3823_v47  ;;  %2536 = vlog2.f32 %v2101_v8  ;;  %v2098_v34 = vpop.xlane.xlu0 %2097 }
 0x4e9   :  { %v2525_v14 = vpop.eup %2524  ;;  %2172 = vst.msk [vmem:[%s3985_s6 + $0x18] sm:$0xff] %vm1960_vm0, %v2156_v46  ;;  %v2142_v2 = vadd.f32 %v2116_v18, %v3825_v52  ;;  %2538 = vlog2.f32 %v2098_v34 }
 0x4ea   :  { %v2527_v15 = vpop.eup %2526  ;;  %v2159_v1 = vsub.f32 %v3736_v17, %v2143_v29  ;;  %v2122_v55 = vmul.f32 0.6931472, %v2525_v14 }
 0x4eb   :  { %v2158_v37 = vsub.f32 %v3728_v59, %v2142_v2  ;;  %v2120_v50 = vmul.f32 0.6931472, %v2527_v15 }
 0x4ec   :  { %2175 = vst.msk [vmem:[%s3985_s6 + $0x30] sm:$0xff] %vm1960_vm0, %v2159_v1  ;;  %v2145_v47 = vadd.f32 %v2122_v55, %v3831_v12  ;;  %v2104_v21 = vpop.xlane.xlu0 %2103 }
 0x4ed   :  { %v2529_v27 = vpop.eup %2528  ;;  %2174 = vst.msk [vmem:[%s3985_s6 + $0x28] sm:$0xff] %vm1960_vm0, %v2158_v37  ;;  %v2144_v17 = vadd.f32 %v2120_v50, %v3833_v58  ;;  %2540 = vlog2.f32 %v2104_v21 }
 0x4ee   :  { %v2531_v52 = vpop.eup %2530  ;;  %v2161_v59 = vsub.f32 %v3752_v22, %v2145_v47  ;;  %v2126_v49 = vmul.f32 0.6931472, %v2529_v27 }
 0x4ef   :  { %v2160_v4 = vsub.f32 %v3747_v44, %v2144_v17  ;;  %v2124_v40 = vmul.f32 0.6931472, %v2531_v52 }
 0x4f0   :  { %2177 = vst.msk [vmem:[%s3985_s6 + $0x40] sm:$0xff] %vm1960_vm0, %v2161_v59  ;;  %v2147_v12 = vadd.f32 %v2126_v49, %v3841_v60 }
 0x4f1   :  { %v2533_v6 = vpop.eup %2532  ;;  %2176 = vst.msk [vmem:[%s3985_s6 + $0x38] sm:$0xff] %vm1960_vm0, %v2160_v4  ;;  %v2146_v58 = vadd.f32 %v2124_v40, %v3843_v61 }
 0x4f2   :  { %v2535_v22 = vpop.eup %2534  ;;  %v2163_v25 = vsub.f32 %v3768_v0, %v2147_v12  ;;  %v2130_v44 = vmul.f32 0.6931472, %v2533_v6 }
 0x4f3   :  { %v2162_v45 = vsub.f32 %v3758_v10, %v2146_v58  ;;  %v2128_v13 = vmul.f32 0.6931472, %v2535_v22 }
 0x4f4   :  { %2179 = vst.msk [vmem:[%s3985_s6 + $0x50] sm:$0xff] %vm1960_vm0, %v2163_v25  ;;  %v2149_v60 = vadd.f32 %v2130_v44, %v3850_v36 }
 0x4f5   :  { %v2537_v53 = vpop.eup %2536  ;;  %2178 = vst.msk [vmem:[%s3985_s6 + $0x48] sm:$0xff] %vm1960_vm0, %v2162_v45  ;;  %v2148_v61 = vadd.f32 %v2128_v13, %v3852_v30 }
 0x4f6   :  { %v2539_v0 = vpop.eup %2538  ;;  %v2165_v38 = vsub.f32 %v3782_v11, %v2149_v60  ;;  %v2134_v10 = vmul.f32 0.6931472, %v2537_v53 }
 0x4f7   :  { %v2164_v62 = vsub.f32 %v3776_v16, %v2148_v61  ;;  %v2132_v42 = vmul.f32 0.6931472, %v2539_v0 }
 0x4f8   :  { %2181 = vst.msk [vmem:[%s3985_s6 + $0x60] sm:$0xff] %vm1960_vm0, %v2165_v38  ;;  %v2151_v36 = vadd.f32 %v2134_v10, %v3859_v32 }
 0x4f9   :  { %2180 = vst.msk [vmem:[%s3985_s6 + $0x58] sm:$0xff] %vm1960_vm0, %v2164_v62  ;;  %v2150_v30 = vadd.f32 %v2132_v42, %v3862_v54 }
 0x4fa   :  { %v2541_v41 = vpop.eup %2540  ;;  %v2167_v11 = vsub.f32 %v3792_v43, %v2151_v36 }
 0x4fb   :  { %v2166_v16 = vsub.f32 %v3789_v31, %v2150_v30  ;;  %v2136_v48 = vmul.f32 0.6931472, %v2541_v41 }
 0x4fc   :  { %2183 = vst.msk [vmem:[%s3985_s6 + $0x70] sm:$0xff] %vm1960_vm0, %v2167_v11 }
 0x4fd   :  { %2182 = vst.msk [vmem:[%s3985_s6 + $0x68] sm:$0xff] %vm1960_vm0, %v2166_v16  ;;  %v2152_v32 = vadd.f32 %v2136_v48, %v3870_v33 }
 0x4ff   :  { %v2168_v54 = vsub.f32 %v3799_v20, %v2152_v32 }
 0x501   :  { %2184 = vst.msk [vmem:[%s3985_s6 + $0x78] sm:$0xff] %vm1960_vm0, %v2168_v54 }

// kernel: gat_forward.5
= control target key start
LH: loop header
LB: loop body
LE: loop exit
PB: predicated region body
PF: predicated region fallthrough
CT: control target
= control target key end

     0   :  { %vm29_vm0 = vcmask 7168   ;;  %vm62_vm1 = vcmask 138240   ;;  %v2336_v0 = vmov -1e+30   ;;  %v2337_v1 = vmov 0.0   ;;  %s3654_s0 = inlined_call_operand.<no memory space> [shape: s32[1], index: 0, kind: input, shape index: {}]   ;;  %s3655_s1 = inlined_call_operand.vmem [shape: bf16[128,34], index: 1, kind: input, shape index: {}]   ;;  %s3656_s2 = inlined_call_operand.vmem [shape: f32[2,128], index: 2, kind: input, shape index: {}]   ;;  %s3657_s3 = inlined_call_operand.vmem [shape: f32[128,2], index: 3, kind: input, shape index: {}]   ;;  %s3658_s4 = inlined_call_operand.vmem [shape: s8[128,128], index: 4, kind: input, shape index: {}]   ;;  %s3659_s5 = inlined_call_operand.vmem [shape: f32[1,32], index: 5, kind: input, shape index: {}]   ;;  %s3660_s6 = inlined_call_operand.vmem [shape: f32[128,32], index: 6, kind: output, shape index: {}]  }
   0x1   :  { %30 = vst.msk [vmem:[#allocation2] sm:$0xff] %vm29_vm0, %v2336_v0  ;;  %31 = vst.msk [vmem:[#allocation2 + $0x8] sm:$0xff] %vm29_vm0, %v2336_v0  ;;  %p2048_p0 = scmp.le.s32.totalorder %s3654_s0, 0 }
   0x2   :  { %32 = vst.msk [vmem:[#allocation2 + $0x10] sm:$0xff] %vm29_vm0, %v2336_v0  ;;  %33 = vst.msk [vmem:[#allocation2 + $0x18] sm:$0xff] %vm29_vm0, %v2336_v0 }
   0x3   :  { %34 = vst.msk [vmem:[#allocation2 + $0x20] sm:$0xff] %vm29_vm0, %v2336_v0  ;;  %35 = vst.msk [vmem:[#allocation2 + $0x28] sm:$0xff] %vm29_vm0, %v2336_v0 }
   0x4   :  { %36 = vst.msk [vmem:[#allocation2 + $0x30] sm:$0xff] %vm29_vm0, %v2336_v0  ;;  %37 = vst.msk [vmem:[#allocation2 + $0x38] sm:$0xff] %vm29_vm0, %v2336_v0 }
   0x5   :  { %38 = vst.msk [vmem:[#allocation2 + $0x40] sm:$0xff] %vm29_vm0, %v2336_v0  ;;  %39 = vst.msk [vmem:[#allocation2 + $0x48] sm:$0xff] %vm29_vm0, %v2336_v0 }
   0x6   :  { %40 = vst.msk [vmem:[#allocation2 + $0x50] sm:$0xff] %vm29_vm0, %v2336_v0  ;;  %41 = vst.msk [vmem:[#allocation2 + $0x58] sm:$0xff] %vm29_vm0, %v2336_v0 }
   0x7   :  { %42 = vst.msk [vmem:[#allocation2 + $0x60] sm:$0xff] %vm29_vm0, %v2336_v0  ;;  %43 = vst.msk [vmem:[#allocation2 + $0x68] sm:$0xff] %vm29_vm0, %v2336_v0 }
   0x8   :  { %44 = vst.msk [vmem:[#allocation2 + $0x70] sm:$0xff] %vm29_vm0, %v2336_v0  ;;  %45 = vst.msk [vmem:[#allocation2 + $0x78] sm:$0xff] %vm29_vm0, %v2336_v0 }
   0x9   :  { %46 = vst.msk [vmem:[#allocation2 + $0x80] sm:$0xff] %vm29_vm0, %v2336_v0  ;;  %47 = vst.msk [vmem:[#allocation2 + $0x88] sm:$0xff] %vm29_vm0, %v2336_v0 }
   0xa   :  { %48 = vst.msk [vmem:[#allocation2 + $0x90] sm:$0xff] %vm29_vm0, %v2336_v0  ;;  %49 = vst.msk [vmem:[#allocation2 + $0x98] sm:$0xff] %vm29_vm0, %v2336_v0 }
   0xb   :  { %50 = vst.msk [vmem:[#allocation2 + $0xa0] sm:$0xff] %vm29_vm0, %v2336_v0  ;;  %51 = vst.msk [vmem:[#allocation2 + $0xa8] sm:$0xff] %vm29_vm0, %v2336_v0 }
   0xc   :  { %52 = vst.msk [vmem:[#allocation2 + $0xb0] sm:$0xff] %vm29_vm0, %v2336_v0  ;;  %53 = vst.msk [vmem:[#allocation2 + $0xb8] sm:$0xff] %vm29_vm0, %v2336_v0 }
   0xd   :  { %54 = vst.msk [vmem:[#allocation2 + $0xc0] sm:$0xff] %vm29_vm0, %v2336_v0  ;;  %55 = vst.msk [vmem:[#allocation2 + $0xc8] sm:$0xff] %vm29_vm0, %v2336_v0 }
   0xe   :  { %56 = vst.msk [vmem:[#allocation2 + $0xd0] sm:$0xff] %vm29_vm0, %v2336_v0  ;;  %57 = vst.msk [vmem:[#allocation2 + $0xd8] sm:$0xff] %vm29_vm0, %v2336_v0 }
   0xf   :  { %58 = vst.msk [vmem:[#allocation2 + $0xe0] sm:$0xff] %vm29_vm0, %v2336_v0  ;;  %59 = vst.msk [vmem:[#allocation2 + $0xe8] sm:$0xff] %vm29_vm0, %v2336_v0 }
  0x10   :  { %60 = vst.msk [vmem:[#allocation2 + $0xf0] sm:$0xff] %vm29_vm0, %v2336_v0  ;;  %61 = vst.msk [vmem:[#allocation2 + $0xf8] sm:$0xff] %vm29_vm0, %v2336_v0 }
  0x11   :  { %63 = vst.msk [vmem:[#allocation3] sm:$0xff] %vm62_vm1, %v2337_v1  ;;  %64 = vst.msk [vmem:[#allocation3 + $0x8] sm:$0xff] %vm62_vm1, %v2337_v1 }
  0x12   :  { %65 = vst.msk [vmem:[#allocation3 + $0x10] sm:$0xff] %vm62_vm1, %v2337_v1  ;;  %66 = vst.msk [vmem:[#allocation3 + $0x18] sm:$0xff] %vm62_vm1, %v2337_v1 }
  0x13   :  { %67 = vst.msk [vmem:[#allocation3 + $0x20] sm:$0xff] %vm62_vm1, %v2337_v1  ;;  %68 = vst.msk [vmem:[#allocation3 + $0x28] sm:$0xff] %vm62_vm1, %v2337_v1 }
  0x14   :  { %69 = vst.msk [vmem:[#allocation3 + $0x30] sm:$0xff] %vm62_vm1, %v2337_v1  ;;  %70 = vst.msk [vmem:[#allocation3 + $0x38] sm:$0xff] %vm62_vm1, %v2337_v1 }
  0x15   :  { %71 = vst.msk [vmem:[#allocation3 + $0x40] sm:$0xff] %vm62_vm1, %v2337_v1  ;;  %72 = vst.msk [vmem:[#allocation3 + $0x48] sm:$0xff] %vm62_vm1, %v2337_v1 }
  0x16   :  { %73 = vst.msk [vmem:[#allocation3 + $0x50] sm:$0xff] %vm62_vm1, %v2337_v1  ;;  %74 = vst.msk [vmem:[#allocation3 + $0x58] sm:$0xff] %vm62_vm1, %v2337_v1 }
  0x17   :  { %75 = vst.msk [vmem:[#allocation3 + $0x60] sm:$0xff] %vm62_vm1, %v2337_v1  ;;  %76 = vst.msk [vmem:[#allocation3 + $0x68] sm:$0xff] %vm62_vm1, %v2337_v1 }
  0x18   :  { %77 = vst.msk [vmem:[#allocation3 + $0x70] sm:$0xff] %vm62_vm1, %v2337_v1  ;;  %78 = vst.msk [vmem:[#allocation3 + $0x78] sm:$0xff] %vm62_vm1, %v2337_v1 }
  0x19   :  { %79 = vst.msk [vmem:[#allocation3 + $0x80] sm:$0xff] %vm62_vm1, %v2337_v1  ;;  %80 = vst.msk [vmem:[#allocation3 + $0x88] sm:$0xff] %vm62_vm1, %v2337_v1 }
  0x1a   :  { %81 = vst.msk [vmem:[#allocation3 + $0x90] sm:$0xff] %vm62_vm1, %v2337_v1  ;;  %82 = vst.msk [vmem:[#allocation3 + $0x98] sm:$0xff] %vm62_vm1, %v2337_v1 }
  0x1b   :  { %83 = vst.msk [vmem:[#allocation3 + $0xa0] sm:$0xff] %vm62_vm1, %v2337_v1  ;;  %84 = vst.msk [vmem:[#allocation3 + $0xa8] sm:$0xff] %vm62_vm1, %v2337_v1 }
  0x1c   :  { %85 = vst.msk [vmem:[#allocation3 + $0xb0] sm:$0xff] %vm62_vm1, %v2337_v1  ;;  %86 = vst.msk [vmem:[#allocation3 + $0xb8] sm:$0xff] %vm62_vm1, %v2337_v1  ;;  %100 = sbr.rel (%p2048_p0) target bundleno = 750 (0x2ee), region = 29 }
  0x1d   :  { %87 = vst.msk [vmem:[#allocation3 + $0xc0] sm:$0xff] %vm62_vm1, %v2337_v1  ;;  %88 = vst.msk [vmem:[#allocation3 + $0xc8] sm:$0xff] %vm62_vm1, %v2337_v1 }
  0x1e   :  { %89 = vst.msk [vmem:[#allocation3 + $0xd0] sm:$0xff] %vm62_vm1, %v2337_v1  ;;  %90 = vst.msk [vmem:[#allocation3 + $0xd8] sm:$0xff] %vm62_vm1, %v2337_v1 }
  0x1f   :  { %91 = vst.msk [vmem:[#allocation3 + $0xe0] sm:$0xff] %vm62_vm1, %v2337_v1  ;;  %92 = vst.msk [vmem:[#allocation3 + $0xe8] sm:$0xff] %vm62_vm1, %v2337_v1 }
  0x20   :  { %93 = vst.msk [vmem:[#allocation3 + $0xf0] sm:$0xff] %vm62_vm1, %v2337_v1  ;;  %94 = vst.msk [vmem:[#allocation3 + $0xf8] sm:$0xff] %vm62_vm1, %v2337_v1 }
  0x21   :  { %v139_v2 = vld [vmem:[%s3657_s3 + $0x40] sm:$0xff]  ;;  %v133_v3 = vld [vmem:[%s3657_s3 + $0x10] sm:$0xff]  ;;  %v2338_v4 = vmov 1   ;;  %v2339_v5 = vmov 0   ;;  %v134_v6 = vld [vmem:[%s3657_s3 + $0x18] sm:$0xff]  ;;  %v227_v25 = vlaneseq }
  0x22   :  { %2163 = vset.pattern.permute.xlu0 %v2338_v4  ;;  %2161 = vset.pattern.permute.xlu1 %v2339_v5  ;;  %v131_v7 = vld [vmem:[%s3657_s3] sm:$0xff]  ;;  %v136_v8 = vld [vmem:[%s3657_s3 + $0x28] sm:$0xff]  ;;  %v138_v10 = vld [vmem:[%s3657_s3 + $0x38] sm:$0xff] }
  0x23   :  { %991 = vperm.xlu0 %2163, %v139_v2   ;;  %159 = vperm.xlu1 %2161, %v133_v3   ;;  %v132_v9 = vld [vmem:[%s3657_s3 + $0x8] sm:$0xff]  ;;  %v135_v11 = vld [vmem:[%s3657_s3 + $0x20] sm:$0xff]  ;;  %v137_v13 = vld [vmem:[%s3657_s3 + $0x30] sm:$0xff]  ;;  %v2504_v28 = vshrl.u32 %v227_v25, 7 }
  0x24   :  { %v140_v12 = vld [vmem:[%s3657_s3 + $0x48] sm:$0xff]  ;;  %v142_v14 = vld [vmem:[%s3657_s3 + $0x58] sm:$0xff]  ;;  %v141_v16 = vld [vmem:[%s3657_s3 + $0x50] sm:$0xff] }
  0x25   :  { %v144_v15 = vld [vmem:[%s3657_s3 + $0x68] sm:$0xff]  ;;  %v146_v17 = vld [vmem:[%s3657_s3 + $0x78] sm:$0xff]  ;;  %v143_v18 = vld [vmem:[%s3657_s3 + $0x60] sm:$0xff]  ;;  %v229_v31 = vsub.s32 0, %v2504_v28 }
  0x26   :  { %v145_v19 = vld [vmem:[%s3657_s3 + $0x70] sm:$0xff]  ;;  %v101_v20 = vld [vmem:[%s3658_s4] sm:$0xff]  ;;  %v2509_v29 = vld [vmem:[%s3655_s1 + $0x38] sm:$0xff]  }
  0x27   :  { %2164 = vset.pattern.permute.xlu0 %v2339_v5  ;;  %164 = vperm.xlu1 %2161, %v134_v6   ;;  %vm105_vm2 = vnez %v101_v20  ;;  %v2519_v34 = vld [vmem:[%s3655_s1 + $0x30] sm:$0xff]   ;;  %v130_v35 = vld [vmem:[%s3656_s2] sm:$0x3]  ;;  %v2535_v39 = vld [vmem:[%s3655_s1 + $0x28] sm:$0xff]  }
  0x28   :  { %149 = vperm.xlu0 %2164, %v131_v7   ;;  %v2500_v21 = vsel %vm105_vm2, 16843009, %v2339_v5  ;;  %2090 = vmatprep.subr.bf16.mxu0 %v2509_v29  ;;  %v2528_v37 = vrot.slane %v130_v35, %v229_v31  ;;  %v2546_v46 = vld [vmem:[%s3655_s1 + $0x20] sm:$0xff]   ;;  %v2564_v55 = vld [vmem:[%s3655_s1 + $0x18] sm:$0xff]   ;;  %v2582_v60 = vld [vmem:[%s3655_s1 + $0x10] sm:$0xff]  }
  0x29   :  { %v283_v22 = vunpack.c.0.s8 %v2500_v21  ;;  %v284_v24 = vunpack.c.1.s8 %v2500_v21  ;;  %2091 = vmatpush3.bf16.msra.mxu0 %v2509_v29  ;;  %v285_v62 = vunpack.c.2.s8 %v2500_v21  ;;  %v102_v63 = vld [vmem:[%s3658_s4 + $0x8] sm:$0xff]  ;;  %v286_v0 = vunpack.c.3.s8 %v2500_v21  ;;  %v103_v20 = vld [vmem:[%s3658_s4 + $0x10] sm:$0xff] }
  0x2a   :  { %2092 = vmatprep.subr.bf16.mxu0 %v2519_v34  ;;  %vm106_vm7 = vnez %v102_v63  ;;  %v2598_v1 = vld [vmem:[%s3655_s1 + $0x8] sm:$0xff]   ;;  %vm107_vm10 = vnez %v103_v20 }
  0x2b   :  { %174 = vperm.xlu1 %2161, %v136_v8   ;;  %v299_v23 = vpack.c.b16 %v283_v22, %v283_v22  ;;  %v301_v27 = vpack.c.b16 %v284_v24, %v284_v24 }
  0x2c   :  { %154 = vperm.xlu0 %2164, %v132_v9  }
  0x2d   :  { %v300_v26 = vpack.c.b8 %v299_v23, %v299_v23  ;;  %v302_v30 = vpack.c.b8 %v301_v27, %v301_v27  ;;  %2093 = vmatpush3.bf16.msra.mxu0 %v2519_v34 }
  0x2e   :  { %2094 = vmatprep.subr.bf16.mxu0 %v2535_v39 }
  0x2f   :  { %184 = vperm.xlu1 %2161, %v138_v10   ;;  %vm331_vm3 = vnez %v300_v26  ;;  %vm332_vm4 = vnez %v302_v30 }
  0x30   :  { %169 = vperm.xlu0 %2164, %v135_v11   ;;  %v347_v36 = vsel %vm331_vm3, 16843009, %v2339_v5  ;;  %v348_v43 = vsel %vm332_vm4, 16843009, %v2339_v5 }
  0x31   :  { %v363_v41 = vunpack.c.0.s8 %v347_v36  ;;  %v364_v49 = vunpack.c.0.s8 %v348_v43  ;;  %2095 = vmatpush3.bf16.msra.mxu0 %v2535_v39 }
  0x32   :  { %2096 = vmatprep.subr.bf16.mxu0 %v2546_v46 }
  0x33   :  { %194 = vperm.xlu1 %2161, %v140_v12   ;;  %vm2548_vm5 = vcmp.ne.s32.totalorder %v363_v41, 0  ;;  %vm2567_vm6 = vcmp.ne.s32.totalorder %v364_v49, 0 }
  0x34   :  { %179 = vperm.xlu0 %2164, %v137_v13  }
  0x35   :  { %2097 = vmatpush3.bf16.msra.mxu0 %v2546_v46 }
  0x36   :  { %2098 = vmatprep.subr.bf16.mxu0 %v2564_v55 }
  0x37   :  { %204 = vperm.xlu1 %2161, %v142_v14  }
  0x38   :  { %189 = vperm.xlu0 %2164, %v139_v2  }
  0x39   :  { %2099 = vmatpush3.bf16.msra.mxu0 %v2564_v55 }
  0x3a   :  { %2100 = vmatprep.subr.bf16.mxu0 %v2582_v60 }
  0x3b   :  { %214 = vperm.xlu1 %2161, %v144_v15  }
  0x3c   :  { %199 = vperm.xlu0 %2164, %v141_v16  }
  0x3d   :  { %2101 = vmatpush3.bf16.msra.mxu0 %v2582_v60 }
  0x3e   :  { %2102 = vmatprep.subr.bf16.mxu0 %v2598_v1 }
  0x3f   :  { %224 = vperm.xlu1 %2161, %v146_v17  }
  0x40   :  { %209 = vperm.xlu0 %2164, %v143_v18  }
  0x41   :  { %2103 = vmatpush3.bf16.msra.mxu0 %v2598_v1 }
  0x43   :  { %2162 = vset.pattern.permute.xlu1 %v2338_v4  ;;  %v2605_v4 = vld [vmem:[%s3655_s1] sm:$0xff]  }
  0x44   :  { %219 = vperm.xlu0 %2164, %v145_v19   ;;  %959 = vperm.xlu1 %2162, %v131_v7   ;;  %v280_v7 = vsel %vm106_vm7, 16843009, %v2339_v5 }
  0x45   :  { %2104 = vmatprep.subr.bf16.mxu0 %v2605_v4  ;;  %v289_v24 = vunpack.c.2.s8 %v280_v7 }
  0x46   :  { %2105 = vmatpush3.bf16.msra.mxu0 %v2605_v4 }
  0x48   :  { %963 = vperm.xlu1 %2162, %v132_v9   ;;  %v1024_v9 = vsub.s32 1, %v2504_v28 }
  0x4c   :  { %967 = vperm.xlu1 %2162, %v133_v3   ;;  %v303_v3 = vpack.c.b16 %v285_v62, %v285_v62 }
  0x50   :  { %971 = vperm.xlu1 %2162, %v134_v6   ;;  %v305_v6 = vpack.c.b16 %v286_v0, %v286_v0 }
  0x54   :  { %975 = vperm.xlu1 %2162, %v135_v11   ;;  %v304_v11 = vpack.c.b8 %v303_v3, %v303_v3 }
  0x56   :  { %vm333_vm8 = vnez %v304_v11 }
  0x57   :  { %v349_v22 = vsel %vm333_vm8, 16843009, %v2339_v5 }
  0x58   :  { %979 = vperm.xlu1 %2162, %v136_v8   ;;  %v287_v8 = vunpack.c.0.s8 %v280_v7 }
  0x5c   :  { %983 = vperm.xlu1 %2162, %v137_v13   ;;  %v306_v13 = vpack.c.b8 %v305_v6, %v305_v6 }
  0x5e   :  { %vm334_vm9 = vnez %v306_v13 }
  0x5f   :  { %v350_v36 = vsel %vm334_vm9, 16843009, %v2339_v5 }
  0x60   :  { %987 = vperm.xlu1 %2162, %v138_v10  }
  0x64   :  { %995 = vperm.xlu1 %2162, %v140_v12   ;;  %v288_v12 = vunpack.c.1.s8 %v280_v7 }
  0x68   :  { %999 = vperm.xlu1 %2162, %v141_v16  }
  0x6c   :  { %1003 = vperm.xlu1 %2162, %v142_v14   ;;  %v307_v14 = vpack.c.b16 %v287_v8, %v287_v8 }
  0x6e   :  { %v308_v23 = vpack.c.b8 %v307_v14, %v307_v14 }
  0x70   :  { %1007 = vperm.xlu1 %2162, %v143_v18   ;;  %v290_v18 = vunpack.c.3.s8 %v280_v7  ;;  %vm335_vm11 = vnez %v308_v23 }
  0x71   :  { %v351_v48 = vsel %vm335_vm11, 16843009, %v2339_v5 }
  0x72   :  { %v313_v28 = vpack.c.b16 %v290_v18, %v290_v18  ;;  %v367_v14 = vunpack.c.0.s8 %v351_v48 }
  0x74   :  { %1011 = vperm.xlu1 %2162, %v144_v15   ;;  %v2615_v15 = vrot.slane %v130_v35, %v1024_v9  ;;  %v365_v35 = vunpack.c.0.s8 %v349_v22  ;;  %vm2680_vm3 = vcmp.ne.s32.totalorder %v367_v14, 0 }
  0x76   :  { %vm2645_vm13 = vcmp.ne.s32.totalorder %v365_v35, 0 }
  0x78   :  { %1015 = vperm.xlu1 %2162, %v145_v19  }
  0x7c   :  { %1019 = vperm.xlu1 %2162, %v146_v17   ;;  %v309_v17 = vpack.c.b16 %v288_v12, %v288_v12 }
  0x7e   :  { %v310_v27 = vpack.c.b8 %v309_v17, %v309_v17 }
  0x80   :  { %2165 = vset.pattern.permute.xlu1 %v2339_v5  ;;  %vm2634_vm12 = vnez %v310_v27 }
  0x9e   :  { %v2512_v32 = vpop.permute.xlu1 %159  ;;  %v2514_v33 = vpop.permute.xlu0 %991 }
  0x9f   :  { %v233_v21 = vadd.f32 %v2528_v37, %v2512_v32 }
  0xa2   :  { %v2530_v38 = vpop.permute.xlu1 %164 }
  0xa3   :  { %v150_v40 = vpop.permute.xlu0 %149  ;;  %v234_v41 = vadd.f32 %v2528_v37, %v2530_v38  ;;  %v2640_v38 = vsel %vm107_vm10, 16843009, %v2339_v5 }
  0xa4   :  { %v231_v42 = vadd.f32 %v2528_v37, %v150_v40  ;;  %v249_v40 = vmul.f32 0.2, %v233_v21  ;;  %v291_v63 = vunpack.c.0.s8 %v2640_v38  ;;  %v292_v17 = vunpack.c.1.s8 %v2640_v38 }
  0xa5   :  { %v250_v0 = vmul.f32 0.2, %v234_v41 }
  0xa6   :  { %v247_v44 = vmul.f32 0.2, %v231_v42  ;;  %v2541_v45 = vpop.permute.xlu1 %174  ;;  %v265_v3 = vmax.f32 %v233_v21, %v249_v40  ;;  %v315_v20 = vpack.c.b16 %v291_v63, %v291_v63  ;;  %v317_v35 = vpack.c.b16 %v292_v17, %v292_v17 }
  0xa7   :  { %v155_v47 = vpop.permute.xlu0 %154  ;;  %v236_v21 = vadd.f32 %v2528_v37, %v2541_v45 }
  0xa8   :  { %v232_v50 = vadd.f32 %v2528_v37, %v155_v47  ;;  %v263_v51 = vmax.f32 %v231_v42, %v247_v44  ;;  %v311_v42 = vpack.c.b16 %v289_v24, %v289_v24  ;;  %v2671_v23 = vsel %vm2645_vm13, %v265_v3, -1e+30 }
  0xa9   :  { %3701 = vst [vmem:[#allocation6_spill] sm:$0xff] %v2671_v23  ;;  %v266_v24 = vmax.f32 %v234_v41, %v250_v0  ;;  %v318_v0 = vpack.c.b8 %v317_v35, %v317_v35 }
  0xaa   :  { %v248_v52 = vmul.f32 0.2, %v232_v50  ;;  %v2555_v53 = vpop.permute.xlu1 %184  ;;  %v2559_v54 = vsel %vm2548_vm5, %v263_v51, -1e+30  ;;  %v312_v7 = vpack.c.b8 %v311_v42, %v311_v42  ;;  %v104_v42 = vld [vmem:[%s3658_s4 + $0x18] sm:$0xff]  ;;  %s2340_s4 = smov 111  }
  0xab   :  { %427 = vmax.xlane.f32.xlu0 %v2559_v54  ;;  %v170_v32 = vpop.permute.xlu0 %169  ;;  %vm340_vm8 = vnez %v318_v0 }
  0xac   :  { %v264_v57 = vmax.f32 %v232_v50, %v248_v52  ;;  %v235_v43 = vadd.f32 %v2528_v37, %v170_v32  ;;  %v366_v50 = vunpack.c.0.s8 %v350_v36  ;;  %v314_v52 = vpack.c.b8 %v313_v28, %v313_v28 }
  0xad   :  { %vm337_vm2 = vnez %v312_v7  ;;  %v293_v36 = vunpack.c.2.s8 %v2640_v38  ;;  %v294_v32 = vunpack.c.3.s8 %v2640_v38 }
  0xae   :  { %v2573_v58 = vpop.permute.xlu1 %194  ;;  %v2577_v59 = vsel %vm2567_vm6, %v264_v57, -1e+30  ;;  %v251_v8 = vmul.f32 0.2, %v235_v43  ;;  %vm2654_vm14 = vcmp.ne.s32.totalorder %v366_v50, 0  ;;  %vm2663_vm15 = vnez %v314_v52 }
  0xaf   :  { %429 = vmax.xlane.f32.xlu1 %v2577_v59  ;;  %v180_v22 = vpop.permute.xlu0 %179  ;;  %v353_v41 = vsel %vm337_vm2, 16843009, %v2339_v5  ;;  %v316_v50 = vpack.c.b8 %v315_v20, %v315_v20  ;;  %v319_v3 = vpack.c.b16 %v293_v36, %v293_v36  ;;  %v240_v0 = vadd.f32 %v2528_v37, %v2573_v58 }
  0xb0   :  { %v267_v28 = vmax.f32 %v235_v43, %v251_v8  ;;  %v252_v43 = vmul.f32 0.2, %v236_v21  ;;  %v369_v63 = vunpack.c.0.s8 %v353_v41 }
  0xb2   :  { %v2587_v61 = vpop.permute.xlu1 %204  ;;  %vm2724_vm7 = vcmp.ne.s32.totalorder %v369_v63, 0 }
  0xb3   :  { %v190_v6 = vpop.permute.xlu0 %189 }
  0xb4   :  { %v2712_v14 = vadd.f32 %v2528_v37, %v190_v6 }
  0xb6   :  { %v2600_v2 = vpop.permute.xlu1 %214  ;;  %v255_v35 = vmul.f32 0.2, %v2712_v14 }
  0xba   :  { %v2612_v10 = vpop.permute.xlu1 %224 }
  0xbf   :  { %v960_v16 = vpop.permute.xlu1 %959 }
  0xc0   :  { %v1026_v19 = vadd.f32 %v2615_v15, %v960_v16  ;;  %v352_v16 = vsel %vm2634_vm12, 16843009, %v2339_v5 }
  0xc2   :  { %v1042_v25 = vmul.f32 0.2, %v1026_v19 }
  0xc3   :  { %v964_v26 = vpop.permute.xlu1 %963 }
  0xc4   :  { %v1027_v30 = vadd.f32 %v2615_v15, %v964_v26  ;;  %v1058_v31 = vmax.f32 %v1026_v19, %v1042_v25  ;;  %v237_v25 = vadd.f32 %v2528_v37, %v180_v22  ;;  %v321_v22 = vpack.c.b16 %v294_v32, %v294_v32 }
  0xc6   :  { %v1043_v44 = vmul.f32 0.2, %v1027_v30  ;;  %v2631_v47 = vsel %vm2548_vm5, %v1058_v31, -1e+30  ;;  %v368_v31 = vunpack.c.0.s8 %v352_v16  ;;  %v253_v51 = vmul.f32 0.2, %v237_v25 }
  0xc7   :  { %v968_v49 = vpop.permute.xlu1 %967  ;;  %1107 = vmax.xlane.f32.xlu0 %v2631_v47  ;;  %vm108_vm5 = vnez %v104_v42  ;;  %v268_v16 = vmax.f32 %v236_v21, %v252_v43  ;;  %v320_v21 = vpack.c.b8 %v319_v3, %v319_v3  ;;  %v356_v42 = vsel %vm340_vm8, 16843009, %v2339_v5 }
  0xc8   :  { %v1028_v57 = vadd.f32 %v2615_v15, %v968_v49  ;;  %v1059_v62 = vmax.f32 %v1027_v30, %v1043_v44  ;;  %v2693_v44 = vsel %vm2654_vm14, %v266_v24, -1e+30  ;;  %v354_v49 = vsel %vm2663_vm15, 16843009, %v2339_v5 }
  0xc9   :  { %3705 = vst [vmem:[#allocation8_spill] sm:$0xff] %v2693_v44  ;;  %vm2704_vm4 = vcmp.ne.s32.totalorder %v368_v31, 0  ;;  %v269_v56 = vmax.f32 %v237_v25, %v253_v51  ;;  %v2729_v13 = vsel %vm108_vm5, 16843009, %v2339_v5  ;;  %vm2752_vm10 = vnez %v320_v21 }
  0xca   :  { %v1044_v9 = vmul.f32 0.2, %v1028_v57  ;;  %v2651_v11 = vsel %vm2567_vm6, %v1059_v62, -1e+30  ;;  %vm339_vm6 = vnez %v316_v50  ;;  %v295_v25 = vunpack.c.0.s8 %v2729_v13  ;;  %v200_v50 = vpop.permute.xlu0 %199 }
  0xcb   :  { %v972_v12 = vpop.permute.xlu1 %971  ;;  %1109 = vmax.xlane.f32.xlu1 %v2651_v11  ;;  %v2738_v45 = vsel %vm2704_vm4, %v268_v16, -1e+30  ;;  %v241_v3 = vadd.f32 %v2528_v37, %v200_v50  ;;  %v271_v16 = vmax.f32 %v2712_v14, %v255_v35  ;;  %v372_v58 = vunpack.c.0.s8 %v356_v42 }
  0xcc   :  { %v1029_v18 = vadd.f32 %v2615_v15, %v972_v12  ;;  %v1060_v19 = vmax.f32 %v1028_v57, %v1044_v9  ;;  %v2700_v57 = vsel %vm2680_vm3, %v267_v28, -1e+30  ;;  %v370_v9 = vunpack.c.0.s8 %v354_v49  ;;  %3713 = vst [vmem:[#allocation12_spill] sm:$0xff] %v2738_v45 }
  0xcd   :  { %3706 = vst [vmem:[#allocation9_spill] sm:$0xff] %v2700_v57  ;;  %v238_v12 = vadd.f32 %v2528_v37, %v2555_v53  ;;  %v1034_v28 = vadd.f32 %v2615_v15, %v2514_v33  ;;  %v322_v49 = vpack.c.b8 %v321_v22, %v321_v22  ;;  %v297_v53 = vunpack.c.2.s8 %v2729_v13 }
  0xce   :  { %v1045_v26 = vmul.f32 0.2, %v1029_v18  ;;  %v2676_v27 = vsel %vm2645_vm13, %v1060_v19, -1e+30  ;;  %vm2740_vm9 = vcmp.ne.s32.totalorder %v370_v9, 0  ;;  %vm2795_vm13 = vcmp.ne.s32.totalorder %v372_v58, 0 }
  0xcf   :  { %3702 = vst [vmem:[#allocation7_spill] sm:$0xff] %v2676_v27  ;;  %v976_v30 = vpop.permute.xlu1 %975  ;;  %431 = vmax.xlane.f32.xlu1 %v2671_v23  ;;  %1111 = vmax.xlane.f32.xlu0 %v2676_v27  ;;  %v1050_v63 = vmul.f32 0.2, %v1034_v28  ;;  %vm2775_vm11 = vnez %v322_v49  ;;  %v256_v21 = vmul.f32 0.2, %v240_v0  ;;  %v327_v50 = vpack.c.b16 %v297_v53, %v297_v53  ;;  %v3147_v27 = vld [vmem:[#allocation2 + $0x68] sm:$0xff] }
  0xd0   :  { %v1030_v40 = vadd.f32 %v2615_v15, %v976_v30  ;;  %v1061_v38 = vmax.f32 %v1029_v18, %v1045_v26  ;;  %v355_v26 = vsel %vm339_vm6, 16843009, %v2339_v5  ;;  %v254_v30 = vmul.f32 0.2, %v238_v12 }
  0xd1   :  { %v371_v33 = vunpack.c.0.s8 %v355_v26  ;;  %v257_v26 = vmul.f32 0.2, %v241_v3  ;;  %v298_v31 = vunpack.c.3.s8 %v2729_v13 }
  0xd2   :  { %v1046_v52 = vmul.f32 0.2, %v1030_v40  ;;  %v2716_v18 = vsel %vm2654_vm14, %v1061_v38, -1e+30  ;;  %v323_v38 = vpack.c.b16 %v295_v25, %v295_v25  ;;  %v270_v6 = vmax.f32 %v238_v12, %v254_v30  ;;  %v210_v25 = vpop.permute.xlu0 %209 }
  0xd3   :  { %v980_v62 = vpop.permute.xlu1 %979  ;;  %433 = vmax.xlane.f32.xlu1 %v2693_v44  ;;  %435 = vmax.xlane.f32.xlu0 %v2700_v57  ;;  %3709 = vst [vmem:[#allocation10_spill] sm:$0xff] %v2716_v18  ;;  %v357_v12 = vsel %vm2752_vm10, 16843009, %v2339_v5  ;;  %vm2784_vm12 = vcmp.ne.s32.totalorder %v371_v33, 0  ;;  %v3149_v44 = vld [vmem:[#allocation2 + $0x70] sm:$0xff] }
  0xd4   :  { %v1031_v7 = vadd.f32 %v2615_v15, %v980_v62  ;;  %v1062_v8 = vmax.f32 %v1030_v40, %v1046_v52  ;;  %v2747_v40 = vsel %vm2724_vm7, %v269_v56, -1e+30  ;;  %v296_v62 = vunpack.c.1.s8 %v2729_v13 }
  0xd5   :  { %3716 = vst [vmem:[#allocation13_spill] sm:$0xff] %v2747_v40  ;;  %v324_v56 = vpack.c.b8 %v323_v38, %v323_v38  ;;  %v2782_v14 = vsel %vm2740_vm9, %v270_v6, -1e+30  ;;  %v2791_v35 = vsel %vm2784_vm12, %v271_v16, -1e+30  ;;  %v373_v33 = vunpack.c.0.s8 %v357_v12 }
  0xd6   :  { %v1047_v17 = vmul.f32 0.2, %v1031_v7  ;;  %v2720_v19 = vsel %vm2680_vm3, %v1062_v8, -1e+30  ;;  %3723 = vst [vmem:[#allocation16_spill] sm:$0xff] %v2782_v14  ;;  %3726 = vst [vmem:[#allocation17_spill] sm:$0xff] %v2791_v35  ;;  %v273_v16 = vmax.f32 %v241_v3, %v257_v26  ;;  %v328_v12 = vpack.c.b8 %v327_v50, %v327_v50  ;;  %v220_v53 = vpop.permute.xlu0 %219 }
  0xd7   :  { %3710 = vst [vmem:[#allocation11_spill] sm:$0xff] %v2720_v19  ;;  %v984_v20 = vpop.permute.xlu1 %983  ;;  %1113 = vmax.xlane.f32.xlu1 %v2716_v18  ;;  %1115 = vmax.xlane.f32.xlu0 %v2720_v19  ;;  %vm2803_vm14 = vnez %v324_v56  ;;  %vm2820_vm15 = vcmp.ne.s32.totalorder %v373_v33, 0  ;;  %v329_v33 = vpack.c.b16 %v298_v31, %v298_v31 }
  0xd8   :  { %v1032_v24 = vadd.f32 %v2615_v15, %v984_v20  ;;  %v1063_v41 = vmax.f32 %v1031_v7, %v1047_v17  ;;  %v325_v20 = vpack.c.b16 %v296_v62, %v296_v62  ;;  %v272_v62 = vmax.f32 %v240_v0, %v256_v21 }
  0xd9   :  { %v359_v0 = vsel %vm2803_vm14, 16843009, %v2339_v5  ;;  %v2835_v21 = vsel %vm2820_vm15, %v273_v16, -1e+30  ;;  %v330_v16 = vpack.c.b8 %v329_v33, %v329_v33 }
  0xda   :  { %v1048_v36 = vmul.f32 0.2, %v1032_v24  ;;  %v2763_v8 = vsel %vm2704_vm4, %v1063_v41, -1e+30  ;;  %v326_v49 = vpack.c.b8 %v325_v20, %v325_v20  ;;  %v2831_v56 = vsel %vm2795_vm13, %v272_v62, -1e+30 }
  0xdb   :  { %v988_v32 = vpop.permute.xlu1 %987  ;;  %437 = vmax.xlane.f32.xlu1 %v2738_v45  ;;  %439 = vmax.xlane.f32.xlu0 %v2747_v40  ;;  %3719 = vst [vmem:[#allocation14_spill] sm:$0xff] %v2763_v8  ;;  %3735 = vst [vmem:[#allocation20_spill] sm:$0xff] %v2831_v56  ;;  %vm345_vm4 = vnez %v328_v12  ;;  %vm346_vm6 = vnez %v330_v16  ;;  %v3128_v40 = vld [vmem:[#allocation2 + $0xe0] sm:$0xff] }
  0xdc   :  { %v1033_v51 = vadd.f32 %v2615_v15, %v988_v32  ;;  %v1064_v52 = vmax.f32 %v1032_v24, %v1048_v36  ;;  %v1066_v24 = vmax.f32 %v1034_v28, %v1050_v63  ;;  %v358_v28 = vsel %vm2775_vm11, 16843009, %v2339_v5  ;;  %3736 = vst [vmem:[#allocation21_spill] sm:$0xff] %v2835_v21 }
  0xdd   :  { %v374_v58 = vunpack.c.0.s8 %v358_v28  ;;  %vm344_vm2 = vnez %v326_v49  ;;  %v245_v28 = vadd.f32 %v2528_v37, %v220_v53 }
  0xde   :  { %v1049_v7 = vmul.f32 0.2, %v1033_v51  ;;  %v2767_v9 = vsel %vm2724_vm7, %v1064_v52, -1e+30  ;;  %v243_v52 = vadd.f32 %v2528_v37, %v210_v25  ;;  %v2812_v38 = vsel %vm2784_vm12, %v1066_v24, -1e+30 }
  0xdf   :  { %3720 = vst [vmem:[#allocation15_spill] sm:$0xff] %v2767_v9  ;;  %v996_v17 = vpop.permute.xlu1 %995  ;;  %1117 = vmax.xlane.f32.xlu1 %v2763_v8  ;;  %1119 = vmax.xlane.f32.xlu0 %v2767_v9  ;;  %3731 = vst [vmem:[#allocation18_spill] sm:$0xff] %v2812_v38  ;;  %vm2839_vm3 = vcmp.ne.s32.totalorder %v374_v58, 0  ;;  %v375_v25 = vunpack.c.0.s8 %v359_v0 }
  0xe0   :  { %v1035_v30 = vadd.f32 %v2615_v15, %v996_v17  ;;  %v1065_v36 = vmax.f32 %v1033_v51, %v1049_v7  ;;  %v242_v51 = vadd.f32 %v2528_v37, %v2587_v61  ;;  %v259_v20 = vmul.f32 0.2, %v243_v52 }
  0xe1   :  { %vm2858_vm5 = vcmp.ne.s32.totalorder %v375_v25, 0 }
  0xe2   :  { %v1051_v63 = vmul.f32 0.2, %v1035_v30  ;;  %v2816_v7 = vsel %vm2740_vm9, %v1065_v36, -1e+30  ;;  %v258_v48 = vmul.f32 0.2, %v242_v51 }
  0xe3   :  { %v1000_v41 = vpop.permute.xlu1 %999  ;;  %441 = vmax.xlane.f32.xlu1 %v2782_v14  ;;  %443 = vmax.xlane.f32.xlu0 %v2791_v35  ;;  %3732 = vst [vmem:[#allocation19_spill] sm:$0xff] %v2816_v7  ;;  %v3112_v35 = vld [vmem:[#allocation2 + $0x60] sm:$0xff]  ;;  %v3126_v14 = vld [vmem:[#allocation2 + $0xd8] sm:$0xff] }
  0xe4   :  { %v1036_v42 = vadd.f32 %v2615_v15, %v1000_v41  ;;  %v1067_v22 = vmax.f32 %v1035_v30, %v1051_v63  ;;  %v360_v41 = vsel %vm344_vm2, 16843009, %v2339_v5  ;;  %v244_v30 = vadd.f32 %v2528_v37, %v2600_v2 }
  0xe5   :  { %v274_v43 = vmax.f32 %v242_v51, %v258_v48  ;;  %v275_v63 = vmax.f32 %v243_v52, %v259_v20  ;;  %v361_v51 = vsel %vm345_vm4, 16843009, %v2339_v5  ;;  %v376_v58 = vunpack.c.0.s8 %v360_v41 }
  0xe6   :  { %v1052_v6 = vmul.f32 0.2, %v1036_v42  ;;  %v2850_v50 = vsel %vm2795_vm13, %v1067_v22, -1e+30  ;;  %v260_v32 = vmul.f32 0.2, %v244_v30  ;;  %v377_v20 = vunpack.c.0.s8 %v361_v51 }
  0xe7   :  { %v1004_v17 = vpop.permute.xlu1 %1003  ;;  %1121 = vmax.xlane.f32.xlu1 %v2816_v7  ;;  %1123 = vmax.xlane.f32.xlu0 %v2812_v38  ;;  %3739 = vst [vmem:[#allocation22_spill] sm:$0xff] %v2850_v50  ;;  %v261_v52 = vmul.f32 0.2, %v245_v28  ;;  %v2870_v12 = vsel %vm2858_vm5, %v275_v63, -1e+30  ;;  %vm2881_vm7 = vcmp.ne.s32.totalorder %v376_v58, 0 }
  0xe8   :  { %v1037_v3 = vadd.f32 %v2615_v15, %v1004_v17  ;;  %v1068_v24 = vmax.f32 %v1036_v42, %v1052_v6  ;;  %v2865_v17 = vsel %vm2839_vm3, %v274_v43, -1e+30  ;;  %3744 = vst [vmem:[#allocation25_spill] sm:$0xff] %v2870_v12  ;;  %vm393_vm8 = vcmp.ne.s32.totalorder %v377_v20, 0 }
  0xe9   :  { %3743 = vst [vmem:[#allocation24_spill] sm:$0xff] %v2865_v17  ;;  %v277_v33 = vmax.f32 %v245_v28, %v261_v52 }
  0xea   :  { %v1053_v42 = vmul.f32 0.2, %v1037_v3  ;;  %v2854_v62 = vsel %vm2820_vm15, %v1068_v24, -1e+30  ;;  %v276_v24 = vmax.f32 %v244_v30, %v260_v32 }
  0xeb   :  { %v1008_v26 = vpop.permute.xlu1 %1007  ;;  %445 = vmax.xlane.f32.xlu1 %v2831_v56  ;;  %447 = vmax.xlane.f32.xlu0 %v2835_v21  ;;  %3740 = vst [vmem:[#allocation23_spill] sm:$0xff] %v2854_v62  ;;  %v2897_v43 = vsel %vm393_vm8, %v277_v33, -1e+30  ;;  %v3096_v21 = vld [vmem:[#allocation2 + $0xd0] sm:$0xff]  ;;  %v3110_v56 = vld [vmem:[#allocation2 + $0x58] sm:$0xff] }
  0xec   :  { %v1038_v36 = vadd.f32 %v2615_v15, %v1008_v26  ;;  %v1069_v61 = vmax.f32 %v1037_v3, %v1053_v42  ;;  %v246_v3 = vadd.f32 %v2528_v37, %v2612_v10  ;;  %v362_v37 = vsel %vm346_vm6, 16843009, %v2339_v5  ;;  %3750 = vst [vmem:[#allocation29_spill] sm:$0xff] %v2897_v43 }
  0xed   :  { %v2894_v13 = vsel %vm2881_vm7, %v276_v24, -1e+30  ;;  %v378_v28 = vunpack.c.0.s8 %v362_v37  ;;  %v2975_v37 = vld [vmem:[#allocation2 + $0x20] sm:$0xff]  ;;  %v3028_v24 = vld [vmem:[#allocation2 + $0xb0] sm:$0xff] }
  0xee   :  { %v1054_v49 = vmul.f32 0.2, %v1038_v36  ;;  %v2879_v22 = vsel %vm2839_vm3, %v1069_v61, -1e+30  ;;  %v262_v10 = vmul.f32 0.2, %v246_v3 }
  0xef   :  { %v1012_v6 = vpop.permute.xlu1 %1011  ;;  %1125 = vmax.xlane.f32.xlu1 %v2850_v50  ;;  %1127 = vmax.xlane.f32.xlu0 %v2854_v62  ;;  %3745 = vst [vmem:[#allocation26_spill] sm:$0xff] %v2879_v22  ;;  %3749 = vst [vmem:[#allocation28_spill] sm:$0xff] %v2894_v13  ;;  %vm394_vm9 = vcmp.ne.s32.totalorder %v378_v28, 0  ;;  %v2923_v61 = vld [vmem:[#allocation2] sm:$0xff] }
  0xf0   :  { %v1039_v0 = vadd.f32 %v2615_v15, %v1012_v6  ;;  %v1070_v31 = vmax.f32 %v1038_v36, %v1054_v49  ;;  %v278_v51 = vmax.f32 %v246_v3, %v262_v10  ;;  %v2960_v3 = vld [vmem:[#allocation2 + $0x90] sm:$0xff]  ;;  %v3026_v10 = vld [vmem:[#allocation2 + $0xa8] sm:$0xff] }
  0xf2   :  { %v1055_v25 = vmul.f32 0.2, %v1039_v0  ;;  %v2887_v41 = vsel %vm2858_vm5, %v1070_v31, -1e+30 }
  0xf3   :  { %v1016_v48 = vpop.permute.xlu1 %1015  ;;  %449 = vmax.xlane.f32.xlu1 %v2865_v17  ;;  %451 = vmax.xlane.f32.xlu0 %v2870_v12  ;;  %3748 = vst [vmem:[#allocation27_spill] sm:$0xff] %v2887_v41  ;;  %v3080_v12 = vld [vmem:[#allocation2 + $0x50] sm:$0xff]  ;;  %v3094_v17 = vld [vmem:[#allocation2 + $0xc8] sm:$0xff] }
  0xf4   :  { %v1040_v53 = vadd.f32 %v2615_v15, %v1016_v48  ;;  %v1071_v49 = vmax.f32 %v1039_v0, %v1055_v25  ;;  %v2948_v0 = vld [vmem:[#allocation2 + $0x88] sm:$0xff] }
  0xf6   :  { %v1056_v36 = vmul.f32 0.2, %v1040_v53  ;;  %v2903_v5 = vsel %vm2881_vm7, %v1071_v49, -1e+30 }
  0xf7   :  { %v1020_v42 = vpop.permute.xlu1 %1019  ;;  %1129 = vmax.xlane.f32.xlu1 %v2879_v22  ;;  %1131 = vmax.xlane.f32.xlu0 %v2887_v41  ;;  %3751 = vst [vmem:[#allocation30_spill] sm:$0xff] %v2903_v5 }
  0xf8   :  { %v1041_v30 = vadd.f32 %v2615_v15, %v1020_v42  ;;  %v1072_v63 = vmax.f32 %v1040_v53, %v1056_v36  ;;  %v2909_v15 = vsel %vm394_vm9, %v278_v51, -1e+30  ;;  %v2958_v53 = vld [vmem:[#allocation2 + $0x10] sm:$0xff]  ;;  %v2973_v42 = vld [vmem:[#allocation2 + $0x18] sm:$0xff]  ;;  %v2992_v51 = vld [vmem:[#allocation2 + $0xa0] sm:$0xff] }
  0xf9   :  { %3753 = vst [vmem:[#allocation32_spill] sm:$0xff] %v2909_v15 }
  0xfa   :  { %v1057_v6 = vmul.f32 0.2, %v1041_v30  ;;  %v2905_v2 = vsel %vm393_vm8, %v1072_v63, -1e+30 }
  0xfb   :  { %453 = vmax.xlane.f32.xlu1 %v2894_v13  ;;  %455 = vmax.xlane.f32.xlu0 %v2897_v43  ;;  %3752 = vst [vmem:[#allocation31_spill] sm:$0xff] %v2905_v2  ;;  %v3062_v43 = vld [vmem:[#allocation2 + $0xb8] sm:$0xff]  ;;  %v3078_v13 = vld [vmem:[#allocation2 + $0x48] sm:$0xff] }
  0xfc   :  { %v1073_v16 = vmax.f32 %v1041_v30, %v1057_v6  ;;  %v2990_v6 = vld [vmem:[#allocation2 + $0x98] sm:$0xff] }
  0xfe   :  { %v2912_v32 = vsel %vm394_vm9, %v1073_v16, -1e+30 }
  0xff   :  { %1133 = vmax.xlane.f32.xlu1 %v2903_v5  ;;  %1135 = vmax.xlane.f32.xlu0 %v2905_v2  ;;  %3754 = vst [vmem:[#allocation33_spill] sm:$0xff] %v2912_v32  ;;  %v3064_v5 = vld [vmem:[#allocation2 + $0xc0] sm:$0xff] }
 0x103   :  { %457 = vmax.xlane.f32.xlu1 %v2909_v15 }
 0x107   :  { %1137 = vmax.xlane.f32.xlu1 %v2912_v32 }
 0x115   :  { %1458 = vrot.lane.b32.xlu0 %v2509_v29, %s2340_s4  ;;  %v2928_v29 = vld [vmem:[#allocation2 + $0x8] sm:$0xff] }
 0x118   :  { %1456 = vrot.lane.b32.xlu1 %v2519_v34, %s2340_s4  ;;  %v3044_v34 = vld [vmem:[#allocation2 + $0x40] sm:$0xff] }
 0x119   :  { %1454 = vrot.lane.b32.xlu0 %v2535_v39, %s2340_s4 }
 0x11c   :  { %1452 = vrot.lane.b32.xlu1 %v2546_v46, %s2340_s4 }
 0x11d   :  { %1450 = vrot.lane.b32.xlu0 %v2564_v55, %s2340_s4  ;;  %v3042_v55 = vld [vmem:[#allocation2 + $0x38] sm:$0xff] }
 0x120   :  { %1448 = vrot.lane.b32.xlu1 %v2582_v60, %s2340_s4  ;;  %v2943_v60 = vld [vmem:[#allocation2 + $0x80] sm:$0xff] }
 0x121   :  { %1446 = vrot.lane.b32.xlu0 %v2598_v1, %s2340_s4 }
 0x124   :  { %1444 = vrot.lane.b32.xlu1 %v2605_v4, %s2340_s4 }
 0x134   :  { %v428_v58 = vpop.xlane.xlu0 %427 }
 0x135   :  { %v2926_v52 = vmax.f32 %v2923_v61, %v428_v58 }
 0x137   :  { %942 = vst.msk [vmem:[#allocation2] sm:$0xff] %vm29_vm0, %v2926_v52  ;;  %525 = vperm.xlu1 %2165, %v2926_v52   ;;  %v3755_v19 = vsub.f32 %v2923_v61, %v2926_v52 }
 0x138   :  { %v430_v39 = vpop.xlane.xlu1 %429 }
 0x139   :  { %v2936_v46 = vmax.f32 %v2928_v29, %v430_v39  ;;  %v491_v45 = vmul.f32 1.442695, %v3755_v19 }
 0x13b   :  { %943 = vst.msk [vmem:[#allocation2 + $0x8] sm:$0xff] %vm29_vm0, %v2936_v46  ;;  %530 = vperm.xlu0 %2164, %v2936_v46   ;;  %v3756_v23 = vsub.f32 %v2928_v29, %v2936_v46  ;;  %2174 = vpow2.f32 %v491_v45 }
 0x150   :  { %v1108_v1 = vpop.xlane.xlu0 %1107 }
 0x151   :  { %v2946_v4 = vmax.f32 %v2943_v60, %v1108_v1 }
 0x153   :  { %1597 = vst.msk [vmem:[#allocation2 + $0x80] sm:$0xff] %vm29_vm0, %v2946_v4  ;;  %1205 = vperm.xlu1 %2165, %v2946_v4  }
 0x154   :  { %v1110_v48 = vpop.xlane.xlu1 %1109 }
 0x155   :  { %v2956_v20 = vmax.f32 %v2948_v0, %v1110_v48  ;;  %v3006_v48 = vld [vmem:[#allocation2 + $0x28] sm:$0xff] }
 0x157   :  { %1598 = vst.msk [vmem:[#allocation2 + $0x88] sm:$0xff] %vm29_vm0, %v2956_v20  ;;  %1210 = vperm.xlu1 %2165, %v2956_v20  }
 0x158   :  { %v432_v26 = vpop.xlane.xlu1 %431  ;;  %v1112_v25 = vpop.xlane.xlu0 %1111 }
 0x159   :  { %v2968_v36 = vmax.f32 %v2958_v53, %v432_v26  ;;  %v2971_v33 = vmax.f32 %v2960_v3, %v1112_v25  ;;  %v3008_v26 = vld [vmem:[#allocation2 + $0x30] sm:$0xff] }
 0x15b   :  { %944 = vst.msk [vmem:[#allocation2 + $0x10] sm:$0xff] %vm29_vm0, %v2968_v36  ;;  %1599 = vst.msk [vmem:[#allocation2 + $0x90] sm:$0xff] %vm29_vm0, %v2971_v33  ;;  %535 = vperm.xlu0 %2164, %v2968_v36  }
 0x15c   :  { %v434_v30 = vpop.xlane.xlu1 %433  ;;  %v436_v49 = vpop.xlane.xlu0 %435 }
 0x15d   :  { %v2985_v63 = vmax.f32 %v2973_v42, %v434_v30  ;;  %v2988_v28 = vmax.f32 %v2975_v37, %v436_v49 }
 0x15f   :  { %945 = vst.msk [vmem:[#allocation2 + $0x18] sm:$0xff] %vm29_vm0, %v2985_v63  ;;  %946 = vst.msk [vmem:[#allocation2 + $0x20] sm:$0xff] %vm29_vm0, %v2988_v28  ;;  %540 = vperm.xlu1 %2165, %v2985_v63   ;;  %1215 = vperm.xlu0 %2164, %v2971_v33  }
 0x160   :  { %v1114_v16 = vpop.xlane.xlu1 %1113  ;;  %v1116_v58 = vpop.xlane.xlu0 %1115 }
 0x161   :  { %v3001_v39 = vmax.f32 %v2990_v6, %v1114_v16  ;;  %v3004_v1 = vmax.f32 %v2992_v51, %v1116_v58 }
 0x163   :  { %1600 = vst.msk [vmem:[#allocation2 + $0x98] sm:$0xff] %vm29_vm0, %v3001_v39  ;;  %1601 = vst.msk [vmem:[#allocation2 + $0xa0] sm:$0xff] %vm29_vm0, %v3004_v1  ;;  %1220 = vperm.xlu1 %2165, %v3001_v39   ;;  %545 = vperm.xlu0 %2164, %v2988_v28  }
 0x164   :  { %v438_v49 = vpop.xlane.xlu1 %437  ;;  %v440_v16 = vpop.xlane.xlu0 %439 }
 0x165   :  { %v3021_v58 = vmax.f32 %v3006_v48, %v438_v49  ;;  %v3024_v25 = vmax.f32 %v3008_v26, %v440_v16 }
 0x167   :  { %947 = vst.msk [vmem:[#allocation2 + $0x28] sm:$0xff] %vm29_vm0, %v3021_v58  ;;  %948 = vst.msk [vmem:[#allocation2 + $0x30] sm:$0xff] %vm29_vm0, %v3024_v25  ;;  %550 = vperm.xlu1 %2165, %v3021_v58   ;;  %1225 = vperm.xlu0 %2164, %v3004_v1  }
 0x168   :  { %v1118_v30 = vpop.xlane.xlu1 %1117  ;;  %v1120_v49 = vpop.xlane.xlu0 %1119 }
 0x169   :  { %v3037_v31 = vmax.f32 %v3026_v10, %v1118_v30  ;;  %v3040_v16 = vmax.f32 %v3028_v24, %v1120_v49 }
 0x16b   :  { %1602 = vst.msk [vmem:[#allocation2 + $0xa8] sm:$0xff] %vm29_vm0, %v3037_v31  ;;  %1603 = vst.msk [vmem:[#allocation2 + $0xb0] sm:$0xff] %vm29_vm0, %v3040_v16  ;;  %1230 = vperm.xlu1 %2165, %v3037_v31   ;;  %555 = vperm.xlu0 %2164, %v3024_v25  }
 0x16c   :  { %v442_v30 = vpop.xlane.xlu1 %441  ;;  %v444_v49 = vpop.xlane.xlu0 %443 }
 0x16d   :  { %v3057_v15 = vmax.f32 %v3042_v55, %v442_v30  ;;  %v3060_v32 = vmax.f32 %v3044_v34, %v444_v49 }
 0x16f   :  { %949 = vst.msk [vmem:[#allocation2 + $0x38] sm:$0xff] %vm29_vm0, %v3057_v15  ;;  %950 = vst.msk [vmem:[#allocation2 + $0x40] sm:$0xff] %vm29_vm0, %v3060_v32  ;;  %560 = vperm.xlu1 %2165, %v3057_v15   ;;  %1235 = vperm.xlu0 %2164, %v3040_v16  }
 0x170   :  { %v1122_v2 = vpop.xlane.xlu1 %1121  ;;  %v1124_v30 = vpop.xlane.xlu0 %1123 }
 0x171   :  { %v3073_v41 = vmax.f32 %v3062_v43, %v1122_v2  ;;  %v3076_v49 = vmax.f32 %v3064_v5, %v1124_v30 }
 0x173   :  { %1604 = vst.msk [vmem:[#allocation2 + $0xb8] sm:$0xff] %vm29_vm0, %v3073_v41  ;;  %1605 = vst.msk [vmem:[#allocation2 + $0xc0] sm:$0xff] %vm29_vm0, %v3076_v49  ;;  %1240 = vperm.xlu1 %2165, %v3073_v41   ;;  %565 = vperm.xlu0 %2164, %v3060_v32  }
 0x174   :  { %v446_v22 = vpop.xlane.xlu1 %445  ;;  %v448_v2 = vpop.xlane.xlu0 %447 }
 0x175   :  { %v3089_v62 = vmax.f32 %v3078_v13, %v446_v22  ;;  %v3092_v30 = vmax.f32 %v3080_v12, %v448_v2 }
 0x177   :  { %951 = vst.msk [vmem:[#allocation2 + $0x48] sm:$0xff] %vm29_vm0, %v3089_v62  ;;  %952 = vst.msk [vmem:[#allocation2 + $0x50] sm:$0xff] %vm29_vm0, %v3092_v30  ;;  %570 = vperm.xlu1 %2165, %v3089_v62   ;;  %1245 = vperm.xlu0 %2164, %v3076_v49  }
 0x178   :  { %v1126_v50 = vpop.xlane.xlu1 %1125  ;;  %v1128_v22 = vpop.xlane.xlu0 %1127 }
 0x179   :  { %v3105_v38 = vmax.f32 %v3094_v17, %v1126_v50  ;;  %v3108_v2 = vmax.f32 %v3096_v21, %v1128_v22 }
 0x17b   :  { %1606 = vst.msk [vmem:[#allocation2 + $0xc8] sm:$0xff] %vm29_vm0, %v3105_v38  ;;  %1607 = vst.msk [vmem:[#allocation2 + $0xd0] sm:$0xff] %vm29_vm0, %v3108_v2  ;;  %1250 = vperm.xlu1 %2165, %v3105_v38   ;;  %575 = vperm.xlu0 %2164, %v3092_v30  }
 0x17c   :  { %v450_v7 = vpop.xlane.xlu1 %449  ;;  %v452_v50 = vpop.xlane.xlu0 %451 }
 0x17d   :  { %v3121_v9 = vmax.f32 %v3110_v56, %v450_v7  ;;  %v3124_v22 = vmax.f32 %v3112_v35, %v452_v50  ;;  %v477_v7 = vsub.f32 %v2958_v53, %v2968_v36  ;;  %v493_v53 = vmul.f32 1.442695, %v3756_v23  ;;  %v3170_v36 = vld [vmem:[#allocation2 + $0xe8] sm:$0xff] }
 0x17e   :  { %v479_v23 = vsub.f32 %v2975_v37, %v2988_v28 }
 0x17f   :  { %953 = vst.msk [vmem:[#allocation2 + $0x58] sm:$0xff] %vm29_vm0, %v3121_v9  ;;  %954 = vst.msk [vmem:[#allocation2 + $0x60] sm:$0xff] %vm29_vm0, %v3124_v22  ;;  %580 = vperm.xlu1 %2165, %v3121_v9   ;;  %1255 = vperm.xlu0 %2164, %v3108_v2   ;;  %v495_v19 = vmul.f32 1.442695, %v477_v7  ;;  %2176 = vpow2.f32 %v493_v53  ;;  %v481_v7 = vsub.f32 %v3008_v26, %v3024_v25 }
 0x180   :  { %v1130_v8 = vpop.xlane.xlu1 %1129  ;;  %v1132_v50 = vpop.xlane.xlu0 %1131  ;;  %v499_v28 = vmul.f32 1.442695, %v479_v23  ;;  %v482_v26 = vsub.f32 %v3042_v55, %v3057_v15  ;;  %v484_v55 = vsub.f32 %v3078_v13, %v3089_v62  ;;  %v486_v62 = vsub.f32 %v3110_v56, %v3121_v9 }
 0x181   :  { %v3142_v57 = vmax.f32 %v3126_v14, %v1130_v8  ;;  %v3145_v18 = vmax.f32 %v3128_v40, %v1132_v50  ;;  %v478_v8 = vsub.f32 %v2973_v42, %v2985_v63  ;;  %v3172_v50 = vld [vmem:[#allocation2 + $0xf0] sm:$0xff]  ;;  %2178 = vpow2.f32 %v495_v19 }
 0x182   :  { %v480_v42 = vsub.f32 %v3006_v48, %v3021_v58  ;;  %v503_v19 = vmul.f32 1.442695, %v481_v7  ;;  %v505_v15 = vmul.f32 1.442695, %v482_v26  ;;  %v509_v7 = vmul.f32 1.442695, %v484_v55 }
 0x183   :  { %1608 = vst.msk [vmem:[#allocation2 + $0xd8] sm:$0xff] %vm29_vm0, %v3142_v57  ;;  %1609 = vst.msk [vmem:[#allocation2 + $0xe0] sm:$0xff] %vm29_vm0, %v3145_v18  ;;  %1260 = vperm.xlu1 %2165, %v3142_v57   ;;  %585 = vperm.xlu0 %2164, %v3124_v22   ;;  %v497_v45 = vmul.f32 1.442695, %v478_v8  ;;  %v483_v8 = vsub.f32 %v3044_v34, %v3060_v32 }
 0x184   :  { %v454_v61 = vpop.xlane.xlu1 %453  ;;  %v456_v52 = vpop.xlane.xlu0 %455  ;;  %v501_v48 = vmul.f32 1.442695, %v480_v42 }
 0x185   :  { %v3165_v29 = vmax.f32 %v3147_v27, %v454_v61  ;;  %v3168_v46 = vmax.f32 %v3149_v44, %v456_v52  ;;  %v3190_v52 = vld [vmem:[#allocation2 + $0x78] sm:$0xff]  ;;  %2180 = vpow2.f32 %v497_v45  ;;  %v507_v34 = vmul.f32 1.442695, %v483_v8 }
 0x186   :  { %2182 = vpow2.f32 %v499_v28  ;;  %v485_v45 = vsub.f32 %v3080_v12, %v3092_v30  ;;  %v487_v30 = vsub.f32 %v3112_v35, %v3124_v22 }
 0x187   :  { %955 = vst.msk [vmem:[#allocation2 + $0x68] sm:$0xff] %vm29_vm0, %v3165_v29  ;;  %956 = vst.msk [vmem:[#allocation2 + $0x70] sm:$0xff] %vm29_vm0, %v3168_v46  ;;  %590 = vperm.xlu1 %2165, %v3165_v29   ;;  %1265 = vperm.xlu0 %2164, %v3145_v18   ;;  %2184 = vpow2.f32 %v501_v48  ;;  %v489_v56 = vsub.f32 %v3149_v44, %v3168_v46  ;;  %v3757_v44 = vsub.f32 %v2943_v60, %v2946_v4 }
 0x188   :  { %v1134_v37 = vpop.xlane.xlu1 %1133  ;;  %v1136_v63 = vpop.xlane.xlu0 %1135  ;;  %2186 = vpow2.f32 %v503_v19  ;;  %v511_v12 = vmul.f32 1.442695, %v485_v45  ;;  %v515_v9 = vmul.f32 1.442695, %v487_v30  ;;  %v3759_v60 = vsub.f32 %v2960_v3, %v2971_v33 }
 0x189   :  { %v3185_v53 = vmax.f32 %v3170_v36, %v1134_v37  ;;  %v3188_v61 = vmax.f32 %v3172_v50, %v1136_v63  ;;  %v3205_v37 = vld [vmem:[#allocation2 + $0xf8] sm:$0xff]  ;;  %v2175_v63 = vpop.eup %2174  ;;  %2188 = vpow2.f32 %v505_v15  ;;  %v519_v55 = vmul.f32 1.442695, %v489_v56 }
 0x18a   :  { %2190 = vpow2.f32 %v507_v34  ;;  %v1175_v4 = vmul.f32 1.442695, %v3759_v60 }
 0x18b   :  { %1610 = vst.msk [vmem:[#allocation2 + $0xe8] sm:$0xff] %vm29_vm0, %v3185_v53  ;;  %1611 = vst.msk [vmem:[#allocation2 + $0xf0] sm:$0xff] %vm29_vm0, %v3188_v61  ;;  %1270 = vperm.xlu1 %2165, %v3185_v53   ;;  %595 = vperm.xlu0 %2164, %v3168_v46   ;;  %2192 = vpow2.f32 %v509_v7  ;;  %v1171_v46 = vmul.f32 1.442695, %v3757_v44 }
 0x18c   :  { %v458_v25 = vpop.xlane.xlu1 %457  ;;  %v1459_v58 = vpop.permute.xlu0 %1458  ;;  %2194 = vpow2.f32 %v511_v12 }
 0x18d   :  { %v3203_v23 = vmax.f32 %v3190_v52, %v458_v25  ;;  %2122 = vmatprep.subr.bf16.mxu1 %v1459_v58  ;;  %v2177_v28 = vpop.eup %2176  ;;  %v513_v25 = vmul.f32 1.442695, %v486_v62 }
 0x18e   :  { %2123 = vmatpush3.bf16.msra.mxu1 %v1459_v58  ;;  %v2179_v48 = vpop.eup %2178  ;;  %v488_v58 = vsub.f32 %v3147_v27, %v3165_v29 }
 0x18f   :  { %957 = vst.msk [vmem:[#allocation2 + $0x78] sm:$0xff] %vm29_vm0, %v3203_v23  ;;  %600 = vperm.xlu1 %2165, %v3203_v23   ;;  %1275 = vperm.xlu0 %2164, %v3188_v61   ;;  %2196 = vpow2.f32 %v513_v25  ;;  %v490_v27 = vsub.f32 %v3190_v52, %v3203_v23  ;;  %v3758_v52 = vsub.f32 %v2948_v0, %v2956_v20 }
 0x190   :  { %v1138_v32 = vpop.xlane.xlu1 %1137  ;;  %v1455_v26 = vpop.permute.xlu0 %1454  ;;  %v517_v22 = vmul.f32 1.442695, %v488_v58  ;;  %2198 = vpow2.f32 %v515_v9  ;;  %v3761_v20 = vsub.f32 %v2992_v51, %v3004_v1  ;;  %v3763_v51 = vsub.f32 %v3028_v24, %v3040_v16 }
 0x191   :  { %v3216_v42 = vmax.f32 %v3205_v37, %v1138_v32  ;;  %v521_v45 = vmul.f32 1.442695, %v490_v27  ;;  %v1173_v23 = vmul.f32 1.442695, %v3758_v52  ;;  %v1163_v58 = vsub.f32 %v3064_v5, %v3076_v49 }
 0x192   :  { %v2181_v19 = vpop.eup %2180  ;;  %2200 = vpow2.f32 %v517_v22  ;;  %v1179_v30 = vmul.f32 1.442695, %v3761_v20  ;;  %v1183_v1 = vmul.f32 1.442695, %v3763_v51  ;;  %v1165_v9 = vsub.f32 %v3096_v21, %v3108_v2 }
 0x193   :  { %1612 = vst.msk [vmem:[#allocation2 + $0xf8] sm:$0xff] %vm29_vm0, %v3216_v42  ;;  %1280 = vperm.xlu1 %2165, %v3216_v42   ;;  %669 = vperm.xlu0 %2164, %v2175_v63   ;;  %v2183_v8 = vpop.eup %2182  ;;  %2202 = vpow2.f32 %v519_v55  ;;  %v1166_v16 = vsub.f32 %v3126_v14, %v3142_v57  ;;  %v1167_v49 = vsub.f32 %v3128_v40, %v3145_v18 }
 0x194   :  { %v1457_v13 = vpop.permute.xlu1 %1456  ;;  %v2185_v15 = vpop.eup %2184  ;;  %2204 = vpow2.f32 %v1171_v46  ;;  %v1168_v14 = vsub.f32 %v3170_v36, %v3185_v53  ;;  %v1169_v18 = vsub.f32 %v3172_v50, %v3188_v61 }
 0x195   :  { %2124 = vmatprep.subr.bf16.mxu1 %v1457_v13  ;;  %v2187_v29 = vpop.eup %2186  ;;  %v1451_v32 = vpop.permute.xlu0 %1450  ;;  %2206 = vpow2.f32 %v521_v45  ;;  %v1193_v22 = vmul.f32 1.442695, %v1166_v16  ;;  %v1195_v57 = vmul.f32 1.442695, %v1167_v49 }
 0x196   :  { %2125 = vmatpush3.bf16.msra.mxu1 %v1457_v13  ;;  %v2189_v34 = vpop.eup %2188  ;;  %2208 = vpow2.f32 %v1173_v23 }
 0x197   :  { %674 = vperm.xlu1 %2165, %v2177_v28   ;;  %679 = vperm.xlu0 %2164, %v2179_v48   ;;  %v2191_v63 = vpop.eup %2190  ;;  %v3760_v48 = vsub.f32 %v2990_v6, %v3001_v39  ;;  %2210 = vpow2.f32 %v1175_v4  ;;  %v1162_v6 = vsub.f32 %v3062_v43, %v3073_v41  ;;  %v1187_v43 = vmul.f32 1.442695, %v1163_v58 }
 0x198   :  { %2126 = vmatprep.subr.bf16.mxu1 %v1455_v26  ;;  %v1453_v35 = vpop.permute.xlu1 %1452  ;;  %v2193_v7 = vpop.eup %2192 }
 0x199   :  { %v2195_v62 = vpop.eup %2194  ;;  %v1447_v13 = vpop.permute.xlu0 %1446  ;;  %v1177_v12 = vmul.f32 1.442695, %v3760_v48 }
 0x19a   :  { %2127 = vmatpush3.bf16.msra.mxu1 %v1455_v26  ;;  %v3762_v26 = vsub.f32 %v3026_v10, %v3037_v31  ;;  %v1185_v31 = vmul.f32 1.442695, %v1162_v6  ;;  %v1164_v10 = vsub.f32 %v3094_v17, %v3105_v38  ;;  %v1191_v38 = vmul.f32 1.442695, %v1165_v9 }
 0x19b   :  { %684 = vperm.xlu1 %2165, %v2181_v19   ;;  %689 = vperm.xlu0 %2164, %v2183_v8   ;;  %2212 = vpow2.f32 %v1177_v12 }
 0x19c   :  { %2128 = vmatprep.subr.bf16.mxu1 %v1453_v35  ;;  %v1449_v28 = vpop.permute.xlu1 %1448  ;;  %v2197_v0 = vpop.eup %2196  ;;  %v1181_v25 = vmul.f32 1.442695, %v3762_v26  ;;  %2214 = vpow2.f32 %v1179_v30  ;;  %v1189_v5 = vmul.f32 1.442695, %v1164_v10  ;;  %v3765_v30 = vld [vmem:[#allocation8_spill] sm:$0xff]  ;;  %v3768_v10 = vld [vmem:[#allocation9_spill] sm:$0xff] }
 0x19d   :  { %v2199_v3 = vpop.eup %2198 }
 0x19e   :  { %2129 = vmatpush3.bf16.msra.mxu1 %v1453_v35  ;;  %2216 = vpow2.f32 %v1181_v25 }
 0x19f   :  { %694 = vperm.xlu1 %2165, %v2185_v15   ;;  %699 = vperm.xlu0 %2164, %v2187_v29   ;;  %v2201_v39 = vpop.eup %2200  ;;  %2218 = vpow2.f32 %v1183_v1  ;;  %v1199_v29 = vmul.f32 1.442695, %v1169_v18  ;;  %v3773_v18 = vld [vmem:[#allocation16_spill] sm:$0xff] }
 0x1a0   :  { %2130 = vmatprep.subr.bf16.mxu1 %v1451_v32  ;;  %v1445_v33 = vpop.permute.xlu1 %1444  ;;  %v2203_v19 = vpop.eup %2202  ;;  %2220 = vpow2.f32 %v1185_v31 }
 0x1a1   :  { %v2205_v41 = vpop.eup %2204  ;;  %2222 = vpow2.f32 %v1187_v43  ;;  %v3769_v43 = vld [vmem:[#allocation12_spill] sm:$0xff] }
 0x1a2   :  { %2131 = vmatpush3.bf16.msra.mxu1 %v1451_v32  ;;  %v2207_v24 = vpop.eup %2206  ;;  %2224 = vpow2.f32 %v1189_v5  ;;  %v1170_v32 = vsub.f32 %v3205_v37, %v3216_v42 }
 0x1a3   :  { %704 = vperm.xlu1 %2165, %v2189_v34   ;;  %709 = vperm.xlu0 %2164, %v2191_v63   ;;  %v2209_v8 = vpop.eup %2208  ;;  %2226 = vpow2.f32 %v1191_v38 }
 0x1a4   :  { %2132 = vmatprep.subr.bf16.mxu1 %v1449_v28  ;;  %v2211_v17 = vpop.eup %2210  ;;  %2228 = vpow2.f32 %v1193_v22  ;;  %v1201_v50 = vmul.f32 1.442695, %v1170_v32  ;;  %v3774_v32 = vld [vmem:[#allocation15_spill] sm:$0xff] }
 0x1a5   :  { %2230 = vpow2.f32 %v1195_v57 }
 0x1a6   :  { %2133 = vmatpush3.bf16.msra.mxu1 %v1449_v28 }
 0x1a7   :  { %714 = vperm.xlu1 %2165, %v2193_v7   ;;  %719 = vperm.xlu0 %2164, %v2195_v62  }
 0x1a8   :  { %2134 = vmatprep.subr.bf16.mxu1 %v1447_v13  ;;  %v2213_v15 = vpop.eup %2212 }
 0x1a9   :  { %v2215_v55 = vpop.eup %2214 }
 0x1aa   :  { %2135 = vmatpush3.bf16.msra.mxu1 %v1447_v13 }
 0x1ab   :  { %724 = vperm.xlu1 %2165, %v2197_v0   ;;  %729 = vperm.xlu0 %2164, %v2199_v3   ;;  %v3764_v0 = vld [vmem:[#allocation6_spill] sm:$0xff] }
 0x1ac   :  { %2136 = vmatprep.subr.bf16.mxu1 %v1445_v33 }
 0x1ae   :  { %2137 = vmatpush3.bf16.msra.mxu1 %v1445_v33 }
 0x1af   :  { %734 = vperm.xlu1 %2165, %v2201_v39   ;;  %739 = vperm.xlu0 %2164, %v2203_v19   ;;  %v3766_v39 = vld [vmem:[#allocation7_spill] sm:$0xff] }
 0x1b2   :  { %v526_v56 = vpop.permute.xlu1 %525 }
 0x1b3   :  { %744 = vperm.xlu1 %2165, %v2207_v24   ;;  %1350 = vperm.xlu0 %2164, %v2205_v41   ;;  %v603_v21 = vsub.f32 %v2559_v54, %v526_v56  ;;  %v1197_v54 = vmul.f32 1.442695, %v1168_v14  ;;  %v3772_v14 = vld [vmem:[#allocation13_spill] sm:$0xff] }
 0x1b6   :  { %v531_v35 = vpop.permute.xlu0 %530 }
 0x1b7   :  { %v604_v2 = vsub.f32 %v2577_v59, %v531_v35  ;;  %1355 = vperm.xlu1 %2165, %v2209_v8   ;;  %1360 = vperm.xlu0 %2164, %v2211_v17   ;;  %v2217_v59 = vpop.eup %2216  ;;  %v3770_v8 = vld [vmem:[#allocation11_spill] sm:$0xff]  ;;  %v3771_v17 = vld [vmem:[#allocation14_spill] sm:$0xff] }
 0x1b8   :  { %v2219_v36 = vpop.eup %2218 }
 0x1b9   :  { %v619_v40 = vpack.c.bf16 %v604_v2, %v603_v21  ;;  %v2221_v53 = vpop.eup %2220 }
 0x1ba   :  { %v2223_v61 = vpop.eup %2222 }
 0x1bb   :  { %v628_v27 = vmul.bf16 1069105081, %v619_v40  ;;  %1365 = vperm.xlu1 %2165, %v2213_v15   ;;  %1370 = vperm.xlu0 %2164, %v2215_v55   ;;  %v2225_v44 = vpop.eup %2224 }
 0x1bc   :  { %v2227_v46 = vpop.eup %2226 }
 0x1bd   :  { %2232 = vpow.bf16 %v628_v27  ;;  %v2229_v34 = vpop.eup %2228 }
 0x1be   :  { %2234 = vpow2.f32 %v1197_v54  ;;  %v2231_v45 = vpop.eup %2230 }
 0x1bf   :  { %1375 = vperm.xlu1 %2165, %v2217_v59   ;;  %1380 = vperm.xlu0 %2164, %v2219_v36   ;;  %2236 = vpow2.f32 %v1199_v29 }
 0x1c0   :  { %2238 = vpow2.f32 %v1201_v50 }
 0x1c3   :  { %1385 = vperm.xlu1 %2165, %v2221_v53   ;;  %1390 = vperm.xlu0 %2164, %v2223_v61   ;;  %v3775_v53 = vld [vmem:[#allocation19_spill] sm:$0xff] }
 0x1c7   :  { %1395 = vperm.xlu1 %2165, %v2225_v44   ;;  %1400 = vperm.xlu0 %2164, %v2227_v46  }
 0x1cb   :  { %v2233_v63 = vpop.eup %2232  ;;  %1405 = vperm.xlu1 %2165, %v2229_v34   ;;  %1410 = vperm.xlu0 %2164, %v2231_v45  }
 0x1cc   :  { %2106 = vmatprep.mubr.bf16.mxu0 %v2233_v63  ;;  %v2235_v37 = vpop.eup %2234  ;;  %v3776_v63 = vld [vmem:[#allocation17_spill] sm:$0xff] }
 0x1cd   :  { %v2237_v42 = vpop.eup %2236 }
 0x1ce   :  { %v1206_v28 = vpop.permute.xlu1 %1205  ;;  %v2239_v52 = vpop.eup %2238 }
 0x1cf   :  { %1415 = vperm.xlu1 %2165, %v2235_v37   ;;  %1420 = vperm.xlu0 %2164, %v2237_v42   ;;  %v1283_v7 = vsub.f32 %v2631_v47, %v1206_v28  ;;  %v3767_v47 = vld [vmem:[#allocation10_spill] sm:$0xff]  ;;  %v3777_v42 = vld [vmem:[#allocation20_spill] sm:$0xff] }
 0x1d2   :  { %v1211_v23 = vpop.permute.xlu1 %1210 }
 0x1d3   :  { %v1284_v60 = vsub.f32 %v2651_v11, %v1211_v23  ;;  %1425 = vperm.xlu1 %2165, %v2239_v52  }
 0x1d5   :  { %v1299_v4 = vpack.c.bf16 %v1284_v60, %v1283_v7 }
 0x1d6   :  { %v536_v62 = vpop.permute.xlu0 %535 }
 0x1d7   :  { %v1308_v13 = vmul.bf16 1069105081, %v1299_v4  ;;  %v605_v20 = vsub.f32 %v3764_v0, %v536_v62  ;;  %v3778_v62 = vld [vmem:[#allocation18_spill] sm:$0xff] }
 0x1d9   :  { %2240 = vpow.bf16 %v1308_v13 }
 0x1da   :  { %v541_v48 = vpop.permute.xlu1 %540  ;;  %v1216_v12 = vpop.permute.xlu0 %1215 }
 0x1db   :  { %v606_v3 = vsub.f32 %v3765_v30, %v541_v48  ;;  %v1285_v51 = vsub.f32 %v3766_v39, %v1216_v12  ;;  %v3779_v48 = vld [vmem:[#allocation22_spill] sm:$0xff] }
 0x1dd   :  { %v620_v33 = vpack.c.bf16 %v606_v3, %v605_v20 }
 0x1de   :  { %v1221_v26 = vpop.permute.xlu1 %1220  ;;  %v546_v25 = vpop.permute.xlu0 %545 }
 0x1df   :  { %v631_v6 = vmul.bf16 1069105081, %v620_v33  ;;  %v1286_v1 = vsub.f32 %v3767_v47, %v1221_v26  ;;  %v607_v41 = vsub.f32 %v3768_v10, %v546_v25  ;;  %v3780_v26 = vld [vmem:[#allocation21_spill] sm:$0xff]  ;;  %v3783_v10 = vld [vmem:[#allocation26_spill] sm:$0xff] }
 0x1e1   :  { %2242 = vpow.bf16 %v631_v6  ;;  %v1300_v11 = vpack.c.bf16 %v1286_v1, %v1285_v51  ;;  %v3781_v6 = vld [vmem:[#allocation24_spill] sm:$0xff] }
 0x1e2   :  { %v551_v58 = vpop.permute.xlu1 %550  ;;  %v1226_v19 = vpop.permute.xlu0 %1225 }
 0x1e3   :  { %v1311_v31 = vmul.bf16 1069105081, %v1300_v11  ;;  %v608_v9 = vsub.f32 %v3769_v43, %v551_v58  ;;  %v1287_v38 = vsub.f32 %v3770_v8, %v1226_v19  ;;  %v3782_v19 = vld [vmem:[#allocation23_spill] sm:$0xff]  ;;  %v3785_v8 = vld [vmem:[#allocation28_spill] sm:$0xff] }
 0x1e5   :  { %2244 = vpow.bf16 %v1311_v31  ;;  %v621_v24 = vpack.c.bf16 %v608_v9, %v607_v41 }
 0x1e6   :  { %v1231_v16 = vpop.permute.xlu1 %1230  ;;  %v556_v5 = vpop.permute.xlu0 %555 }
 0x1e7   :  { %v2241_v49 = vpop.eup %2240  ;;  %v634_v56 = vmul.bf16 1069105081, %v621_v24  ;;  %v1288_v35 = vsub.f32 %v3771_v17, %v1231_v16  ;;  %v609_v15 = vsub.f32 %v3772_v14, %v556_v5 }
 0x1e8   :  { %2138 = vmatprep.mubr.bf16.mxu1 %v2241_v49  ;;  %v3784_v49 = vld [vmem:[#allocation25_spill] sm:$0xff] }
 0x1e9   :  { %2246 = vpow.bf16 %v634_v56  ;;  %v1301_v22 = vpack.c.bf16 %v1288_v35, %v1287_v38 }
 0x1ea   :  { %v561_v21 = vpop.permute.xlu1 %560  ;;  %v1236_v2 = vpop.permute.xlu0 %1235 }
 0x1eb   :  { %v1314_v57 = vmul.bf16 1069105081, %v1301_v22  ;;  %v610_v40 = vsub.f32 %v3773_v18, %v561_v21  ;;  %v1289_v36 = vsub.f32 %v3774_v32, %v1236_v2  ;;  %v3789_v32 = vld [vmem:[#allocation32_spill] sm:$0xff] }
 0x1ed   :  { %2248 = vpow.bf16 %v1314_v57  ;;  %v622_v55 = vpack.c.bf16 %v610_v40, %v609_v15  ;;  %v3786_v57 = vld [vmem:[#allocation27_spill] sm:$0xff]  ;;  %v3787_v15 = vld [vmem:[#allocation30_spill] sm:$0xff] }
 0x1ee   :  { %v1241_v27 = vpop.permute.xlu1 %1240  ;;  %v566_v54 = vpop.permute.xlu0 %565 }
 0x1ef   :  { %v2243_v59 = vpop.eup %2242  ;;  %v637_v29 = vmul.bf16 1069105081, %v622_v55  ;;  %v1290_v50 = vsub.f32 %v3775_v53, %v1241_v27  ;;  %v611_v37 = vsub.f32 %v3776_v63, %v566_v54  ;;  %v3791_v63 = vld [vmem:[#allocation33_spill] sm:$0xff] }
 0x1f0   :  { %2107 = vmatmul.mubr.bf16.vlgmr.msra.gmra.mxu0 %v2243_v59  ;;  %v3788_v59 = vld [vmem:[#allocation29_spill] sm:$0xff] }
 0x1f1   :  { %2250 = vpow.bf16 %v637_v29  ;;  %v1302_v61 = vpack.c.bf16 %v1290_v50, %v1289_v36 }
 0x1f2   :  { %v571_v44 = vpop.permute.xlu1 %570  ;;  %v1246_v46 = vpop.permute.xlu0 %1245 }
 0x1f3   :  { %v2245_v34 = vpop.eup %2244  ;;  %v1317_v45 = vmul.bf16 1069105081, %v1302_v61  ;;  %v612_v28 = vsub.f32 %v3777_v42, %v571_v44  ;;  %v1291_v13 = vsub.f32 %v3778_v62, %v1246_v46 }
 0x1f4   :  { %2139 = vmatmul.mubr.bf16.vlgmr.msra.gmra.mxu1 %v2245_v34  ;;  %v3790_v34 = vld [vmem:[#allocation31_spill] sm:$0xff] }
 0x1f5   :  { %2252 = vpow.bf16 %v1317_v45  ;;  %v623_v52 = vpack.c.bf16 %v612_v28, %v611_v37 }
 0x1f6   :  { %v1251_v23 = vpop.permute.xlu1 %1250  ;;  %v576_v7 = vpop.permute.xlu0 %575 }
 0x1f7   :  { %v2247_v60 = vpop.eup %2246  ;;  %v640_v4 = vmul.bf16 1069105081, %v623_v52  ;;  %v1292_v12 = vsub.f32 %v3779_v48, %v1251_v23  ;;  %v613_v25 = vsub.f32 %v3780_v26, %v576_v7 }
 0x1f8   :  { %2110 = vmatprep.mubr.bf16.mxu0 %v2247_v60 }
 0x1f9   :  { %2254 = vpow.bf16 %v640_v4  ;;  %v1303_v0 = vpack.c.bf16 %v1292_v12, %v1291_v13 }
 0x1fa   :  { %v581_v20 = vpop.permute.xlu1 %580  ;;  %v1256_v30 = vpop.permute.xlu0 %1255 }
 0x1fb   :  { %v2249_v3 = vpop.eup %2248  ;;  %v1320_v33 = vmul.bf16 1069105081, %v1303_v0  ;;  %v614_v39 = vsub.f32 %v3781_v6, %v581_v20  ;;  %v1293_v31 = vsub.f32 %v3782_v19, %v1256_v30 }
 0x1fc   :  { %2142 = vmatprep.mubr.bf16.mxu1 %v2249_v3 }
 0x1fd   :  { %2256 = vpow.bf16 %v1320_v33  ;;  %v624_v51 = vpack.c.bf16 %v614_v39, %v613_v25 }
 0x1fe   :  { %v1261_v47 = vpop.permute.xlu1 %1260  ;;  %v586_v1 = vpop.permute.xlu0 %585 }
 0x1ff   :  { %v2251_v11 = vpop.eup %2250  ;;  %v643_v58 = vmul.bf16 1069105081, %v624_v51  ;;  %v1294_v41 = vsub.f32 %v3783_v10, %v1261_v47  ;;  %v615_v56 = vsub.f32 %v3784_v49, %v586_v1  ;;  %v652_v49 = vld [vmem:[#allocation3 + $0x8] sm:$0xff] }
 0x200   :  { %2111 = vmatmul.mubr.bf16.gmra.mxu0 %v2251_v11 }
 0x201   :  { %2258 = vpow.bf16 %v643_v58  ;;  %v1304_v43 = vpack.c.bf16 %v1294_v41, %v1293_v31  ;;  %v653_v58 = vld [vmem:[#allocation3 + $0x10] sm:$0xff]  ;;  %v651_v31 = vld [vmem:[#allocation3] sm:$0xff]  ;;  %v654_v41 = vld [vmem:[#allocation3 + $0x18] sm:$0xff] }
 0x202   :  { %v591_v9 = vpop.permute.xlu1 %590  ;;  %v1266_v24 = vpop.permute.xlu0 %1265 }
 0x203   :  { %v2253_v16 = vpop.eup %2252  ;;  %v1323_v5 = vmul.bf16 1069105081, %v1304_v43  ;;  %v616_v38 = vsub.f32 %v3785_v8, %v591_v9  ;;  %v1295_v14 = vsub.f32 %v3786_v57, %v1266_v24  ;;  %v1334_v43 = vld [vmem:[#allocation3 + $0x90] sm:$0xff] }
 0x204   :  { %2143 = vmatmul.mubr.bf16.gmra.mxu1 %v2253_v16 }
 0x205   :  { %2260 = vpow.bf16 %v1323_v5  ;;  %v625_v17 = vpack.c.bf16 %v616_v38, %v615_v56  ;;  %v1332_v56 = vld [vmem:[#allocation3 + $0x80] sm:$0xff] }
 0x206   :  { %v1271_v35 = vpop.permute.xlu1 %1270  ;;  %v596_v22 = vpop.permute.xlu0 %595 }
 0x207   :  { %v2255_v21 = vpop.eup %2254  ;;  %v646_v2 = vmul.bf16 1069105081, %v625_v17  ;;  %v1296_v18 = vsub.f32 %v3787_v15, %v1271_v35  ;;  %v617_v29 = vsub.f32 %v3788_v59, %v596_v22 }
 0x208   :  { %2114 = vmatprep.mubr.bf16.mxu0 %v2255_v21  ;;  %v1335_v21 = vld [vmem:[#allocation3 + $0x98] sm:$0xff] }
 0x209   :  { %2262 = vpow.bf16 %v646_v2  ;;  %v1305_v40 = vpack.c.bf16 %v1296_v18, %v1295_v14 }
 0x20a   :  { %v601_v55 = vpop.permute.xlu1 %600  ;;  %v1276_v53 = vpop.permute.xlu0 %1275 }
 0x20b   :  { %v2257_v27 = vpop.eup %2256  ;;  %v1326_v54 = vmul.bf16 1069105081, %v1305_v40  ;;  %v618_v36 = vsub.f32 %v3789_v32, %v601_v55  ;;  %v1297_v45 = vsub.f32 %v3790_v34, %v1276_v53  ;;  %v1333_v55 = vld [vmem:[#allocation3 + $0x88] sm:$0xff]  ;;  %v657_v34 = vld [vmem:[#allocation3 + $0x30] sm:$0xff] }
 0x20c   :  { %2146 = vmatprep.mubr.bf16.mxu1 %v2257_v27 }
 0x20d   :  { %2264 = vpow.bf16 %v1326_v54  ;;  %v626_v50 = vpack.c.bf16 %v618_v36, %v617_v29 }
 0x20e   :  { %v1281_v61 = vpop.permute.xlu1 %1280  ;;  %v670_v62 = vpop.permute.xlu0 %669 }
 0x20f   :  { %v2259_v44 = vpop.eup %2258  ;;  %v649_v46 = vmul.bf16 1069105081, %v626_v50  ;;  %v1298_v37 = vsub.f32 %v3791_v63, %v1281_v61  ;;  %v747_v16 = vmul.f32 %v670_v62, %v651_v31  ;;  %v655_v63 = vld [vmem:[#allocation3 + $0x20] sm:$0xff] }
 0x210   :  { %2115 = vmatmul.mubr.bf16.gmra.mxu0 %v2259_v44  ;;  %v1336_v62 = vld [vmem:[#allocation3 + $0xa0] sm:$0xff] }
 0x211   :  { %2266 = vpow.bf16 %v649_v46  ;;  %v1306_v42 = vpack.c.bf16 %v1298_v37, %v1297_v45 }
 0x212   :  { %v675_v13 = vpop.permute.xlu1 %674  ;;  %v680_v48 = vpop.permute.xlu0 %679 }
 0x213   :  { %v2261_v28 = vpop.eup %2260  ;;  %v1329_v52 = vmul.bf16 1069105081, %v1306_v42  ;;  %v749_v10 = vmul.f32 %v680_v48, %v653_v58  ;;  %v748_v14 = vmul.f32 %v675_v13, %v652_v49  ;;  %v658_v42 = vld [vmem:[#allocation3 + $0x38] sm:$0xff] }
 0x214   :  { %2147 = vmatmul.mubr.bf16.gmra.mxu1 %v2261_v28  ;;  %v1338_v28 = vld [vmem:[#allocation3 + $0xb0] sm:$0xff] }
 0x215   :  { %2268 = vpow.bf16 %v1329_v52 }
 0x216   :  { %v685_v12 = vpop.permute.xlu1 %684  ;;  %v3302_v0 = vpop.permute.xlu0 %689 }
 0x217   :  { %v2263_v23 = vpop.eup %2262  ;;  %v750_v38 = vmul.f32 %v685_v12, %v654_v41 }
 0x218   :  { %2118 = vmatprep.mubr.bf16.mxu0 %v2263_v23 }
 0x21a   :  { %v3304_v20 = vpop.permute.xlu1 %694  ;;  %v700_v30 = vpop.permute.xlu0 %699 }
 0x21b   :  { %v2265_v7 = vpop.eup %2264  ;;  %v753_v37 = vmul.f32 %v700_v30, %v657_v34 }
 0x21c   :  { %2150 = vmatprep.mubr.bf16.mxu1 %v2265_v7  ;;  %v751_v7 = vmul.f32 %v3302_v0, %v655_v63  ;;  %v1341_v63 = vld [vmem:[#allocation3 + $0xc8] sm:$0xff] }
 0x21e   :  { %v3306_v3 = vpop.permute.xlu1 %704  ;;  %v3308_v33 = vpop.permute.xlu0 %709 }
 0x21f   :  { %v2267_v60 = vpop.eup %2266  ;;  %v754_v48 = vmul.f32 %v3306_v3, %v658_v42 }
 0x220   :  { %2119 = vmatmul.mubr.bf16.gmra.mxu0 %v2267_v60 }
 0x222   :  { %v3310_v26 = vpop.permute.xlu1 %714  ;;  %v3312_v25 = vpop.permute.xlu0 %719 }
 0x223   :  { %v2269_v4 = vpop.eup %2268 }
 0x224   :  { %2151 = vmatmul.mubr.bf16.gmra.mxu1 %v2269_v4  ;;  %v656_v4 = vld [vmem:[#allocation3 + $0x28] sm:$0xff] }
 0x226   :  { %v3314_v6 = vpop.permute.xlu1 %724  ;;  %v3316_v39 = vpop.permute.xlu0 %729 }
 0x22a   :  { %v3318_v51 = vpop.permute.xlu1 %734  ;;  %v3320_v47 = vpop.permute.xlu0 %739 }
 0x22e   :  { %v3322_v1 = vpop.permute.xlu1 %744  ;;  %v1351_v11 = vpop.permute.xlu0 %1350 }
 0x22f   :  { %v1428_v15 = vmul.f32 %v1351_v11, %v1332_v56 }
 0x232   :  { %v1356_v19 = vpop.permute.xlu1 %1355  ;;  %v1361_v9 = vpop.permute.xlu0 %1360 }
 0x233   :  { %v1430_v17 = vmul.f32 %v1361_v9, %v1334_v43  ;;  %v1429_v53 = vmul.f32 %v1356_v19, %v1333_v55  ;;  %v1339_v19 = vld [vmem:[#allocation3 + $0xb8] sm:$0xff]  ;;  %v1337_v9 = vld [vmem:[#allocation3 + $0xa8] sm:$0xff] }
 0x236   :  { %v1366_v35 = vpop.permute.xlu1 %1365  ;;  %v1371_v61 = vpop.permute.xlu0 %1370 }
 0x237   :  { %v1431_v59 = vmul.f32 %v1366_v35, %v1335_v21  ;;  %v1432_v41 = vmul.f32 %v1371_v61, %v1336_v62  ;;  %v1343_v61 = vld [vmem:[#allocation3 + $0xd8] sm:$0xff] }
 0x23a   :  { %v1376_v45 = vpop.permute.xlu1 %1375  ;;  %v1381_v52 = vpop.permute.xlu0 %1380 }
 0x23b   :  { %v1434_v12 = vmul.f32 %v1381_v52, %v1338_v28 }
 0x23e   :  { %v1386_v11 = vpop.permute.xlu1 %1385 }
 0x242   :  { %v1396_v21 = vpop.permute.xlu1 %1395 }
 0x2b0   :  { %v2108_v24 = vpop.f32.mrf.mxu0 }
 0x2b1   :  { %v910_v5 = vadd.f32 %v2108_v24, %v749_v10  ;;  %v752_v10 = vmul.f32 %v3304_v20, %v656_v4 }
 0x2b2   :  { %v845_v8 = vpop.f32.mrf.mxu0 }
 0x2b3   :  { %927 = vst.msk [vmem:[#allocation3 + $0x10] sm:$0xff] %vm62_vm1, %v910_v5  ;;  %v908_v22 = vadd.f32 %v845_v8, %v747_v16  ;;  %v1435_v5 = vmul.f32 %v1386_v11, %v1339_v19  ;;  %v1433_v8 = vmul.f32 %v1376_v45, %v1337_v9  ;;  %v1346_v19 = vld [vmem:[#allocation3 + $0xf0] sm:$0xff] }
 0x2b4   :  { %v2109_v2 = vpop.f32.mrf.mxu0  ;;  %v2140_v57 = vpop.f32.mrf.mxu1 }
 0x2b5   :  { %925 = vst.msk [vmem:[#allocation3] sm:$0xff] %vm62_vm1, %v908_v22  ;;  %v911_v18 = vadd.f32 %v2109_v2, %v750_v38  ;;  %v1567_v40 = vadd.f32 %v2140_v57, %v1430_v17  ;;  %v1391_v38 = vpop.permute.xlu0 %1390  ;;  %v661_v22 = vld [vmem:[#allocation3 + $0x50] sm:$0xff]  ;;  %v659_v2 = vld [vmem:[#allocation3 + $0x40] sm:$0xff] }
 0x2b6   :  { %v848_v27 = vpop.f32.mrf.mxu0  ;;  %v1502_v54 = vpop.f32.mrf.mxu1  ;;  %v757_v57 = vmul.f32 %v3312_v25, %v661_v22  ;;  %v755_v55 = vmul.f32 %v3308_v33, %v659_v2 }
 0x2b7   :  { %928 = vst.msk [vmem:[#allocation3 + $0x18] sm:$0xff] %vm62_vm1, %v911_v18  ;;  %1583 = vst.msk [vmem:[#allocation3 + $0x90] sm:$0xff] %vm62_vm1, %v1567_v40  ;;  %v909_v29 = vadd.f32 %v848_v27, %v748_v14  ;;  %v1565_v32 = vadd.f32 %v1502_v54, %v1428_v15  ;;  %v662_v14 = vld [vmem:[#allocation3 + $0x58] sm:$0xff]  ;;  %v1342_v15 = vld [vmem:[#allocation3 + $0xd0] sm:$0xff] }
 0x2b8   :  { %v2141_v36 = vpop.f32.mrf.mxu1  ;;  %v660_v54 = vld [vmem:[#allocation3 + $0x48] sm:$0xff] }
 0x2b9   :  { %926 = vst.msk [vmem:[#allocation3 + $0x8] sm:$0xff] %vm62_vm1, %v909_v29  ;;  %1581 = vst.msk [vmem:[#allocation3 + $0x80] sm:$0xff] %vm62_vm1, %v1565_v32  ;;  %v1568_v50 = vadd.f32 %v2141_v36, %v1431_v59  ;;  %v1401_v18 = vpop.permute.xlu0 %1400  ;;  %v1340_v59 = vld [vmem:[#allocation3 + $0xc0] sm:$0xff]  ;;  %v758_v32 = vmul.f32 %v3314_v6, %v662_v14 }
 0x2ba   :  { %v1505_v44 = vpop.f32.mrf.mxu1  ;;  %v1438_v36 = vmul.f32 %v1401_v18, %v1342_v15  ;;  %v1436_v34 = vmul.f32 %v1391_v38, %v1340_v59 }
 0x2bb   :  { %1584 = vst.msk [vmem:[#allocation3 + $0x98] sm:$0xff] %vm62_vm1, %v1568_v50  ;;  %v1566_v46 = vadd.f32 %v1505_v44, %v1429_v53  ;;  %v1406_v53 = vpop.permute.xlu1 %1405 }
 0x2bc   :  { %v1439_v28 = vmul.f32 %v1406_v53, %v1343_v61 }
 0x2bd   :  { %1582 = vst.msk [vmem:[#allocation3 + $0x88] sm:$0xff] %vm62_vm1, %v1566_v46  ;;  %v756_v46 = vmul.f32 %v3310_v26, %v660_v54 }
 0x2c0   :  { %v2112_v23 = vpop.f32.mrf.mxu0 }
 0x2c1   :  { %v914_v60 = vadd.f32 %v2112_v23, %v753_v37 }
 0x2c2   :  { %v861_v13 = vpop.f32.mrf.mxu0 }
 0x2c3   :  { %931 = vst.msk [vmem:[#allocation3 + $0x30] sm:$0xff] %vm62_vm1, %v914_v60  ;;  %v912_v58 = vadd.f32 %v861_v13, %v751_v7  ;;  %v1437_v7 = vmul.f32 %v1396_v21, %v1341_v63  ;;  %v1411_v60 = vpop.permute.xlu0 %1410  ;;  %v665_v13 = vld [vmem:[#allocation3 + $0x70] sm:$0xff] }
 0x2c4   :  { %v2113_v31 = vpop.f32.mrf.mxu0  ;;  %v2144_v30 = vpop.f32.mrf.mxu1  ;;  %v761_v11 = vmul.f32 %v3320_v47, %v665_v13 }
 0x2c5   :  { %929 = vst.msk [vmem:[#allocation3 + $0x20] sm:$0xff] %vm62_vm1, %v912_v58  ;;  %v915_v0 = vadd.f32 %v2113_v31, %v754_v48  ;;  %v1571_v43 = vadd.f32 %v2144_v30, %v1434_v12  ;;  %v1416_v48 = vpop.permute.xlu1 %1415  ;;  %v663_v12 = vld [vmem:[#allocation3 + $0x60] sm:$0xff]  ;;  %v666_v58 = vld [vmem:[#allocation3 + $0x78] sm:$0xff] }
 0x2c6   :  { %v864_v24 = vpop.f32.mrf.mxu0  ;;  %v1518_v16 = vpop.f32.mrf.mxu1 }
 0x2c7   :  { %932 = vst.msk [vmem:[#allocation3 + $0x38] sm:$0xff] %vm62_vm1, %v915_v0  ;;  %1587 = vst.msk [vmem:[#allocation3 + $0xb0] sm:$0xff] %vm62_vm1, %v1571_v43  ;;  %v913_v3 = vadd.f32 %v864_v24, %v752_v10  ;;  %v1569_v49 = vadd.f32 %v1518_v16, %v1432_v41  ;;  %v1421_v31 = vpop.permute.xlu0 %1420  ;;  %v759_v10 = vmul.f32 %v3316_v39, %v663_v12  ;;  %v664_v0 = vld [vmem:[#allocation3 + $0x68] sm:$0xff]  ;;  %v1344_v43 = vld [vmem:[#allocation3 + $0xe0] sm:$0xff] }
 0x2c8   :  { %v2145_v56 = vpop.f32.mrf.mxu1  ;;  %v762_v24 = vmul.f32 %v3322_v1, %v666_v58  ;;  %v1442_v16 = vmul.f32 %v1421_v31, %v1346_v19 }
 0x2c9   :  { %930 = vst.msk [vmem:[#allocation3 + $0x28] sm:$0xff] %vm62_vm1, %v913_v3  ;;  %1585 = vst.msk [vmem:[#allocation3 + $0xa0] sm:$0xff] %vm62_vm1, %v1569_v49  ;;  %v1572_v20 = vadd.f32 %v2145_v56, %v1435_v5  ;;  %v1426_v5 = vpop.permute.xlu1 %1425  ;;  %v1347_v49 = vld [vmem:[#allocation3 + $0xf8] sm:$0xff] }
 0x2ca   :  { %v1521_v17 = vpop.f32.mrf.mxu1  ;;  %v1443_v21 = vmul.f32 %v1426_v5, %v1347_v49 }
 0x2cb   :  { %1588 = vst.msk [vmem:[#allocation3 + $0xb8] sm:$0xff] %vm62_vm1, %v1572_v20  ;;  %v1570_v35 = vadd.f32 %v1521_v17, %v1433_v8  ;;  %v760_v8 = vmul.f32 %v3318_v51, %v664_v0  ;;  %v1440_v20 = vmul.f32 %v1411_v60, %v1344_v43  ;;  %v1345_v17 = vld [vmem:[#allocation3 + $0xe8] sm:$0xff] }
 0x2cc   :  { %v1441_v14 = vmul.f32 %v1416_v48, %v1345_v17 }
 0x2cd   :  { %1586 = vst.msk [vmem:[#allocation3 + $0xa8] sm:$0xff] %vm62_vm1, %v1570_v35 }
 0x2d0   :  { %v2116_v40 = vpop.f32.mrf.mxu0 }
 0x2d1   :  { %v918_v27 = vadd.f32 %v2116_v40, %v757_v57 }
 0x2d2   :  { %v877_v29 = vpop.f32.mrf.mxu0 }
 0x2d3   :  { %935 = vst.msk [vmem:[#allocation3 + $0x50] sm:$0xff] %vm62_vm1, %v918_v27  ;;  %v916_v50 = vadd.f32 %v877_v29, %v755_v55 }
 0x2d4   :  { %v2117_v44 = vpop.f32.mrf.mxu0  ;;  %v2148_v25 = vpop.f32.mrf.mxu1 }
 0x2d5   :  { %933 = vst.msk [vmem:[#allocation3 + $0x40] sm:$0xff] %vm62_vm1, %v916_v50  ;;  %v919_v33 = vadd.f32 %v2117_v44, %v758_v32  ;;  %v1575_v45 = vadd.f32 %v2148_v25, %v1438_v36 }
 0x2d6   :  { %v880_v37 = vpop.f32.mrf.mxu0  ;;  %v1534_v42 = vpop.f32.mrf.mxu1 }
 0x2d7   :  { %936 = vst.msk [vmem:[#allocation3 + $0x58] sm:$0xff] %vm62_vm1, %v919_v33  ;;  %1591 = vst.msk [vmem:[#allocation3 + $0xd0] sm:$0xff] %vm62_vm1, %v1575_v45  ;;  %v917_v6 = vadd.f32 %v880_v37, %v756_v46  ;;  %v1573_v52 = vadd.f32 %v1534_v42, %v1436_v34 }
 0x2d8   :  { %v2149_v23 = vpop.f32.mrf.mxu1 }
 0x2d9   :  { %934 = vst.msk [vmem:[#allocation3 + $0x48] sm:$0xff] %vm62_vm1, %v917_v6  ;;  %1589 = vst.msk [vmem:[#allocation3 + $0xc0] sm:$0xff] %vm62_vm1, %v1573_v52  ;;  %v1576_v26 = vadd.f32 %v2149_v23, %v1439_v28 }
 0x2da   :  { %v1537_v4 = vpop.f32.mrf.mxu1 }
 0x2db   :  { %1592 = vst.msk [vmem:[#allocation3 + $0xd8] sm:$0xff] %vm62_vm1, %v1576_v26  ;;  %v1574_v62 = vadd.f32 %v1537_v4, %v1437_v7 }
 0x2dd   :  { %1590 = vst.msk [vmem:[#allocation3 + $0xc8] sm:$0xff] %vm62_vm1, %v1574_v62 }
 0x2e0   :  { %v2120_v30 = vpop.f32.mrf.mxu0 }
 0x2e1   :  { %v922_v41 = vadd.f32 %v2120_v30, %v761_v11 }
 0x2e2   :  { %v893_v9 = vpop.f32.mrf.mxu0 }
 0x2e3   :  { %939 = vst.msk [vmem:[#allocation3 + $0x70] sm:$0xff] %vm62_vm1, %v922_v41  ;;  %v920_v3 = vadd.f32 %v893_v9, %v759_v10 }
 0x2e4   :  { %v2121_v56 = vpop.f32.mrf.mxu0  ;;  %v2152_v47 = vpop.f32.mrf.mxu1 }
 0x2e5   :  { %937 = vst.msk [vmem:[#allocation3 + $0x60] sm:$0xff] %vm62_vm1, %v920_v3  ;;  %v923_v39 = vadd.f32 %v2121_v56, %v762_v24  ;;  %v1579_v38 = vadd.f32 %v2152_v47, %v1442_v16 }
 0x2e6   :  { %v896_v35 = vpop.f32.mrf.mxu0  ;;  %v1550_v22 = vpop.f32.mrf.mxu1 }
 0x2e7   :  { %940 = vst.msk [vmem:[#allocation3 + $0x78] sm:$0xff] %vm62_vm1, %v923_v39  ;;  %1595 = vst.msk [vmem:[#allocation3 + $0xf0] sm:$0xff] %vm62_vm1, %v1579_v38  ;;  %v921_v1 = vadd.f32 %v896_v35, %v760_v8  ;;  %v1577_v2 = vadd.f32 %v1550_v22, %v1440_v20 }
 0x2e8   :  { %v2153_v57 = vpop.f32.mrf.mxu1 }
 0x2e9   :  { %938 = vst.msk [vmem:[#allocation3 + $0x68] sm:$0xff] %vm62_vm1, %v921_v1  ;;  %1593 = vst.msk [vmem:[#allocation3 + $0xe0] sm:$0xff] %vm62_vm1, %v1577_v2  ;;  %v1580_v51 = vadd.f32 %v2153_v57, %v1443_v21 }
 0x2ea   :  { %v1553_v15 = vpop.f32.mrf.mxu1 }
 0x2eb   :  { %1596 = vst.msk [vmem:[#allocation3 + $0xf8] sm:$0xff] %vm62_vm1, %v1580_v51  ;;  %v1578_v18 = vadd.f32 %v1553_v15, %v1441_v14 }
 0x2ed   :  { %1594 = vst.msk [vmem:[#allocation3 + $0xe8] sm:$0xff] %vm62_vm1, %v1578_v18 }
 0x2ee PF:  { %v3367_v40 = vld [vmem:[#allocation3 + $0x10] sm:$0xff]  ;;  %v3369_v55 = vld [vmem:[#allocation3] sm:$0xff]  ;;  %v3371_v27 = vld [vmem:[#allocation3 + $0x18] sm:$0xff]  ;;  %v2341_v54 = vmov 16   ;;  %s2342_s28 = smov 16   ;;  %vm1969_vm0 = vcmask 130048  }
 0x2ef   :  { %2271 = vset.pattern.permute.xlu1 %v2341_v54  ;;  %2270 = vset.pattern.permute.xlu0 %v2341_v54  ;;  %v1634_v59 = vmax.f32 %v3367_v40, 1e-30  ;;  %v1632_v29 = vmax.f32 %v3369_v55, 1e-30  ;;  %v1635_v32 = vmax.f32 %v3371_v27, 1e-30 }
 0x2f0   :  { %v3376_v36 = vld [vmem:[#allocation3 + $0x8] sm:$0xff]  ;;  %v3381_v61 = vld [vmem:[#allocation3 + $0x20] sm:$0xff]  ;;  %v3385_v46 = vld [vmem:[#allocation3 + $0x38] sm:$0xff]  ;;  %vm2025_vm1 = vcmask 261120  }
 0x2f1   :  { %v3378_v53 = vld [vmem:[#allocation3 + $0x28] sm:$0xff]  ;;  %2272 = vrcp.f32 %v1634_v59  ;;  %v1633_v50 = vmax.f32 %v3376_v36, 1e-30  ;;  %v1636_v25 = vmax.f32 %v3381_v61, 1e-30  ;;  %v3387_v34 = vld [vmem:[#allocation3 + $0x30] sm:$0xff] }
 0x2f2   :  { %2274 = vrcp.f32 %v1632_v29  ;;  %v1637_v44 = vmax.f32 %v3378_v53, 1e-30  ;;  %v1639_v33 = vmax.f32 %v3385_v46, 1e-30  ;;  %v1638_v45 = vmax.f32 %v3387_v34, 1e-30 }
 0x2f3   :  { %2276 = vrcp.f32 %v1635_v32  ;;  %v3391_v63 = vld [vmem:[#allocation3 + $0x88] sm:$0xff]  ;;  %v3393_v37 = vld [vmem:[#allocation3 + $0x80] sm:$0xff]  ;;  %v3397_v6 = vld [vmem:[#allocation3 + $0x98] sm:$0xff] }
 0x2f4   :  { %2278 = vrcp.f32 %v1633_v50  ;;  %v1778_v42 = vmax.f32 %v3391_v63, 1e-30  ;;  %v1777_v28 = vmax.f32 %v3393_v37, 1e-30  ;;  %v3399_v52 = vld [vmem:[#allocation3 + $0x90] sm:$0xff]  ;;  %v3403_v62 = vld [vmem:[#allocation3 + $0xa8] sm:$0xff] }
 0x2f5   :  { %2280 = vrcp.f32 %v1637_v44  ;;  %v1780_v26 = vmax.f32 %v3397_v6, 1e-30  ;;  %v1779_v4 = vmax.f32 %v3399_v52, 1e-30  ;;  %v3405_v48 = vld [vmem:[#allocation3 + $0xa0] sm:$0xff]  ;;  %v3409_v19 = vld [vmem:[#allocation3 + $0xb8] sm:$0xff] }
 0x2f6   :  { %2282 = vrcp.f32 %v1636_v25  ;;  %v1782_v12 = vmax.f32 %v3403_v62, 1e-30  ;;  %v1781_v58 = vmax.f32 %v3405_v48, 1e-30  ;;  %v3411_v30 = vld [vmem:[#allocation3 + $0xb0] sm:$0xff]  ;;  %v3415_v43 = vld [vmem:[#allocation3 + $0xc8] sm:$0xff] }
 0x2f7   :  { %2284 = vrcp.f32 %v1639_v33  ;;  %v1784_v10 = vmax.f32 %v3409_v19, 1e-30  ;;  %v1783_v0 = vmax.f32 %v3411_v30, 1e-30  ;;  %v3417_v24 = vld [vmem:[#allocation3 + $0xc0] sm:$0xff]  ;;  %v3421_v49 = vld [vmem:[#allocation3 + $0xd8] sm:$0xff] }
 0x2f8   :  { %2286 = vrcp.f32 %v1638_v45  ;;  %v1786_v16 = vmax.f32 %v3415_v43, 1e-30  ;;  %v1785_v3 = vmax.f32 %v3417_v24, 1e-30  ;;  %v3423_v47 = vld [vmem:[#allocation3 + $0xd0] sm:$0xff]  ;;  %v3427_v38 = vld [vmem:[#allocation3 + $0xe8] sm:$0xff] }
 0x2f9   :  { %2288 = vrcp.f32 %v1778_v42  ;;  %v1788_v8 = vmax.f32 %v3421_v49, 1e-30  ;;  %v1787_v39 = vmax.f32 %v3423_v47, 1e-30  ;;  %v3429_v35 = vld [vmem:[#allocation3 + $0xe0] sm:$0xff]  ;;  %v3433_v2 = vld [vmem:[#allocation3 + $0xf8] sm:$0xff] }
 0x2fa   :  { %2290 = vrcp.f32 %v1777_v28  ;;  %v1790_v22 = vmax.f32 %v3427_v38, 1e-30  ;;  %v1789_v1 = vmax.f32 %v3429_v35, 1e-30  ;;  %v3435_v14 = vld [vmem:[#allocation3 + $0xf0] sm:$0xff]  ;;  %v3439_v54 = vld [vmem:[#allocation3 + $0x48] sm:$0xff] }
 0x2fb   :  { %2292 = vrcp.f32 %v1780_v26  ;;  %v1792_v51 = vmax.f32 %v3433_v2, 1e-30  ;;  %v1791_v18 = vmax.f32 %v3435_v14, 1e-30  ;;  %v3441_v29 = vld [vmem:[#allocation3 + $0x40] sm:$0xff]  ;;  %v3445_v25 = vld [vmem:[#allocation3 + $0x58] sm:$0xff] }
 0x2fc   :  { %2294 = vrcp.f32 %v1779_v4  ;;  %v1641_v32 = vmax.f32 %v3439_v54, 1e-30  ;;  %v1640_v44 = vmax.f32 %v3441_v29, 1e-30  ;;  %v3447_v45 = vld [vmem:[#allocation3 + $0x50] sm:$0xff] }
 0x2fd   :  { %2296 = vrcp.f32 %v1782_v12  ;;  %v1643_v42 = vmax.f32 %v3445_v25, 1e-30 }
 0x2fe   :  { %v2273_v23 = vpop.eup %2272  ;;  %2298 = vrcp.f32 %v1781_v58 }
 0x2ff   :  { %v2275_v7 = vpop.eup %2274  ;;  %1676 = vperm.xlu1 %2271, %v2273_v23   ;;  %2300 = vrcp.f32 %v1784_v10  ;;  %v1642_v23 = vmax.f32 %v3447_v45, 1e-30 }
 0x300   :  { %v2277_v60 = vpop.eup %2276  ;;  %1666 = vperm.xlu0 %2270, %v2275_v7   ;;  %2302 = vrcp.f32 %v1783_v0  ;;  %v3451_v7 = vld [vmem:[#allocation3 + $0x68] sm:$0xff] }
 0x301   :  { %v2279_v13 = vpop.eup %2278  ;;  %2304 = vrcp.f32 %v1786_v16  ;;  %v1645_v4 = vmax.f32 %v3451_v7, 1e-30 }
 0x302   :  { %v2281_v11 = vpop.eup %2280  ;;  %2306 = vrcp.f32 %v1785_v3 }
 0x303   :  { %1681 = vperm.xlu1 %2271, %v2277_v60   ;;  %v2283_v31 = vpop.eup %2282  ;;  %2308 = vrcp.f32 %v1788_v8  ;;  %v3453_v60 = vld [vmem:[#allocation3 + $0x60] sm:$0xff] }
 0x304   :  { %1671 = vperm.xlu0 %2270, %v2279_v13   ;;  %v2285_v41 = vpop.eup %2284  ;;  %2310 = vrcp.f32 %v1787_v39  ;;  %v1644_v12 = vmax.f32 %v3453_v60, 1e-30 }
 0x305   :  { %v2287_v9 = vpop.eup %2286  ;;  %2312 = vrcp.f32 %v1790_v22 }
 0x306   :  { %v2289_v5 = vpop.eup %2288  ;;  %2314 = vrcp.f32 %v1789_v1 }
 0x307   :  { %1691 = vperm.xlu1 %2271, %v2281_v11   ;;  %v2291_v56 = vpop.eup %2290  ;;  %2316 = vrcp.f32 %v1792_v51  ;;  %v3457_v11 = vld [vmem:[#allocation3 + $0x78] sm:$0xff] }
 0x308   :  { %1686 = vperm.xlu0 %2270, %v2283_v31   ;;  %v2293_v20 = vpop.eup %2292  ;;  %2318 = vrcp.f32 %v1791_v18  ;;  %v3459_v31 = vld [vmem:[#allocation3 + $0x70] sm:$0xff]  ;;  %v1647_v10 = vmax.f32 %v3457_v11, 1e-30 }
 0x309   :  { %v2295_v17 = vpop.eup %2294  ;;  %2320 = vrcp.f32 %v1641_v32  ;;  %v1646_v0 = vmax.f32 %v3459_v31, 1e-30 }
 0x30a   :  { %v2297_v21 = vpop.eup %2296  ;;  %2322 = vrcp.f32 %v1640_v44 }
 0x30b   :  { %1701 = vperm.xlu1 %2271, %v2285_v41   ;;  %v2299_v57 = vpop.eup %2298  ;;  %2324 = vrcp.f32 %v1643_v42 }
 0x30c   :  { %1696 = vperm.xlu0 %2270, %v2287_v9   ;;  %v2301_v15 = vpop.eup %2300  ;;  %2326 = vrcp.f32 %v1642_v23 }
 0x30d   :  { %v2303_v59 = vpop.eup %2302  ;;  %2328 = vrcp.f32 %v1645_v4 }
 0x30e   :  { %v2305_v50 = vpop.eup %2304  ;;  %2330 = vrcp.f32 %v1644_v12 }
 0x30f   :  { %1816 = vperm.xlu1 %2271, %v2289_v5   ;;  %v2307_v33 = vpop.eup %2306  ;;  %2332 = vrcp.f32 %v1647_v10 }
 0x310   :  { %1811 = vperm.xlu0 %2270, %v2291_v56   ;;  %v2309_v28 = vpop.eup %2308  ;;  %2334 = vrcp.f32 %v1646_v0 }
 0x311   :  { %v2311_v26 = vpop.eup %2310 }
 0x312   :  { %v2313_v13 = vpop.eup %2312 }
 0x313   :  { %1826 = vperm.xlu1 %2271, %v2293_v20   ;;  %v2315_v58 = vpop.eup %2314 }
 0x314   :  { %1821 = vperm.xlu0 %2270, %v2295_v17   ;;  %v2317_v41 = vpop.eup %2316 }
 0x315   :  { %v2319_v9 = vpop.eup %2318 }
 0x316   :  { %v2321_v16 = vpop.eup %2320 }
 0x317   :  { %1836 = vperm.xlu1 %2271, %v2297_v21   ;;  %v2323_v5 = vpop.eup %2322 }
 0x318   :  { %1831 = vperm.xlu0 %2270, %v2299_v57   ;;  %v2325_v3 = vpop.eup %2324 }
 0x319   :  { %v2327_v56 = vpop.eup %2326 }
 0x31a   :  { %v2329_v8 = vpop.eup %2328 }
 0x31b   :  { %1846 = vperm.xlu1 %2271, %v2301_v15   ;;  %v2331_v20 = vpop.eup %2330 }
 0x31c   :  { %1841 = vperm.xlu0 %2270, %v2303_v59   ;;  %v2333_v39 = vpop.eup %2332 }
 0x31d   :  { %v2335_v17 = vpop.eup %2334 }
 0x31f   :  { %1856 = vperm.xlu1 %2271, %v2305_v50  }
 0x320   :  { %1851 = vperm.xlu0 %2270, %v2307_v33  }
 0x323   :  { %1866 = vperm.xlu1 %2271, %v2309_v28  }
 0x324   :  { %1861 = vperm.xlu0 %2270, %v2311_v26  }
 0x327   :  { %1876 = vperm.xlu1 %2271, %v2313_v13  }
 0x328   :  { %1871 = vperm.xlu0 %2270, %v2315_v58  }
 0x32b   :  { %1886 = vperm.xlu1 %2271, %v2317_v41  }
 0x32c   :  { %1881 = vperm.xlu0 %2270, %v2319_v9  }
 0x32f   :  { %1711 = vperm.xlu1 %2271, %v2321_v16  }
 0x330   :  { %1706 = vperm.xlu0 %2270, %v2323_v5  }
 0x333   :  { %1721 = vperm.xlu1 %2271, %v2325_v3  }
 0x334   :  { %1716 = vperm.xlu0 %2270, %v2327_v56  }
 0x337   :  { %1731 = vperm.xlu1 %2271, %v2329_v8  }
 0x338   :  { %1726 = vperm.xlu0 %2270, %v2331_v20  }
 0x33b   :  { %1741 = vperm.xlu1 %2271, %v2333_v39  }
 0x33c   :  { %1736 = vperm.xlu0 %2270, %v2335_v17  }
 0x37a   :  { %v3463_v22 = vpop.permute.xlu1 %1676 }
 0x37b   :  { %v3465_v21 = vpop.permute.xlu0 %1666 }
 0x37e   :  { %v3467_v1 = vpop.permute.xlu1 %1681 }
 0x37f   :  { %v3469_v57 = vpop.permute.xlu0 %1671 }
 0x382   :  { %v3471_v51 = vpop.permute.xlu1 %1691 }
 0x383   :  { %v3473_v15 = vpop.permute.xlu0 %1686 }
 0x386   :  { %v3475_v18 = vpop.permute.xlu1 %1701 }
 0x387   :  { %v3477_v59 = vpop.permute.xlu0 %1696 }
 0x38a   :  { %v1817_v32 = vpop.permute.xlu1 %1816 }
 0x38b   :  { %v1890_v50 = vmul.f32 %v1817_v32, %v3391_v63  ;;  %v1812_v44 = vpop.permute.xlu0 %1811 }
 0x38c   :  { %v1889_v33 = vmul.f32 %v1812_v44, %v3393_v37  ;;  %v1744_v44 = vmul.f32 %v3465_v21, %v3369_v55 }
 0x38d   :  { %1923 = vrot.lane.b32.xlu1 %v1890_v50, %s2342_s28  ;;  %v3528_v50 = vld [vmem:[%s3659_s5] ss:$0 sm:$0xff] }
 0x38e   :  { %1921 = vrot.lane.b32.xlu0 %v1889_v33, %s2342_s28  ;;  %v1827_v42 = vpop.permute.xlu1 %1826 }
 0x38f   :  { %v1892_v28 = vmul.f32 %v1827_v42, %v3397_v6  ;;  %v1822_v23 = vpop.permute.xlu0 %1821 }
 0x390   :  { %v1891_v26 = vmul.f32 %v1822_v23, %v3399_v52 }
 0x391   :  { %1927 = vrot.lane.b32.xlu1 %v1892_v28, %s2342_s28 }
 0x392   :  { %1925 = vrot.lane.b32.xlu0 %v1891_v26, %s2342_s28  ;;  %v1837_v4 = vpop.permute.xlu1 %1836 }
 0x393   :  { %v1894_v63 = vmul.f32 %v1837_v4, %v3403_v62  ;;  %v1832_v13 = vpop.permute.xlu0 %1831  ;;  %v1747_v4 = vmul.f32 %v3467_v1, %v3371_v27  ;;  %v1749_v1 = vmul.f32 %v3471_v51, %v3378_v53 }
 0x394   :  { %v1893_v37 = vmul.f32 %v1832_v13, %v3405_v48 }
 0x395   :  { %1931 = vrot.lane.b32.xlu1 %v1894_v63, %s2342_s28 }
 0x396   :  { %1929 = vrot.lane.b32.xlu0 %v1893_v37, %s2342_s28  ;;  %v1847_v12 = vpop.permute.xlu1 %1846 }
 0x397   :  { %v1896_v6 = vmul.f32 %v1847_v12, %v3409_v19  ;;  %v1842_v58 = vpop.permute.xlu0 %1841 }
 0x398   :  { %v1895_v52 = vmul.f32 %v1842_v58, %v3411_v30 }
 0x399   :  { %1935 = vrot.lane.b32.xlu1 %v1896_v6, %s2342_s28 }
 0x39a   :  { %1933 = vrot.lane.b32.xlu0 %v1895_v52, %s2342_s28  ;;  %v1857_v10 = vpop.permute.xlu1 %1856 }
 0x39b   :  { %v1898_v62 = vmul.f32 %v1857_v10, %v3415_v43  ;;  %v1852_v41 = vpop.permute.xlu0 %1851 }
 0x39c   :  { %v1897_v48 = vmul.f32 %v1852_v41, %v3417_v24  ;;  %v1751_v41 = vmul.f32 %v3475_v18, %v3385_v46 }
 0x39d   :  { %1939 = vrot.lane.b32.xlu1 %v1898_v62, %s2342_s28 }
 0x39e   :  { %1937 = vrot.lane.b32.xlu0 %v1897_v48, %s2342_s28  ;;  %v1867_v0 = vpop.permute.xlu1 %1866 }
 0x39f   :  { %v1900_v19 = vmul.f32 %v1867_v0, %v3421_v49  ;;  %v1862_v9 = vpop.permute.xlu0 %1861 }
 0x3a0   :  { %v1899_v30 = vmul.f32 %v1862_v9, %v3423_v47 }
 0x3a1   :  { %1943 = vrot.lane.b32.xlu1 %v1900_v19, %s2342_s28 }
 0x3a2   :  { %1941 = vrot.lane.b32.xlu0 %v1899_v30, %s2342_s28  ;;  %v1877_v16 = vpop.permute.xlu1 %1876 }
 0x3a3   :  { %v1902_v43 = vmul.f32 %v1877_v16, %v3427_v38  ;;  %v1872_v5 = vpop.permute.xlu0 %1871 }
 0x3a4   :  { %v1901_v24 = vmul.f32 %v1872_v5, %v3429_v35 }
 0x3a5   :  { %1947 = vrot.lane.b32.xlu1 %v1902_v43, %s2342_s28 }
 0x3a6   :  { %1945 = vrot.lane.b32.xlu0 %v1901_v24, %s2342_s28  ;;  %v1887_v3 = vpop.permute.xlu1 %1886 }
 0x3a7   :  { %v1904_v49 = vmul.f32 %v1887_v3, %v3433_v2  ;;  %v1882_v56 = vpop.permute.xlu0 %1881 }
 0x3a8   :  { %v1903_v47 = vmul.f32 %v1882_v56, %v3435_v14  ;;  %v1745_v14 = vmul.f32 %v3469_v57, %v3376_v36  ;;  %v1746_v57 = vmul.f32 %v3463_v22, %v3367_v40  ;;  %v1748_v22 = vmul.f32 %v3473_v15, %v3381_v61 }
 0x3a9   :  { %1951 = vrot.lane.b32.xlu1 %v1904_v49, %s2342_s28  ;;  %v1750_v15 = vmul.f32 %v3477_v59, %v3387_v34 }
 0x3aa   :  { %1949 = vrot.lane.b32.xlu0 %v1903_v47, %s2342_s28  ;;  %v1712_v8 = vpop.permute.xlu1 %1711 }
 0x3ab   :  { %v1707_v20 = vpop.permute.xlu0 %1706  ;;  %v1753_v16 = vmul.f32 %v1712_v8, %v3439_v54 }
 0x3ac   :  { %v1752_v59 = vmul.f32 %v1707_v20, %v3441_v29 }
 0x3ae   :  { %v3511_v38 = vpop.permute.xlu1 %1721 }
 0x3af   :  { %v3513_v39 = vpop.permute.xlu0 %1716  ;;  %v1755_v47 = vmul.f32 %v3511_v38, %v3445_v25 }
 0x3b0   :  { %v1754_v8 = vmul.f32 %v3513_v39, %v3447_v45 }
 0x3b2   :  { %v3515_v35 = vpop.permute.xlu1 %1731 }
 0x3b3   :  { %v3517_v17 = vpop.permute.xlu0 %1726 }
 0x3b4   :  { %v1756_v39 = vmul.f32 %v3517_v17, %v3453_v60 }
 0x3b6   :  { %v3519_v32 = vpop.permute.xlu1 %1741 }
 0x3b7   :  { %v3521_v2 = vpop.permute.xlu0 %1736 }
 0x3b8   :  { %v1758_v17 = vmul.f32 %v3521_v2, %v3459_v31 }
 0x3ff   :  { %v1924_v33 = vpop.permute.xlu1 %1923 }
 0x400   :  { %v1971_v42 = vsel %vm1969_vm0, %v1745_v14, %v1924_v33  ;;  %v1922_v28 = vpop.permute.xlu0 %1921 }
 0x401   :  { %v1994_v23 = vadd.f32 %v3528_v50, %v1971_v42  ;;  %v1970_v26 = vsel %vm1969_vm0, %v1744_v44, %v1922_v28  ;;  %v1757_v28 = vmul.f32 %v3515_v35, %v3451_v7 }
 0x402   :  { %v1993_v36 = vadd.f32 %v3528_v50, %v1970_v26 }
 0x403   :  { %v2010_v63 = vmax.f32 %v1994_v23, 0.0  ;;  %v1928_v13 = vpop.permute.xlu1 %1927 }
 0x404   :  { %v2009_v55 = vmax.f32 %v1993_v36, 0.0  ;;  %v1973_v21 = vsel %vm1969_vm0, %v1747_v4, %v1928_v13  ;;  %v1926_v37 = vpop.permute.xlu0 %1925 }
 0x405   :  { %2027 = vst.msk [vmem:[%s3660_s6 + $0x8] sm:$0xff] %vm2025_vm1, %v2010_v63  ;;  %v1996_v12 = vadd.f32 %v3528_v50, %v1973_v21  ;;  %v1972_v27 = vsel %vm1969_vm0, %v1746_v57, %v1926_v37  ;;  %v1759_v63 = vmul.f32 %v3519_v32, %v3457_v11 }
 0x406   :  { %2026 = vst.msk [vmem:[%s3660_s6] sm:$0xff] %vm2025_vm1, %v2009_v55  ;;  %v1995_v40 = vadd.f32 %v3528_v50, %v1972_v27 }
 0x407   :  { %v2012_v6 = vmax.f32 %v1996_v12, 0.0  ;;  %v1932_v58 = vpop.permute.xlu1 %1931 }
 0x408   :  { %v2011_v52 = vmax.f32 %v1995_v40, 0.0  ;;  %v1975_v10 = vsel %vm1969_vm0, %v1749_v1, %v1932_v58  ;;  %v1930_v62 = vpop.permute.xlu0 %1929 }
 0x409   :  { %2029 = vst.msk [vmem:[%s3660_s6 + $0x18] sm:$0xff] %vm2025_vm1, %v2012_v6  ;;  %v1998_v53 = vadd.f32 %v3528_v50, %v1975_v10  ;;  %v1974_v51 = vsel %vm1969_vm0, %v1748_v22, %v1930_v62 }
 0x40a   :  { %2028 = vst.msk [vmem:[%s3660_s6 + $0x10] sm:$0xff] %vm2025_vm1, %v2011_v52  ;;  %v1997_v61 = vadd.f32 %v3528_v50, %v1974_v51 }
 0x40b   :  { %v2014_v48 = vmax.f32 %v1998_v53, 0.0  ;;  %v1936_v0 = vpop.permute.xlu1 %1935 }
 0x40c   :  { %v2013_v19 = vmax.f32 %v1997_v61, 0.0  ;;  %v1977_v9 = vsel %vm1969_vm0, %v1751_v41, %v1936_v0  ;;  %v1934_v30 = vpop.permute.xlu0 %1933 }
 0x40d   :  { %2031 = vst.msk [vmem:[%s3660_s6 + $0x28] sm:$0xff] %vm2025_vm1, %v2014_v48  ;;  %v2000_v46 = vadd.f32 %v3528_v50, %v1977_v9  ;;  %v1976_v18 = vsel %vm1969_vm0, %v1750_v15, %v1934_v30 }
 0x40e   :  { %2030 = vst.msk [vmem:[%s3660_s6 + $0x20] sm:$0xff] %vm2025_vm1, %v2013_v19  ;;  %v1999_v34 = vadd.f32 %v3528_v50, %v1976_v18 }
 0x40f   :  { %v2016_v43 = vmax.f32 %v2000_v46, 0.0  ;;  %v1940_v5 = vpop.permute.xlu1 %1939 }
 0x410   :  { %v2015_v24 = vmax.f32 %v1999_v34, 0.0  ;;  %v1979_v3 = vsel %vm1969_vm0, %v1753_v16, %v1940_v5  ;;  %v1938_v49 = vpop.permute.xlu0 %1937 }
 0x411   :  { %2033 = vst.msk [vmem:[%s3660_s6 + $0x38] sm:$0xff] %vm2025_vm1, %v2016_v43  ;;  %v2002_v54 = vadd.f32 %v3528_v50, %v1979_v3  ;;  %v1978_v56 = vsel %vm1969_vm0, %v1752_v59, %v1938_v49 }
 0x412   :  { %2032 = vst.msk [vmem:[%s3660_s6 + $0x30] sm:$0xff] %vm2025_vm1, %v2015_v24  ;;  %v2001_v29 = vadd.f32 %v3528_v50, %v1978_v56 }
 0x413   :  { %v2018_v20 = vmax.f32 %v2002_v54, 0.0  ;;  %v1944_v14 = vpop.permute.xlu1 %1943 }
 0x414   :  { %v2017_v44 = vmax.f32 %v2001_v29, 0.0  ;;  %v1981_v33 = vsel %vm1969_vm0, %v1755_v47, %v1944_v14  ;;  %v1942_v42 = vpop.permute.xlu0 %1941 }
 0x415   :  { %2035 = vst.msk [vmem:[%s3660_s6 + $0x48] sm:$0xff] %vm2025_vm1, %v2018_v20  ;;  %v2004_v25 = vadd.f32 %v3528_v50, %v1981_v33  ;;  %v1980_v38 = vsel %vm1969_vm0, %v1754_v8, %v1942_v42 }
 0x416   :  { %2034 = vst.msk [vmem:[%s3660_s6 + $0x40] sm:$0xff] %vm2025_vm1, %v2017_v44  ;;  %v2003_v45 = vadd.f32 %v3528_v50, %v1980_v38 }
 0x417   :  { %v2020_v23 = vmax.f32 %v2004_v25, 0.0  ;;  %v1948_v26 = vpop.permute.xlu1 %1947 }
 0x418   :  { %v2019_v4 = vmax.f32 %v2003_v45, 0.0  ;;  %v1983_v36 = vsel %vm1969_vm0, %v1757_v28, %v1948_v26  ;;  %v1946_v57 = vpop.permute.xlu0 %1945 }
 0x419   :  { %2037 = vst.msk [vmem:[%s3660_s6 + $0x58] sm:$0xff] %vm2025_vm1, %v2020_v23  ;;  %v2006_v7 = vadd.f32 %v3528_v50, %v1983_v36  ;;  %v1982_v35 = vsel %vm1969_vm0, %v1756_v39, %v1946_v57 }
 0x41a   :  { %2036 = vst.msk [vmem:[%s3660_s6 + $0x50] sm:$0xff] %vm2025_vm1, %v2019_v4  ;;  %v2005_v60 = vadd.f32 %v3528_v50, %v1982_v35 }
 0x41b   :  { %v2022_v13 = vmax.f32 %v2006_v7, 0.0  ;;  %v1952_v55 = vpop.permute.xlu1 %1951 }
 0x41c   :  { %v2021_v21 = vmax.f32 %v2005_v60, 0.0  ;;  %v1985_v37 = vsel %vm1969_vm0, %v1759_v63, %v1952_v55  ;;  %v1950_v12 = vpop.permute.xlu0 %1949 }
 0x41d   :  { %2039 = vst.msk [vmem:[%s3660_s6 + $0x68] sm:$0xff] %vm2025_vm1, %v2022_v13  ;;  %v2008_v11 = vadd.f32 %v3528_v50, %v1985_v37  ;;  %v1984_v32 = vsel %vm1969_vm0, %v1758_v17, %v1950_v12 }
 0x41e   :  { %2038 = vst.msk [vmem:[%s3660_s6 + $0x60] sm:$0xff] %vm2025_vm1, %v2021_v21  ;;  %v2007_v31 = vadd.f32 %v3528_v50, %v1984_v32 }
 0x41f   :  { %v2024_v2 = vmax.f32 %v2008_v11, 0.0 }
 0x420   :  { %v2023_v27 = vmax.f32 %v2007_v31, 0.0 }
 0x421   :  { %2041 = vst.msk [vmem:[%s3660_s6 + $0x78] sm:$0xff] %vm2025_vm1, %v2024_v2 }
 0x422   :  { %2040 = vst.msk [vmem:[%s3660_s6 + $0x70] sm:$0xff] %vm2025_vm1, %v2023_v27 }

</bundles_post_ra>
